<compile_context>
chip_gen: v7x
topology: tpu7x:2x2x1
jax: 0.10.0
libtpu: 0.0.40
codegen_flags: <defaults>
</compile_context>

<pallas_src>
import functools

import jax
import jax.numpy as jnp
from jax.experimental import pallas as pl
from jax.experimental.pallas import tpu as pltpu

_EPS = 1e-5          # nn.BatchNorm2d default eps
_TK_MAX = 1024       # max K tile (lanes of A / sublanes of B)
_TN_MAX = 256        # max Cout tile
_TM_MAX = 256        # max M tile (rows), multiple of 16 for bf16 sublane packing


def _round_up(x, m):
    return ((x + m - 1) // m) * m


def _pick_tiles(extent, align, max_tile):
    """Balanced tiling: pad `extent` to `align`, split into near-equal tiles <= max_tile,
    preferring the split with the least padding (review: avoid K padding blowup)."""
    e = _round_up(extent, align)
    n0 = pl.cdiv(e, max_tile)
    best = None
    for n in range(n0, n0 + 8):
        t = _round_up(pl.cdiv(e, n), align)
        pe = t * n
        if best is None or pe < best[2]:
            best = (t, n, pe)
        if pe == e:
            break
    return best  # (tile, num_tiles, padded_extent)


def _default_vmem_limit():
    # ~3/4 of physical per-core VMEM, capped at 100 MiB:
    #   v7x (64 MiB)  -> 48 MiB;  v5e/v6e (128 MiB) -> 96 MiB.
    try:
        info = pltpu.get_tpu_info()
        cap = getattr(info, "vmem_capacity_bytes", None)
        if cap:
            return int(min(cap * 3 // 4, 100 * 1024 * 1024))
    except Exception:
        pass
    return 48 * 1024 * 1024


_VMEM_LIMIT = _default_vmem_limit()


# ----------------------------------------------------------------------------
# Kernel bodies
# ----------------------------------------------------------------------------
def _fused_matmul_bn_kernel(a_ref, b_ref, g_ref, bt_ref, *rest,
                            m_valid, relu, has_residual):
    """Single-M-tile path: matmul + one-pass BN (+residual)(+ReLU) epilogue."""
    if has_residual:
        r_ref, o_ref, acc_ref = rest
    else:
        o_ref, acc_ref = rest
    k = pl.program_id(1)

    @pl.when(k == 0)
    def _():
        acc_ref[...] = jnp.zeros_like(acc_ref)

    acc_ref[...] += jnp.dot(a_ref[...], b_ref[...],
                            preferred_element_type=jnp.float32)

    @pl.when(k == pl.num_programs(1) - 1)
    def _():
        acc = acc_ref[...]
        # Zero-padded rows contribute 0 to both sums -> no row mask needed.
        inv_m = 1.0 / float(m_valid)
        mean = jnp.sum(acc, axis=0, keepdims=True) * inv_m
        ex2 = jnp.sum(acc * acc, axis=0, keepdims=True) * inv_m
        var = jnp.maximum(ex2 - mean * mean, 0.0)
        scale = jax.lax.rsqrt(var + _EPS) * g_ref[...]
        shift = bt_ref[...] - mean * scale
        y = acc * scale + shift
        if has_residual:
            y = y + r_ref[...].astype(jnp.float32)
        if relu:
            y = jnp.maximum(y, 0.0)
        o_ref[...] = y.astype(o_ref.dtype)


def _matmul_stats_kernel(a_ref, b_ref, y_ref, stats_ref, acc_ref):
    """Two-pass path, pass 1: tiled matmul; per-channel sum / sum-of-squares are
    accumulated into the resident stats output block across M tiles."""
    m = pl.program_id(1)
    k = pl.program_id(2)

    @pl.when(k == 0)
    def _():
        acc_ref[...] = jnp.zeros_like(acc_ref)

    acc_ref[...] += jnp.dot(a_ref[...], b_ref[...],
                            preferred_element_type=jnp.float32)

    @pl.when(k == pl.num_programs(2) - 1)
    def _():
        acc = acc_ref[...]
        y_ref[...] = acc.astype(y_ref.dtype)
        s = jnp.sum(acc, axis=0, keepdims=True)
        sq = jnp.sum(acc * acc, axis=0, keepdims=True)
        row = jax.lax.broadcasted_iota(jnp.int32, stats_ref.shape, 0)
        upd = jnp.where(row == 0, s, 0.0) + jnp.where(row == 1, sq, 0.0)

        @pl.when(m == 0)
        def _():
            stats_ref[...] = upd

        @pl.when(m > 0)
        def _():
            stats_ref[...] = stats_ref[...] + upd


def _bn_apply_kernel(y_ref, stats_ref, g_ref, bt_ref, *rest,
                     m_valid, relu, has_residual):
    """Two-pass path, pass 2: normalize with global batch stats (+residual)(+ReLU)."""
    if has_residual:
        r_ref, o_ref = rest
    else:
        (o_ref,) = rest
    inv_m = 1.0 / float(m_valid)
    mean = stats_ref[0:1, :] * inv_m
    ex2 = stats_ref[1:2, :] * inv_m
    var = jnp.maximum(ex2 - mean * mean, 0.0)
    scale = jax.lax.rsqrt(var + _EPS) * g_ref[...]
    shift = bt_ref[...] - mean * scale
    y = y_ref[...].astype(jnp.float32) * scale + shift
    if has_residual:
        y = y + r_ref[...].astype(jnp.float32)
    if relu:
        y = jnp.maximum(y, 0.0)
    o_ref[...] = y.astype(o_ref.dtype)


# ----------------------------------------------------------------------------
# Fused conv-matmul + BatchNorm (+ residual) (+ ReLU)
# ----------------------------------------------------------------------------
def fused_conv_bn(patches, w2d, gamma, beta, *, relu, residual, m_valid):
    """[M,K] @ [K,Cout] + training-mode BN (+residual)(+ReLU).

    Returns ([Mp, Np] bf16, Np) where Np = round_up(Cout, 128).  Padded channels
    are exactly zero, so the padding can be carried to the next layer."""
    M, K = patches.shape
    Cout = w2d.shape[1]

    tk, nkt, Kp = _pick_tiles(K, 128, _TK_MAX)
    tn, nnt, Np = _pick_tiles(Cout, 128, _TN_MAX)
    tm, nmt, Mp = _pick_tiles(M, 16, _TM_MAX)

    a = patches
    if (Mp, Kp) != (M, K):
        a = jnp.pad(a, ((0, Mp - M), (0, Kp - K)))
    a = a.astype(jnp.bfloat16)
    b = jnp.pad(w2d.astype(jnp.float32),
                ((0, Kp - K), (0, Np - Cout))).astype(jnp.bfloat16)
    g = jnp.pad(gamma.reshape(1, -1).astype(jnp.float32),
                ((0, 0), (0, Np - Cout)), constant_values=1.0)
    bt = jnp.pad(beta.reshape(1, -1).astype(jnp.float32),
                 ((0, 0), (0, Np - Cout)))

    has_res = residual is not None
    r = None
    if has_res:
        r = residual
        if r.shape[1] < Np:
            r = jnp.pad(r, ((0, 0), (0, Np - r.shape[1])))
        if r.shape[0] < Mp:
            r = jnp.pad(r, ((0, Mp - r.shape[0]), (0, 0)))
        r = r.astype(jnp.bfloat16)

    mm_flops = 2 * Mp * Kp * Np

    if nmt == 1:
        # -------- single fused call: matmul + BN epilogue in one kernel -------
        inputs = [a, b, g, bt]
        in_specs = [pl.BlockSpec((Mp, tk), lambda n, k: (0, k)),
                    pl.BlockSpec((tk, tn), lambda n, k: (k, n)),
                    pl.BlockSpec((1, tn), lambda n, k: (0, n)),
                    pl.BlockSpec((1, tn), lambda n, k: (0, n))]
        if has_res:
            inputs.append(r)
            in_specs.append(pl.BlockSpec((Mp, tn), lambda n, k: (0, n)))
        kern = functools.partial(_fused_matmul_bn_kernel, m_valid=m_valid,
                                 relu=relu, has_residual=has_res)
        out = pl.pallas_call(
            kern,
            out_shape=jax.ShapeDtypeStruct((Mp, Np), jnp.bfloat16),
            grid_spec=pltpu.PrefetchScalarGridSpec(
                num_scalar_prefetch=0,
                grid=(nnt, nkt),
                in_specs=in_specs,
                out_specs=pl.BlockSpec((Mp, tn), lambda n, k: (0, n)),
                scratch_shapes=[pltpu.VMEM((Mp, tn), jnp.float32)]),
            compiler_params=pltpu.CompilerParams(
                dimension_semantics=("parallel", "arbitrary"),
                vmem_limit_bytes=_VMEM_LIMIT),
            cost_estimate=pl.CostEstimate(
                flops=mm_flops, transcendentals=Np,
                bytes_accessed=a.size * 2 + b.size * 2 + Mp * Np * 2
                               + (Mp * Np * 2 if has_res else 0)),
        )(*inputs)
        return out, Np

    # -------- two-pass path: pass 1 = matmul + stats -------------------------
    # NOTE: A blocks are re-read once per Cout tile (nnt); nnt == 1 for the demo.
    y_raw, stats = pl.pallas_call(
        _matmul_stats_kernel,
        out_shape=(jax.ShapeDtypeStruct((Mp, Np), jnp.bfloat16),
                   jax.ShapeDtypeStruct((8, Np), jnp.float32)),
        grid_spec=pltpu.PrefetchScalarGridSpec(
            num_scalar_prefetch=0,
            grid=(nnt, nmt, nkt),
            in_specs=[pl.BlockSpec((tm, tk), lambda n, m, k: (m, k)),
                      pl.BlockSpec((tk, tn), lambda n, m, k: (k, n))],
            out_specs=[pl.BlockSpec((tm, tn), lambda n, m, k: (m, n)),
                       pl.BlockSpec((8, tn), lambda n, m, k: (0, n))],
            scratch_shapes=[pltpu.VMEM((tm, tn), jnp.float32)]),
        compiler_params=pltpu.CompilerParams(
            dimension_semantics=("parallel", "arbitrary", "arbitrary"),
            vmem_limit_bytes=_VMEM_LIMIT),
        cost_estimate=pl.CostEstimate(
            flops=mm_flops, transcendentals=0,
            bytes_accessed=a.size * 2 * nnt + b.size * 2 + Mp * Np * 2 + 8 * Np * 4),
    )(a, b)

    # -------- pass 2: normalize (+residual)(+ReLU) ----------------------------
    inputs = [y_raw, stats, g, bt]
    in_specs = [pl.BlockSpec((tm, tn), lambda m, n: (m, n)),
                pl.BlockSpec((8, tn), lambda m, n: (0, n)),
                pl.BlockSpec((1, tn), lambda m, n: (0, n)),
                pl.BlockSpec((1, tn), lambda m, n: (0, n))]
    if has_res:
        inputs.append(r)
        in_specs.append(pl.BlockSpec((tm, tn), lambda m, n: (m, n)))
    kern = functools.partial(_bn_apply_kernel, m_valid=m_valid,
                             relu=relu, has_residual=has_res)
    out = pl.pallas_call(
        kern,
        out_shape=jax.ShapeDtypeStruct((Mp, Np), jnp.bfloat16),
        grid_spec=pltpu.PrefetchScalarGridSpec(
            num_scalar_prefetch=0,
            grid=(nmt, nnt),
            in_specs=in_specs,
            out_specs=pl.BlockSpec((tm, tn), lambda m, n: (m, n))),
        compiler_params=pltpu.CompilerParams(
            dimension_semantics=("parallel", "parallel"),
            vmem_limit_bytes=_VMEM_LIMIT),
        cost_estimate=pl.CostEstimate(
            flops=4 * Mp * Np, transcendentals=Np,
            bytes_accessed=Mp * Np * 4 + (Mp * Np * 2 if has_res else 0)),
    )(*inputs)
    return out, Np


# ----------------------------------------------------------------------------
# Conv wrapper: im2col glue (bf16) around the fused kernel
# ----------------------------------------------------------------------------
def _im2col(x, kh, kw, stride, padding):
    # TODO(synk): fold the kh*kw window into the kernel's K grid axis via shifted-
    #             window DMA instead of materializing the patch tensor in HBM.
    N, H, W, C = x.shape
    if padding:
        x = jnp.pad(x, ((0, 0), (padding, padding), (padding, padding), (0, 0)))
    Hp, Wp = x.shape[1], x.shape[2]
    Ho = (Hp - kh) // stride + 1
    Wo = (Wp - kw) // stride + 1
    cols = []
    for ki in range(kh):
        for kj in range(kw):
            cols.append(x[:,
                          ki:ki + stride * (Ho - 1) + 1:stride,
                          kj:kj + stride * (Wo - 1) + 1:stride, :])
    patches = cols[0] if len(cols) == 1 else jnp.concatenate(cols, axis=-1)
    return patches.reshape(N * Ho * Wo, kh * kw * C), Ho, Wo


def conv_bn_act(x, w, stride, padding, gamma, beta, relu, residual=None):
    """NHWC conv (bias-free) + training-mode BN [+residual] [+ReLU].

    `x` (bf16) may carry zero-padded channel lanes; the weight's Cin is zero-padded
    to match.  Returns NHWC bf16 with channels padded to a multiple of 128."""
    N = x.shape[0]
    Cx = x.shape[-1]
    kh, kw, Cin, Cout = w.shape
    if Cx != Cin:
        w = jnp.pad(w, ((0, 0), (0, 0), (0, Cx - Cin), (0, 0)))
    patches, Ho, Wo = _im2col(x, kh, kw, stride, padding)
    M = N * Ho * Wo
    res2d = None
    if residual is not None:
        res2d = residual.reshape(M, residual.shape[-1])
    out2d, Np = fused_conv_bn(patches, w.reshape(kh * kw * Cx, Cout),
                              gamma, beta, relu=relu, residual=res2d, m_valid=M)
    return out2d[:M].reshape(N, Ho, Wo, Np)


# ----------------------------------------------------------------------------
# Fused avgpool + flatten + Linear head kernel
# ----------------------------------------------------------------------------
def _head_kernel(x_ref, w_ref, b_ref, o_ref):
    feat = jnp.mean(x_ref[...].astype(jnp.float32), axis=1)          # [Nb, C]
    o_ref[...] = jnp.dot(feat.astype(jnp.bfloat16), w_ref[...],
                         preferred_element_type=jnp.float32) + b_ref[...]


def head_forward(x_nhwc, w, b):
    """AdaptiveAvgPool2d((1,1)) + flatten + Linear.  w:[dim_in,ncls], b:[1,ncls].
    TODO(synk): fuse the pooling into the final conv block's epilogue for large maps."""
    N, H, W, C = x_nhwc.shape
    dim_in, n_classes = w.shape
    ncp = _round_up(n_classes, 128)                  # lane-dense output
    Nb = max(8, _round_up(N, 8))                     # sublane-aligned rows
    wp = jnp.pad(w.astype(jnp.float32),
                 ((0, C - dim_in), (0, ncp - n_classes))).astype(jnp.bfloat16)
    bp = jnp.pad(b.astype(jnp.float32), ((0, 0), (0, ncp - n_classes)))
    xr = x_nhwc.reshape(N, H * W, C)
    if Nb > N:
        xr = jnp.pad(xr, ((0, Nb - N), (0, 0), (0, 0)))
    vmem = pl.BlockSpec(memory_space=pltpu.MemorySpace.VMEM)
    out = pl.pallas_call(
        _head_kernel,
        out_shape=jax.ShapeDtypeStruct((Nb, ncp), jnp.float32),
        in_specs=[vmem, vmem, vmem],
        out_specs=vmem,
        compiler_params=pltpu.CompilerParams(vmem_limit_bytes=_VMEM_LIMIT),
        cost_estimate=pl.CostEstimate(
            flops=2 * Nb * C * ncp, transcendentals=0,
            bytes_accessed=Nb * H * W * C * 2 + C * ncp * 2 + Nb * ncp * 4),
    )(xr, wp, bp)
    return out[:N, :n_classes]


# ----------------------------------------------------------------------------
# Parameter construction (deterministic, mirrors the PyTorch __init__)
# ----------------------------------------------------------------------------
def _kaiming(key, kh, kw, cin, cout):
    # kaiming_normal_(mode='fan_out', nonlinearity='relu'): std = sqrt(2/(cout*kh*kw))
    std = (2.0 / (cout * kh * kw)) ** 0.5
    return jax.random.normal(key, (kh, kw, cin, cout), jnp.float32) * std


def _bn_params(c):
    return {'gamma': jnp.ones((c,), jnp.float32),
            'beta': jnp.zeros((c,), jnp.float32)}


def build_basic_block(key, in_planes, planes, stride):
    ks = jax.random.split(key, 3)
    p = {'stride': stride,
         'conv1': _kaiming(ks[0], 3, 3, in_planes, planes), 'bn1': _bn_params(planes),
         'conv2': _kaiming(ks[1], 3, 3, planes, planes), 'bn2': _bn_params(planes)}
    if stride != 1 or in_planes != planes:
        p['sc_conv'] = _kaiming(ks[2], 1, 1, in_planes, planes)
        p['sc_bn'] = _bn_params(planes)
    return p


def build_bottleneck(key, in_planes, planes, stride):
    exp = 4
    ks = jax.random.split(key, 4)
    p = {'stride': stride,
         'conv1': _kaiming(ks[0], 1, 1, in_planes, planes), 'bn1': _bn_params(planes),
         'conv2': _kaiming(ks[1], 3, 3, planes, planes), 'bn2': _bn_params(planes),
         'conv3': _kaiming(ks[2], 1, 1, planes, exp * planes), 'bn3': _bn_params(exp * planes)}
    if stride != 1 or in_planes != exp * planes:
        p['sc_conv'] = _kaiming(ks[3], 1, 1, in_planes, exp * planes)
        p['sc_bn'] = _bn_params(exp * planes)
    return p


_MODEL_DICT = {
    'resnet18': ('basic', [2, 2, 2, 2]),
    'resnet34': ('basic', [3, 4, 6, 3]),
    'resnet50': ('bottleneck', [3, 4, 6, 3]),
    'resnet101': ('bottleneck', [3, 4, 23, 3]),
}


def build_resnet(key, name, nf, in_channel=3):
    block_type, num_blocks = _MODEL_DICT[name]
    expansion = 1 if block_type == 'basic' else 4
    keys = iter(jax.random.split(key, 256))
    params = {'conv1': _kaiming(next(keys), 3, 3, in_channel, nf),
              'bn1': _bn_params(nf),
              'block_type': block_type,
              'last_hid': nf * 8 * expansion,
              'layers': []}
    in_planes = nf
    for mult, nb, stride0 in zip([1, 2, 4, 8], num_blocks, [1, 2, 2, 2]):
        planes = mult * nf
        strides = [stride0] + [1] * (nb - 1)
        blocks = []
        for s in strides:
            if block_type == 'basic':
                blocks.append(build_basic_block(next(keys), in_planes, planes, s))
            else:
                blocks.append(build_bottleneck(next(keys), in_planes, planes, s))
            in_planes = planes * expansion
        params['layers'].append(blocks)
    return params


def build_multihead(key, name='resnet18', nf=8, in_channel=3,
                    n_classes_per_head=10, n_heads=3):
    k_enc, k_heads = jax.random.split(key)
    enc = build_resnet(k_enc, name, nf, in_channel)
    dim_in = enc['last_hid']
    bound = 1.0 / (dim_in ** 0.5)           # nn.Linear default init range
    heads = []
    for hk in jax.random.split(k_heads, n_heads):
        kw_, kb_ = jax.random.split(hk)
        # stored pre-transposed as [dim_in, n_classes] for the head kernel
        w = jax.random.uniform(kw_, (dim_in, n_classes_per_head), jnp.float32, -bound, bound)
        b = jax.random.uniform(kb_, (1, n_classes_per_head), jnp.float32, -bound, bound)
        heads.append({'w': w, 'b': b})
    return {'encoder': enc, 'heads': heads}


# ----------------------------------------------------------------------------
# Forward passes
# ----------------------------------------------------------------------------
def basic_block_forward(p, x):
    out = conv_bn_act(x, p['conv1'], p['stride'], 1,
                      p['bn1']['gamma'], p['bn1']['beta'], relu=True)
    if 'sc_conv' in p:
        sc = conv_bn_act(x, p['sc_conv'], p['stride'], 0,
                         p['sc_bn']['gamma'], p['sc_bn']['beta'], relu=False)
    else:
        sc = x
    # conv2 + bn2 + residual add + ReLU fused into the BN epilogue / apply kernel
    return conv_bn_act(out, p['conv2'], 1, 1,
                       p['bn2']['gamma'], p['bn2']['beta'], relu=True, residual=sc)


def bottleneck_forward(p, x):
    out = conv_bn_act(x, p['conv1'], 1, 0,
                      p['bn1']['gamma'], p['bn1']['beta'], relu=True)
    out = conv_bn_act(out, p['conv2'], p['stride'], 1,
                      p['bn2']['gamma'], p['bn2']['beta'], relu=True)
    if 'sc_conv' in p:
        sc = conv_bn_act(x, p['sc_conv'], p['stride'], 0,
                         p['sc_bn']['gamma'], p['sc_bn']['beta'], relu=False)
    else:
        sc = x
    return conv_bn_act(out, p['conv3'], 1, 0,
                       p['bn3']['gamma'], p['bn3']['beta'], relu=True, residual=sc)


def encoder_forward(enc, x_nchw):
    # x_nchw is NCHW f32 (PyTorch convention); convert once to bf16 NHWC.
    x = jnp.transpose(x_nchw, (0, 2, 3, 1)).astype(jnp.bfloat16)
    out = conv_bn_act(x, enc['conv1'], 1, 1,
                      enc['bn1']['gamma'], enc['bn1']['beta'], relu=True)
    block_fwd = basic_block_forward if enc['block_type'] == 'basic' else bottleneck_forward
    for layer in enc['layers']:
        for blk in layer:
            out = block_fwd(blk, out)
    return out   # NHWC bf16, channel-padded; avgpool+flatten happen in the head kernel


def multihead_forward(params, x, task):
    feat_map = encoder_forward(params['encoder'], x)
    h = params['heads'][task]
    return head_forward(feat_map, h['w'], h['b'])


# ----------------------------------------------------------------------------
if __name__ == "__main__":
    key = jax.random.PRNGKey(0)
    kp, kx, kc = jax.random.split(key, 3)

    # ---- full MultiHeadResNet forward: resnet18 backbone, nf=8, 3 heads x 10 ----
    B, C, H, W = 2, 3, 16, 16
    params = build_multihead(kp, name='resnet18', nf=8, in_channel=C,
                             n_classes_per_head=10, n_heads=3)
    x = jax.random.normal(kx, (B, C, H, W), jnp.float32)      # NCHW like PyTorch

    fwd = jax.jit(functools.partial(multihead_forward, params, task=1))
    out = fwd(x)
    jax.block_until_ready(out)
    assert out.shape == (B, 10), out.shape
    assert bool(jnp.all(jnp.isfinite(out)))

    # ---- standalone check of the tiled two-pass-BN conv path vs pure JAX ------
    kc1, kc2, kc3, kc4, kc5 = jax.random.split(kc, 5)
    cin, cout = 8, 16
    xc = jax.random.normal(kc1, (2, 16, 16, cin), jnp.float32).astype(jnp.bfloat16)
    wc = jax.random.normal(kc2, (3, 3, cin, cout), jnp.float32) * 0.1
    gc = 1.0 + 0.2 * jax.random.normal(kc3, (cout,), jnp.float32)
    bc = 0.1 * jax.random.normal(kc4, (cout,), jnp.float32)
    res_vals = jax.random.normal(kc5, (2, 16, 16, cout), jnp.float32).astype(jnp.bfloat16)
    res_full = jnp.zeros((2, 16, 16, 128), jnp.bfloat16).at[..., :cout].set(res_vals)

    out_k = jax.jit(lambda a, w_, r: conv_bn_act(a, w_, 1, 1, gc, bc, True, residual=r))(
        xc, wc, res_full)[..., :cout].astype(jnp.float32)
    jax.block_until_ready(out_k)

    x32 = xc.astype(jnp.float32)
    w32 = wc.astype(jnp.bfloat16).astype(jnp.float32)     # same weight quantization as the kernel
    y = jax.lax.conv_general_dilated(x32, w32, (1, 1), ((1, 1), (1, 1)),
                                     dimension_numbers=('NHWC', 'HWIO', 'NHWC'))
    mean = jnp.mean(y, axis=(0, 1, 2), keepdims=True)
    var = jnp.mean((y - mean) ** 2, axis=(0, 1, 2), keepdims=True)
    ref = (y - mean) * jax.lax.rsqrt(var + _EPS) * gc + bc
    ref = jnp.maximum(ref + res_vals.astype(jnp.float32), 0.0)
    max_err = float(jnp.max(jnp.abs(out_k - ref)))
    assert bool(jnp.allclose(out_k, ref, atol=0.1, rtol=0.1)), max_err

    print("KERNEL_OK")
</pallas_src>

<mosaic_0001>
module attributes {stable_mosaic.version = 11 : i64} {
  func.func @_matmul_stats_kernel(%arg0: i32, %arg1: i32, %arg2: i32, %arg3: memref<256x128xbf16, #tpu.memory_space<vmem>>, %arg4: memref<128x128xbf16, #tpu.memory_space<vmem>>, %arg5: memref<256x128xbf16, #tpu.memory_space<vmem>>, %arg6: memref<8x128xf32, #tpu.memory_space<vmem>>, %arg7: memref<256x128xf32, #tpu.memory_space<vmem>>) attributes {dimension_semantics = [#tpu.dimension_semantics<parallel>, #tpu.dimension_semantics<arbitrary>, #tpu.dimension_semantics<arbitrary>], iteration_bounds = array<i64: 1, 2, 1>, scalar_prefetch = 0 : i64, scratch_operands = 1 : i64, tpu.core_type = #tpu.core_type<tc>, window_params = [{transform_indices = @transform_0, window_bounds = array<i64: 256, 128>}, {transform_indices = @transform_1, window_bounds = array<i64: 128, 128>}, {transform_indices = @transform_2, window_bounds = array<i64: 256, 128>}, {transform_indices = @transform_3, window_bounds = array<i64: 8, 128>}]} {
    %c0_i32 = arith.constant 0 : i32
    %0 = arith.cmpi eq, %arg2, %c0_i32 : i32
    %1 = arith.extui %0 : i1 to i32
    %c0_i32_0 = arith.constant 0 : i32
    %2 = arith.cmpi ne, %1, %c0_i32_0 : i32
    scf.if %2 {
      %cst_10 = arith.constant 0.000000e+00 : f32
      %12 = vector.broadcast %cst_10 : f32 to vector<256x128xf32>
      %c0_11 = arith.constant 0 : index
      %c0_12 = arith.constant 0 : index
      %13 = vector.load %arg7[%c0_11, %c0_12] : memref<256x128xf32, #tpu.memory_space<vmem>>, vector<256x128xf32>
      tpu.vector_store %arg7[%c0_11, %c0_12], %12 {strides = array<i32>} : memref<256x128xf32, #tpu.memory_space<vmem>>, vector<256x128xf32>,
    } else {
    }
    %c0 = arith.constant 0 : index
    %c0_1 = arith.constant 0 : index
    %3 = vector.load %arg7[%c0, %c0_1] : memref<256x128xf32, #tpu.memory_space<vmem>>, vector<256x128xf32>
    %c0_2 = arith.constant 0 : index
    %c0_3 = arith.constant 0 : index
    %4 = vector.load %arg3[%c0_2, %c0_3] : memref<256x128xbf16, #tpu.memory_space<vmem>>, vector<256x128xbf16>
    %c0_4 = arith.constant 0 : index
    %c0_5 = arith.constant 0 : index
    %5 = vector.load %arg4[%c0_4, %c0_5] : memref<128x128xbf16, #tpu.memory_space<vmem>>, vector<128x128xbf16>
    %cst = arith.constant dense<0.000000e+00> : vector<256x128xf32>
    %6 = tpu.matmul %4, %5, %cst {dimension_numbers = #tpu.dot_dimension_numbers<[1], [0], [0], [1], [0, 0, 1, 1], [], []>} : vector<256x128xbf16>, vector<128x128xbf16>, vector<256x128xf32> -> vector<256x128xf32>
    %7 = arith.addf %3, %6 : vector<256x128xf32>
    %c0_6 = arith.constant 0 : index
    %c0_7 = arith.constant 0 : index
    %8 = vector.load %arg7[%c0_6, %c0_7] : memref<256x128xf32, #tpu.memory_space<vmem>>, vector<256x128xf32>
    tpu.vector_store %arg7[%c0_6, %c0_7], %7 {strides = array<i32>} : memref<256x128xf32, #tpu.memory_space<vmem>>, vector<256x128xf32>,
    %c0_i32_8 = arith.constant 0 : i32
    %9 = arith.cmpi eq, %arg2, %c0_i32_8 : i32
    %10 = arith.extui %9 : i1 to i32
    %c0_i32_9 = arith.constant 0 : i32
    %11 = arith.cmpi ne, %10, %c0_i32_9 : i32
    scf.if %11 {
      %c0_10 = arith.constant 0 : index
      %c0_11 = arith.constant 0 : index
      %12 = vector.load %arg7[%c0_10, %c0_11] : memref<256x128xf32, #tpu.memory_space<vmem>>, vector<256x128xf32>
      %13 = arith.truncf %12 : vector<256x128xf32> to vector<256x128xbf16>
      %c0_12 = arith.constant 0 : index
      %c0_13 = arith.constant 0 : index
      %14 = vector.load %arg5[%c0_12, %c0_13] : memref<256x128xbf16, #tpu.memory_space<vmem>>, vector<256x128xbf16>
      tpu.vector_store %arg5[%c0_12, %c0_13], %13 {strides = array<i32>} : memref<256x128xbf16, #tpu.memory_space<vmem>>, vector<256x128xbf16>,
      %cst_14 = arith.constant dense<0.000000e+00> : vector<128xf32>
      %15 = vector.multi_reduction <add>, %12, %cst_14 [0] : vector<256x128xf32> to vector<128xf32>
      %16 = vector.shape_cast %15 : vector<128xf32> to vector<1x128xf32>
      %17 = arith.mulf %12, %12 : vector<256x128xf32>
      %cst_15 = arith.constant dense<0.000000e+00> : vector<128xf32>
      %18 = vector.multi_reduction <add>, %17, %cst_15 [0] : vector<256x128xf32> to vector<128xf32>
      %19 = vector.shape_cast %18 : vector<128xf32> to vector<1x128xf32>
      %20 = tpu.iota {dimensions = array<i32: 0>} : vector<8x128xi32>
      %c0_i32_16 = arith.constant 0 : i32
      %21 = vector.broadcast %c0_i32_16 : i32 to vector<8x128xi32>
      %22 = arith.cmpi eq, %20, %21 : vector<8x128xi32>
      %cst_17 = arith.constant 0.000000e+00 : f32
      %23 = vector.shape_cast %16 : vector<1x128xf32> to vector<1x128xf32>
      %24 = vector.broadcast %23 : vector<1x128xf32> to vector<8x128xf32>
      %25 = vector.broadcast %cst_17 : f32 to vector<8x128xf32>
      %26 = arith.select %22, %24, %25 : vector<8x128xi1>, vector<8x128xf32>
      %c1_i32 = arith.constant 1 : i32
      %27 = vector.broadcast %c1_i32 : i32 to vector<8x128xi32>
      %28 = arith.cmpi eq, %20, %27 : vector<8x128xi32>
      %cst_18 = arith.constant 0.000000e+00 : f32
      %29 = vector.shape_cast %19 : vector<1x128xf32> to vector<1x128xf32>
      %30 = vector.broadcast %29 : vector<1x128xf32> to vector<8x128xf32>
      %31 = vector.broadcast %cst_18 : f32 to vector<8x128xf32>
      %32 = arith.select %28, %30, %31 : vector<8x128xi1>, vector<8x128xf32>
      %33 = arith.addf %26, %32 : vector<8x128xf32>
      %c0_i32_19 = arith.constant 0 : i32
      %34 = arith.cmpi eq, %arg1, %c0_i32_19 : i32
      %35 = arith.extui %34 : i1 to i32
      %c0_i32_20 = arith.constant 0 : i32
      %36 = arith.cmpi ne, %35, %c0_i32_20 : i32
      scf.if %36 {
        %c0_23 = arith.constant 0 : index
        %c0_24 = arith.constant 0 : index
        %40 = vector.load %arg6[%c0_23, %c0_24] : memref<8x128xf32, #tpu.memory_space<vmem>>, vector<8x128xf32>
        tpu.vector_store %arg6[%c0_23, %c0_24], %33 {strides = array<i32>} : memref<8x128xf32, #tpu.memory_space<vmem>>, vector<8x128xf32>,
      } else {
      }
      %c0_i32_21 = arith.constant 0 : i32
      %37 = arith.cmpi sgt, %arg1, %c0_i32_21 : i32
      %38 = arith.extui %37 : i1 to i32
      %c0_i32_22 = arith.constant 0 : i32
      %39 = arith.cmpi ne, %38, %c0_i32_22 : i32
      scf.if %39 {
        %c0_23 = arith.constant 0 : index
        %c0_24 = arith.constant 0 : index
        %40 = vector.load %arg6[%c0_23, %c0_24] : memref<8x128xf32, #tpu.memory_space<vmem>>, vector<8x128xf32>
        %41 = arith.addf %40, %33 : vector<8x128xf32>
        %c0_25 = arith.constant 0 : index
        %c0_26 = arith.constant 0 : index
        %42 = vector.load %arg6[%c0_25, %c0_26] : memref<8x128xf32, #tpu.memory_space<vmem>>, vector<8x128xf32>
        tpu.vector_store %arg6[%c0_25, %c0_26], %41 {strides = array<i32>} : memref<8x128xf32, #tpu.memory_space<vmem>>, vector<8x128xf32>,
      } else {
      }
    } else {
    }
    return
  }
  func.func @transform_0(%arg0: i32, %arg1: i32, %arg2: i32) -> (i32, i32) {
    %c0_i32 = arith.constant 0 : i32
    return %arg1, %arg2 : i32, i32
  }
  func.func @transform_1(%arg0: i32, %arg1: i32, %arg2: i32) -> (i32, i32) {
    %c0_i32 = arith.constant 0 : i32
    return %arg2, %arg0 : i32, i32
  }
  func.func @transform_2(%arg0: i32, %arg1: i32, %arg2: i32) -> (i32, i32) {
    %c0_i32 = arith.constant 0 : i32
    return %arg1, %arg0 : i32, i32
  }
  func.func @transform_3(%arg0: i32, %arg1: i32, %arg2: i32) -> (i32, i32) {
    %c0_i32 = arith.constant 0 : i32
    %c0_i32_0 = arith.constant 0 : i32
    return %c0_i32, %arg0 : i32, i32
  }
}

module attributes {stable_mosaic.version = 11 : i64} {
  func.func @_bn_apply_kernel(%arg0: i32, %arg1: i32, %arg2: memref<256x128xbf16, #tpu.memory_space<vmem>>, %arg3: memref<8x128xf32, #tpu.memory_space<vmem>>, %arg4: memref<1x128xf32, #tpu.memory_space<vmem>>, %arg5: memref<1x128xf32, #tpu.memory_space<vmem>>, %arg6: memref<256x128xbf16, #tpu.memory_space<vmem>>) attributes {dimension_semantics = [#tpu.dimension_semantics<parallel>, #tpu.dimension_semantics<parallel>], iteration_bounds = array<i64: 2, 1>, scalar_prefetch = 0 : i64, scratch_operands = 0 : i64, tpu.core_type = #tpu.core_type<tc>, window_params = [{transform_indices = @transform_0, window_bounds = array<i64: 256, 128>}, {transform_indices = @transform_1, window_bounds = array<i64: 8, 128>}, {transform_indices = @transform_2, window_bounds = array<i64: 1, 128>}, {transform_indices = @transform_3, window_bounds = array<i64: 1, 128>}, {transform_indices = @transform_4, window_bounds = array<i64: 256, 128>}]} {
    %c0 = arith.constant 0 : index
    %c0_0 = arith.constant 0 : index
    %0 = vector.load %arg3[%c0, %c0_0] : memref<8x128xf32, #tpu.memory_space<vmem>>, vector<1x128xf32>
    %cst = arith.constant 0.001953125 : f32
    %1 = vector.broadcast %cst : f32 to vector<1x128xf32>
    %2 = arith.mulf %0, %1 : vector<1x128xf32>
    %c1 = arith.constant 1 : index
    %c0_1 = arith.constant 0 : index
    %3 = vector.load %arg3[%c1, %c0_1] : memref<8x128xf32, #tpu.memory_space<vmem>>, vector<1x128xf32>
    %cst_2 = arith.constant 0.001953125 : f32
    %4 = vector.broadcast %cst_2 : f32 to vector<1x128xf32>
    %5 = arith.mulf %3, %4 : vector<1x128xf32>
    %6 = arith.mulf %2, %2 : vector<1x128xf32>
    %7 = arith.subf %5, %6 : vector<1x128xf32>
    %cst_3 = arith.constant 0.000000e+00 : f32
    %8 = vector.broadcast %cst_3 : f32 to vector<1x128xf32>
    %9 = arith.maximumf %7, %8 : vector<1x128xf32>
    %cst_4 = arith.constant 9.99999974E-6 : f32
    %10 = vector.broadcast %cst_4 : f32 to vector<1x128xf32>
    %11 = arith.addf %9, %10 : vector<1x128xf32>
    %12 = math.rsqrt %11 : vector<1x128xf32>
    %c0_5 = arith.constant 0 : index
    %c0_6 = arith.constant 0 : index
    %13 = vector.load %arg4[%c0_5, %c0_6] : memref<1x128xf32, #tpu.memory_space<vmem>>, vector<1x128xf32>
    %14 = arith.mulf %12, %13 : vector<1x128xf32>
    %c0_7 = arith.constant 0 : index
    %c0_8 = arith.constant 0 : index
    %15 = vector.load %arg5[%c0_7, %c0_8] : memref<1x128xf32, #tpu.memory_space<vmem>>, vector<1x128xf32>
    %16 = arith.mulf %2, %14 : vector<1x128xf32>
    %17 = arith.subf %15, %16 : vector<1x128xf32>
    %c0_9 = arith.constant 0 : index
    %c0_10 = arith.constant 0 : index
    %18 = vector.load %arg2[%c0_9, %c0_10] : memref<256x128xbf16, #tpu.memory_space<vmem>>, vector<256x128xbf16>
    %19 = arith.extf %18 : vector<256x128xbf16> to vector<256x128xf32>
    %20 = vector.broadcast %14 : vector<1x128xf32> to vector<256x128xf32>
    %21 = arith.mulf %19, %20 : vector<256x128xf32>
    %22 = vector.broadcast %17 : vector<1x128xf32> to vector<256x128xf32>
    %23 = arith.addf %21, %22 : vector<256x128xf32>
    %cst_11 = arith.constant 0.000000e+00 : f32
    %24 = vector.broadcast %cst_11 : f32 to vector<256x128xf32>
    %25 = arith.maximumf %23, %24 : vector<256x128xf32>
    %26 = arith.truncf %25 : vector<256x128xf32> to vector<256x128xbf16>
    %c0_12 = arith.constant 0 : index
    %c0_13 = arith.constant 0 : index
    %27 = vector.load %arg6[%c0_12, %c0_13] : memref<256x128xbf16, #tpu.memory_space<vmem>>, vector<256x128xbf16>
    tpu.vector_store %arg6[%c0_12, %c0_13], %26 {strides = array<i32>} : memref<256x128xbf16, #tpu.memory_space<vmem>>, vector<256x128xbf16>,
    return
  }
  func.func @transform_0(%arg0: i32, %arg1: i32) -> (i32, i32) {
    %c0_i32 = arith.constant 0 : i32
    return %arg0, %arg1 : i32, i32
  }
  func.func @transform_1(%arg0: i32, %arg1: i32) -> (i32, i32) {
    %c0_i32 = arith.constant 0 : i32
    %c0_i32_0 = arith.constant 0 : i32
    return %c0_i32, %arg1 : i32, i32
  }
  func.func @transform_2(%arg0: i32, %arg1: i32) -> (i32, i32) {
    %c0_i32 = arith.constant 0 : i32
    %c0_i32_0 = arith.constant 0 : i32
    return %c0_i32, %arg1 : i32, i32
  }
  func.func @transform_3(%arg0: i32, %arg1: i32) -> (i32, i32) {
    %c0_i32 = arith.constant 0 : i32
    %c0_i32_0 = arith.constant 0 : i32
    return %c0_i32, %arg1 : i32, i32
  }
  func.func @transform_4(%arg0: i32, %arg1: i32) -> (i32, i32) {
    %c0_i32 = arith.constant 0 : i32
    return %arg0, %arg1 : i32, i32
  }
}

module attributes {stable_mosaic.version = 11 : i64} {
  func.func @_bn_apply_kernel(%arg0: i32, %arg1: i32, %arg2: memref<256x128xbf16, #tpu.memory_space<vmem>>, %arg3: memref<8x128xf32, #tpu.memory_space<vmem>>, %arg4: memref<1x128xf32, #tpu.memory_space<vmem>>, %arg5: memref<1x128xf32, #tpu.memory_space<vmem>>, %arg6: memref<256x128xbf16, #tpu.memory_space<vmem>>, %arg7: memref<256x128xbf16, #tpu.memory_space<vmem>>) attributes {dimension_semantics = [#tpu.dimension_semantics<parallel>, #tpu.dimension_semantics<parallel>], iteration_bounds = array<i64: 2, 1>, scalar_prefetch = 0 : i64, scratch_operands = 0 : i64, tpu.core_type = #tpu.core_type<tc>, window_params = [{transform_indices = @transform_0, window_bounds = array<i64: 256, 128>}, {transform_indices = @transform_1, window_bounds = array<i64: 8, 128>}, {transform_indices = @transform_2, window_bounds = array<i64: 1, 128>}, {transform_indices = @transform_3, window_bounds = array<i64: 1, 128>}, {transform_indices = @transform_4, window_bounds = array<i64: 256, 128>}, {transform_indices = @transform_5, window_bounds = array<i64: 256, 128>}]} {
    %c0 = arith.constant 0 : index
    %c0_0 = arith.constant 0 : index
    %0 = vector.load %arg3[%c0, %c0_0] : memref<8x128xf32, #tpu.memory_space<vmem>>, vector<1x128xf32>
    %cst = arith.constant 0.001953125 : f32
    %1 = vector.broadcast %cst : f32 to vector<1x128xf32>
    %2 = arith.mulf %0, %1 : vector<1x128xf32>
    %c1 = arith.constant 1 : index
    %c0_1 = arith.constant 0 : index
    %3 = vector.load %arg3[%c1, %c0_1] : memref<8x128xf32, #tpu.memory_space<vmem>>, vector<1x128xf32>
    %cst_2 = arith.constant 0.001953125 : f32
    %4 = vector.broadcast %cst_2 : f32 to vector<1x128xf32>
    %5 = arith.mulf %3, %4 : vector<1x128xf32>
    %6 = arith.mulf %2, %2 : vector<1x128xf32>
    %7 = arith.subf %5, %6 : vector<1x128xf32>
    %cst_3 = arith.constant 0.000000e+00 : f32
    %8 = vector.broadcast %cst_3 : f32 to vector<1x128xf32>
    %9 = arith.maximumf %7, %8 : vector<1x128xf32>
    %cst_4 = arith.constant 9.99999974E-6 : f32
    %10 = vector.broadcast %cst_4 : f32 to vector<1x128xf32>
    %11 = arith.addf %9, %10 : vector<1x128xf32>
    %12 = math.rsqrt %11 : vector<1x128xf32>
    %c0_5 = arith.constant 0 : index
    %c0_6 = arith.constant 0 : index
    %13 = vector.load %arg4[%c0_5, %c0_6] : memref<1x128xf32, #tpu.memory_space<vmem>>, vector<1x128xf32>
    %14 = arith.mulf %12, %13 : vector<1x128xf32>
    %c0_7 = arith.constant 0 : index
    %c0_8 = arith.constant 0 : index
    %15 = vector.load %arg5[%c0_7, %c0_8] : memref<1x128xf32, #tpu.memory_space<vmem>>, vector<1x128xf32>
    %16 = arith.mulf %2, %14 : vector<1x128xf32>
    %17 = arith.subf %15, %16 : vector<1x128xf32>
    %c0_9 = arith.constant 0 : index
    %c0_10 = arith.constant 0 : index
    %18 = vector.load %arg2[%c0_9, %c0_10] : memref<256x128xbf16, #tpu.memory_space<vmem>>, vector<256x128xbf16>
    %19 = arith.extf %18 : vector<256x128xbf16> to vector<256x128xf32>
    %20 = vector.broadcast %14 : vector<1x128xf32> to vector<256x128xf32>
    %21 = arith.mulf %19, %20 : vector<256x128xf32>
    %22 = vector.broadcast %17 : vector<1x128xf32> to vector<256x128xf32>
    %23 = arith.addf %21, %22 : vector<256x128xf32>
    %c0_11 = arith.constant 0 : index
    %c0_12 = arith.constant 0 : index
    %24 = vector.load %arg6[%c0_11, %c0_12] : memref<256x128xbf16, #tpu.memory_space<vmem>>, vector<256x128xbf16>
    %25 = arith.extf %24 : vector<256x128xbf16> to vector<256x128xf32>
    %26 = arith.addf %23, %25 : vector<256x128xf32>
    %cst_13 = arith.constant 0.000000e+00 : f32
    %27 = vector.broadcast %cst_13 : f32 to vector<256x128xf32>
    %28 = arith.maximumf %26, %27 : vector<256x128xf32>
    %29 = arith.truncf %28 : vector<256x128xf32> to vector<256x128xbf16>
    %c0_14 = arith.constant 0 : index
    %c0_15 = arith.constant 0 : index
    %30 = vector.load %arg7[%c0_14, %c0_15] : memref<256x128xbf16, #tpu.memory_space<vmem>>, vector<256x128xbf16>
    tpu.vector_store %arg7[%c0_14, %c0_15], %29 {strides = array<i32>} : memref<256x128xbf16, #tpu.memory_space<vmem>>, vector<256x128xbf16>,
    return
  }
  func.func @transform_0(%arg0: i32, %arg1: i32) -> (i32, i32) {
    %c0_i32 = arith.constant 0 : i32
    return %arg0, %arg1 : i32, i32
  }
  func.func @transform_1(%arg0: i32, %arg1: i32) -> (i32, i32) {
    %c0_i32 = arith.constant 0 : i32
    %c0_i32_0 = arith.constant 0 : i32
    return %c0_i32, %arg1 : i32, i32
  }
  func.func @transform_2(%arg0: i32, %arg1: i32) -> (i32, i32) {
    %c0_i32 = arith.constant 0 : i32
    %c0_i32_0 = arith.constant 0 : i32
    return %c0_i32, %arg1 : i32, i32
  }
  func.func @transform_3(%arg0: i32, %arg1: i32) -> (i32, i32) {
    %c0_i32 = arith.constant 0 : i32
    %c0_i32_0 = arith.constant 0 : i32
    return %c0_i32, %arg1 : i32, i32
  }
  func.func @transform_4(%arg0: i32, %arg1: i32) -> (i32, i32) {
    %c0_i32 = arith.constant 0 : i32
    return %arg0, %arg1 : i32, i32
  }
  func.func @transform_5(%arg0: i32, %arg1: i32) -> (i32, i32) {
    %c0_i32 = arith.constant 0 : i32
    return %arg0, %arg1 : i32, i32
  }
}

module attributes {stable_mosaic.version = 11 : i64} {
  func.func @_matmul_stats_kernel(%arg0: i32, %arg1: i32, %arg2: i32, %arg3: memref<256x384xbf16, #tpu.memory_space<vmem>>, %arg4: memref<384x128xbf16, #tpu.memory_space<vmem>>, %arg5: memref<256x128xbf16, #tpu.memory_space<vmem>>, %arg6: memref<8x128xf32, #tpu.memory_space<vmem>>, %arg7: memref<256x128xf32, #tpu.memory_space<vmem>>) attributes {dimension_semantics = [#tpu.dimension_semantics<parallel>, #tpu.dimension_semantics<arbitrary>, #tpu.dimension_semantics<arbitrary>], iteration_bounds = array<i64: 1, 2, 3>, scalar_prefetch = 0 : i64, scratch_operands = 1 : i64, tpu.core_type = #tpu.core_type<tc>, window_params = [{transform_indices = @transform_0, window_bounds = array<i64: 256, 384>}, {transform_indices = @transform_1, window_bounds = array<i64: 384, 128>}, {transform_indices = @transform_2, window_bounds = array<i64: 256, 128>}, {transform_indices = @transform_3, window_bounds = array<i64: 8, 128>}]} {
    %c0_i32 = arith.constant 0 : i32
    %0 = arith.cmpi eq, %arg2, %c0_i32 : i32
    %1 = arith.extui %0 : i1 to i32
    %c0_i32_0 = arith.constant 0 : i32
    %2 = arith.cmpi ne, %1, %c0_i32_0 : i32
    scf.if %2 {
      %cst_9 = arith.constant 0.000000e+00 : f32
      %12 = vector.broadcast %cst_9 : f32 to vector<256x128xf32>
      %c0_10 = arith.constant 0 : index
      %c0_11 = arith.constant 0 : index
      %13 = vector.load %arg7[%c0_10, %c0_11] : memref<256x128xf32, #tpu.memory_space<vmem>>, vector<256x128xf32>
      tpu.vector_store %arg7[%c0_10, %c0_11], %12 {strides = array<i32>} : memref<256x128xf32, #tpu.memory_space<vmem>>, vector<256x128xf32>,
    } else {
    }
    %c0 = arith.constant 0 : index
    %c0_1 = arith.constant 0 : index
    %3 = vector.load %arg7[%c0, %c0_1] : memref<256x128xf32, #tpu.memory_space<vmem>>, vector<256x128xf32>
    %c0_2 = arith.constant 0 : index
    %c0_3 = arith.constant 0 : index
    %4 = vector.load %arg3[%c0_2, %c0_3] : memref<256x384xbf16, #tpu.memory_space<vmem>>, vector<256x384xbf16>
    %c0_4 = arith.constant 0 : index
    %c0_5 = arith.constant 0 : index
    %5 = vector.load %arg4[%c0_4, %c0_5] : memref<384x128xbf16, #tpu.memory_space<vmem>>, vector<384x128xbf16>
    %cst = arith.constant dense<0.000000e+00> : vector<256x128xf32>
    %6 = tpu.matmul %4, %5, %cst {dimension_numbers = #tpu.dot_dimension_numbers<[1], [0], [0], [1], [0, 0, 1, 1], [], []>} : vector<256x384xbf16>, vector<384x128xbf16>, vector<256x128xf32> -> vector<256x128xf32>
    %7 = arith.addf %3, %6 : vector<256x128xf32>
    %c0_6 = arith.constant 0 : index
    %c0_7 = arith.constant 0 : index
    %8 = vector.load %arg7[%c0_6, %c0_7] : memref<256x128xf32, #tpu.memory_space<vmem>>, vector<256x128xf32>
    tpu.vector_store %arg7[%c0_6, %c0_7], %7 {strides = array<i32>} : memref<256x128xf32, #tpu.memory_space<vmem>>, vector<256x128xf32>,
    %c2_i32 = arith.constant 2 : i32
    %9 = arith.cmpi eq, %arg2, %c2_i32 : i32
    %10 = arith.extui %9 : i1 to i32
    %c0_i32_8 = arith.constant 0 : i32
    %11 = arith.cmpi ne, %10, %c0_i32_8 : i32
    scf.if %11 {
      %c0_9 = arith.constant 0 : index
      %c0_10 = arith.constant 0 : index
      %12 = vector.load %arg7[%c0_9, %c0_10] : memref<256x128xf32, #tpu.memory_space<vmem>>, vector<256x128xf32>
      %13 = arith.truncf %12 : vector<256x128xf32> to vector<256x128xbf16>
      %c0_11 = arith.constant 0 : index
      %c0_12 = arith.constant 0 : index
      %14 = vector.load %arg5[%c0_11, %c0_12] : memref<256x128xbf16, #tpu.memory_space<vmem>>, vector<256x128xbf16>
      tpu.vector_store %arg5[%c0_11, %c0_12], %13 {strides = array<i32>} : memref<256x128xbf16, #tpu.memory_space<vmem>>, vector<256x128xbf16>,
      %cst_13 = arith.constant dense<0.000000e+00> : vector<128xf32>
      %15 = vector.multi_reduction <add>, %12, %cst_13 [0] : vector<256x128xf32> to vector<128xf32>
      %16 = vector.shape_cast %15 : vector<128xf32> to vector<1x128xf32>
      %17 = arith.mulf %12, %12 : vector<256x128xf32>
      %cst_14 = arith.constant dense<0.000000e+00> : vector<128xf32>
      %18 = vector.multi_reduction <add>, %17, %cst_14 [0] : vector<256x128xf32> to vector<128xf32>
      %19 = vector.shape_cast %18 : vector<128xf32> to vector<1x128xf32>
      %20 = tpu.iota {dimensions = array<i32: 0>} : vector<8x128xi32>
      %c0_i32_15 = arith.constant 0 : i32
      %21 = vector.broadcast %c0_i32_15 : i32 to vector<8x128xi32>
      %22 = arith.cmpi eq, %20, %21 : vector<8x128xi32>
      %cst_16 = arith.constant 0.000000e+00 : f32
      %23 = vector.shape_cast %16 : vector<1x128xf32> to vector<1x128xf32>
      %24 = vector.broadcast %23 : vector<1x128xf32> to vector<8x128xf32>
      %25 = vector.broadcast %cst_16 : f32 to vector<8x128xf32>
      %26 = arith.select %22, %24, %25 : vector<8x128xi1>, vector<8x128xf32>
      %c1_i32 = arith.constant 1 : i32
      %27 = vector.broadcast %c1_i32 : i32 to vector<8x128xi32>
      %28 = arith.cmpi eq, %20, %27 : vector<8x128xi32>
      %cst_17 = arith.constant 0.000000e+00 : f32
      %29 = vector.shape_cast %19 : vector<1x128xf32> to vector<1x128xf32>
      %30 = vector.broadcast %29 : vector<1x128xf32> to vector<8x128xf32>
      %31 = vector.broadcast %cst_17 : f32 to vector<8x128xf32>
      %32 = arith.select %28, %30, %31 : vector<8x128xi1>, vector<8x128xf32>
      %33 = arith.addf %26, %32 : vector<8x128xf32>
      %c0_i32_18 = arith.constant 0 : i32
      %34 = arith.cmpi eq, %arg1, %c0_i32_18 : i32
      %35 = arith.extui %34 : i1 to i32
      %c0_i32_19 = arith.constant 0 : i32
      %36 = arith.cmpi ne, %35, %c0_i32_19 : i32
      scf.if %36 {
        %c0_22 = arith.constant 0 : index
        %c0_23 = arith.constant 0 : index
        %40 = vector.load %arg6[%c0_22, %c0_23] : memref<8x128xf32, #tpu.memory_space<vmem>>, vector<8x128xf32>
        tpu.vector_store %arg6[%c0_22, %c0_23], %33 {strides = array<i32>} : memref<8x128xf32, #tpu.memory_space<vmem>>, vector<8x128xf32>,
      } else {
      }
      %c0_i32_20 = arith.constant 0 : i32
      %37 = arith.cmpi sgt, %arg1, %c0_i32_20 : i32
      %38 = arith.extui %37 : i1 to i32
      %c0_i32_21 = arith.constant 0 : i32
      %39 = arith.cmpi ne, %38, %c0_i32_21 : i32
      scf.if %39 {
        %c0_22 = arith.constant 0 : index
        %c0_23 = arith.constant 0 : index
        %40 = vector.load %arg6[%c0_22, %c0_23] : memref<8x128xf32, #tpu.memory_space<vmem>>, vector<8x128xf32>
        %41 = arith.addf %40, %33 : vector<8x128xf32>
        %c0_24 = arith.constant 0 : index
        %c0_25 = arith.constant 0 : index
        %42 = vector.load %arg6[%c0_24, %c0_25] : memref<8x128xf32, #tpu.memory_space<vmem>>, vector<8x128xf32>
        tpu.vector_store %arg6[%c0_24, %c0_25], %41 {strides = array<i32>} : memref<8x128xf32, #tpu.memory_space<vmem>>, vector<8x128xf32>,
      } else {
      }
    } else {
    }
    return
  }
  func.func @transform_0(%arg0: i32, %arg1: i32, %arg2: i32) -> (i32, i32) {
    %c0_i32 = arith.constant 0 : i32
    return %arg1, %arg2 : i32, i32
  }
  func.func @transform_1(%arg0: i32, %arg1: i32, %arg2: i32) -> (i32, i32) {
    %c0_i32 = arith.constant 0 : i32
    return %arg2, %arg0 : i32, i32
  }
  func.func @transform_2(%arg0: i32, %arg1: i32, %arg2: i32) -> (i32, i32) {
    %c0_i32 = arith.constant 0 : i32
    return %arg1, %arg0 : i32, i32
  }
  func.func @transform_3(%arg0: i32, %arg1: i32, %arg2: i32) -> (i32, i32) {
    %c0_i32 = arith.constant 0 : i32
    %c0_i32_0 = arith.constant 0 : i32
    return %c0_i32, %arg0 : i32, i32
  }
}

module attributes {stable_mosaic.version = 11 : i64} {
  func.func @_fused_matmul_bn_kernel(%arg0: i32, %arg1: i32, %arg2: memref<128x384xbf16, #tpu.memory_space<vmem>>, %arg3: memref<384x128xbf16, #tpu.memory_space<vmem>>, %arg4: memref<1x128xf32, #tpu.memory_space<vmem>>, %arg5: memref<1x128xf32, #tpu.memory_space<vmem>>, %arg6: memref<128x128xbf16, #tpu.memory_space<vmem>>, %arg7: memref<128x128xf32, #tpu.memory_space<vmem>>) attributes {dimension_semantics = [#tpu.dimension_semantics<parallel>, #tpu.dimension_semantics<arbitrary>], iteration_bounds = array<i64: 1, 3>, scalar_prefetch = 0 : i64, scratch_operands = 1 : i64, tpu.core_type = #tpu.core_type<tc>, window_params = [{transform_indices = @transform_0, window_bounds = array<i64: 128, 384>}, {transform_indices = @transform_1, window_bounds = array<i64: 384, 128>}, {transform_indices = @transform_2, window_bounds = array<i64: 1, 128>}, {transform_indices = @transform_3, window_bounds = array<i64: 1, 128>}, {transform_indices = @transform_4, window_bounds = array<i64: 128, 128>}]} {
    %c0_i32 = arith.constant 0 : i32
    %0 = arith.cmpi eq, %arg1, %c0_i32 : i32
    %1 = arith.extui %0 : i1 to i32
    %c0_i32_0 = arith.constant 0 : i32
    %2 = arith.cmpi ne, %1, %c0_i32_0 : i32
    scf.if %2 {
      %cst_9 = arith.constant 0.000000e+00 : f32
      %12 = vector.broadcast %cst_9 : f32 to vector<128x128xf32>
      %c0_10 = arith.constant 0 : index
      %c0_11 = arith.constant 0 : index
      %13 = vector.load %arg7[%c0_10, %c0_11] : memref<128x128xf32, #tpu.memory_space<vmem>>, vector<128x128xf32>
      tpu.vector_store %arg7[%c0_10, %c0_11], %12 {strides = array<i32>} : memref<128x128xf32, #tpu.memory_space<vmem>>, vector<128x128xf32>,
    } else {
    }
    %c0 = arith.constant 0 : index
    %c0_1 = arith.constant 0 : index
    %3 = vector.load %arg7[%c0, %c0_1] : memref<128x128xf32, #tpu.memory_space<vmem>>, vector<128x128xf32>
    %c0_2 = arith.constant 0 : index
    %c0_3 = arith.constant 0 : index
    %4 = vector.load %arg2[%c0_2, %c0_3] : memref<128x384xbf16, #tpu.memory_space<vmem>>, vector<128x384xbf16>
    %c0_4 = arith.constant 0 : index
    %c0_5 = arith.constant 0 : index
    %5 = vector.load %arg3[%c0_4, %c0_5] : memref<384x128xbf16, #tpu.memory_space<vmem>>, vector<384x128xbf16>
    %cst = arith.constant dense<0.000000e+00> : vector<128x128xf32>
    %6 = tpu.matmul %4, %5, %cst {dimension_numbers = #tpu.dot_dimension_numbers<[1], [0], [0], [1], [0, 0, 1, 1], [], []>} : vector<128x384xbf16>, vector<384x128xbf16>, vector<128x128xf32> -> vector<128x128xf32>
    %7 = arith.addf %3, %6 : vector<128x128xf32>
    %c0_6 = arith.constant 0 : index
    %c0_7 = arith.constant 0 : index
    %8 = vector.load %arg7[%c0_6, %c0_7] : memref<128x128xf32, #tpu.memory_space<vmem>>, vector<128x128xf32>
    tpu.vector_store %arg7[%c0_6, %c0_7], %7 {strides = array<i32>} : memref<128x128xf32, #tpu.memory_space<vmem>>, vector<128x128xf32>,
    %c2_i32 = arith.constant 2 : i32
    %9 = arith.cmpi eq, %arg1, %c2_i32 : i32
    %10 = arith.extui %9 : i1 to i32
    %c0_i32_8 = arith.constant 0 : i32
    %11 = arith.cmpi ne, %10, %c0_i32_8 : i32
    scf.if %11 {
      %c0_9 = arith.constant 0 : index
      %c0_10 = arith.constant 0 : index
      %12 = vector.load %arg7[%c0_9, %c0_10] : memref<128x128xf32, #tpu.memory_space<vmem>>, vector<128x128xf32>
      %cst_11 = arith.constant dense<0.000000e+00> : vector<128xf32>
      %13 = vector.multi_reduction <add>, %12, %cst_11 [0] : vector<128x128xf32> to vector<128xf32>
      %14 = vector.shape_cast %13 : vector<128xf32> to vector<1x128xf32>
      %cst_12 = arith.constant 7.812500e-03 : f32
      %15 = vector.broadcast %cst_12 : f32 to vector<1x128xf32>
      %16 = arith.mulf %14, %15 : vector<1x128xf32>
      %17 = arith.mulf %12, %12 : vector<128x128xf32>
      %cst_13 = arith.constant dense<0.000000e+00> : vector<128xf32>
      %18 = vector.multi_reduction <add>, %17, %cst_13 [0] : vector<128x128xf32> to vector<128xf32>
      %19 = vector.shape_cast %18 : vector<128xf32> to vector<1x128xf32>
      %cst_14 = arith.constant 7.812500e-03 : f32
      %20 = vector.broadcast %cst_14 : f32 to vector<1x128xf32>
      %21 = arith.mulf %19, %20 : vector<1x128xf32>
      %22 = arith.mulf %16, %16 : vector<1x128xf32>
      %23 = arith.subf %21, %22 : vector<1x128xf32>
      %cst_15 = arith.constant 0.000000e+00 : f32
      %24 = vector.broadcast %cst_15 : f32 to vector<1x128xf32>
      %25 = arith.maximumf %23, %24 : vector<1x128xf32>
      %cst_16 = arith.constant 9.99999974E-6 : f32
      %26 = vector.broadcast %cst_16 : f32 to vector<1x128xf32>
      %27 = arith.addf %25, %26 : vector<1x128xf32>
      %28 = math.rsqrt %27 : vector<1x128xf32>
      %c0_17 = arith.constant 0 : index
      %c0_18 = arith.constant 0 : index
      %29 = vector.load %arg4[%c0_17, %c0_18] : memref<1x128xf32, #tpu.memory_space<vmem>>, vector<1x128xf32>
      %30 = arith.mulf %28, %29 : vector<1x128xf32>
      %c0_19 = arith.constant 0 : index
      %c0_20 = arith.constant 0 : index
      %31 = vector.load %arg5[%c0_19, %c0_20] : memref<1x128xf32, #tpu.memory_space<vmem>>, vector<1x128xf32>
      %32 = arith.mulf %16, %30 : vector<1x128xf32>
      %33 = arith.subf %31, %32 : vector<1x128xf32>
      %34 = vector.broadcast %30 : vector<1x128xf32> to vector<128x128xf32>
      %35 = arith.mulf %12, %34 : vector<128x128xf32>
      %36 = vector.broadcast %33 : vector<1x128xf32> to vector<128x128xf32>
      %37 = arith.addf %35, %36 : vector<128x128xf32>
      %cst_21 = arith.constant 0.000000e+00 : f32
      %38 = vector.broadcast %cst_21 : f32 to vector<128x128xf32>
      %39 = arith.maximumf %37, %38 : vector<128x128xf32>
      %40 = arith.truncf %39 : vector<128x128xf32> to vector<128x128xbf16>
      %c0_22 = arith.constant 0 : index
      %c0_23 = arith.constant 0 : index
      %41 = vector.load %arg6[%c0_22, %c0_23] : memref<128x128xbf16, #tpu.memory_space<vmem>>, vector<128x128xbf16>
      tpu.vector_store %arg6[%c0_22, %c0_23], %40 {strides = array<i32>} : memref<128x128xbf16, #tpu.memory_space<vmem>>, vector<128x128xbf16>,
    } else {
    }
    return
  }
  func.func @transform_0(%arg0: i32, %arg1: i32) -> (i32, i32) {
    %c0_i32 = arith.constant 0 : i32
    %c0_i32_0 = arith.constant 0 : i32
    return %c0_i32, %arg1 : i32, i32
  }
  func.func @transform_1(%arg0: i32, %arg1: i32) -> (i32, i32) {
    %c0_i32 = arith.constant 0 : i32
    return %arg1, %arg0 : i32, i32
  }
  func.func @transform_2(%arg0: i32, %arg1: i32) -> (i32, i32) {
    %c0_i32 = arith.constant 0 : i32
    %c0_i32_0 = arith.constant 0 : i32
    return %c0_i32, %arg0 : i32, i32
  }
  func.func @transform_3(%arg0: i32, %arg1: i32) -> (i32, i32) {
    %c0_i32 = arith.constant 0 : i32
    %c0_i32_0 = arith.constant 0 : i32
    return %c0_i32, %arg0 : i32, i32
  }
  func.func @transform_4(%arg0: i32, %arg1: i32) -> (i32, i32) {
    %c0_i32 = arith.constant 0 : i32
    %c0_i32_0 = arith.constant 0 : i32
    return %c0_i32, %arg0 : i32, i32
  }
}

module attributes {stable_mosaic.version = 11 : i64} {
  func.func @_fused_matmul_bn_kernel(%arg0: i32, %arg1: i32, %arg2: memref<128x128xbf16, #tpu.memory_space<vmem>>, %arg3: memref<128x128xbf16, #tpu.memory_space<vmem>>, %arg4: memref<1x128xf32, #tpu.memory_space<vmem>>, %arg5: memref<1x128xf32, #tpu.memory_space<vmem>>, %arg6: memref<128x128xbf16, #tpu.memory_space<vmem>>, %arg7: memref<128x128xf32, #tpu.memory_space<vmem>>) attributes {dimension_semantics = [#tpu.dimension_semantics<parallel>, #tpu.dimension_semantics<arbitrary>], iteration_bounds = array<i64: 1, 1>, scalar_prefetch = 0 : i64, scratch_operands = 1 : i64, tpu.core_type = #tpu.core_type<tc>, window_params = [{transform_indices = @transform_0, window_bounds = array<i64: 128, 128>}, {transform_indices = @transform_1, window_bounds = array<i64: 128, 128>}, {transform_indices = @transform_2, window_bounds = array<i64: 1, 128>}, {transform_indices = @transform_3, window_bounds = array<i64: 1, 128>}, {transform_indices = @transform_4, window_bounds = array<i64: 128, 128>}]} {
    %c0_i32 = arith.constant 0 : i32
    %0 = arith.cmpi eq, %arg1, %c0_i32 : i32
    %1 = arith.extui %0 : i1 to i32
    %c0_i32_0 = arith.constant 0 : i32
    %2 = arith.cmpi ne, %1, %c0_i32_0 : i32
    scf.if %2 {
      %cst_10 = arith.constant 0.000000e+00 : f32
      %12 = vector.broadcast %cst_10 : f32 to vector<128x128xf32>
      %c0_11 = arith.constant 0 : index
      %c0_12 = arith.constant 0 : index
      %13 = vector.load %arg7[%c0_11, %c0_12] : memref<128x128xf32, #tpu.memory_space<vmem>>, vector<128x128xf32>
      tpu.vector_store %arg7[%c0_11, %c0_12], %12 {strides = array<i32>} : memref<128x128xf32, #tpu.memory_space<vmem>>, vector<128x128xf32>,
    } else {
    }
    %c0 = arith.constant 0 : index
    %c0_1 = arith.constant 0 : index
    %3 = vector.load %arg7[%c0, %c0_1] : memref<128x128xf32, #tpu.memory_space<vmem>>, vector<128x128xf32>
    %c0_2 = arith.constant 0 : index
    %c0_3 = arith.constant 0 : index
    %4 = vector.load %arg2[%c0_2, %c0_3] : memref<128x128xbf16, #tpu.memory_space<vmem>>, vector<128x128xbf16>
    %c0_4 = arith.constant 0 : index
    %c0_5 = arith.constant 0 : index
    %5 = vector.load %arg3[%c0_4, %c0_5] : memref<128x128xbf16, #tpu.memory_space<vmem>>, vector<128x128xbf16>
    %cst = arith.constant dense<0.000000e+00> : vector<128x128xf32>
    %6 = tpu.matmul %4, %5, %cst {dimension_numbers = #tpu.dot_dimension_numbers<[1], [0], [0], [1], [0, 0, 1, 1], [], []>} : vector<128x128xbf16>, vector<128x128xbf16>, vector<128x128xf32> -> vector<128x128xf32>
    %7 = arith.addf %3, %6 : vector<128x128xf32>
    %c0_6 = arith.constant 0 : index
    %c0_7 = arith.constant 0 : index
    %8 = vector.load %arg7[%c0_6, %c0_7] : memref<128x128xf32, #tpu.memory_space<vmem>>, vector<128x128xf32>
    tpu.vector_store %arg7[%c0_6, %c0_7], %7 {strides = array<i32>} : memref<128x128xf32, #tpu.memory_space<vmem>>, vector<128x128xf32>,
    %c0_i32_8 = arith.constant 0 : i32
    %9 = arith.cmpi eq, %arg1, %c0_i32_8 : i32
    %10 = arith.extui %9 : i1 to i32
    %c0_i32_9 = arith.constant 0 : i32
    %11 = arith.cmpi ne, %10, %c0_i32_9 : i32
    scf.if %11 {
      %c0_10 = arith.constant 0 : index
      %c0_11 = arith.constant 0 : index
      %12 = vector.load %arg7[%c0_10, %c0_11] : memref<128x128xf32, #tpu.memory_space<vmem>>, vector<128x128xf32>
      %cst_12 = arith.constant dense<0.000000e+00> : vector<128xf32>
      %13 = vector.multi_reduction <add>, %12, %cst_12 [0] : vector<128x128xf32> to vector<128xf32>
      %14 = vector.shape_cast %13 : vector<128xf32> to vector<1x128xf32>
      %cst_13 = arith.constant 7.812500e-03 : f32
      %15 = vector.broadcast %cst_13 : f32 to vector<1x128xf32>
      %16 = arith.mulf %14, %15 : vector<1x128xf32>
      %17 = arith.mulf %12, %12 : vector<128x128xf32>
      %cst_14 = arith.constant dense<0.000000e+00> : vector<128xf32>
      %18 = vector.multi_reduction <add>, %17, %cst_14 [0] : vector<128x128xf32> to vector<128xf32>
      %19 = vector.shape_cast %18 : vector<128xf32> to vector<1x128xf32>
      %cst_15 = arith.constant 7.812500e-03 : f32
      %20 = vector.broadcast %cst_15 : f32 to vector<1x128xf32>
      %21 = arith.mulf %19, %20 : vector<1x128xf32>
      %22 = arith.mulf %16, %16 : vector<1x128xf32>
      %23 = arith.subf %21, %22 : vector<1x128xf32>
      %cst_16 = arith.constant 0.000000e+00 : f32
      %24 = vector.broadcast %cst_16 : f32 to vector<1x128xf32>
      %25 = arith.maximumf %23, %24 : vector<1x128xf32>
      %cst_17 = arith.constant 9.99999974E-6 : f32
      %26 = vector.broadcast %cst_17 : f32 to vector<1x128xf32>
      %27 = arith.addf %25, %26 : vector<1x128xf32>
      %28 = math.rsqrt %27 : vector<1x128xf32>
      %c0_18 = arith.constant 0 : index
      %c0_19 = arith.constant 0 : index
      %29 = vector.load %arg4[%c0_18, %c0_19] : memref<1x128xf32, #tpu.memory_space<vmem>>, vector<1x128xf32>
      %30 = arith.mulf %28, %29 : vector<1x128xf32>
      %c0_20 = arith.constant 0 : index
      %c0_21 = arith.constant 0 : index
      %31 = vector.load %arg5[%c0_20, %c0_21] : memref<1x128xf32, #tpu.memory_space<vmem>>, vector<1x128xf32>
      %32 = arith.mulf %16, %30 : vector<1x128xf32>
      %33 = arith.subf %31, %32 : vector<1x128xf32>
      %34 = vector.broadcast %30 : vector<1x128xf32> to vector<128x128xf32>
      %35 = arith.mulf %12, %34 : vector<128x128xf32>
      %36 = vector.broadcast %33 : vector<1x128xf32> to vector<128x128xf32>
      %37 = arith.addf %35, %36 : vector<128x128xf32>
      %38 = arith.truncf %37 : vector<128x128xf32> to vector<128x128xbf16>
      %c0_22 = arith.constant 0 : index
      %c0_23 = arith.constant 0 : index
      %39 = vector.load %arg6[%c0_22, %c0_23] : memref<128x128xbf16, #tpu.memory_space<vmem>>, vector<128x128xbf16>
      tpu.vector_store %arg6[%c0_22, %c0_23], %38 {strides = array<i32>} : memref<128x128xbf16, #tpu.memory_space<vmem>>, vector<128x128xbf16>,
    } else {
    }
    return
  }
  func.func @transform_0(%arg0: i32, %arg1: i32) -> (i32, i32) {
    %c0_i32 = arith.constant 0 : i32
    %c0_i32_0 = arith.constant 0 : i32
    return %c0_i32, %arg1 : i32, i32
  }
  func.func @transform_1(%arg0: i32, %arg1: i32) -> (i32, i32) {
    %c0_i32 = arith.constant 0 : i32
    return %arg1, %arg0 : i32, i32
  }
  func.func @transform_2(%arg0: i32, %arg1: i32) -> (i32, i32) {
    %c0_i32 = arith.constant 0 : i32
    %c0_i32_0 = arith.constant 0 : i32
    return %c0_i32, %arg0 : i32, i32
  }
  func.func @transform_3(%arg0: i32, %arg1: i32) -> (i32, i32) {
    %c0_i32 = arith.constant 0 : i32
    %c0_i32_0 = arith.constant 0 : i32
    return %c0_i32, %arg0 : i32, i32
  }
  func.func @transform_4(%arg0: i32, %arg1: i32) -> (i32, i32) {
    %c0_i32 = arith.constant 0 : i32
    %c0_i32_0 = arith.constant 0 : i32
    return %c0_i32, %arg0 : i32, i32
  }
}

module attributes {stable_mosaic.version = 11 : i64} {
  func.func @_fused_matmul_bn_kernel(%arg0: i32, %arg1: i32, %arg2: memref<128x384xbf16, #tpu.memory_space<vmem>>, %arg3: memref<384x128xbf16, #tpu.memory_space<vmem>>, %arg4: memref<1x128xf32, #tpu.memory_space<vmem>>, %arg5: memref<1x128xf32, #tpu.memory_space<vmem>>, %arg6: memref<128x128xbf16, #tpu.memory_space<vmem>>, %arg7: memref<128x128xbf16, #tpu.memory_space<vmem>>, %arg8: memref<128x128xf32, #tpu.memory_space<vmem>>) attributes {dimension_semantics = [#tpu.dimension_semantics<parallel>, #tpu.dimension_semantics<arbitrary>], iteration_bounds = array<i64: 1, 3>, scalar_prefetch = 0 : i64, scratch_operands = 1 : i64, tpu.core_type = #tpu.core_type<tc>, window_params = [{transform_indices = @transform_0, window_bounds = array<i64: 128, 384>}, {transform_indices = @transform_1, window_bounds = array<i64: 384, 128>}, {transform_indices = @transform_2, window_bounds = array<i64: 1, 128>}, {transform_indices = @transform_3, window_bounds = array<i64: 1, 128>}, {transform_indices = @transform_4, window_bounds = array<i64: 128, 128>}, {transform_indices = @transform_5, window_bounds = array<i64: 128, 128>}]} {
    %c0_i32 = arith.constant 0 : i32
    %0 = arith.cmpi eq, %arg1, %c0_i32 : i32
    %1 = arith.extui %0 : i1 to i32
    %c0_i32_0 = arith.constant 0 : i32
    %2 = arith.cmpi ne, %1, %c0_i32_0 : i32
    scf.if %2 {
      %cst_9 = arith.constant 0.000000e+00 : f32
      %12 = vector.broadcast %cst_9 : f32 to vector<128x128xf32>
      %c0_10 = arith.constant 0 : index
      %c0_11 = arith.constant 0 : index
      %13 = vector.load %arg8[%c0_10, %c0_11] : memref<128x128xf32, #tpu.memory_space<vmem>>, vector<128x128xf32>
      tpu.vector_store %arg8[%c0_10, %c0_11], %12 {strides = array<i32>} : memref<128x128xf32, #tpu.memory_space<vmem>>, vector<128x128xf32>,
    } else {
    }
    %c0 = arith.constant 0 : index
    %c0_1 = arith.constant 0 : index
    %3 = vector.load %arg8[%c0, %c0_1] : memref<128x128xf32, #tpu.memory_space<vmem>>, vector<128x128xf32>
    %c0_2 = arith.constant 0 : index
    %c0_3 = arith.constant 0 : index
    %4 = vector.load %arg2[%c0_2, %c0_3] : memref<128x384xbf16, #tpu.memory_space<vmem>>, vector<128x384xbf16>
    %c0_4 = arith.constant 0 : index
    %c0_5 = arith.constant 0 : index
    %5 = vector.load %arg3[%c0_4, %c0_5] : memref<384x128xbf16, #tpu.memory_space<vmem>>, vector<384x128xbf16>
    %cst = arith.constant dense<0.000000e+00> : vector<128x128xf32>
    %6 = tpu.matmul %4, %5, %cst {dimension_numbers = #tpu.dot_dimension_numbers<[1], [0], [0], [1], [0, 0, 1, 1], [], []>} : vector<128x384xbf16>, vector<384x128xbf16>, vector<128x128xf32> -> vector<128x128xf32>
    %7 = arith.addf %3, %6 : vector<128x128xf32>
    %c0_6 = arith.constant 0 : index
    %c0_7 = arith.constant 0 : index
    %8 = vector.load %arg8[%c0_6, %c0_7] : memref<128x128xf32, #tpu.memory_space<vmem>>, vector<128x128xf32>
    tpu.vector_store %arg8[%c0_6, %c0_7], %7 {strides = array<i32>} : memref<128x128xf32, #tpu.memory_space<vmem>>, vector<128x128xf32>,
    %c2_i32 = arith.constant 2 : i32
    %9 = arith.cmpi eq, %arg1, %c2_i32 : i32
    %10 = arith.extui %9 : i1 to i32
    %c0_i32_8 = arith.constant 0 : i32
    %11 = arith.cmpi ne, %10, %c0_i32_8 : i32
    scf.if %11 {
      %c0_9 = arith.constant 0 : index
      %c0_10 = arith.constant 0 : index
      %12 = vector.load %arg8[%c0_9, %c0_10] : memref<128x128xf32, #tpu.memory_space<vmem>>, vector<128x128xf32>
      %cst_11 = arith.constant dense<0.000000e+00> : vector<128xf32>
      %13 = vector.multi_reduction <add>, %12, %cst_11 [0] : vector<128x128xf32> to vector<128xf32>
      %14 = vector.shape_cast %13 : vector<128xf32> to vector<1x128xf32>
      %cst_12 = arith.constant 7.812500e-03 : f32
      %15 = vector.broadcast %cst_12 : f32 to vector<1x128xf32>
      %16 = arith.mulf %14, %15 : vector<1x128xf32>
      %17 = arith.mulf %12, %12 : vector<128x128xf32>
      %cst_13 = arith.constant dense<0.000000e+00> : vector<128xf32>
      %18 = vector.multi_reduction <add>, %17, %cst_13 [0] : vector<128x128xf32> to vector<128xf32>
      %19 = vector.shape_cast %18 : vector<128xf32> to vector<1x128xf32>
      %cst_14 = arith.constant 7.812500e-03 : f32
      %20 = vector.broadcast %cst_14 : f32 to vector<1x128xf32>
      %21 = arith.mulf %19, %20 : vector<1x128xf32>
      %22 = arith.mulf %16, %16 : vector<1x128xf32>
      %23 = arith.subf %21, %22 : vector<1x128xf32>
      %cst_15 = arith.constant 0.000000e+00 : f32
      %24 = vector.broadcast %cst_15 : f32 to vector<1x128xf32>
      %25 = arith.maximumf %23, %24 : vector<1x128xf32>
      %cst_16 = arith.constant 9.99999974E-6 : f32
      %26 = vector.broadcast %cst_16 : f32 to vector<1x128xf32>
      %27 = arith.addf %25, %26 : vector<1x128xf32>
      %28 = math.rsqrt %27 : vector<1x128xf32>
      %c0_17 = arith.constant 0 : index
      %c0_18 = arith.constant 0 : index
      %29 = vector.load %arg4[%c0_17, %c0_18] : memref<1x128xf32, #tpu.memory_space<vmem>>, vector<1x128xf32>
      %30 = arith.mulf %28, %29 : vector<1x128xf32>
      %c0_19 = arith.constant 0 : index
      %c0_20 = arith.constant 0 : index
      %31 = vector.load %arg5[%c0_19, %c0_20] : memref<1x128xf32, #tpu.memory_space<vmem>>, vector<1x128xf32>
      %32 = arith.mulf %16, %30 : vector<1x128xf32>
      %33 = arith.subf %31, %32 : vector<1x128xf32>
      %34 = vector.broadcast %30 : vector<1x128xf32> to vector<128x128xf32>
      %35 = arith.mulf %12, %34 : vector<128x128xf32>
      %36 = vector.broadcast %33 : vector<1x128xf32> to vector<128x128xf32>
      %37 = arith.addf %35, %36 : vector<128x128xf32>
      %c0_21 = arith.constant 0 : index
      %c0_22 = arith.constant 0 : index
      %38 = vector.load %arg6[%c0_21, %c0_22] : memref<128x128xbf16, #tpu.memory_space<vmem>>, vector<128x128xbf16>
      %39 = arith.extf %38 : vector<128x128xbf16> to vector<128x128xf32>
      %40 = arith.addf %37, %39 : vector<128x128xf32>
      %cst_23 = arith.constant 0.000000e+00 : f32
      %41 = vector.broadcast %cst_23 : f32 to vector<128x128xf32>
      %42 = arith.maximumf %40, %41 : vector<128x128xf32>
      %43 = arith.truncf %42 : vector<128x128xf32> to vector<128x128xbf16>
      %c0_24 = arith.constant 0 : index
      %c0_25 = arith.constant 0 : index
      %44 = vector.load %arg7[%c0_24, %c0_25] : memref<128x128xbf16, #tpu.memory_space<vmem>>, vector<128x128xbf16>
      tpu.vector_store %arg7[%c0_24, %c0_25], %43 {strides = array<i32>} : memref<128x128xbf16, #tpu.memory_space<vmem>>, vector<128x128xbf16>,
    } else {
    }
    return
  }
  func.func @transform_0(%arg0: i32, %arg1: i32) -> (i32, i32) {
    %c0_i32 = arith.constant 0 : i32
    %c0_i32_0 = arith.constant 0 : i32
    return %c0_i32, %arg1 : i32, i32
  }
  func.func @transform_1(%arg0: i32, %arg1: i32) -> (i32, i32) {
    %c0_i32 = arith.constant 0 : i32
    return %arg1, %arg0 : i32, i32
  }
  func.func @transform_2(%arg0: i32, %arg1: i32) -> (i32, i32) {
    %c0_i32 = arith.constant 0 : i32
    %c0_i32_0 = arith.constant 0 : i32
    return %c0_i32, %arg0 : i32, i32
  }
  func.func @transform_3(%arg0: i32, %arg1: i32) -> (i32, i32) {
    %c0_i32 = arith.constant 0 : i32
    %c0_i32_0 = arith.constant 0 : i32
    return %c0_i32, %arg0 : i32, i32
  }
  func.func @transform_4(%arg0: i32, %arg1: i32) -> (i32, i32) {
    %c0_i32 = arith.constant 0 : i32
    %c0_i32_0 = arith.constant 0 : i32
    return %c0_i32, %arg0 : i32, i32
  }
  func.func @transform_5(%arg0: i32, %arg1: i32) -> (i32, i32) {
    %c0_i32 = arith.constant 0 : i32
    %c0_i32_0 = arith.constant 0 : i32
    return %c0_i32, %arg0 : i32, i32
  }
}

module attributes {stable_mosaic.version = 11 : i64} {
  func.func @_fused_matmul_bn_kernel(%arg0: i32, %arg1: i32, %arg2: memref<32x384xbf16, #tpu.memory_space<vmem>>, %arg3: memref<384x128xbf16, #tpu.memory_space<vmem>>, %arg4: memref<1x128xf32, #tpu.memory_space<vmem>>, %arg5: memref<1x128xf32, #tpu.memory_space<vmem>>, %arg6: memref<32x128xbf16, #tpu.memory_space<vmem>>, %arg7: memref<32x128xf32, #tpu.memory_space<vmem>>) attributes {dimension_semantics = [#tpu.dimension_semantics<parallel>, #tpu.dimension_semantics<arbitrary>], iteration_bounds = array<i64: 1, 3>, scalar_prefetch = 0 : i64, scratch_operands = 1 : i64, tpu.core_type = #tpu.core_type<tc>, window_params = [{transform_indices = @transform_0, window_bounds = array<i64: 32, 384>}, {transform_indices = @transform_1, window_bounds = array<i64: 384, 128>}, {transform_indices = @transform_2, window_bounds = array<i64: 1, 128>}, {transform_indices = @transform_3, window_bounds = array<i64: 1, 128>}, {transform_indices = @transform_4, window_bounds = array<i64: 32, 128>}]} {
    %c0_i32 = arith.constant 0 : i32
    %0 = arith.cmpi eq, %arg1, %c0_i32 : i32
    %1 = arith.extui %0 : i1 to i32
    %c0_i32_0 = arith.constant 0 : i32
    %2 = arith.cmpi ne, %1, %c0_i32_0 : i32
    scf.if %2 {
      %cst_9 = arith.constant 0.000000e+00 : f32
      %12 = vector.broadcast %cst_9 : f32 to vector<32x128xf32>
      %c0_10 = arith.constant 0 : index
      %c0_11 = arith.constant 0 : index
      %13 = vector.load %arg7[%c0_10, %c0_11] : memref<32x128xf32, #tpu.memory_space<vmem>>, vector<32x128xf32>
      tpu.vector_store %arg7[%c0_10, %c0_11], %12 {strides = array<i32>} : memref<32x128xf32, #tpu.memory_space<vmem>>, vector<32x128xf32>,
    } else {
    }
    %c0 = arith.constant 0 : index
    %c0_1 = arith.constant 0 : index
    %3 = vector.load %arg7[%c0, %c0_1] : memref<32x128xf32, #tpu.memory_space<vmem>>, vector<32x128xf32>
    %c0_2 = arith.constant 0 : index
    %c0_3 = arith.constant 0 : index
    %4 = vector.load %arg2[%c0_2, %c0_3] : memref<32x384xbf16, #tpu.memory_space<vmem>>, vector<32x384xbf16>
    %c0_4 = arith.constant 0 : index
    %c0_5 = arith.constant 0 : index
    %5 = vector.load %arg3[%c0_4, %c0_5] : memref<384x128xbf16, #tpu.memory_space<vmem>>, vector<384x128xbf16>
    %cst = arith.constant dense<0.000000e+00> : vector<32x128xf32>
    %6 = tpu.matmul %4, %5, %cst {dimension_numbers = #tpu.dot_dimension_numbers<[1], [0], [0], [1], [0, 0, 1, 1], [], []>} : vector<32x384xbf16>, vector<384x128xbf16>, vector<32x128xf32> -> vector<32x128xf32>
    %7 = arith.addf %3, %6 : vector<32x128xf32>
    %c0_6 = arith.constant 0 : index
    %c0_7 = arith.constant 0 : index
    %8 = vector.load %arg7[%c0_6, %c0_7] : memref<32x128xf32, #tpu.memory_space<vmem>>, vector<32x128xf32>
    tpu.vector_store %arg7[%c0_6, %c0_7], %7 {strides = array<i32>} : memref<32x128xf32, #tpu.memory_space<vmem>>, vector<32x128xf32>,
    %c2_i32 = arith.constant 2 : i32
    %9 = arith.cmpi eq, %arg1, %c2_i32 : i32
    %10 = arith.extui %9 : i1 to i32
    %c0_i32_8 = arith.constant 0 : i32
    %11 = arith.cmpi ne, %10, %c0_i32_8 : i32
    scf.if %11 {
      %c0_9 = arith.constant 0 : index
      %c0_10 = arith.constant 0 : index
      %12 = vector.load %arg7[%c0_9, %c0_10] : memref<32x128xf32, #tpu.memory_space<vmem>>, vector<32x128xf32>
      %cst_11 = arith.constant dense<0.000000e+00> : vector<128xf32>
      %13 = vector.multi_reduction <add>, %12, %cst_11 [0] : vector<32x128xf32> to vector<128xf32>
      %14 = vector.shape_cast %13 : vector<128xf32> to vector<1x128xf32>
      %cst_12 = arith.constant 3.125000e-02 : f32
      %15 = vector.broadcast %cst_12 : f32 to vector<1x128xf32>
      %16 = arith.mulf %14, %15 : vector<1x128xf32>
      %17 = arith.mulf %12, %12 : vector<32x128xf32>
      %cst_13 = arith.constant dense<0.000000e+00> : vector<128xf32>
      %18 = vector.multi_reduction <add>, %17, %cst_13 [0] : vector<32x128xf32> to vector<128xf32>
      %19 = vector.shape_cast %18 : vector<128xf32> to vector<1x128xf32>
      %cst_14 = arith.constant 3.125000e-02 : f32
      %20 = vector.broadcast %cst_14 : f32 to vector<1x128xf32>
      %21 = arith.mulf %19, %20 : vector<1x128xf32>
      %22 = arith.mulf %16, %16 : vector<1x128xf32>
      %23 = arith.subf %21, %22 : vector<1x128xf32>
      %cst_15 = arith.constant 0.000000e+00 : f32
      %24 = vector.broadcast %cst_15 : f32 to vector<1x128xf32>
      %25 = arith.maximumf %23, %24 : vector<1x128xf32>
      %cst_16 = arith.constant 9.99999974E-6 : f32
      %26 = vector.broadcast %cst_16 : f32 to vector<1x128xf32>
      %27 = arith.addf %25, %26 : vector<1x128xf32>
      %28 = math.rsqrt %27 : vector<1x128xf32>
      %c0_17 = arith.constant 0 : index
      %c0_18 = arith.constant 0 : index
      %29 = vector.load %arg4[%c0_17, %c0_18] : memref<1x128xf32, #tpu.memory_space<vmem>>, vector<1x128xf32>
      %30 = arith.mulf %28, %29 : vector<1x128xf32>
      %c0_19 = arith.constant 0 : index
      %c0_20 = arith.constant 0 : index
      %31 = vector.load %arg5[%c0_19, %c0_20] : memref<1x128xf32, #tpu.memory_space<vmem>>, vector<1x128xf32>
      %32 = arith.mulf %16, %30 : vector<1x128xf32>
      %33 = arith.subf %31, %32 : vector<1x128xf32>
      %34 = vector.broadcast %30 : vector<1x128xf32> to vector<32x128xf32>
      %35 = arith.mulf %12, %34 : vector<32x128xf32>
      %36 = vector.broadcast %33 : vector<1x128xf32> to vector<32x128xf32>
      %37 = arith.addf %35, %36 : vector<32x128xf32>
      %cst_21 = arith.constant 0.000000e+00 : f32
      %38 = vector.broadcast %cst_21 : f32 to vector<32x128xf32>
      %39 = arith.maximumf %37, %38 : vector<32x128xf32>
      %40 = arith.truncf %39 : vector<32x128xf32> to vector<32x128xbf16>
      %c0_22 = arith.constant 0 : index
      %c0_23 = arith.constant 0 : index
      %41 = vector.load %arg6[%c0_22, %c0_23] : memref<32x128xbf16, #tpu.memory_space<vmem>>, vector<32x128xbf16>
      tpu.vector_store %arg6[%c0_22, %c0_23], %40 {strides = array<i32>} : memref<32x128xbf16, #tpu.memory_space<vmem>>, vector<32x128xbf16>,
    } else {
    }
    return
  }
  func.func @transform_0(%arg0: i32, %arg1: i32) -> (i32, i32) {
    %c0_i32 = arith.constant 0 : i32
    %c0_i32_0 = arith.constant 0 : i32
    return %c0_i32, %arg1 : i32, i32
  }
  func.func @transform_1(%arg0: i32, %arg1: i32) -> (i32, i32) {
    %c0_i32 = arith.constant 0 : i32
    return %arg1, %arg0 : i32, i32
  }
  func.func @transform_2(%arg0: i32, %arg1: i32) -> (i32, i32) {
    %c0_i32 = arith.constant 0 : i32
    %c0_i32_0 = arith.constant 0 : i32
    return %c0_i32, %arg0 : i32, i32
  }
  func.func @transform_3(%arg0: i32, %arg1: i32) -> (i32, i32) {
    %c0_i32 = arith.constant 0 : i32
    %c0_i32_0 = arith.constant 0 : i32
    return %c0_i32, %arg0 : i32, i32
  }
  func.func @transform_4(%arg0: i32, %arg1: i32) -> (i32, i32) {
    %c0_i32 = arith.constant 0 : i32
    %c0_i32_0 = arith.constant 0 : i32
    return %c0_i32, %arg0 : i32, i32
  }
}

module attributes {stable_mosaic.version = 11 : i64} {
  func.func @_fused_matmul_bn_kernel(%arg0: i32, %arg1: i32, %arg2: memref<32x384xbf16, #tpu.memory_space<vmem>>, %arg3: memref<384x128xbf16, #tpu.memory_space<vmem>>, %arg4: memref<1x128xf32, #tpu.memory_space<vmem>>, %arg5: memref<1x128xf32, #tpu.memory_space<vmem>>, %arg6: memref<32x128xbf16, #tpu.memory_space<vmem>>, %arg7: memref<32x128xbf16, #tpu.memory_space<vmem>>, %arg8: memref<32x128xf32, #tpu.memory_space<vmem>>) attributes {dimension_semantics = [#tpu.dimension_semantics<parallel>, #tpu.dimension_semantics<arbitrary>], iteration_bounds = array<i64: 1, 3>, scalar_prefetch = 0 : i64, scratch_operands = 1 : i64, tpu.core_type = #tpu.core_type<tc>, window_params = [{transform_indices = @transform_0, window_bounds = array<i64: 32, 384>}, {transform_indices = @transform_1, window_bounds = array<i64: 384, 128>}, {transform_indices = @transform_2, window_bounds = array<i64: 1, 128>}, {transform_indices = @transform_3, window_bounds = array<i64: 1, 128>}, {transform_indices = @transform_4, window_bounds = array<i64: 32, 128>}, {transform_indices = @transform_5, window_bounds = array<i64: 32, 128>}]} {
    %c0_i32 = arith.constant 0 : i32
    %0 = arith.cmpi eq, %arg1, %c0_i32 : i32
    %1 = arith.extui %0 : i1 to i32
    %c0_i32_0 = arith.constant 0 : i32
    %2 = arith.cmpi ne, %1, %c0_i32_0 : i32
    scf.if %2 {
      %cst_9 = arith.constant 0.000000e+00 : f32
      %12 = vector.broadcast %cst_9 : f32 to vector<32x128xf32>
      %c0_10 = arith.constant 0 : index
      %c0_11 = arith.constant 0 : index
      %13 = vector.load %arg8[%c0_10, %c0_11] : memref<32x128xf32, #tpu.memory_space<vmem>>, vector<32x128xf32>
      tpu.vector_store %arg8[%c0_10, %c0_11], %12 {strides = array<i32>} : memref<32x128xf32, #tpu.memory_space<vmem>>, vector<32x128xf32>,
    } else {
    }
    %c0 = arith.constant 0 : index
    %c0_1 = arith.constant 0 : index
    %3 = vector.load %arg8[%c0, %c0_1] : memref<32x128xf32, #tpu.memory_space<vmem>>, vector<32x128xf32>
    %c0_2 = arith.constant 0 : index
    %c0_3 = arith.constant 0 : index
    %4 = vector.load %arg2[%c0_2, %c0_3] : memref<32x384xbf16, #tpu.memory_space<vmem>>, vector<32x384xbf16>
    %c0_4 = arith.constant 0 : index
    %c0_5 = arith.constant 0 : index
    %5 = vector.load %arg3[%c0_4, %c0_5] : memref<384x128xbf16, #tpu.memory_space<vmem>>, vector<384x128xbf16>
    %cst = arith.constant dense<0.000000e+00> : vector<32x128xf32>
    %6 = tpu.matmul %4, %5, %cst {dimension_numbers = #tpu.dot_dimension_numbers<[1], [0], [0], [1], [0, 0, 1, 1], [], []>} : vector<32x384xbf16>, vector<384x128xbf16>, vector<32x128xf32> -> vector<32x128xf32>
    %7 = arith.addf %3, %6 : vector<32x128xf32>
    %c0_6 = arith.constant 0 : index
    %c0_7 = arith.constant 0 : index
    %8 = vector.load %arg8[%c0_6, %c0_7] : memref<32x128xf32, #tpu.memory_space<vmem>>, vector<32x128xf32>
    tpu.vector_store %arg8[%c0_6, %c0_7], %7 {strides = array<i32>} : memref<32x128xf32, #tpu.memory_space<vmem>>, vector<32x128xf32>,
    %c2_i32 = arith.constant 2 : i32
    %9 = arith.cmpi eq, %arg1, %c2_i32 : i32
    %10 = arith.extui %9 : i1 to i32
    %c0_i32_8 = arith.constant 0 : i32
    %11 = arith.cmpi ne, %10, %c0_i32_8 : i32
    scf.if %11 {
      %c0_9 = arith.constant 0 : index
      %c0_10 = arith.constant 0 : index
      %12 = vector.load %arg8[%c0_9, %c0_10] : memref<32x128xf32, #tpu.memory_space<vmem>>, vector<32x128xf32>
      %cst_11 = arith.constant dense<0.000000e+00> : vector<128xf32>
      %13 = vector.multi_reduction <add>, %12, %cst_11 [0] : vector<32x128xf32> to vector<128xf32>
      %14 = vector.shape_cast %13 : vector<128xf32> to vector<1x128xf32>
      %cst_12 = arith.constant 3.125000e-02 : f32
      %15 = vector.broadcast %cst_12 : f32 to vector<1x128xf32>
      %16 = arith.mulf %14, %15 : vector<1x128xf32>
      %17 = arith.mulf %12, %12 : vector<32x128xf32>
      %cst_13 = arith.constant dense<0.000000e+00> : vector<128xf32>
      %18 = vector.multi_reduction <add>, %17, %cst_13 [0] : vector<32x128xf32> to vector<128xf32>
      %19 = vector.shape_cast %18 : vector<128xf32> to vector<1x128xf32>
      %cst_14 = arith.constant 3.125000e-02 : f32
      %20 = vector.broadcast %cst_14 : f32 to vector<1x128xf32>
      %21 = arith.mulf %19, %20 : vector<1x128xf32>
      %22 = arith.mulf %16, %16 : vector<1x128xf32>
      %23 = arith.subf %21, %22 : vector<1x128xf32>
      %cst_15 = arith.constant 0.000000e+00 : f32
      %24 = vector.broadcast %cst_15 : f32 to vector<1x128xf32>
      %25 = arith.maximumf %23, %24 : vector<1x128xf32>
      %cst_16 = arith.constant 9.99999974E-6 : f32
      %26 = vector.broadcast %cst_16 : f32 to vector<1x128xf32>
      %27 = arith.addf %25, %26 : vector<1x128xf32>
      %28 = math.rsqrt %27 : vector<1x128xf32>
      %c0_17 = arith.constant 0 : index
      %c0_18 = arith.constant 0 : index
      %29 = vector.load %arg4[%c0_17, %c0_18] : memref<1x128xf32, #tpu.memory_space<vmem>>, vector<1x128xf32>
      %30 = arith.mulf %28, %29 : vector<1x128xf32>
      %c0_19 = arith.constant 0 : index
      %c0_20 = arith.constant 0 : index
      %31 = vector.load %arg5[%c0_19, %c0_20] : memref<1x128xf32, #tpu.memory_space<vmem>>, vector<1x128xf32>
      %32 = arith.mulf %16, %30 : vector<1x128xf32>
      %33 = arith.subf %31, %32 : vector<1x128xf32>
      %34 = vector.broadcast %30 : vector<1x128xf32> to vector<32x128xf32>
      %35 = arith.mulf %12, %34 : vector<32x128xf32>
      %36 = vector.broadcast %33 : vector<1x128xf32> to vector<32x128xf32>
      %37 = arith.addf %35, %36 : vector<32x128xf32>
      %c0_21 = arith.constant 0 : index
      %c0_22 = arith.constant 0 : index
      %38 = vector.load %arg6[%c0_21, %c0_22] : memref<32x128xbf16, #tpu.memory_space<vmem>>, vector<32x128xbf16>
      %39 = arith.extf %38 : vector<32x128xbf16> to vector<32x128xf32>
      %40 = arith.addf %37, %39 : vector<32x128xf32>
      %cst_23 = arith.constant 0.000000e+00 : f32
      %41 = vector.broadcast %cst_23 : f32 to vector<32x128xf32>
      %42 = arith.maximumf %40, %41 : vector<32x128xf32>
      %43 = arith.truncf %42 : vector<32x128xf32> to vector<32x128xbf16>
      %c0_24 = arith.constant 0 : index
      %c0_25 = arith.constant 0 : index
      %44 = vector.load %arg7[%c0_24, %c0_25] : memref<32x128xbf16, #tpu.memory_space<vmem>>, vector<32x128xbf16>
      tpu.vector_store %arg7[%c0_24, %c0_25], %43 {strides = array<i32>} : memref<32x128xbf16, #tpu.memory_space<vmem>>, vector<32x128xbf16>,
    } else {
    }
    return
  }
  func.func @transform_0(%arg0: i32, %arg1: i32) -> (i32, i32) {
    %c0_i32 = arith.constant 0 : i32
    %c0_i32_0 = arith.constant 0 : i32
    return %c0_i32, %arg1 : i32, i32
  }
  func.func @transform_1(%arg0: i32, %arg1: i32) -> (i32, i32) {
    %c0_i32 = arith.constant 0 : i32
    return %arg1, %arg0 : i32, i32
  }
  func.func @transform_2(%arg0: i32, %arg1: i32) -> (i32, i32) {
    %c0_i32 = arith.constant 0 : i32
    %c0_i32_0 = arith.constant 0 : i32
    return %c0_i32, %arg0 : i32, i32
  }
  func.func @transform_3(%arg0: i32, %arg1: i32) -> (i32, i32) {
    %c0_i32 = arith.constant 0 : i32
    %c0_i32_0 = arith.constant 0 : i32
    return %c0_i32, %arg0 : i32, i32
  }
  func.func @transform_4(%arg0: i32, %arg1: i32) -> (i32, i32) {
    %c0_i32 = arith.constant 0 : i32
    %c0_i32_0 = arith.constant 0 : i32
    return %c0_i32, %arg0 : i32, i32
  }
  func.func @transform_5(%arg0: i32, %arg1: i32) -> (i32, i32) {
    %c0_i32 = arith.constant 0 : i32
    %c0_i32_0 = arith.constant 0 : i32
    return %c0_i32, %arg0 : i32, i32
  }
}

module attributes {stable_mosaic.version = 11 : i64} {
  func.func @_fused_matmul_bn_kernel(%arg0: i32, %arg1: i32, %arg2: memref<32x128xbf16, #tpu.memory_space<vmem>>, %arg3: memref<128x128xbf16, #tpu.memory_space<vmem>>, %arg4: memref<1x128xf32, #tpu.memory_space<vmem>>, %arg5: memref<1x128xf32, #tpu.memory_space<vmem>>, %arg6: memref<32x128xbf16, #tpu.memory_space<vmem>>, %arg7: memref<32x128xf32, #tpu.memory_space<vmem>>) attributes {dimension_semantics = [#tpu.dimension_semantics<parallel>, #tpu.dimension_semantics<arbitrary>], iteration_bounds = array<i64: 1, 1>, scalar_prefetch = 0 : i64, scratch_operands = 1 : i64, tpu.core_type = #tpu.core_type<tc>, window_params = [{transform_indices = @transform_0, window_bounds = array<i64: 32, 128>}, {transform_indices = @transform_1, window_bounds = array<i64: 128, 128>}, {transform_indices = @transform_2, window_bounds = array<i64: 1, 128>}, {transform_indices = @transform_3, window_bounds = array<i64: 1, 128>}, {transform_indices = @transform_4, window_bounds = array<i64: 32, 128>}]} {
    %c0_i32 = arith.constant 0 : i32
    %0 = arith.cmpi eq, %arg1, %c0_i32 : i32
    %1 = arith.extui %0 : i1 to i32
    %c0_i32_0 = arith.constant 0 : i32
    %2 = arith.cmpi ne, %1, %c0_i32_0 : i32
    scf.if %2 {
      %cst_10 = arith.constant 0.000000e+00 : f32
      %12 = vector.broadcast %cst_10 : f32 to vector<32x128xf32>
      %c0_11 = arith.constant 0 : index
      %c0_12 = arith.constant 0 : index
      %13 = vector.load %arg7[%c0_11, %c0_12] : memref<32x128xf32, #tpu.memory_space<vmem>>, vector<32x128xf32>
      tpu.vector_store %arg7[%c0_11, %c0_12], %12 {strides = array<i32>} : memref<32x128xf32, #tpu.memory_space<vmem>>, vector<32x128xf32>,
    } else {
    }
    %c0 = arith.constant 0 : index
    %c0_1 = arith.constant 0 : index
    %3 = vector.load %arg7[%c0, %c0_1] : memref<32x128xf32, #tpu.memory_space<vmem>>, vector<32x128xf32>
    %c0_2 = arith.constant 0 : index
    %c0_3 = arith.constant 0 : index
    %4 = vector.load %arg2[%c0_2, %c0_3] : memref<32x128xbf16, #tpu.memory_space<vmem>>, vector<32x128xbf16>
    %c0_4 = arith.constant 0 : index
    %c0_5 = arith.constant 0 : index
    %5 = vector.load %arg3[%c0_4, %c0_5] : memref<128x128xbf16, #tpu.memory_space<vmem>>, vector<128x128xbf16>
    %cst = arith.constant dense<0.000000e+00> : vector<32x128xf32>
    %6 = tpu.matmul %4, %5, %cst {dimension_numbers = #tpu.dot_dimension_numbers<[1], [0], [0], [1], [0, 0, 1, 1], [], []>} : vector<32x128xbf16>, vector<128x128xbf16>, vector<32x128xf32> -> vector<32x128xf32>
    %7 = arith.addf %3, %6 : vector<32x128xf32>
    %c0_6 = arith.constant 0 : index
    %c0_7 = arith.constant 0 : index
    %8 = vector.load %arg7[%c0_6, %c0_7] : memref<32x128xf32, #tpu.memory_space<vmem>>, vector<32x128xf32>
    tpu.vector_store %arg7[%c0_6, %c0_7], %7 {strides = array<i32>} : memref<32x128xf32, #tpu.memory_space<vmem>>, vector<32x128xf32>,
    %c0_i32_8 = arith.constant 0 : i32
    %9 = arith.cmpi eq, %arg1, %c0_i32_8 : i32
    %10 = arith.extui %9 : i1 to i32
    %c0_i32_9 = arith.constant 0 : i32
    %11 = arith.cmpi ne, %10, %c0_i32_9 : i32
    scf.if %11 {
      %c0_10 = arith.constant 0 : index
      %c0_11 = arith.constant 0 : index
      %12 = vector.load %arg7[%c0_10, %c0_11] : memref<32x128xf32, #tpu.memory_space<vmem>>, vector<32x128xf32>
      %cst_12 = arith.constant dense<0.000000e+00> : vector<128xf32>
      %13 = vector.multi_reduction <add>, %12, %cst_12 [0] : vector<32x128xf32> to vector<128xf32>
      %14 = vector.shape_cast %13 : vector<128xf32> to vector<1x128xf32>
      %cst_13 = arith.constant 3.125000e-02 : f32
      %15 = vector.broadcast %cst_13 : f32 to vector<1x128xf32>
      %16 = arith.mulf %14, %15 : vector<1x128xf32>
      %17 = arith.mulf %12, %12 : vector<32x128xf32>
      %cst_14 = arith.constant dense<0.000000e+00> : vector<128xf32>
      %18 = vector.multi_reduction <add>, %17, %cst_14 [0] : vector<32x128xf32> to vector<128xf32>
      %19 = vector.shape_cast %18 : vector<128xf32> to vector<1x128xf32>
      %cst_15 = arith.constant 3.125000e-02 : f32
      %20 = vector.broadcast %cst_15 : f32 to vector<1x128xf32>
      %21 = arith.mulf %19, %20 : vector<1x128xf32>
      %22 = arith.mulf %16, %16 : vector<1x128xf32>
      %23 = arith.subf %21, %22 : vector<1x128xf32>
      %cst_16 = arith.constant 0.000000e+00 : f32
      %24 = vector.broadcast %cst_16 : f32 to vector<1x128xf32>
      %25 = arith.maximumf %23, %24 : vector<1x128xf32>
      %cst_17 = arith.constant 9.99999974E-6 : f32
      %26 = vector.broadcast %cst_17 : f32 to vector<1x128xf32>
      %27 = arith.addf %25, %26 : vector<1x128xf32>
      %28 = math.rsqrt %27 : vector<1x128xf32>
      %c0_18 = arith.constant 0 : index
      %c0_19 = arith.constant 0 : index
      %29 = vector.load %arg4[%c0_18, %c0_19] : memref<1x128xf32, #tpu.memory_space<vmem>>, vector<1x128xf32>
      %30 = arith.mulf %28, %29 : vector<1x128xf32>
      %c0_20 = arith.constant 0 : index
      %c0_21 = arith.constant 0 : index
      %31 = vector.load %arg5[%c0_20, %c0_21] : memref<1x128xf32, #tpu.memory_space<vmem>>, vector<1x128xf32>
      %32 = arith.mulf %16, %30 : vector<1x128xf32>
      %33 = arith.subf %31, %32 : vector<1x128xf32>
      %34 = vector.broadcast %30 : vector<1x128xf32> to vector<32x128xf32>
      %35 = arith.mulf %12, %34 : vector<32x128xf32>
      %36 = vector.broadcast %33 : vector<1x128xf32> to vector<32x128xf32>
      %37 = arith.addf %35, %36 : vector<32x128xf32>
      %38 = arith.truncf %37 : vector<32x128xf32> to vector<32x128xbf16>
      %c0_22 = arith.constant 0 : index
      %c0_23 = arith.constant 0 : index
      %39 = vector.load %arg6[%c0_22, %c0_23] : memref<32x128xbf16, #tpu.memory_space<vmem>>, vector<32x128xbf16>
      tpu.vector_store %arg6[%c0_22, %c0_23], %38 {strides = array<i32>} : memref<32x128xbf16, #tpu.memory_space<vmem>>, vector<32x128xbf16>,
    } else {
    }
    return
  }
  func.func @transform_0(%arg0: i32, %arg1: i32) -> (i32, i32) {
    %c0_i32 = arith.constant 0 : i32
    %c0_i32_0 = arith.constant 0 : i32
    return %c0_i32, %arg1 : i32, i32
  }
  func.func @transform_1(%arg0: i32, %arg1: i32) -> (i32, i32) {
    %c0_i32 = arith.constant 0 : i32
    return %arg1, %arg0 : i32, i32
  }
  func.func @transform_2(%arg0: i32, %arg1: i32) -> (i32, i32) {
    %c0_i32 = arith.constant 0 : i32
    %c0_i32_0 = arith.constant 0 : i32
    return %c0_i32, %arg0 : i32, i32
  }
  func.func @transform_3(%arg0: i32, %arg1: i32) -> (i32, i32) {
    %c0_i32 = arith.constant 0 : i32
    %c0_i32_0 = arith.constant 0 : i32
    return %c0_i32, %arg0 : i32, i32
  }
  func.func @transform_4(%arg0: i32, %arg1: i32) -> (i32, i32) {
    %c0_i32 = arith.constant 0 : i32
    %c0_i32_0 = arith.constant 0 : i32
    return %c0_i32, %arg0 : i32, i32
  }
}

module attributes {stable_mosaic.version = 11 : i64} {
  func.func @_fused_matmul_bn_kernel(%arg0: i32, %arg1: i32, %arg2: memref<16x384xbf16, #tpu.memory_space<vmem>>, %arg3: memref<384x128xbf16, #tpu.memory_space<vmem>>, %arg4: memref<1x128xf32, #tpu.memory_space<vmem>>, %arg5: memref<1x128xf32, #tpu.memory_space<vmem>>, %arg6: memref<16x128xbf16, #tpu.memory_space<vmem>>, %arg7: memref<16x128xf32, #tpu.memory_space<vmem>>) attributes {dimension_semantics = [#tpu.dimension_semantics<parallel>, #tpu.dimension_semantics<arbitrary>], iteration_bounds = array<i64: 1, 3>, scalar_prefetch = 0 : i64, scratch_operands = 1 : i64, tpu.core_type = #tpu.core_type<tc>, window_params = [{transform_indices = @transform_0, window_bounds = array<i64: 16, 384>}, {transform_indices = @transform_1, window_bounds = array<i64: 384, 128>}, {transform_indices = @transform_2, window_bounds = array<i64: 1, 128>}, {transform_indices = @transform_3, window_bounds = array<i64: 1, 128>}, {transform_indices = @transform_4, window_bounds = array<i64: 16, 128>}]} {
    %c0_i32 = arith.constant 0 : i32
    %0 = arith.cmpi eq, %arg1, %c0_i32 : i32
    %1 = arith.extui %0 : i1 to i32
    %c0_i32_0 = arith.constant 0 : i32
    %2 = arith.cmpi ne, %1, %c0_i32_0 : i32
    scf.if %2 {
      %cst_9 = arith.constant 0.000000e+00 : f32
      %12 = vector.broadcast %cst_9 : f32 to vector<16x128xf32>
      %c0_10 = arith.constant 0 : index
      %c0_11 = arith.constant 0 : index
      %13 = vector.load %arg7[%c0_10, %c0_11] : memref<16x128xf32, #tpu.memory_space<vmem>>, vector<16x128xf32>
      tpu.vector_store %arg7[%c0_10, %c0_11], %12 {strides = array<i32>} : memref<16x128xf32, #tpu.memory_space<vmem>>, vector<16x128xf32>,
    } else {
    }
    %c0 = arith.constant 0 : index
    %c0_1 = arith.constant 0 : index
    %3 = vector.load %arg7[%c0, %c0_1] : memref<16x128xf32, #tpu.memory_space<vmem>>, vector<16x128xf32>
    %c0_2 = arith.constant 0 : index
    %c0_3 = arith.constant 0 : index
    %4 = vector.load %arg2[%c0_2, %c0_3] : memref<16x384xbf16, #tpu.memory_space<vmem>>, vector<16x384xbf16>
    %c0_4 = arith.constant 0 : index
    %c0_5 = arith.constant 0 : index
    %5 = vector.load %arg3[%c0_4, %c0_5] : memref<384x128xbf16, #tpu.memory_space<vmem>>, vector<384x128xbf16>
    %cst = arith.constant dense<0.000000e+00> : vector<16x128xf32>
    %6 = tpu.matmul %4, %5, %cst {dimension_numbers = #tpu.dot_dimension_numbers<[1], [0], [0], [1], [0, 0, 1, 1], [], []>} : vector<16x384xbf16>, vector<384x128xbf16>, vector<16x128xf32> -> vector<16x128xf32>
    %7 = arith.addf %3, %6 : vector<16x128xf32>
    %c0_6 = arith.constant 0 : index
    %c0_7 = arith.constant 0 : index
    %8 = vector.load %arg7[%c0_6, %c0_7] : memref<16x128xf32, #tpu.memory_space<vmem>>, vector<16x128xf32>
    tpu.vector_store %arg7[%c0_6, %c0_7], %7 {strides = array<i32>} : memref<16x128xf32, #tpu.memory_space<vmem>>, vector<16x128xf32>,
    %c2_i32 = arith.constant 2 : i32
    %9 = arith.cmpi eq, %arg1, %c2_i32 : i32
    %10 = arith.extui %9 : i1 to i32
    %c0_i32_8 = arith.constant 0 : i32
    %11 = arith.cmpi ne, %10, %c0_i32_8 : i32
    scf.if %11 {
      %c0_9 = arith.constant 0 : index
      %c0_10 = arith.constant 0 : index
      %12 = vector.load %arg7[%c0_9, %c0_10] : memref<16x128xf32, #tpu.memory_space<vmem>>, vector<16x128xf32>
      %cst_11 = arith.constant dense<0.000000e+00> : vector<128xf32>
      %13 = vector.multi_reduction <add>, %12, %cst_11 [0] : vector<16x128xf32> to vector<128xf32>
      %14 = vector.shape_cast %13 : vector<128xf32> to vector<1x128xf32>
      %cst_12 = arith.constant 1.250000e-01 : f32
      %15 = vector.broadcast %cst_12 : f32 to vector<1x128xf32>
      %16 = arith.mulf %14, %15 : vector<1x128xf32>
      %17 = arith.mulf %12, %12 : vector<16x128xf32>
      %cst_13 = arith.constant dense<0.000000e+00> : vector<128xf32>
      %18 = vector.multi_reduction <add>, %17, %cst_13 [0] : vector<16x128xf32> to vector<128xf32>
      %19 = vector.shape_cast %18 : vector<128xf32> to vector<1x128xf32>
      %cst_14 = arith.constant 1.250000e-01 : f32
      %20 = vector.broadcast %cst_14 : f32 to vector<1x128xf32>
      %21 = arith.mulf %19, %20 : vector<1x128xf32>
      %22 = arith.mulf %16, %16 : vector<1x128xf32>
      %23 = arith.subf %21, %22 : vector<1x128xf32>
      %cst_15 = arith.constant 0.000000e+00 : f32
      %24 = vector.broadcast %cst_15 : f32 to vector<1x128xf32>
      %25 = arith.maximumf %23, %24 : vector<1x128xf32>
      %cst_16 = arith.constant 9.99999974E-6 : f32
      %26 = vector.broadcast %cst_16 : f32 to vector<1x128xf32>
      %27 = arith.addf %25, %26 : vector<1x128xf32>
      %28 = math.rsqrt %27 : vector<1x128xf32>
      %c0_17 = arith.constant 0 : index
      %c0_18 = arith.constant 0 : index
      %29 = vector.load %arg4[%c0_17, %c0_18] : memref<1x128xf32, #tpu.memory_space<vmem>>, vector<1x128xf32>
      %30 = arith.mulf %28, %29 : vector<1x128xf32>
      %c0_19 = arith.constant 0 : index
      %c0_20 = arith.constant 0 : index
      %31 = vector.load %arg5[%c0_19, %c0_20] : memref<1x128xf32, #tpu.memory_space<vmem>>, vector<1x128xf32>
      %32 = arith.mulf %16, %30 : vector<1x128xf32>
      %33 = arith.subf %31, %32 : vector<1x128xf32>
      %34 = vector.broadcast %30 : vector<1x128xf32> to vector<16x128xf32>
      %35 = arith.mulf %12, %34 : vector<16x128xf32>
      %36 = vector.broadcast %33 : vector<1x128xf32> to vector<16x128xf32>
      %37 = arith.addf %35, %36 : vector<16x128xf32>
      %cst_21 = arith.constant 0.000000e+00 : f32
      %38 = vector.broadcast %cst_21 : f32 to vector<16x128xf32>
      %39 = arith.maximumf %37, %38 : vector<16x128xf32>
      %40 = arith.truncf %39 : vector<16x128xf32> to vector<16x128xbf16>
      %c0_22 = arith.constant 0 : index
      %c0_23 = arith.constant 0 : index
      %41 = vector.load %arg6[%c0_22, %c0_23] : memref<16x128xbf16, #tpu.memory_space<vmem>>, vector<16x128xbf16>
      tpu.vector_store %arg6[%c0_22, %c0_23], %40 {strides = array<i32>} : memref<16x128xbf16, #tpu.memory_space<vmem>>, vector<16x128xbf16>,
    } else {
    }
    return
  }
  func.func @transform_0(%arg0: i32, %arg1: i32) -> (i32, i32) {
    %c0_i32 = arith.constant 0 : i32
    %c0_i32_0 = arith.constant 0 : i32
    return %c0_i32, %arg1 : i32, i32
  }
  func.func @transform_1(%arg0: i32, %arg1: i32) -> (i32, i32) {
    %c0_i32 = arith.constant 0 : i32
    return %arg1, %arg0 : i32, i32
  }
  func.func @transform_2(%arg0: i32, %arg1: i32) -> (i32, i32) {
    %c0_i32 = arith.constant 0 : i32
    %c0_i32_0 = arith.constant 0 : i32
    return %c0_i32, %arg0 : i32, i32
  }
  func.func @transform_3(%arg0: i32, %arg1: i32) -> (i32, i32) {
    %c0_i32 = arith.constant 0 : i32
    %c0_i32_0 = arith.constant 0 : i32
    return %c0_i32, %arg0 : i32, i32
  }
  func.func @transform_4(%arg0: i32, %arg1: i32) -> (i32, i32) {
    %c0_i32 = arith.constant 0 : i32
    %c0_i32_0 = arith.constant 0 : i32
    return %c0_i32, %arg0 : i32, i32
  }
}

module attributes {stable_mosaic.version = 11 : i64} {
  func.func @_fused_matmul_bn_kernel(%arg0: i32, %arg1: i32, %arg2: memref<16x128xbf16, #tpu.memory_space<vmem>>, %arg3: memref<128x128xbf16, #tpu.memory_space<vmem>>, %arg4: memref<1x128xf32, #tpu.memory_space<vmem>>, %arg5: memref<1x128xf32, #tpu.memory_space<vmem>>, %arg6: memref<16x128xbf16, #tpu.memory_space<vmem>>, %arg7: memref<16x128xf32, #tpu.memory_space<vmem>>) attributes {dimension_semantics = [#tpu.dimension_semantics<parallel>, #tpu.dimension_semantics<arbitrary>], iteration_bounds = array<i64: 1, 1>, scalar_prefetch = 0 : i64, scratch_operands = 1 : i64, tpu.core_type = #tpu.core_type<tc>, window_params = [{transform_indices = @transform_0, window_bounds = array<i64: 16, 128>}, {transform_indices = @transform_1, window_bounds = array<i64: 128, 128>}, {transform_indices = @transform_2, window_bounds = array<i64: 1, 128>}, {transform_indices = @transform_3, window_bounds = array<i64: 1, 128>}, {transform_indices = @transform_4, window_bounds = array<i64: 16, 128>}]} {
    %c0_i32 = arith.constant 0 : i32
    %0 = arith.cmpi eq, %arg1, %c0_i32 : i32
    %1 = arith.extui %0 : i1 to i32
    %c0_i32_0 = arith.constant 0 : i32
    %2 = arith.cmpi ne, %1, %c0_i32_0 : i32
    scf.if %2 {
      %cst_10 = arith.constant 0.000000e+00 : f32
      %12 = vector.broadcast %cst_10 : f32 to vector<16x128xf32>
      %c0_11 = arith.constant 0 : index
      %c0_12 = arith.constant 0 : index
      %13 = vector.load %arg7[%c0_11, %c0_12] : memref<16x128xf32, #tpu.memory_space<vmem>>, vector<16x128xf32>
      tpu.vector_store %arg7[%c0_11, %c0_12], %12 {strides = array<i32>} : memref<16x128xf32, #tpu.memory_space<vmem>>, vector<16x128xf32>,
    } else {
    }
    %c0 = arith.constant 0 : index
    %c0_1 = arith.constant 0 : index
    %3 = vector.load %arg7[%c0, %c0_1] : memref<16x128xf32, #tpu.memory_space<vmem>>, vector<16x128xf32>
    %c0_2 = arith.constant 0 : index
    %c0_3 = arith.constant 0 : index
    %4 = vector.load %arg2[%c0_2, %c0_3] : memref<16x128xbf16, #tpu.memory_space<vmem>>, vector<16x128xbf16>
    %c0_4 = arith.constant 0 : index
    %c0_5 = arith.constant 0 : index
    %5 = vector.load %arg3[%c0_4, %c0_5] : memref<128x128xbf16, #tpu.memory_space<vmem>>, vector<128x128xbf16>
    %cst = arith.constant dense<0.000000e+00> : vector<16x128xf32>
    %6 = tpu.matmul %4, %5, %cst {dimension_numbers = #tpu.dot_dimension_numbers<[1], [0], [0], [1], [0, 0, 1, 1], [], []>} : vector<16x128xbf16>, vector<128x128xbf16>, vector<16x128xf32> -> vector<16x128xf32>
    %7 = arith.addf %3, %6 : vector<16x128xf32>
    %c0_6 = arith.constant 0 : index
    %c0_7 = arith.constant 0 : index
    %8 = vector.load %arg7[%c0_6, %c0_7] : memref<16x128xf32, #tpu.memory_space<vmem>>, vector<16x128xf32>
    tpu.vector_store %arg7[%c0_6, %c0_7], %7 {strides = array<i32>} : memref<16x128xf32, #tpu.memory_space<vmem>>, vector<16x128xf32>,
    %c0_i32_8 = arith.constant 0 : i32
    %9 = arith.cmpi eq, %arg1, %c0_i32_8 : i32
    %10 = arith.extui %9 : i1 to i32
    %c0_i32_9 = arith.constant 0 : i32
    %11 = arith.cmpi ne, %10, %c0_i32_9 : i32
    scf.if %11 {
      %c0_10 = arith.constant 0 : index
      %c0_11 = arith.constant 0 : index
      %12 = vector.load %arg7[%c0_10, %c0_11] : memref<16x128xf32, #tpu.memory_space<vmem>>, vector<16x128xf32>
      %cst_12 = arith.constant dense<0.000000e+00> : vector<128xf32>
      %13 = vector.multi_reduction <add>, %12, %cst_12 [0] : vector<16x128xf32> to vector<128xf32>
      %14 = vector.shape_cast %13 : vector<128xf32> to vector<1x128xf32>
      %cst_13 = arith.constant 1.250000e-01 : f32
      %15 = vector.broadcast %cst_13 : f32 to vector<1x128xf32>
      %16 = arith.mulf %14, %15 : vector<1x128xf32>
      %17 = arith.mulf %12, %12 : vector<16x128xf32>
      %cst_14 = arith.constant dense<0.000000e+00> : vector<128xf32>
      %18 = vector.multi_reduction <add>, %17, %cst_14 [0] : vector<16x128xf32> to vector<128xf32>
      %19 = vector.shape_cast %18 : vector<128xf32> to vector<1x128xf32>
      %cst_15 = arith.constant 1.250000e-01 : f32
      %20 = vector.broadcast %cst_15 : f32 to vector<1x128xf32>
      %21 = arith.mulf %19, %20 : vector<1x128xf32>
      %22 = arith.mulf %16, %16 : vector<1x128xf32>
      %23 = arith.subf %21, %22 : vector<1x128xf32>
      %cst_16 = arith.constant 0.000000e+00 : f32
      %24 = vector.broadcast %cst_16 : f32 to vector<1x128xf32>
      %25 = arith.maximumf %23, %24 : vector<1x128xf32>
      %cst_17 = arith.constant 9.99999974E-6 : f32
      %26 = vector.broadcast %cst_17 : f32 to vector<1x128xf32>
      %27 = arith.addf %25, %26 : vector<1x128xf32>
      %28 = math.rsqrt %27 : vector<1x128xf32>
      %c0_18 = arith.constant 0 : index
      %c0_19 = arith.constant 0 : index
      %29 = vector.load %arg4[%c0_18, %c0_19] : memref<1x128xf32, #tpu.memory_space<vmem>>, vector<1x128xf32>
      %30 = arith.mulf %28, %29 : vector<1x128xf32>
      %c0_20 = arith.constant 0 : index
      %c0_21 = arith.constant 0 : index
      %31 = vector.load %arg5[%c0_20, %c0_21] : memref<1x128xf32, #tpu.memory_space<vmem>>, vector<1x128xf32>
      %32 = arith.mulf %16, %30 : vector<1x128xf32>
      %33 = arith.subf %31, %32 : vector<1x128xf32>
      %34 = vector.broadcast %30 : vector<1x128xf32> to vector<16x128xf32>
      %35 = arith.mulf %12, %34 : vector<16x128xf32>
      %36 = vector.broadcast %33 : vector<1x128xf32> to vector<16x128xf32>
      %37 = arith.addf %35, %36 : vector<16x128xf32>
      %38 = arith.truncf %37 : vector<16x128xf32> to vector<16x128xbf16>
      %c0_22 = arith.constant 0 : index
      %c0_23 = arith.constant 0 : index
      %39 = vector.load %arg6[%c0_22, %c0_23] : memref<16x128xbf16, #tpu.memory_space<vmem>>, vector<16x128xbf16>
      tpu.vector_store %arg6[%c0_22, %c0_23], %38 {strides = array<i32>} : memref<16x128xbf16, #tpu.memory_space<vmem>>, vector<16x128xbf16>,
    } else {
    }
    return
  }
  func.func @transform_0(%arg0: i32, %arg1: i32) -> (i32, i32) {
    %c0_i32 = arith.constant 0 : i32
    %c0_i32_0 = arith.constant 0 : i32
    return %c0_i32, %arg1 : i32, i32
  }
  func.func @transform_1(%arg0: i32, %arg1: i32) -> (i32, i32) {
    %c0_i32 = arith.constant 0 : i32
    return %arg1, %arg0 : i32, i32
  }
  func.func @transform_2(%arg0: i32, %arg1: i32) -> (i32, i32) {
    %c0_i32 = arith.constant 0 : i32
    %c0_i32_0 = arith.constant 0 : i32
    return %c0_i32, %arg0 : i32, i32
  }
  func.func @transform_3(%arg0: i32, %arg1: i32) -> (i32, i32) {
    %c0_i32 = arith.constant 0 : i32
    %c0_i32_0 = arith.constant 0 : i32
    return %c0_i32, %arg0 : i32, i32
  }
  func.func @transform_4(%arg0: i32, %arg1: i32) -> (i32, i32) {
    %c0_i32 = arith.constant 0 : i32
    %c0_i32_0 = arith.constant 0 : i32
    return %c0_i32, %arg0 : i32, i32
  }
}

module attributes {stable_mosaic.version = 11 : i64} {
  func.func @_fused_matmul_bn_kernel(%arg0: i32, %arg1: i32, %arg2: memref<16x384xbf16, #tpu.memory_space<vmem>>, %arg3: memref<384x128xbf16, #tpu.memory_space<vmem>>, %arg4: memref<1x128xf32, #tpu.memory_space<vmem>>, %arg5: memref<1x128xf32, #tpu.memory_space<vmem>>, %arg6: memref<16x128xbf16, #tpu.memory_space<vmem>>, %arg7: memref<16x128xbf16, #tpu.memory_space<vmem>>, %arg8: memref<16x128xf32, #tpu.memory_space<vmem>>) attributes {dimension_semantics = [#tpu.dimension_semantics<parallel>, #tpu.dimension_semantics<arbitrary>], iteration_bounds = array<i64: 1, 3>, scalar_prefetch = 0 : i64, scratch_operands = 1 : i64, tpu.core_type = #tpu.core_type<tc>, window_params = [{transform_indices = @transform_0, window_bounds = array<i64: 16, 384>}, {transform_indices = @transform_1, window_bounds = array<i64: 384, 128>}, {transform_indices = @transform_2, window_bounds = array<i64: 1, 128>}, {transform_indices = @transform_3, window_bounds = array<i64: 1, 128>}, {transform_indices = @transform_4, window_bounds = array<i64: 16, 128>}, {transform_indices = @transform_5, window_bounds = array<i64: 16, 128>}]} {
    %c0_i32 = arith.constant 0 : i32
    %0 = arith.cmpi eq, %arg1, %c0_i32 : i32
    %1 = arith.extui %0 : i1 to i32
    %c0_i32_0 = arith.constant 0 : i32
    %2 = arith.cmpi ne, %1, %c0_i32_0 : i32
    scf.if %2 {
      %cst_9 = arith.constant 0.000000e+00 : f32
      %12 = vector.broadcast %cst_9 : f32 to vector<16x128xf32>
      %c0_10 = arith.constant 0 : index
      %c0_11 = arith.constant 0 : index
      %13 = vector.load %arg8[%c0_10, %c0_11] : memref<16x128xf32, #tpu.memory_space<vmem>>, vector<16x128xf32>
      tpu.vector_store %arg8[%c0_10, %c0_11], %12 {strides = array<i32>} : memref<16x128xf32, #tpu.memory_space<vmem>>, vector<16x128xf32>,
    } else {
    }
    %c0 = arith.constant 0 : index
    %c0_1 = arith.constant 0 : index
    %3 = vector.load %arg8[%c0, %c0_1] : memref<16x128xf32, #tpu.memory_space<vmem>>, vector<16x128xf32>
    %c0_2 = arith.constant 0 : index
    %c0_3 = arith.constant 0 : index
    %4 = vector.load %arg2[%c0_2, %c0_3] : memref<16x384xbf16, #tpu.memory_space<vmem>>, vector<16x384xbf16>
    %c0_4 = arith.constant 0 : index
    %c0_5 = arith.constant 0 : index
    %5 = vector.load %arg3[%c0_4, %c0_5] : memref<384x128xbf16, #tpu.memory_space<vmem>>, vector<384x128xbf16>
    %cst = arith.constant dense<0.000000e+00> : vector<16x128xf32>
    %6 = tpu.matmul %4, %5, %cst {dimension_numbers = #tpu.dot_dimension_numbers<[1], [0], [0], [1], [0, 0, 1, 1], [], []>} : vector<16x384xbf16>, vector<384x128xbf16>, vector<16x128xf32> -> vector<16x128xf32>
    %7 = arith.addf %3, %6 : vector<16x128xf32>
    %c0_6 = arith.constant 0 : index
    %c0_7 = arith.constant 0 : index
    %8 = vector.load %arg8[%c0_6, %c0_7] : memref<16x128xf32, #tpu.memory_space<vmem>>, vector<16x128xf32>
    tpu.vector_store %arg8[%c0_6, %c0_7], %7 {strides = array<i32>} : memref<16x128xf32, #tpu.memory_space<vmem>>, vector<16x128xf32>,
    %c2_i32 = arith.constant 2 : i32
    %9 = arith.cmpi eq, %arg1, %c2_i32 : i32
    %10 = arith.extui %9 : i1 to i32
    %c0_i32_8 = arith.constant 0 : i32
    %11 = arith.cmpi ne, %10, %c0_i32_8 : i32
    scf.if %11 {
      %c0_9 = arith.constant 0 : index
      %c0_10 = arith.constant 0 : index
      %12 = vector.load %arg8[%c0_9, %c0_10] : memref<16x128xf32, #tpu.memory_space<vmem>>, vector<16x128xf32>
      %cst_11 = arith.constant dense<0.000000e+00> : vector<128xf32>
      %13 = vector.multi_reduction <add>, %12, %cst_11 [0] : vector<16x128xf32> to vector<128xf32>
      %14 = vector.shape_cast %13 : vector<128xf32> to vector<1x128xf32>
      %cst_12 = arith.constant 1.250000e-01 : f32
      %15 = vector.broadcast %cst_12 : f32 to vector<1x128xf32>
      %16 = arith.mulf %14, %15 : vector<1x128xf32>
      %17 = arith.mulf %12, %12 : vector<16x128xf32>
      %cst_13 = arith.constant dense<0.000000e+00> : vector<128xf32>
      %18 = vector.multi_reduction <add>, %17, %cst_13 [0] : vector<16x128xf32> to vector<128xf32>
      %19 = vector.shape_cast %18 : vector<128xf32> to vector<1x128xf32>
      %cst_14 = arith.constant 1.250000e-01 : f32
      %20 = vector.broadcast %cst_14 : f32 to vector<1x128xf32>
      %21 = arith.mulf %19, %20 : vector<1x128xf32>
      %22 = arith.mulf %16, %16 : vector<1x128xf32>
      %23 = arith.subf %21, %22 : vector<1x128xf32>
      %cst_15 = arith.constant 0.000000e+00 : f32
      %24 = vector.broadcast %cst_15 : f32 to vector<1x128xf32>
      %25 = arith.maximumf %23, %24 : vector<1x128xf32>
      %cst_16 = arith.constant 9.99999974E-6 : f32
      %26 = vector.broadcast %cst_16 : f32 to vector<1x128xf32>
      %27 = arith.addf %25, %26 : vector<1x128xf32>
      %28 = math.rsqrt %27 : vector<1x128xf32>
      %c0_17 = arith.constant 0 : index
      %c0_18 = arith.constant 0 : index
      %29 = vector.load %arg4[%c0_17, %c0_18] : memref<1x128xf32, #tpu.memory_space<vmem>>, vector<1x128xf32>
      %30 = arith.mulf %28, %29 : vector<1x128xf32>
      %c0_19 = arith.constant 0 : index
      %c0_20 = arith.constant 0 : index
      %31 = vector.load %arg5[%c0_19, %c0_20] : memref<1x128xf32, #tpu.memory_space<vmem>>, vector<1x128xf32>
      %32 = arith.mulf %16, %30 : vector<1x128xf32>
      %33 = arith.subf %31, %32 : vector<1x128xf32>
      %34 = vector.broadcast %30 : vector<1x128xf32> to vector<16x128xf32>
      %35 = arith.mulf %12, %34 : vector<16x128xf32>
      %36 = vector.broadcast %33 : vector<1x128xf32> to vector<16x128xf32>
      %37 = arith.addf %35, %36 : vector<16x128xf32>
      %c0_21 = arith.constant 0 : index
      %c0_22 = arith.constant 0 : index
      %38 = vector.load %arg6[%c0_21, %c0_22] : memref<16x128xbf16, #tpu.memory_space<vmem>>, vector<16x128xbf16>
      %39 = arith.extf %38 : vector<16x128xbf16> to vector<16x128xf32>
      %40 = arith.addf %37, %39 : vector<16x128xf32>
      %cst_23 = arith.constant 0.000000e+00 : f32
      %41 = vector.broadcast %cst_23 : f32 to vector<16x128xf32>
      %42 = arith.maximumf %40, %41 : vector<16x128xf32>
      %43 = arith.truncf %42 : vector<16x128xf32> to vector<16x128xbf16>
      %c0_24 = arith.constant 0 : index
      %c0_25 = arith.constant 0 : index
      %44 = vector.load %arg7[%c0_24, %c0_25] : memref<16x128xbf16, #tpu.memory_space<vmem>>, vector<16x128xbf16>
      tpu.vector_store %arg7[%c0_24, %c0_25], %43 {strides = array<i32>} : memref<16x128xbf16, #tpu.memory_space<vmem>>, vector<16x128xbf16>,
    } else {
    }
    return
  }
  func.func @transform_0(%arg0: i32, %arg1: i32) -> (i32, i32) {
    %c0_i32 = arith.constant 0 : i32
    %c0_i32_0 = arith.constant 0 : i32
    return %c0_i32, %arg1 : i32, i32
  }
  func.func @transform_1(%arg0: i32, %arg1: i32) -> (i32, i32) {
    %c0_i32 = arith.constant 0 : i32
    return %arg1, %arg0 : i32, i32
  }
  func.func @transform_2(%arg0: i32, %arg1: i32) -> (i32, i32) {
    %c0_i32 = arith.constant 0 : i32
    %c0_i32_0 = arith.constant 0 : i32
    return %c0_i32, %arg0 : i32, i32
  }
  func.func @transform_3(%arg0: i32, %arg1: i32) -> (i32, i32) {
    %c0_i32 = arith.constant 0 : i32
    %c0_i32_0 = arith.constant 0 : i32
    return %c0_i32, %arg0 : i32, i32
  }
  func.func @transform_4(%arg0: i32, %arg1: i32) -> (i32, i32) {
    %c0_i32 = arith.constant 0 : i32
    %c0_i32_0 = arith.constant 0 : i32
    return %c0_i32, %arg0 : i32, i32
  }
  func.func @transform_5(%arg0: i32, %arg1: i32) -> (i32, i32) {
    %c0_i32 = arith.constant 0 : i32
    %c0_i32_0 = arith.constant 0 : i32
    return %c0_i32, %arg0 : i32, i32
  }
}

module attributes {stable_mosaic.version = 11 : i64} {
  func.func @_head_kernel(%arg0: memref<8x4x128xbf16, #tpu.memory_space<vmem>>, %arg1: memref<128x128xbf16, #tpu.memory_space<vmem>>, %arg2: memref<1x128xf32, #tpu.memory_space<vmem>>, %arg3: memref<8x128xf32, #tpu.memory_space<vmem>>) attributes {dimension_semantics = [], scalar_prefetch = 0 : i64, scratch_operands = 0 : i64, tpu.core_type = #tpu.core_type<tc>} {
    %c0 = arith.constant 0 : index
    %c0_0 = arith.constant 0 : index
    %c0_1 = arith.constant 0 : index
    %0 = vector.load %arg0[%c0, %c0_0, %c0_1] : memref<8x4x128xbf16, #tpu.memory_space<vmem>>, vector<8x4x128xbf16>
    %1 = arith.extf %0 : vector<8x4x128xbf16> to vector<8x4x128xf32>
    %cst = arith.constant dense<0.000000e+00> : vector<8x128xf32>
    %2 = vector.multi_reduction <add>, %1, %cst [1] : vector<8x4x128xf32> to vector<8x128xf32>
    %cst_2 = arith.constant 4.000000e+00 : f32
    %3 = vector.broadcast %cst_2 : f32 to vector<8x128xf32>
    %4 = arith.divf %2, %3 : vector<8x128xf32>
    %5 = arith.truncf %4 : vector<8x128xf32> to vector<8x128xbf16>
    %c0_3 = arith.constant 0 : index
    %c0_4 = arith.constant 0 : index
    %6 = vector.load %arg1[%c0_3, %c0_4] : memref<128x128xbf16, #tpu.memory_space<vmem>>, vector<128x128xbf16>
    %cst_5 = arith.constant dense<0.000000e+00> : vector<8x128xf32>
    %7 = tpu.matmul %5, %6, %cst_5 {dimension_numbers = #tpu.dot_dimension_numbers<[1], [0], [0], [1], [0, 0, 1, 1], [], []>} : vector<8x128xbf16>, vector<128x128xbf16>, vector<8x128xf32> -> vector<8x128xf32>
    %c0_6 = arith.constant 0 : index
    %c0_7 = arith.constant 0 : index
    %8 = vector.load %arg2[%c0_6, %c0_7] : memref<1x128xf32, #tpu.memory_space<vmem>>, vector<1x128xf32>
    %9 = vector.broadcast %8 : vector<1x128xf32> to vector<8x128xf32>
    %10 = arith.addf %7, %9 : vector<8x128xf32>
    %c0_8 = arith.constant 0 : index
    %c0_9 = arith.constant 0 : index
    %11 = vector.load %arg3[%c0_8, %c0_9] : memref<8x128xf32, #tpu.memory_space<vmem>>, vector<8x128xf32>
    tpu.vector_store %arg3[%c0_8, %c0_9], %10 {strides = array<i32>} : memref<8x128xf32, #tpu.memory_space<vmem>>, vector<8x128xf32>,
    return
  }
}

</mosaic_0001>

<bundles_post_ra>
// kernel: multihead_forward.27
= control target key start
LH: loop header
LB: loop body
LE: loop exit
PB: predicated region body
PF: predicated region fallthrough
CT: control target
= control target key end

     0   :  { %s1065_s15 = smov 0   ;;  %s1067_s16 = smov 0   ;;  %s1304_s0 = inlined_call_operand.vmem [shape: bf16[512,128], index: 0, kind: input, shape index: {}]   ;;  %s1305_s1 = inlined_call_operand.vmem [shape: f32[8,128], index: 1, kind: input, shape index: {}]   ;;  %s1306_s2 = inlined_call_operand.vmem [shape: f32[1,128], index: 2, kind: input, shape index: {}]   ;;  %s1307_s3 = inlined_call_operand.vmem [shape: f32[1,128], index: 3, kind: input, shape index: {}]   ;;  %s1308_s4 = inlined_call_operand.vmem [shape: bf16[512,128], index: 4, kind: output, shape index: {}]  }
   0x1   :  { %s1069_s17 = smov 0  }
   0x2 LB: > { %s26_s18 = sadd.s32 1, %s1034_s16  ;;  %p745_p0 = scmp.ge.s32.totalorder %s1038_s17, 1  ;;  %s1038_s17 = sphi %s1069_s17, %s14_s17   ;;  %s1034_s16 = sphi %s1067_s16, %s1310_s16   ;;  %s1030_s15 = sphi %s1065_s15, %s1309_s15  }
   0x3   : > { %p28_p1 = scmp.ge.s32.totalorder %s26_s18, 2  ;;  %p207_p2 = scmp.lt.s32.totalorder %s1038_s17, 3 }
   0x5   : > { %s1312_s18 = smov (%p28_p1, %s26_s18), 0  ;;  %p208_p3 = pnand %p745_p0, %p207_p2 }
   0x6   : > { %s746_s19 = sshll.u32 (!%p208_p3), %s1030_s15, 5  ;;  %v277_v0 = vld [vmem:[%s1305_s1] sm:$0x1] (!%p208_p3)  ;;  %v279_v1 = vld [vmem:[%s1305_s1 + $0x1] sm:$0x1] (!%p208_p3)  ;;  %v355_v8 = vlaneseq (!%p208_p3) }
   0x7   : > { %211 = sbr.rel (%p208_p3) target bundleno = 66 (0x42), region = 36  ;;  %p250_p4 = scmp.lt.s32.totalorder (!%p208_p3), %s746_s19, 63  ;;  %v278_v2 = vmul.f32 (!%p208_p3), 0.001953125, %v277_v0  ;;  %v280_v3 = vmul.f32 (!%p208_p3), 0.001953125, %v279_v1  ;;  %v286_v28 = vld [vmem:[%s1306_s2] sm:$0x1] (!%p208_p3) }
   0x8   : > { %v1099_v9 = vshrl.u32 (!%p208_p3), %v355_v8, 7  ;;  %v288_v52 = vld [vmem:[%s1307_s3] sm:$0x1] (!%p208_p3) }
   0x9   : > { %v281_v4 = vmul.f32 (!%p208_p3), %v278_v2, %v278_v2 }
   0xa   : > { %v357_v18 = vsub.s32 (!%p208_p3), 0, %v1099_v9 }
   0xb   : > { %v282_v5 = vsub.f32 (!%p208_p3), %v280_v3, %v281_v4 }
   0xd   : > { %v283_v6 = vmax.f32 (!%p208_p3), %v282_v5, 0.0 }
   0xe   : > { %s1314_s19 = smov (!%p250_p4, %s746_s19), 63 }
   0xf   : > { %s747_s24 = sshll.u32 %s1314_s19, 2  ;;  %v284_v7 = vadd.f32 1e-05, %v283_v6 }
  0x10   : > { %s1097_s27 = scalar_lea.vmem %s1304_s0, %s747_s24  ;;  %s1199_s8 = scalar_lea.vmem %s1308_s4, %s747_s24 }
  0x11   : > { %1014 = vrsqrt.f32 %v284_v7  ;;  %v817_v10 = vld [vmem:[%s1097_s27] sm:$0xff]   ;;  %v960_v11 = vld [vmem:[%s1097_s27 + $0x8] sm:$0xff]   ;;  %v961_v12 = vld [vmem:[%s1097_s27 + $0x10] sm:$0xff]  }
  0x12   : > { %v962_v13 = vld [vmem:[%s1097_s27 + $0x18] sm:$0xff]   ;;  %v1106_v14 = vld [vmem:[%s1097_s27 + $0x20] sm:$0xff]   ;;  %v1109_v15 = vld [vmem:[%s1097_s27 + $0x28] sm:$0xff]   ;;  %v818_v16 = vunpack.c.l.bf16 %v817_v10  ;;  %v819_v17 = vunpack.c.h.bf16 %v817_v10  ;;  %v822_v19 = vunpack.c.l.bf16 %v960_v11  ;;  %v823_v22 = vunpack.c.h.bf16 %v960_v11 }
  0x13   : > { %v965_v20 = vld [vmem:[%s1097_s27 + $0x30] sm:$0xff]   ;;  %v1114_v21 = vld [vmem:[%s1097_s27 + $0x38] sm:$0xff]   ;;  %v826_v23 = vunpack.c.l.bf16 %v961_v12  ;;  %v827_v24 = vunpack.c.h.bf16 %v961_v12  ;;  %v830_v25 = vunpack.c.l.bf16 %v962_v13  ;;  %v1117_v26 = vld [vmem:[%s1097_s27 + $0x40] sm:$0xff]   ;;  %v831_v29 = vunpack.c.h.bf16 %v962_v13 }
  0x14   : > { %v1120_v27 = vld [vmem:[%s1097_s27 + $0x48] sm:$0xff]   ;;  %v834_v30 = vunpack.c.l.bf16 %v1106_v14  ;;  %v835_v31 = vunpack.c.h.bf16 %v1106_v14  ;;  %v838_v32 = vunpack.c.l.bf16 %v1109_v15  ;;  %v1129_v33 = vld [vmem:[%s1097_s27 + $0x50] sm:$0xff]   ;;  %v839_v34 = vunpack.c.h.bf16 %v1109_v15  ;;  %v1134_v38 = vld [vmem:[%s1097_s27 + $0x58] sm:$0xff]  }
  0x15   : > { %v842_v35 = vunpack.c.l.bf16 %v965_v20  ;;  %v843_v36 = vunpack.c.h.bf16 %v965_v20  ;;  %v846_v37 = vunpack.c.l.bf16 %v1114_v21  ;;  %v1137_v39 = vld [vmem:[%s1097_s27 + $0x60] sm:$0xff]   ;;  %v847_v41 = vunpack.c.h.bf16 %v1114_v21  ;;  %v1144_v45 = vld [vmem:[%s1097_s27 + $0x68] sm:$0xff]   ;;  %v1150_v50 = vld [vmem:[%s1097_s27 + $0x70] sm:$0xff]  }
  0x16   : > { %v850_v42 = vunpack.c.l.bf16 %v1117_v26  ;;  %v851_v43 = vunpack.c.h.bf16 %v1117_v26  ;;  %v854_v44 = vunpack.c.l.bf16 %v1120_v27  ;;  %v855_v47 = vunpack.c.h.bf16 %v1120_v27  ;;  %v1153_v51 = vld [vmem:[%s1097_s27 + $0x78] sm:$0xff]  }
  0x17   : > { %v858_v48 = vunpack.c.l.bf16 %v1129_v33  ;;  %v859_v49 = vunpack.c.h.bf16 %v1129_v33  ;;  %v862_v53 = vunpack.c.l.bf16 %v1134_v38  ;;  %v863_v54 = vunpack.c.h.bf16 %v1134_v38 }
  0x18   : > { %v866_v55 = vunpack.c.l.bf16 %v1137_v39  ;;  %v867_v56 = vunpack.c.h.bf16 %v1137_v39  ;;  %v870_v59 = vunpack.c.l.bf16 %v1144_v45  ;;  %v871_v60 = vunpack.c.h.bf16 %v1144_v45 }
  0x19   : > { %v874_v61 = vunpack.c.l.bf16 %v1150_v50  ;;  %v875_v62 = vunpack.c.h.bf16 %v1150_v50  ;;  %v878_v63 = vunpack.c.l.bf16 %v1153_v51  ;;  %v879_v0 = vunpack.c.h.bf16 %v1153_v51 }
  0x1b   : > { %v1015_v40 = vpop.eup %1014 }
  0x1c   : > { %v287_v46 = vmul.f32 %v1015_v40, %v286_v28 }
  0x1e   : > { %v289_v57 = vmul.f32 %v287_v46, %v278_v2  ;;  %v1162_v58 = vrot.slane %v287_v46, %v357_v18 }
  0x20   : > { %v290_v1 = vsub.f32 %v288_v52, %v289_v57  ;;  %v359_v3 = vmul.f32 %v818_v16, %v1162_v58  ;;  %v360_v4 = vmul.f32 %v819_v17, %v1162_v58  ;;  %v361_v2 = vmul.f32 %v822_v19, %v1162_v58 }
  0x21   : > { %v362_v5 = vmul.f32 %v823_v22, %v1162_v58  ;;  %v363_v6 = vmul.f32 %v826_v23, %v1162_v58  ;;  %v364_v7 = vmul.f32 %v827_v24, %v1162_v58  ;;  %v365_v8 = vmul.f32 %v830_v25, %v1162_v58 }
  0x22   : > { %v1177_v9 = vrot.slane %v290_v1, %v357_v18  ;;  %v366_v10 = vmul.f32 %v831_v29, %v1162_v58  ;;  %v367_v11 = vmul.f32 %v834_v30, %v1162_v58  ;;  %v368_v12 = vmul.f32 %v835_v31, %v1162_v58 }
  0x23   : > { %v369_v13 = vmul.f32 %v838_v32, %v1162_v58  ;;  %v370_v14 = vmul.f32 %v839_v34, %v1162_v58  ;;  %v371_v15 = vmul.f32 %v842_v35, %v1162_v58  ;;  %v372_v16 = vmul.f32 %v843_v36, %v1162_v58 }
  0x24   : > { %v397_v17 = vadd.f32 %v1177_v9, %v359_v3  ;;  %v398_v18 = vadd.f32 %v1177_v9, %v360_v4  ;;  %v399_v19 = vadd.f32 %v1177_v9, %v361_v2  ;;  %v400_v20 = vadd.f32 %v1177_v9, %v362_v5 }
  0x25   : > { %v401_v22 = vadd.f32 %v1177_v9, %v363_v6  ;;  %v402_v23 = vadd.f32 %v1177_v9, %v364_v7  ;;  %v403_v24 = vadd.f32 %v1177_v9, %v365_v8  ;;  %v404_v25 = vadd.f32 %v1177_v9, %v366_v10 }
  0x26   : > { %v429_v28 = vmax.f32 %v397_v17, 0.0  ;;  %v430_v29 = vmax.f32 %v398_v18, 0.0  ;;  %v431_v30 = vmax.f32 %v399_v19, 0.0  ;;  %v432_v31 = vmax.f32 %v400_v20, 0.0 }
  0x27   : > { %v433_v32 = vmax.f32 %v401_v22, 0.0  ;;  %v434_v34 = vmax.f32 %v402_v23, 0.0  ;;  %v435_v35 = vmax.f32 %v403_v24, 0.0  ;;  %v436_v36 = vmax.f32 %v404_v25, 0.0 }
  0x28   : > { %v883_v40 = vpack.c.bf16 %v430_v29, %v429_v28  ;;  %v888_v46 = vpack.c.bf16 %v432_v31, %v431_v30  ;;  %v405_v52 = vadd.f32 %v1177_v9, %v367_v11  ;;  %v406_v57 = vadd.f32 %v1177_v9, %v368_v12 }
  0x29   : > { %v893_v1 = vpack.c.bf16 %v434_v34, %v433_v32  ;;  %v898_v3 = vpack.c.bf16 %v436_v36, %v435_v35  ;;  %v407_v4 = vadd.f32 %v1177_v9, %v369_v13  ;;  %v408_v2 = vadd.f32 %v1177_v9, %v370_v14 }
  0x2a   : > { %884 = vst [vmem:[%s1199_s8] sm:$0xff] %v883_v40   ;;  %975 = vst [vmem:[%s1199_s8 + $0x8] sm:$0xff] %v888_v46   ;;  %v437_v5 = vmax.f32 %v405_v52, 0.0  ;;  %v438_v6 = vmax.f32 %v406_v57, 0.0  ;;  %v409_v7 = vadd.f32 %v1177_v9, %v371_v15  ;;  %v410_v8 = vadd.f32 %v1177_v9, %v372_v16 }
  0x2b   : > { %976 = vst [vmem:[%s1199_s8 + $0x10] sm:$0xff] %v893_v1   ;;  %977 = vst [vmem:[%s1199_s8 + $0x18] sm:$0xff] %v898_v3   ;;  %v439_v10 = vmax.f32 %v407_v4, 0.0  ;;  %v440_v11 = vmax.f32 %v408_v2, 0.0  ;;  %v373_v12 = vmul.f32 %v846_v37, %v1162_v58  ;;  %v374_v13 = vmul.f32 %v847_v41, %v1162_v58 }
  0x2c   : > { %v903_v14 = vpack.c.bf16 %v438_v6, %v437_v5  ;;  %v441_v17 = vmax.f32 %v409_v7, 0.0  ;;  %v442_v18 = vmax.f32 %v410_v8, 0.0  ;;  %v375_v15 = vmul.f32 %v850_v42, %v1162_v58 }
  0x2d   : > { %v908_v16 = vpack.c.bf16 %v440_v11, %v439_v10  ;;  %v411_v19 = vadd.f32 %v1177_v9, %v373_v12  ;;  %v412_v20 = vadd.f32 %v1177_v9, %v374_v13  ;;  %v376_v37 = vmul.f32 %v851_v43, %v1162_v58 }
  0x2e   : > { %978 = vst [vmem:[%s1199_s8 + $0x20] sm:$0xff] %v903_v14   ;;  %v913_v21 = vpack.c.bf16 %v442_v18, %v441_v17  ;;  %v413_v41 = vadd.f32 %v1177_v9, %v375_v15  ;;  %v377_v22 = vmul.f32 %v854_v44, %v1162_v58  ;;  %v378_v42 = vmul.f32 %v855_v47, %v1162_v58 }
  0x2f   : > { %979 = vst [vmem:[%s1199_s8 + $0x28] sm:$0xff] %v908_v16   ;;  %v443_v23 = vmax.f32 %v411_v19, 0.0  ;;  %v444_v24 = vmax.f32 %v412_v20, 0.0  ;;  %v414_v25 = vadd.f32 %v1177_v9, %v376_v37  ;;  %v379_v26 = vmul.f32 %v858_v48, %v1162_v58 }
  0x30   : > { %980 = vst [vmem:[%s1199_s8 + $0x30] sm:$0xff] %v913_v21   ;;  %v445_v43 = vmax.f32 %v413_v41, 0.0  ;;  %v415_v28 = vadd.f32 %v1177_v9, %v377_v22  ;;  %v416_v44 = vadd.f32 %v1177_v9, %v378_v42  ;;  %v380_v27 = vmul.f32 %v859_v49, %v1162_v58 }
  0x31   : > { %v918_v47 = vpack.c.bf16 %v444_v24, %v443_v23  ;;  %v446_v29 = vmax.f32 %v414_v25, 0.0  ;;  %v417_v30 = vadd.f32 %v1177_v9, %v379_v26  ;;  %v381_v31 = vmul.f32 %v862_v53, %v1162_v58 }
  0x32   : > { %v447_v48 = vmax.f32 %v415_v28, 0.0  ;;  %v448_v32 = vmax.f32 %v416_v44, 0.0  ;;  %v418_v34 = vadd.f32 %v1177_v9, %v380_v27  ;;  %v382_v35 = vmul.f32 %v863_v54, %v1162_v58 }
  0x33   : > { %981 = vst [vmem:[%s1199_s8 + $0x38] sm:$0xff] %v918_v47   ;;  %v923_v33 = vpack.c.bf16 %v446_v29, %v445_v43  ;;  %v449_v49 = vmax.f32 %v417_v30, 0.0  ;;  %v419_v36 = vadd.f32 %v1177_v9, %v381_v31  ;;  %v383_v40 = vmul.f32 %v866_v55, %v1162_v58 }
  0x34   : > { %v928_v46 = vpack.c.bf16 %v448_v32, %v447_v48  ;;  %v450_v53 = vmax.f32 %v418_v34, 0.0  ;;  %v420_v52 = vadd.f32 %v1177_v9, %v382_v35  ;;  %v384_v38 = vmul.f32 %v867_v56, %v1162_v58 }
  0x35   : > { %982 = vst [vmem:[%s1199_s8 + $0x40] sm:$0xff] %v923_v33   ;;  %v451_v54 = vmax.f32 %v419_v36, 0.0  ;;  %v421_v57 = vadd.f32 %v1177_v9, %v383_v40  ;;  %v385_v1 = vmul.f32 %v870_v59, %v1162_v58  ;;  %v386_v55 = vmul.f32 %v871_v60, %v1162_v58 }
  0x36   : > { %983 = vst [vmem:[%s1199_s8 + $0x48] sm:$0xff] %v928_v46   ;;  %v933_v3 = vpack.c.bf16 %v450_v53, %v449_v49  ;;  %v452_v4 = vmax.f32 %v420_v52, 0.0  ;;  %v422_v39 = vadd.f32 %v1177_v9, %v384_v38  ;;  %v387_v56 = vmul.f32 %v874_v61, %v1162_v58 }
  0x37   : > { %v453_v2 = vmax.f32 %v421_v57, 0.0  ;;  %v423_v5 = vadd.f32 %v1177_v9, %v385_v1  ;;  %v424_v6 = vadd.f32 %v1177_v9, %v386_v55  ;;  %v388_v45 = vmul.f32 %v875_v62, %v1162_v58 }
  0x38   : > { %984 = vst [vmem:[%s1199_s8 + $0x50] sm:$0xff] %v933_v3   ;;  %v938_v59 = vpack.c.bf16 %v452_v4, %v451_v54  ;;  %v454_v60 = vmax.f32 %v422_v39, 0.0  ;;  %v425_v7 = vadd.f32 %v1177_v9, %v387_v56  ;;  %v389_v61 = vmul.f32 %v878_v63, %v1162_v58 }
  0x39   : > { %v455_v8 = vmax.f32 %v423_v5, 0.0  ;;  %v456_v10 = vmax.f32 %v424_v6, 0.0  ;;  %v426_v11 = vadd.f32 %v1177_v9, %v388_v45  ;;  %v390_v50 = vmul.f32 %v879_v0, %v1162_v58 }
  0x3a   : > { %985 = vst [vmem:[%s1199_s8 + $0x58] sm:$0xff] %v938_v59   ;;  %v943_v62 = vpack.c.bf16 %v454_v60, %v453_v2  ;;  %v457_v12 = vmax.f32 %v425_v7, 0.0  ;;  %v427_v13 = vadd.f32 %v1177_v9, %v389_v61 }
  0x3b   : > { %v948_v14 = vpack.c.bf16 %v456_v10, %v455_v8  ;;  %v458_v17 = vmax.f32 %v426_v11, 0.0  ;;  %v428_v18 = vadd.f32 %v1177_v9, %v390_v50 }
  0x3c   : > { %986 = vst [vmem:[%s1199_s8 + $0x60] sm:$0xff] %v943_v62   ;;  %v459_v63 = vmax.f32 %v427_v13, 0.0 }
  0x3d   : > { %987 = vst [vmem:[%s1199_s8 + $0x68] sm:$0xff] %v948_v14   ;;  %v953_v15 = vpack.c.bf16 %v458_v17, %v457_v12  ;;  %v460_v16 = vmax.f32 %v428_v18, 0.0 }
  0x3f   : > { %988 = vst [vmem:[%s1199_s8 + $0x70] sm:$0xff] %v953_v15   ;;  %v958_v19 = vpack.c.bf16 %v460_v16, %v459_v63 }
  0x41   : > { %989 = vst [vmem:[%s1199_s8 + $0x78] sm:$0xff] %v958_v19  }
  0x42 PF: > { %s14_s17 = sadd.s32 1, %s1038_s17   ;;  %s1309_s15 = smov %s1034_s16 }
  0x43   : > { %p11_p5 = scmp.ge.s32.totalorder %s14_s17, 4   ;;  %s1310_s16 = smov %s1312_s18 }
  0x45   :  { %13 = sbr.rel (!%p11_p5) target bundleno = 2 (0x2), region = 75 }

// kernel: multihead_forward.26
= control target key start
LH: loop header
LB: loop body
LE: loop exit
PB: predicated region body
PF: predicated region fallthrough
CT: control target
= control target key end

     0   :  { %s1567_s12 = smov 0   ;;  %s1569_s13 = smov 0   ;;  %s1765_s0 = inlined_call_operand.vmem [shape: bf16[512,128], index: 0, kind: input, shape index: {}]   ;;  %s1766_s1 = inlined_call_operand.vmem [shape: bf16[128,128], index: 1, kind: input, shape index: {}]   ;;  %s1767_s2 = inlined_call_operand.vmem [shape: bf16[512,128], index: 2, kind: output, shape index: {0}]   ;;  %s1768_s3 = inlined_call_operand.vmem [shape: f32[8,128], index: 3, kind: output, shape index: {1}]  }
   0x1   :  { %s1571_s14 = smov 0  }
   0x2 LB: > { %s29_s15 = sadd.s32 1, %s1541_s13  ;;  %p1194_p0 = scmp.ge.s32.totalorder %s1545_s14, 1  ;;  %s1545_s14 = sphi %s1571_s14, %s14_s14   ;;  %s1541_s13 = sphi %s1569_s13, %s1770_s13   ;;  %s1537_s12 = sphi %s1567_s12, %s1769_s12  }
   0x3   : > { %p31_p1 = scmp.ge.s32.totalorder %s29_s15, 2  ;;  %p183_p2 = scmp.lt.s32.totalorder %s1545_s14, 3 }
   0x5   : > { %s1772_s15 = smov (%p31_p1, %s29_s15), 0  ;;  %p184_p3 = pnand %p1194_p0, %p183_p2 }
   0x6   : > { %v1499_v0 = vld [vmem:[%s1766_s1] sm:$0xff] (!%p184_p3)   ;;  %s1195_s18 = sshll.u32 (!%p184_p3), %s1537_s12, 5  ;;  %v1500_v1 = vld [vmem:[%s1766_s1 + $0x8] sm:$0xff] (!%p184_p3)   ;;  %v1501_v2 = vld [vmem:[%s1766_s1 + $0x10] sm:$0xff] (!%p184_p3)   ;;  %p1255_p5 = scmp.ne.s32.totalorder (!%p184_p3), %s1537_s12, 0 }
   0x7   : > { %187 = sbr.rel (%p184_p3) target bundleno = 344 (0x158), region = 28  ;;  %p226_p4 = scmp.lt.s32.totalorder (!%p184_p3), %s1195_s18, 63  ;;  %1411 = vmatprep.subr.bf16.mxu0 (!%p184_p3), %v1499_v0  ;;  %1459 = vmatprep.subr.bf16.mxu1 (!%p184_p3), %v1499_v0  ;;  %v1502_v3 = vld [vmem:[%s1766_s1 + $0x18] sm:$0xff] (!%p184_p3)   ;;  %v1503_v5 = vld [vmem:[%s1766_s1 + $0x20] sm:$0xff] (!%p184_p3)   ;;  %v1504_v6 = vld [vmem:[%s1766_s1 + $0x28] sm:$0xff] (!%p184_p3)  }
   0x8   : > { %1412 = vmatpush3.bf16.msra.mxu0 (!%p184_p3), %v1499_v0  ;;  %1467 = vmatpush3.bf16.msra.mxu1 (!%p184_p3), %v1499_v0  ;;  %v1505_v8 = vld [vmem:[%s1766_s1 + $0x30] sm:$0xff] (!%p184_p3)   ;;  %v1506_v9 = vld [vmem:[%s1766_s1 + $0x38] sm:$0xff] (!%p184_p3)  }
   0x9   : > { %1413 = vmatprep.subr.bf16.mxu0 (!%p184_p3), %v1500_v1  ;;  %1460 = vmatprep.subr.bf16.mxu1 (!%p184_p3), %v1500_v1 }
   0xc   : > { %1414 = vmatpush3.bf16.msra.mxu0 (!%p184_p3), %v1500_v1  ;;  %1468 = vmatpush3.bf16.msra.mxu1 (!%p184_p3), %v1500_v1 }
   0xd   : > { %1415 = vmatprep.subr.bf16.mxu0 (!%p184_p3), %v1501_v2  ;;  %1461 = vmatprep.subr.bf16.mxu1 (!%p184_p3), %v1501_v2 }
   0xe   : > { %s1774_s18 = smov (!%p226_p4, %s1195_s18), 63 }
   0xf   : > { %s1196_s23 = sshll.u32 %s1774_s18, 2 }
  0x10   : > { %s1605_s26 = scalar_lea.vmem %s1765_s0, %s1196_s23  ;;  %1416 = vmatpush3.bf16.msra.mxu0 %v1501_v2  ;;  %1469 = vmatpush3.bf16.msra.mxu1 %v1501_v2  ;;  %s1647_s16 = scalar_lea.vmem %s1767_s2, %s1196_s23 }
  0x11   : > { %v1507_v4 = vld [vmem:[%s1605_s26] sm:$0xff]   ;;  %1417 = vmatprep.subr.bf16.mxu0 %v1502_v3  ;;  %1462 = vmatprep.subr.bf16.mxu1 %v1502_v3  ;;  %v1508_v10 = vld [vmem:[%s1605_s26 + $0x8] sm:$0xff]   ;;  %v1509_v12 = vld [vmem:[%s1605_s26 + $0x10] sm:$0xff]  }
  0x12   : > { %1427 = vmatprep.mubr.bf16.mxu0 %v1507_v4  ;;  %v1515_v7 = vld [vmem:[%s1605_s26 + $0x40] sm:$0xff]   ;;  %v1516_v11 = vld [vmem:[%s1605_s26 + $0x48] sm:$0xff]   ;;  %v1517_v13 = vld [vmem:[%s1605_s26 + $0x50] sm:$0xff]  }
  0x13   : > { %1443 = vmatprep.mubr.bf16.mxu1 %v1515_v7  ;;  %v1510_v14 = vld [vmem:[%s1605_s26 + $0x18] sm:$0xff]   ;;  %v1511_v16 = vld [vmem:[%s1605_s26 + $0x20] sm:$0xff]   ;;  %v1512_v18 = vld [vmem:[%s1605_s26 + $0x28] sm:$0xff]  }
  0x14   : > { %1418 = vmatpush3.bf16.msra.mxu0 %v1502_v3  ;;  %1470 = vmatpush3.bf16.msra.mxu1 %v1502_v3  ;;  %v1518_v15 = vld [vmem:[%s1605_s26 + $0x58] sm:$0xff]   ;;  %v1519_v17 = vld [vmem:[%s1605_s26 + $0x60] sm:$0xff]   ;;  %v1520_v19 = vld [vmem:[%s1605_s26 + $0x68] sm:$0xff]  }
  0x15   : > { %1419 = vmatprep.subr.bf16.mxu0 %v1503_v5  ;;  %1463 = vmatprep.subr.bf16.mxu1 %v1503_v5  ;;  %v1513_v20 = vld [vmem:[%s1605_s26 + $0x30] sm:$0xff]   ;;  %v1514_v22 = vld [vmem:[%s1605_s26 + $0x38] sm:$0xff]  }
  0x16   : > { %v1521_v21 = vld [vmem:[%s1605_s26 + $0x70] sm:$0xff]   ;;  %v1522_v23 = vld [vmem:[%s1605_s26 + $0x78] sm:$0xff]  }
  0x18   : > { %1420 = vmatpush3.bf16.msra.mxu0 %v1503_v5  ;;  %1471 = vmatpush3.bf16.msra.mxu1 %v1503_v5 }
  0x19   : > { %1421 = vmatprep.subr.bf16.mxu0 %v1504_v6  ;;  %1464 = vmatprep.subr.bf16.mxu1 %v1504_v6 }
  0x1c   : > { %1422 = vmatpush3.bf16.msra.mxu0 %v1504_v6  ;;  %1472 = vmatpush3.bf16.msra.mxu1 %v1504_v6 }
  0x1d   : > { %1423 = vmatprep.subr.bf16.mxu0 %v1505_v8  ;;  %1465 = vmatprep.subr.bf16.mxu1 %v1505_v8 }
  0x20   : > { %1424 = vmatpush3.bf16.msra.mxu0 %v1505_v8  ;;  %1473 = vmatpush3.bf16.msra.mxu1 %v1505_v8 }
  0x21   : > { %1425 = vmatprep.subr.bf16.mxu0 %v1506_v9  ;;  %1466 = vmatprep.subr.bf16.mxu1 %v1506_v9 }
  0x24   : > { %1426 = vmatpush3.bf16.msra.mxu0 %v1506_v9  ;;  %1474 = vmatpush3.bf16.msra.mxu1 %v1506_v9 }
  0x27   : > { %1428 = vmatmul.mubr.bf16.vlgmr.msra.gmra.mrb[0].mxu0 %v1508_v10  ;;  %1444 = vmatmul.mubr.bf16.vlgmr.msra.gmra.mrb[0].mxu1 %v1516_v11 }
  0x28   : > { %1431 = vmatprep.mubr.bf16.mxu0 %v1509_v12  ;;  %1447 = vmatprep.mubr.bf16.mxu1 %v1517_v13 }
  0x2f   : > { %1432 = vmatmul.mubr.bf16.gmra.mrb[4].mxu0 %v1510_v14  ;;  %1448 = vmatmul.mubr.bf16.gmra.mrb[4].mxu1 %v1518_v15 }
  0x30   : > { %1435 = vmatprep.mubr.bf16.mxu0 %v1511_v16  ;;  %1451 = vmatprep.mubr.bf16.mxu1 %v1519_v17 }
  0x37   : > { %1436 = vmatmul.mubr.bf16.gmra.mrb[8].mxu0 %v1512_v18  ;;  %1452 = vmatmul.mubr.bf16.gmra.mrb[8].mxu1 %v1520_v19 }
  0x38   : > { %1439 = vmatprep.mubr.bf16.mxu0 %v1513_v20  ;;  %1455 = vmatprep.mubr.bf16.mxu1 %v1521_v21 }
  0x3f   : > { %1440 = vmatmul.mubr.bf16.gmra.mrb[12].mxu0 %v1514_v22  ;;  %1456 = vmatmul.mubr.bf16.gmra.mrb[12].mxu1 %v1522_v23 }
  0xfa   : > { %v1429_v24 = vpop.f32.mrb[0].mxu0  ;;  %v1638_v25 = vpop.f32.mrb[0].mxu1 }
  0xfb   : > { %v551_v26 = vpop.f32.mrb[1].mxu0  ;;  %v1640_v27 = vpop.f32.mrb[1].mxu1  ;;  %v976_v39 = vmul.f32 %v1429_v24, %v1429_v24 }
  0xfc   : > { %v1430_v28 = vpop.f32.mrb[2].mxu0  ;;  %v1649_v29 = vpop.f32.mrb[2].mxu1  ;;  %v974_v30 = vmul.f32 %v551_v26, %v551_v26 }
  0xfd   : > { %v1300_v31 = vpack.c.bf16 %v1430_v28, %v1429_v24  ;;  %v554_v32 = vpop.f32.mrb[3].mxu0  ;;  %v1340_v33 = vpack.c.bf16 %v1649_v29, %v1638_v25  ;;  %v1653_v34 = vpop.f32.mrb[3].mxu1  ;;  %v977_v42 = vmul.f32 %v1430_v28, %v1430_v28 }
  0xfe   : > { %v1295_v35 = vpack.c.bf16 %v554_v32, %v551_v26  ;;  %v937_v36 = vadd.f32 %v554_v32, %v551_v26  ;;  %v975_v37 = vmul.f32 %v554_v32, %v554_v32  ;;  %v1335_v38 = vpack.c.bf16 %v1653_v34, %v1640_v27 }
  0xff   : > { %1372 = vst [vmem:[%s1647_s16 + $0x8] sm:$0xff] %v1300_v31   ;;  %1380 = vst [vmem:[%s1647_s16 + $0x48] sm:$0xff] %v1340_v33  }
 0x100   : > { %1296 = vst [vmem:[%s1647_s16] sm:$0xff] %v1295_v35   ;;  %v938_v40 = vadd.f32 %v1429_v24, %v937_v36  ;;  %v1006_v41 = vadd.f32 %v975_v37, %v974_v30  ;;  %1379 = vst [vmem:[%s1647_s16 + $0x40] sm:$0xff] %v1335_v38  }
 0x102   : > { %v1007_v43 = vadd.f32 %v1006_v41, %v976_v39  ;;  %v1433_v44 = vpop.f32.mrb[4].mxu0  ;;  %v939_v45 = vadd.f32 %v1430_v28, %v938_v40  ;;  %v1661_v46 = vpop.f32.mrb[4].mxu1 }
 0x103   : > { %v567_v47 = vpop.f32.mrb[5].mxu0  ;;  %v1663_v48 = vpop.f32.mrb[5].mxu1  ;;  %v980_v63 = vmul.f32 %v1433_v44, %v1433_v44 }
 0x104   : > { %v940_v49 = vadd.f32 %v939_v45, %v567_v47  ;;  %v978_v50 = vmul.f32 %v567_v47, %v567_v47  ;;  %v1008_v51 = vadd.f32 %v1007_v43, %v977_v42  ;;  %v1434_v52 = vpop.f32.mrb[6].mxu0  ;;  %v1665_v53 = vpop.f32.mrb[6].mxu1 }
 0x105   : > { %v1310_v54 = vpack.c.bf16 %v1434_v52, %v1433_v44  ;;  %v570_v55 = vpop.f32.mrb[7].mxu0  ;;  %v1350_v56 = vpack.c.bf16 %v1665_v53, %v1661_v46  ;;  %v1669_v57 = vpop.f32.mrb[7].mxu1  ;;  %v981_v2 = vmul.f32 %v1434_v52, %v1434_v52 }
 0x106   : > { %v1009_v58 = vadd.f32 %v1008_v51, %v978_v50  ;;  %v1305_v59 = vpack.c.bf16 %v570_v55, %v567_v47  ;;  %v941_v60 = vadd.f32 %v940_v49, %v570_v55  ;;  %v979_v61 = vmul.f32 %v570_v55, %v570_v55 }
 0x107   : > { %1374 = vst [vmem:[%s1647_s16 + $0x18] sm:$0xff] %v1310_v54   ;;  %1382 = vst [vmem:[%s1647_s16 + $0x58] sm:$0xff] %v1350_v56   ;;  %v1345_v62 = vpack.c.bf16 %v1669_v57, %v1663_v48 }
 0x108   : > { %1373 = vst [vmem:[%s1647_s16 + $0x10] sm:$0xff] %v1305_v59   ;;  %v942_v0 = vadd.f32 %v1433_v44, %v941_v60  ;;  %v1010_v1 = vadd.f32 %v1009_v58, %v979_v61  ;;  %v990_v61 = vmul.f32 %v1640_v27, %v1640_v27 }
 0x109   : > { %1381 = vst [vmem:[%s1647_s16 + $0x50] sm:$0xff] %v1345_v62  }
 0x10a   : > { %v1011_v3 = vadd.f32 %v1010_v1, %v980_v63  ;;  %v1437_v4 = vpop.f32.mrb[8].mxu0  ;;  %v943_v5 = vadd.f32 %v1434_v52, %v942_v0  ;;  %v1677_v6 = vpop.f32.mrb[8].mxu1 }
 0x10b   : > { %v583_v7 = vpop.f32.mrb[9].mxu0  ;;  %v1679_v8 = vpop.f32.mrb[9].mxu1  ;;  %v984_v23 = vmul.f32 %v1437_v4, %v1437_v4 }
 0x10c   : > { %v944_v9 = vadd.f32 %v943_v5, %v583_v7  ;;  %v982_v10 = vmul.f32 %v583_v7, %v583_v7  ;;  %v1012_v11 = vadd.f32 %v1011_v3, %v981_v2  ;;  %v1438_v12 = vpop.f32.mrb[10].mxu0  ;;  %v1681_v13 = vpop.f32.mrb[10].mxu1  ;;  %v991_v2 = vmul.f32 %v1653_v34, %v1653_v34 }
 0x10d   : > { %v1320_v14 = vpack.c.bf16 %v1438_v12, %v1437_v4  ;;  %v586_v15 = vpop.f32.mrb[11].mxu0  ;;  %v1360_v16 = vpack.c.bf16 %v1681_v13, %v1677_v6  ;;  %v1685_v17 = vpop.f32.mrb[11].mxu1  ;;  %v985_v28 = vmul.f32 %v1438_v12, %v1438_v12  ;;  %v992_v3 = vmul.f32 %v1638_v25, %v1638_v25 }
 0x10e   : > { %v1013_v18 = vadd.f32 %v1012_v11, %v982_v10  ;;  %v1315_v19 = vpack.c.bf16 %v586_v15, %v583_v7  ;;  %v945_v20 = vadd.f32 %v944_v9, %v586_v15  ;;  %v983_v21 = vmul.f32 %v586_v15, %v586_v15 }
 0x10f   : > { %1376 = vst [vmem:[%s1647_s16 + $0x28] sm:$0xff] %v1320_v14   ;;  %1384 = vst [vmem:[%s1647_s16 + $0x68] sm:$0xff] %v1360_v16   ;;  %v1355_v22 = vpack.c.bf16 %v1685_v17, %v1679_v8  ;;  %v993_v7 = vmul.f32 %v1649_v29, %v1649_v29  ;;  %v995_v15 = vmul.f32 %v1669_v57, %v1669_v57 }
 0x110   : > { %1375 = vst [vmem:[%s1647_s16 + $0x20] sm:$0xff] %v1315_v19   ;;  %v946_v24 = vadd.f32 %v1437_v4, %v945_v20  ;;  %v1014_v26 = vadd.f32 %v1013_v18, %v983_v21 }
 0x111   : > { %1383 = vst [vmem:[%s1647_s16 + $0x60] sm:$0xff] %v1355_v22  }
 0x112   : > { %v1015_v30 = vadd.f32 %v1014_v26, %v984_v23  ;;  %v1441_v31 = vpop.f32.mrb[12].mxu0  ;;  %v947_v32 = vadd.f32 %v1438_v12, %v946_v24  ;;  %v1693_v33 = vpop.f32.mrb[12].mxu1  ;;  %v999_v24 = vmul.f32 %v1685_v17, %v1685_v17 }
 0x113   : > { %v599_v35 = vpop.f32.mrb[13].mxu0  ;;  %v663_v36 = vpop.f32.mrb[13].mxu1  ;;  %v988_v54 = vmul.f32 %v1441_v31, %v1441_v31 }
 0x114   : > { %v948_v37 = vadd.f32 %v947_v32, %v599_v35  ;;  %v986_v38 = vmul.f32 %v599_v35, %v599_v35  ;;  %v1016_v39 = vadd.f32 %v1015_v30, %v985_v28  ;;  %v1442_v40 = vpop.f32.mrb[14].mxu0  ;;  %v1695_v41 = vpop.f32.mrb[14].mxu1 }
 0x115   : > { %v1330_v42 = vpack.c.bf16 %v1442_v40, %v1441_v31  ;;  %v602_v43 = vpop.f32.mrb[15].mxu0  ;;  %v1370_v44 = vpack.c.bf16 %v1695_v41, %v1693_v33  ;;  %v666_v45 = vpop.f32.mrb[15].mxu1  ;;  %v989_v58 = vmul.f32 %v1442_v40, %v1442_v40 }
 0x116   : > { %v1017_v47 = vadd.f32 %v1016_v39, %v986_v38  ;;  %v1325_v49 = vpack.c.bf16 %v602_v43, %v599_v35  ;;  %v949_v50 = vadd.f32 %v948_v37, %v602_v43  ;;  %v987_v51 = vmul.f32 %v602_v43, %v602_v43 }
 0x117   : > { %1378 = vst [vmem:[%s1647_s16 + $0x38] sm:$0xff] %v1330_v42   ;;  %1386 = vst [vmem:[%s1647_s16 + $0x78] sm:$0xff] %v1370_v44   ;;  %v1365_v52 = vpack.c.bf16 %v666_v45, %v663_v36  ;;  %v1003_v39 = vmul.f32 %v666_v45, %v666_v45 }
 0x118   : > { %1377 = vst [vmem:[%s1647_s16 + $0x30] sm:$0xff] %v1325_v49   ;;  %v950_v55 = vadd.f32 %v1441_v31, %v949_v50  ;;  %v1018_v56 = vadd.f32 %v1017_v47, %v987_v51  ;;  %v1043_v50 = vlaneseq }
 0x119   : > { %1385 = vst [vmem:[%s1647_s16 + $0x70] sm:$0xff] %v1365_v52  }
 0x11a   : > { %v1019_v59 = vadd.f32 %v1018_v56, %v988_v54  ;;  %v951_v60 = vadd.f32 %v1442_v40, %v950_v55  ;;  %v1044_v55 = vshrl.u32 %v1043_v50, 7 }
 0x11c   : > { %v952_v62 = vadd.f32 %v951_v60, %v1640_v27  ;;  %v1020_v63 = vadd.f32 %v1019_v59, %v989_v58  ;;  %v994_v27 = vmul.f32 %v1663_v48, %v1663_v48  ;;  %vm1045_vm0 = vcmp.eq.s32.totalorder %v1044_v55, 0 }
 0x11d   : > { %vm1047_vm1 = vcmp.eq.s32.totalorder %v1044_v55, 1 }
 0x11e   : > { %v1021_v0 = vadd.f32 %v1020_v63, %v990_v61  ;;  %v953_v1 = vadd.f32 %v952_v62, %v1653_v34 }
 0x120   : > { %v954_v4 = vadd.f32 %v1638_v25, %v953_v1  ;;  %v1022_v5 = vadd.f32 %v1021_v0, %v991_v2  ;;  %v996_v25 = vmul.f32 %v1661_v46, %v1661_v46 }
 0x122   : > { %v1023_v9 = vadd.f32 %v1022_v5, %v992_v3  ;;  %v955_v10 = vadd.f32 %v1649_v29, %v954_v4  ;;  %v997_v29 = vmul.f32 %v1665_v53, %v1665_v53 }
 0x124   : > { %v956_v11 = vadd.f32 %v955_v10, %v1663_v48  ;;  %v1024_v12 = vadd.f32 %v1023_v9, %v993_v7  ;;  %v998_v48 = vmul.f32 %v1679_v8, %v1679_v8 }
 0x126   : > { %v1025_v14 = vadd.f32 %v1024_v12, %v994_v27  ;;  %v957_v34 = vadd.f32 %v956_v11, %v1669_v57 }
 0x128   : > { %v958_v16 = vadd.f32 %v1661_v46, %v957_v34  ;;  %v1026_v18 = vadd.f32 %v1025_v14, %v995_v15  ;;  %v1000_v46 = vmul.f32 %v1677_v6, %v1677_v6 }
 0x12a   : > { %v1027_v19 = vadd.f32 %v1026_v18, %v996_v25  ;;  %v959_v20 = vadd.f32 %v1665_v53, %v958_v16  ;;  %v1001_v53 = vmul.f32 %v1681_v13, %v1681_v13 }
 0x12c   : > { %v960_v21 = vadd.f32 %v959_v20, %v1679_v8  ;;  %v1028_v22 = vadd.f32 %v1027_v19, %v997_v29  ;;  %v1002_v8 = vmul.f32 %v663_v36, %v663_v36 }
 0x12e   : > { %v1029_v23 = vadd.f32 %v1028_v22, %v998_v48  ;;  %v961_v57 = vadd.f32 %v960_v21, %v1685_v17  ;;  %v1004_v17 = vmul.f32 %v1693_v33, %v1693_v33 }
 0x130   : > { %v962_v26 = vadd.f32 %v1677_v6, %v961_v57  ;;  %v1030_v28 = vadd.f32 %v1029_v23, %v999_v24  ;;  %v1005_v6 = vmul.f32 %v1695_v41, %v1695_v41 }
 0x132   : > { %v1031_v30 = vadd.f32 %v1030_v28, %v1000_v46  ;;  %v963_v31 = vadd.f32 %v1681_v13, %v962_v26 }
 0x134   : > { %v964_v32 = vadd.f32 %v963_v31, %v663_v36  ;;  %v1032_v35 = vadd.f32 %v1031_v30, %v1001_v53 }
 0x136   : > { %v1033_v37 = vadd.f32 %v1032_v35, %v1002_v8  ;;  %v965_v38 = vadd.f32 %v964_v32, %v666_v45 }
 0x138   : > { %v966_v40 = vadd.f32 %v1693_v33, %v965_v38  ;;  %v1034_v42 = vadd.f32 %v1033_v37, %v1003_v39 }
 0x13a   : > { %v967_v43 = vadd.f32 %v1695_v41, %v966_v40  ;;  %v1035_v44 = vadd.f32 %v1034_v42, %v1004_v17 }
 0x13c   : > { %v968_v47 = vrot.slane %v967_v43, 4  ;;  %v1036_v13 = vadd.f32 %v1035_v44, %v1005_v6 }
 0x13e   : > { %v969_v49 = vadd.f32 %v968_v47, %v967_v43  ;;  %v1037_v36 = vrot.slane %v1036_v13, 4 }
 0x140   : > { %v970_v51 = vrot.slane %v969_v49, 2  ;;  %v1038_v52 = vadd.f32 %v1037_v36, %v1036_v13 }
 0x142   : > { %v971_v45 = vadd.f32 %v970_v51, %v969_v49  ;;  %v1039_v54 = vrot.slane %v1038_v52, 2 }
 0x144   : > { %v972_v56 = vrot.slane %v971_v45, 1  ;;  %v1040_v58 = vadd.f32 %v1039_v54, %v1038_v52 }
 0x145   : > { %1053 = sbr.rel (%p1255_p5) target bundleno = 334 (0x14e), region = 40 }
 0x146   : > { %v973_v33 = vadd.f32 %v972_v56, %v971_v45  ;;  %v1041_v59 = vrot.slane %v1040_v58, 1 }
 0x148   : > { %v1042_v60 = vadd.f32 %v1041_v59, %v1040_v58  ;;  %v1046_v61 = vsel %vm1045_vm0, %v973_v33, 0.0 }
 0x14a   : > { %v1048_v41 = vsel %vm1047_vm1, %v1042_v60, 0.0 }
 0x14b   : > { %v1049_v62 = vadd.f32 %v1048_v41, %v1046_v61 }
 0x14d   : > { %1054 = vst [vmem:[%s1768_s3] sm:$0xff] %v1049_v62 }
 0x14e PF: > { %p1256_p6 = scmp.le.s32.totalorder %s1537_s12, 0 }
 0x150   : > { %1058 = sbr.rel (%p1256_p6) target bundleno = 344 (0x158), region = 44 }
 0x154   : > { %v1059_v63 = vld [vmem:[%s1768_s3] sm:$0xff] (!%p1256_p6) }
 0x155   : > { %v1060_v0 = vadd.f32 (!%p1256_p6), %v1059_v63, %v1049_v62 }
 0x157   : > { %1061 = vst [vmem:[%s1768_s3] sm:$0xff] %v1060_v0 }
 0x158 PF: > { %s14_s14 = sadd.s32 1, %s1545_s14   ;;  %s1769_s12 = smov %s1541_s13 }
 0x159   : > { %p11_p7 = scmp.ge.s32.totalorder %s14_s14, 4   ;;  %s1770_s13 = smov %s1772_s15 }
 0x15b   :  { %13 = sbr.rel (!%p11_p7) target bundleno = 2 (0x2), region = 89 }

// kernel: multihead_forward.31
= control target key start
LH: loop header
LB: loop body
LE: loop exit
PB: predicated region body
PF: predicated region fallthrough
CT: control target
= control target key end

     0   :  { %s1322_s18 = smov 0   ;;  %s1324_s19 = smov 0   ;;  %s1765_s0 = inlined_call_operand.vmem [shape: bf16[512,128], index: 0, kind: input, shape index: {}]   ;;  %s1766_s1 = inlined_call_operand.vmem [shape: f32[8,128], index: 1, kind: input, shape index: {}]   ;;  %s1767_s2 = inlined_call_operand.vmem [shape: f32[1,128], index: 2, kind: input, shape index: {}]   ;;  %s1768_s3 = inlined_call_operand.vmem [shape: f32[1,128], index: 3, kind: input, shape index: {}]   ;;  %s1769_s4 = inlined_call_operand.vmem [shape: bf16[512,128], index: 4, kind: input, shape index: {}]   ;;  %s1770_s5 = inlined_call_operand.vmem [shape: bf16[512,128], index: 5, kind: output, shape index: {}]  }
   0x1   :  { %s1326_s20 = smov 0  }
   0x2 LB: > { %s27_s21 = sadd.s32 1, %s1286_s19  ;;  %p916_p0 = scmp.ge.s32.totalorder %s1290_s20, 1  ;;  %s1290_s20 = sphi %s1326_s20, %s15_s20   ;;  %s1286_s19 = sphi %s1324_s19, %s1814_s19   ;;  %s1282_s18 = sphi %s1322_s18, %s1813_s18  }
   0x3   : > { %p29_p1 = scmp.ge.s32.totalorder %s27_s21, 2  ;;  %p248_p2 = scmp.lt.s32.totalorder %s1290_s20, 3 }
   0x5   : > { %s1816_s21 = smov (%p29_p1, %s27_s21), 0  ;;  %p249_p3 = pnand %p916_p0, %p248_p2 }
   0x6   : > { %s917_s22 = sshll.u32 (!%p249_p3), %s1282_s18, 5  ;;  %v337_v0 = vld [vmem:[%s1766_s1] sm:$0x1] (!%p249_p3)  ;;  %v339_v1 = vld [vmem:[%s1766_s1 + $0x1] sm:$0x1] (!%p249_p3)  ;;  %v415_v2 = vlaneseq (!%p249_p3) }
   0x7   : > { %252 = sbr.rel (%p249_p3) target bundleno = 86 (0x56), region = 40  ;;  %p301_p4 = scmp.lt.s32.totalorder (!%p249_p3), %s917_s22, 63  ;;  %v1346_v3 = vmul.f32 (!%p249_p3), 0.001953125, %v337_v0  ;;  %v340_v4 = vmul.f32 (!%p249_p3), 0.001953125, %v339_v1 }
   0x8   : > { %v1350_v6 = vshrl.u32 (!%p249_p3), %v415_v2, 7 }
   0x9   : > { %v341_v5 = vmul.f32 (!%p249_p3), %v1346_v3, %v1346_v3 }
   0xa   : > { %v417_v13 = vsub.s32 (!%p249_p3), 0, %v1350_v6 }
   0xb   : > { %v342_v7 = vsub.f32 (!%p249_p3), %v340_v4, %v341_v5  ;;  %v346_v4 = vld [vmem:[%s1767_s2] sm:$0x1] (!%p249_p3) }
   0xd   : > { %v343_v8 = vmax.f32 (!%p249_p3), %v342_v7, 0.0 }
   0xe   : > { %s1818_s22 = smov (!%p301_p4, %s917_s22), 63 }
   0xf   : > { %s1352_s27 = sshll.u32 %s1818_s22, 2  ;;  %v344_v17 = vadd.f32 1e-05, %v343_v8 }
  0x10   : > { %s1358_s30 = scalar_lea.vmem %s1765_s0, %s1352_s27  ;;  %s1364_s8 = scalar_lea.vmem %s1769_s4, %s1352_s27 }
  0x11   : > { %v1367_v9 = vld [vmem:[%s1358_s30] sm:$0xff]   ;;  %v1373_v11 = vld [vmem:[%s1358_s30 + $0x8] sm:$0xff]   ;;  %v1381_v15 = vld [vmem:[%s1358_s30 + $0x10] sm:$0xff]   ;;  %1266 = vrsqrt.f32 %v344_v17  ;;  %s1612_s15 = scalar_lea.vmem %s1770_s5, %s1352_s27 }
  0x12   : > { %v1370_v10 = vld [vmem:[%s1364_s8] sm:$0xff]   ;;  %v991_v12 = vunpack.c.l.bf16 %v1367_v9  ;;  %v1378_v14 = vld [vmem:[%s1364_s8 + $0x8] sm:$0xff]   ;;  %v1384_v16 = vld [vmem:[%s1364_s8 + $0x10] sm:$0xff]   ;;  %v992_v18 = vunpack.c.h.bf16 %v1367_v9  ;;  %v995_v23 = vunpack.c.l.bf16 %v1373_v11  ;;  %v996_v24 = vunpack.c.h.bf16 %v1373_v11 }
  0x13   : > { %v1055_v19 = vunpack.c.l.bf16 %v1370_v10  ;;  %v1056_v20 = vunpack.c.h.bf16 %v1370_v10  ;;  %v1390_v21 = vld [vmem:[%s1358_s30 + $0x18] sm:$0xff]   ;;  %v1059_v25 = vunpack.c.l.bf16 %v1378_v14  ;;  %v1400_v27 = vld [vmem:[%s1358_s30 + $0x20] sm:$0xff]   ;;  %v999_v29 = vunpack.c.l.bf16 %v1381_v15  ;;  %v1409_v32 = vld [vmem:[%s1358_s30 + $0x28] sm:$0xff]  }
  0x14   : > { %v1393_v22 = vld [vmem:[%s1364_s8 + $0x18] sm:$0xff]   ;;  %v1403_v28 = vld [vmem:[%s1364_s8 + $0x20] sm:$0xff]   ;;  %v1000_v30 = vunpack.c.h.bf16 %v1381_v15  ;;  %v1412_v33 = vld [vmem:[%s1364_s8 + $0x28] sm:$0xff]   ;;  %v1003_v35 = vunpack.c.l.bf16 %v1390_v21  ;;  %v1004_v36 = vunpack.c.h.bf16 %v1390_v21  ;;  %v1007_v41 = vunpack.c.l.bf16 %v1400_v27 }
  0x15   : > { %v1419_v38 = vld [vmem:[%s1358_s30 + $0x30] sm:$0xff]   ;;  %v1008_v42 = vunpack.c.h.bf16 %v1400_v27  ;;  %v1429_v44 = vld [vmem:[%s1358_s30 + $0x38] sm:$0xff]   ;;  %v1011_v47 = vunpack.c.l.bf16 %v1409_v32  ;;  %v1012_v48 = vunpack.c.h.bf16 %v1409_v32  ;;  %v1439_v50 = vld [vmem:[%s1358_s30 + $0x40] sm:$0xff]  }
  0x16   : > { %v1422_v39 = vld [vmem:[%s1364_s8 + $0x30] sm:$0xff]   ;;  %v1432_v45 = vld [vmem:[%s1364_s8 + $0x38] sm:$0xff]   ;;  %v1442_v51 = vld [vmem:[%s1364_s8 + $0x40] sm:$0xff]   ;;  %v1015_v53 = vunpack.c.l.bf16 %v1419_v38  ;;  %v1016_v54 = vunpack.c.h.bf16 %v1419_v38 }
  0x17   : > { %v1449_v56 = vld [vmem:[%s1358_s30 + $0x48] sm:$0xff]   ;;  %v1459_v62 = vld [vmem:[%s1358_s30 + $0x50] sm:$0xff]   ;;  %v1469_v5 = vld [vmem:[%s1358_s30 + $0x58] sm:$0xff]  }
  0x18   : > { %v1452_v57 = vld [vmem:[%s1364_s8 + $0x48] sm:$0xff]   ;;  %v1462_v63 = vld [vmem:[%s1364_s8 + $0x50] sm:$0xff]   ;;  %v1472_v7 = vld [vmem:[%s1364_s8 + $0x58] sm:$0xff]  }
  0x19   : > { %v1479_v1 = vld [vmem:[%s1358_s30 + $0x60] sm:$0xff]   ;;  %v1492_v61 = vld [vmem:[%s1358_s30 + $0x68] sm:$0xff]   ;;  %v1502_v49 = vld [vmem:[%s1358_s30 + $0x70] sm:$0xff]  }
  0x1a   : > { %v1482_v58 = vld [vmem:[%s1364_s8 + $0x60] sm:$0xff]   ;;  %v1499_v2 = vld [vmem:[%s1364_s8 + $0x68] sm:$0xff]   ;;  %v1509_v43 = vld [vmem:[%s1364_s8 + $0x70] sm:$0xff]  }
  0x1b   : > { %v1267_v8 = vpop.eup %1266  ;;  %v1515_v37 = vld [vmem:[%s1358_s30 + $0x78] sm:$0xff]   ;;  %v348_v17 = vld [vmem:[%s1768_s3] sm:$0x1]  ;;  %v1111_v52 = vunpack.c.l.bf16 %v1509_v43 }
  0x1c   : > { %v347_v60 = vmul.f32 %v1267_v8, %v346_v4  ;;  %v1518_v34 = vld [vmem:[%s1364_s8 + $0x78] sm:$0xff]   ;;  %v1048_v8 = vunpack.c.h.bf16 %v1502_v49  ;;  %v1051_v31 = vunpack.c.l.bf16 %v1515_v37 }
  0x1d   : > { %v1115_v0 = vunpack.c.l.bf16 %v1518_v34  ;;  %v1116_v4 = vunpack.c.h.bf16 %v1518_v34 }
  0x1e   : > { %v349_v59 = vmul.f32 %v347_v60, %v1346_v3  ;;  %v1530_v40 = vrot.slane %v347_v60, %v417_v13 }
  0x20   : > { %v350_v26 = vsub.f32 %v348_v17, %v349_v59  ;;  %v419_v3 = vmul.f32 %v991_v12, %v1530_v40  ;;  %v420_v60 = vmul.f32 %v992_v18, %v1530_v40  ;;  %v421_v55 = vmul.f32 %v995_v23, %v1530_v40 }
  0x21   : > { %v422_v46 = vmul.f32 %v996_v24, %v1530_v40  ;;  %v423_v59 = vmul.f32 %v999_v29, %v1530_v40  ;;  %v424_v12 = vmul.f32 %v1000_v30, %v1530_v40  ;;  %v425_v9 = vmul.f32 %v1003_v35, %v1530_v40 }
  0x22   : > { %v1561_v18 = vrot.slane %v350_v26, %v417_v13  ;;  %v426_v11 = vmul.f32 %v1004_v36, %v1530_v40  ;;  %v427_v23 = vmul.f32 %v1007_v41, %v1530_v40  ;;  %v428_v15 = vmul.f32 %v1008_v42, %v1530_v40 }
  0x23   : > { %v429_v24 = vmul.f32 %v1011_v47, %v1530_v40  ;;  %v430_v6 = vmul.f32 %v1012_v48, %v1530_v40  ;;  %v431_v13 = vmul.f32 %v1015_v53, %v1530_v40  ;;  %v432_v21 = vmul.f32 %v1016_v54, %v1530_v40 }
  0x24   : > { %v457_v26 = vadd.f32 %v1561_v18, %v419_v3  ;;  %v458_v27 = vadd.f32 %v1561_v18, %v420_v60  ;;  %v459_v29 = vadd.f32 %v1561_v18, %v421_v55  ;;  %v460_v30 = vadd.f32 %v1561_v18, %v422_v46 }
  0x25   : > { %v461_v35 = vadd.f32 %v1561_v18, %v423_v59  ;;  %v462_v32 = vadd.f32 %v1561_v18, %v424_v12  ;;  %v463_v36 = vadd.f32 %v1561_v18, %v425_v9  ;;  %v464_v41 = vadd.f32 %v1561_v18, %v426_v11 }
  0x26   : > { %v553_v38 = vadd.f32 %v1055_v19, %v457_v26  ;;  %v554_v42 = vadd.f32 %v1056_v20, %v458_v27  ;;  %v555_v47 = vadd.f32 %v1059_v25, %v459_v29  ;;  %v1771_v46 = vunpack.c.h.bf16 %v1378_v14 }
  0x27   : > { %v1772_v53 = vunpack.c.l.bf16 %v1384_v16  ;;  %v1773_v55 = vunpack.c.h.bf16 %v1384_v16  ;;  %v1774_v3 = vunpack.c.l.bf16 %v1393_v22  ;;  %v1775_v19 = vunpack.c.h.bf16 %v1393_v22 }
  0x28   : > { %v556_v48 = vadd.f32 %v1771_v46, %v460_v30  ;;  %v585_v10 = vmax.f32 %v553_v38, 0.0  ;;  %v586_v20 = vmax.f32 %v554_v42, 0.0  ;;  %v587_v12 = vmax.f32 %v555_v47, 0.0 }
  0x29   : > { %v557_v54 = vadd.f32 %v1772_v53, %v461_v35  ;;  %v558_v17 = vadd.f32 %v1773_v55, %v462_v32  ;;  %v559_v60 = vadd.f32 %v1774_v3, %v463_v36  ;;  %v560_v59 = vadd.f32 %v1775_v19, %v464_v41 }
  0x2a   : > { %v588_v9 = vmax.f32 %v556_v48, 0.0  ;;  %v1120_v26 = vpack.c.bf16 %v586_v20, %v585_v10  ;;  %v465_v27 = vadd.f32 %v1561_v18, %v427_v23  ;;  %v466_v29 = vadd.f32 %v1561_v18, %v428_v15 }
  0x2b   : > { %v589_v14 = vmax.f32 %v557_v54, 0.0  ;;  %v590_v16 = vmax.f32 %v558_v17, 0.0  ;;  %v591_v25 = vmax.f32 %v559_v60, 0.0  ;;  %v592_v11 = vmax.f32 %v560_v59, 0.0 }
  0x2c   : > { %v1125_v22 = vpack.c.bf16 %v588_v9, %v587_v12  ;;  %v467_v32 = vadd.f32 %v1561_v18, %v429_v24  ;;  %v468_v36 = vadd.f32 %v1561_v18, %v430_v6  ;;  %1121 = vst [vmem:[%s1612_s15] sm:$0xff] %v1120_v26   ;;  %v1776_v41 = vunpack.c.l.bf16 %v1403_v28 }
  0x2d   : > { %v1130_v30 = vpack.c.bf16 %v590_v16, %v589_v14  ;;  %v1135_v35 = vpack.c.bf16 %v592_v11, %v591_v25  ;;  %v1777_v42 = vunpack.c.h.bf16 %v1403_v28  ;;  %v469_v46 = vadd.f32 %v1561_v18, %v431_v13 }
  0x2e   : > { %1227 = vst [vmem:[%s1612_s15 + $0x8] sm:$0xff] %v1125_v22   ;;  %v561_v38 = vadd.f32 %v1776_v41, %v465_v27  ;;  %v470_v23 = vadd.f32 %v1561_v18, %v432_v21  ;;  %v1778_v15 = vunpack.c.l.bf16 %v1412_v33  ;;  %v1779_v24 = vunpack.c.h.bf16 %v1412_v33 }
  0x2f   : > { %v562_v47 = vadd.f32 %v1777_v42, %v466_v29  ;;  %1228 = vst [vmem:[%s1612_s15 + $0x10] sm:$0xff] %v1130_v30   ;;  %1229 = vst [vmem:[%s1612_s15 + $0x18] sm:$0xff] %v1135_v35   ;;  %v1780_v53 = vunpack.c.l.bf16 %v1429_v44  ;;  %v1781_v28 = vunpack.c.h.bf16 %v1429_v44  ;;  %v1782_v21 = vunpack.c.l.bf16 %v1422_v39 }
  0x30   : > { %v563_v48 = vadd.f32 %v1778_v15, %v467_v32  ;;  %v564_v6 = vadd.f32 %v1779_v24, %v468_v36  ;;  %v593_v17 = vmax.f32 %v561_v38, 0.0  ;;  %v1783_v60 = vunpack.c.h.bf16 %v1422_v39 }
  0x31   : > { %v433_v54 = vmul.f32 %v1780_v53, %v1530_v40  ;;  %v434_v55 = vmul.f32 %v1781_v28, %v1530_v40  ;;  %v594_v13 = vmax.f32 %v562_v47, 0.0  ;;  %v565_v3 = vadd.f32 %v1782_v21, %v469_v46 }
  0x32   : > { %v566_v19 = vadd.f32 %v1783_v60, %v470_v23  ;;  %v595_v59 = vmax.f32 %v563_v48, 0.0  ;;  %v596_v33 = vmax.f32 %v564_v6, 0.0  ;;  %v1784_v14 = vunpack.c.l.bf16 %v1439_v50 }
  0x33   : > { %v471_v10 = vadd.f32 %v1561_v18, %v433_v54  ;;  %v472_v20 = vadd.f32 %v1561_v18, %v434_v55  ;;  %v1140_v12 = vpack.c.bf16 %v594_v13, %v593_v17  ;;  %v597_v9 = vmax.f32 %v565_v3, 0.0 }
  0x34   : > { %v598_v44 = vmax.f32 %v566_v19, 0.0  ;;  %v435_v16 = vmul.f32 %v1784_v14, %v1530_v40  ;;  %v1145_v25 = vpack.c.bf16 %v596_v33, %v595_v59  ;;  %v1785_v11 = vunpack.c.l.bf16 %v1432_v45 }
  0x35   : > { %v1786_v26 = vunpack.c.h.bf16 %v1432_v45  ;;  %v1787_v27 = vunpack.c.h.bf16 %v1439_v50  ;;  %1230 = vst [vmem:[%s1612_s15 + $0x20] sm:$0xff] %v1140_v12   ;;  %v1788_v32 = vunpack.c.l.bf16 %v1449_v56  ;;  %v1789_v41 = vunpack.c.h.bf16 %v1449_v56 }
  0x36   : > { %v567_v39 = vadd.f32 %v1785_v11, %v471_v10  ;;  %v1150_v30 = vpack.c.bf16 %v598_v44, %v597_v9  ;;  %v473_v35 = vadd.f32 %v1561_v18, %v435_v16  ;;  %1231 = vst [vmem:[%s1612_s15 + $0x28] sm:$0xff] %v1145_v25   ;;  %v1790_v50 = vunpack.c.l.bf16 %v1459_v62 }
  0x37   : > { %v568_v22 = vadd.f32 %v1786_v26, %v472_v20  ;;  %v436_v29 = vmul.f32 %v1787_v27, %v1530_v40  ;;  %v437_v36 = vmul.f32 %v1788_v32, %v1530_v40  ;;  %v438_v38 = vmul.f32 %v1789_v41, %v1530_v40 }
  0x38   : > { %v599_v42 = vmax.f32 %v567_v39, 0.0  ;;  %v439_v46 = vmul.f32 %v1790_v50, %v1530_v40  ;;  %1232 = vst [vmem:[%s1612_s15 + $0x30] sm:$0xff] %v1150_v30   ;;  %v1791_v23 = vunpack.c.l.bf16 %v1442_v51  ;;  %v1792_v56 = vunpack.c.h.bf16 %v1459_v62 }
  0x39   : > { %v600_v45 = vmax.f32 %v568_v22, 0.0  ;;  %v474_v47 = vadd.f32 %v1561_v18, %v436_v29  ;;  %v475_v48 = vadd.f32 %v1561_v18, %v437_v36  ;;  %v476_v24 = vadd.f32 %v1561_v18, %v438_v38 }
  0x3a   : > { %v569_v15 = vadd.f32 %v1791_v23, %v473_v35  ;;  %v440_v6 = vmul.f32 %v1792_v56, %v1530_v40  ;;  %v1793_v54 = vunpack.c.h.bf16 %v1442_v51  ;;  %v477_v55 = vadd.f32 %v1561_v18, %v439_v46 }
  0x3b   : > { %v1155_v53 = vpack.c.bf16 %v600_v45, %v599_v42  ;;  %v1794_v17 = vunpack.c.l.bf16 %v1469_v5  ;;  %v1795_v3 = vunpack.c.l.bf16 %v1452_v57  ;;  %v1796_v19 = vunpack.c.h.bf16 %v1452_v57 }
  0x3c   : > { %v570_v28 = vadd.f32 %v1793_v54, %v474_v47  ;;  %v601_v21 = vmax.f32 %v569_v15, 0.0  ;;  %v478_v62 = vadd.f32 %v1561_v18, %v440_v6  ;;  %v1797_v51 = vunpack.c.l.bf16 %v1462_v63 }
  0x3d   : > { %v441_v13 = vmul.f32 %v1794_v17, %v1530_v40  ;;  %v571_v60 = vadd.f32 %v1795_v3, %v475_v48  ;;  %v572_v59 = vadd.f32 %v1796_v19, %v476_v24  ;;  %1233 = vst [vmem:[%s1612_s15 + $0x38] sm:$0xff] %v1155_v53   ;;  %v1798_v20 = vunpack.c.h.bf16 %v1469_v5 }
  0x3e   : > { %v602_v33 = vmax.f32 %v570_v28, 0.0  ;;  %v573_v10 = vadd.f32 %v1797_v51, %v477_v55  ;;  %v1799_v16 = vunpack.c.h.bf16 %v1462_v63  ;;  %v1800_v25 = vunpack.c.l.bf16 %v1479_v1 }
  0x3f   : > { %v442_v12 = vmul.f32 %v1798_v20, %v1530_v40  ;;  %v479_v9 = vadd.f32 %v1561_v18, %v441_v13  ;;  %v603_v44 = vmax.f32 %v571_v60, 0.0  ;;  %v604_v14 = vmax.f32 %v572_v59, 0.0 }
  0x40   : > { %v574_v57 = vadd.f32 %v1799_v16, %v478_v62  ;;  %v443_v11 = vmul.f32 %v1800_v25, %v1530_v40  ;;  %v1160_v39 = vpack.c.bf16 %v602_v33, %v601_v21  ;;  %v605_v26 = vmax.f32 %v573_v10, 0.0 }
  0x41   : > { %v480_v22 = vadd.f32 %v1561_v18, %v442_v12  ;;  %v1801_v27 = vunpack.c.l.bf16 %v1472_v7  ;;  %v1165_v29 = vpack.c.bf16 %v604_v14, %v603_v44  ;;  %v1802_v35 = vunpack.c.h.bf16 %v1479_v1 }
  0x42   : > { %v606_v30 = vmax.f32 %v574_v57, 0.0  ;;  %v481_v63 = vadd.f32 %v1561_v18, %v443_v11  ;;  %1234 = vst [vmem:[%s1612_s15 + $0x40] sm:$0xff] %v1160_v39   ;;  %v1803_v36 = vunpack.c.h.bf16 %v1472_v7  ;;  %v1804_v42 = vunpack.c.l.bf16 %v1492_v61 }
  0x43   : > { %v575_v5 = vadd.f32 %v1801_v27, %v479_v9  ;;  %v444_v32 = vmul.f32 %v1802_v35, %v1530_v40  ;;  %v1805_v47 = vunpack.c.h.bf16 %v1492_v61  ;;  %1235 = vst [vmem:[%s1612_s15 + $0x48] sm:$0xff] %v1165_v29   ;;  %v1806_v23 = vunpack.c.l.bf16 %v1482_v58 }
  0x44   : > { %v576_v41 = vadd.f32 %v1803_v36, %v480_v22  ;;  %v445_v45 = vmul.f32 %v1804_v42, %v1530_v40  ;;  %v1170_v46 = vpack.c.bf16 %v606_v30, %v605_v26  ;;  %v1807_v7 = vunpack.c.l.bf16 %v1502_v49 }
  0x45   : > { %v607_v38 = vmax.f32 %v575_v5, 0.0  ;;  %v446_v50 = vmul.f32 %v1805_v47, %v1530_v40  ;;  %v482_v1 = vadd.f32 %v1561_v18, %v444_v32  ;;  %v577_v15 = vadd.f32 %v1806_v23, %v481_v63 }
  0x46   : > { %v447_v48 = vmul.f32 %v1807_v7, %v1530_v40  ;;  %v608_v24 = vmax.f32 %v576_v41, 0.0  ;;  %v483_v56 = vadd.f32 %v1561_v18, %v445_v45  ;;  %v448_v61 = vmul.f32 %v1048_v8, %v1530_v40  ;;  %1236 = vst [vmem:[%s1612_s15 + $0x50] sm:$0xff] %v1170_v46  }
  0x47   : > { %v484_v6 = vadd.f32 %v1561_v18, %v446_v50  ;;  %v1808_v53 = vunpack.c.h.bf16 %v1482_v58  ;;  %v609_v28 = vmax.f32 %v577_v15, 0.0  ;;  %v449_v17 = vmul.f32 %v1051_v31, %v1530_v40 }
  0x48   : > { %v485_v55 = vadd.f32 %v1561_v18, %v447_v48  ;;  %v1175_v13 = vpack.c.bf16 %v608_v24, %v607_v38  ;;  %v1809_v21 = vunpack.c.l.bf16 %v1499_v2  ;;  %v1810_v60 = vunpack.c.h.bf16 %v1499_v2 }
  0x49   : > { %v578_v54 = vadd.f32 %v1808_v53, %v482_v1  ;;  %v486_v49 = vadd.f32 %v1561_v18, %v448_v61  ;;  %v1811_v59 = vunpack.c.h.bf16 %v1515_v37  ;;  %v487_v31 = vadd.f32 %v1561_v18, %v449_v17 }
  0x4a   : > { %v579_v3 = vadd.f32 %v1809_v21, %v483_v56  ;;  %v580_v19 = vadd.f32 %v1810_v60, %v484_v6  ;;  %v581_v58 = vadd.f32 %v1111_v52, %v485_v55  ;;  %1237 = vst [vmem:[%s1612_s15 + $0x58] sm:$0xff] %v1175_v13   ;;  %v1812_v2 = vunpack.c.h.bf16 %v1509_v43 }
  0x4b   : > { %v610_v8 = vmax.f32 %v578_v54, 0.0  ;;  %v450_v62 = vmul.f32 %v1811_v59, %v1530_v40  ;;  %v583_v52 = vadd.f32 %v1115_v0, %v487_v31 }
  0x4c   : > { %v611_v33 = vmax.f32 %v579_v3, 0.0  ;;  %v612_v51 = vmax.f32 %v580_v19, 0.0  ;;  %v582_v10 = vadd.f32 %v1812_v2, %v486_v49  ;;  %v613_v12 = vmax.f32 %v581_v58, 0.0 }
  0x4d   : > { %v1180_v20 = vpack.c.bf16 %v610_v8, %v609_v28  ;;  %v488_v9 = vadd.f32 %v1561_v18, %v450_v62  ;;  %v615_v14 = vmax.f32 %v583_v52, 0.0 }
  0x4e   : > { %v1185_v37 = vpack.c.bf16 %v612_v51, %v611_v33  ;;  %v614_v44 = vmax.f32 %v582_v10, 0.0 }
  0x4f   : > { %1238 = vst [vmem:[%s1612_s15 + $0x60] sm:$0xff] %v1180_v20   ;;  %v584_v40 = vadd.f32 %v1116_v4, %v488_v9 }
  0x50   : > { %1239 = vst [vmem:[%s1612_s15 + $0x68] sm:$0xff] %v1185_v37   ;;  %v1190_v16 = vpack.c.bf16 %v614_v44, %v613_v12 }
  0x51   : > { %v616_v57 = vmax.f32 %v584_v40, 0.0 }
  0x52   : > { %1240 = vst [vmem:[%s1612_s15 + $0x70] sm:$0xff] %v1190_v16  }
  0x53   : > { %v1195_v43 = vpack.c.bf16 %v616_v57, %v615_v14 }
  0x55   : > { %1241 = vst [vmem:[%s1612_s15 + $0x78] sm:$0xff] %v1195_v43  }
  0x56 PF: > { %s15_s20 = sadd.s32 1, %s1290_s20   ;;  %s1813_s18 = smov %s1286_s19 }
  0x57   : > { %p12_p5 = scmp.ge.s32.totalorder %s15_s20, 4   ;;  %s1814_s19 = smov %s1816_s21 }
  0x59   :  { %14 = sbr.rel (!%p12_p5) target bundleno = 2 (0x2), region = 82 }

// kernel: multihead_forward.28
= control target key start
LH: loop header
LB: loop body
LE: loop exit
PB: predicated region body
PF: predicated region fallthrough
CT: control target
= control target key end

     0   :  { %s2568_s12 = smov 0   ;;  %s2570_s13 = smov 0   ;;  %s3067_s0 = inlined_call_operand.vmem [shape: bf16[512,1152], index: 0, kind: input, shape index: {}]   ;;  %s3068_s1 = inlined_call_operand.vmem [shape: bf16[1152,128], index: 1, kind: input, shape index: {}]   ;;  %s3069_s2 = inlined_call_operand.vmem [shape: bf16[512,128], index: 2, kind: output, shape index: {0}]   ;;  %s3070_s3 = inlined_call_operand.vmem [shape: f32[8,128], index: 3, kind: output, shape index: {1}]  }
   0x1   :  { %s2572_s14 = smov 0   ;;  %s2574_s15 = smov 0  }
   0x2   :  { %s2576_s16 = smov 0   ;;  %s2578_s17 = smov 0  }
   0x3   :  { %s2580_s18 = smov 0  }
   0x4 LB: > { %s26_s19 = sadd.s32 1, %s2537_s16  ;;  %s29_s20 = sadd.s32 1, %s2541_s17  ;;  %s2545_s18 = sphi %s2580_s18, %s14_s18   ;;  %s2541_s17 = sphi %s2578_s17, %s3076_s17   ;;  %s2537_s16 = sphi %s2576_s16, %s3075_s16   ;;  %s2533_s15 = sphi %s2574_s15, %s3074_s15   ;;  %s2529_s14 = sphi %s2572_s14, %s3073_s14   ;;  %s2525_s13 = sphi %s2570_s13, %s3072_s13   ;;  %s2521_s12 = sphi %s2568_s12, %s3071_s12  }
   0x5   : > { %p27_p0 = scmp.ge.s32.totalorder %s26_s19, 3  ;;  %p49_p1 = scmp.ne.s32.totalorder %s2525_s13, %s2521_s12 }
   0x6   : > { %p50_p2 = scmp.eq.s32.totalorder %s2545_s18, 0  ;;  %s42_s24 = sadd.s32 1, %s2525_s13 }
   0x7   : > { %s3078_s19 = smov (%p27_p0, %s26_s19), 0  ;;  %s3080_s20 = smov (!%p27_p0, %s29_s20), %s2541_s17 }
   0x8   : > { %p51_p3 = por %p50_p2, %p49_p1  ;;  %p31_p4 = scmp.ge.s32.totalorder %s3080_s20, 2 }
   0x9   : > { %s38_s21 = ssub.s32 %s2537_s16, %s3078_s19  ;;  %p1833_p6 = scmp.ge.s32.totalorder %s2545_s18, 6 }
   0xa   : > { %s3082_s20 = smov (%p31_p4, %s3080_s20), 0 }
   0xb   : > { %s37_s22 = ssub.s32 %s2541_s17, %s3082_s20  ;;  %157 = sbr.rel (%p1833_p6) target bundleno = 64 (0x40), region = 16 }
   0xc   : > { %s39_s23 = sor.u32 %s38_s21, %s37_s22 }
   0xd   : > { %p40_p5 = scmp.eq.s32.totalorder %s39_s23, 0 }
   0xf   : > { %s2619_s25 = scalar_select %p40_p5, %s2525_s13, %s42_s24  }
  0x12   : > { %160 = sbr.rel (!%p51_p3) target bundleno = 64 (0x40), region = 20  ;;  %s162_s26 = sand.u32 (%p51_p3), 1, %s2525_s13  }
  0x13   : > { %s166_s27 = smul.u32 (%p51_p3), 3, %s2537_s16 }
  0x14   : > { %s2343_s28 = smul.u32 (%p51_p3), 384, %s162_s26 }
  0x15   : > { %s2344_s29 = smul.u32 (%p51_p3), 288, %s2541_s17 }
  0x16   : > { %s2633_s8 = scalar_lea.vmem (%p51_p3), [#allocation3], %s2343_s28 }
  0x17   : > { %s168_s30 = sadd.s32 (%p51_p3), %s2344_s29, %s166_s27 }
  0x18   : > { %s1836_s4 = sshll.u32 (%p51_p3), %s168_s30, 2 }
  0x19   : > { %s2628_s7 = scalar_lea.vmem %s3067_s0, %s1836_s4 }
  0x1a   : > { %v185_v0 = vld [vmem:[%s2628_s7] sm:$0xff]  ;;  %v189_v2 = vld [vmem:[%s2628_s7 + $0x48] sm:$0xff]  ;;  %v193_v4 = vld [vmem:[%s2628_s7 + $0x90] sm:$0xff] }
  0x1b   : > { %v187_v1 = vld [vmem:[%s2628_s7 + $0x24] sm:$0xff]  ;;  %186 = vst [vmem:[%s2633_s8] sm:$0xff] %v185_v0  ;;  %190 = vst [vmem:[%s2633_s8 + $0x18] sm:$0xff] %v189_v2  ;;  %v191_v3 = vld [vmem:[%s2628_s7 + $0x6c] sm:$0xff] }
  0x1c   : > { %188 = vst [vmem:[%s2633_s8 + $0xc] sm:$0xff] %v187_v1  ;;  %v195_v5 = vld [vmem:[%s2628_s7 + $0xb4] sm:$0xff]  ;;  %192 = vst [vmem:[%s2633_s8 + $0x24] sm:$0xff] %v191_v3  ;;  %v199_v7 = vld [vmem:[%s2628_s7 + $0xfc] sm:$0xff] }
  0x1d   : > { %194 = vst [vmem:[%s2633_s8 + $0x30] sm:$0xff] %v193_v4  ;;  %196 = vst [vmem:[%s2633_s8 + $0x3c] sm:$0xff] %v195_v5  ;;  %v197_v6 = vld [vmem:[%s2628_s7 + $0xd8] sm:$0xff]  ;;  %v201_v8 = vld [vmem:[%s2628_s7 + $0x120] sm:$0xff] }
  0x1e   : > { %198 = vst [vmem:[%s2633_s8 + $0x48] sm:$0xff] %v197_v6  ;;  %200 = vst [vmem:[%s2633_s8 + $0x54] sm:$0xff] %v199_v7  ;;  %v203_v9 = vld [vmem:[%s2628_s7 + $0x144] sm:$0xff]  ;;  %v207_v11 = vld [vmem:[%s2628_s7 + $0x18c] sm:$0xff] }
  0x1f   : > { %202 = vst [vmem:[%s2633_s8 + $0x60] sm:$0xff] %v201_v8  ;;  %v205_v10 = vld [vmem:[%s2628_s7 + $0x168] sm:$0xff]  ;;  %204 = vst [vmem:[%s2633_s8 + $0x6c] sm:$0xff] %v203_v9  ;;  %v209_v12 = vld [vmem:[%s2628_s7 + $0x1b0] sm:$0xff] }
  0x20   : > { %206 = vst [vmem:[%s2633_s8 + $0x78] sm:$0xff] %v205_v10  ;;  %208 = vst [vmem:[%s2633_s8 + $0x84] sm:$0xff] %v207_v11  ;;  %v211_v13 = vld [vmem:[%s2628_s7 + $0x1d4] sm:$0xff]  ;;  %v215_v15 = vld [vmem:[%s2628_s7 + $0x21c] sm:$0xff] }
  0x21   : > { %v213_v14 = vld [vmem:[%s2628_s7 + $0x1f8] sm:$0xff]  ;;  %210 = vst [vmem:[%s2633_s8 + $0x90] sm:$0xff] %v209_v12  ;;  %212 = vst [vmem:[%s2633_s8 + $0x9c] sm:$0xff] %v211_v13  ;;  %v217_v16 = vld [vmem:[%s2628_s7 + $0x240] sm:$0xff] }
  0x22   : > { %214 = vst [vmem:[%s2633_s8 + $0xa8] sm:$0xff] %v213_v14  ;;  %v219_v17 = vld [vmem:[%s2628_s7 + $0x264] sm:$0xff]  ;;  %216 = vst [vmem:[%s2633_s8 + $0xb4] sm:$0xff] %v215_v15  ;;  %v223_v19 = vld [vmem:[%s2628_s7 + $0x2ac] sm:$0xff] }
  0x23   : > { %218 = vst [vmem:[%s2633_s8 + $0xc0] sm:$0xff] %v217_v16  ;;  %220 = vst [vmem:[%s2633_s8 + $0xcc] sm:$0xff] %v219_v17  ;;  %v221_v18 = vld [vmem:[%s2628_s7 + $0x288] sm:$0xff]  ;;  %v225_v20 = vld [vmem:[%s2628_s7 + $0x2d0] sm:$0xff] }
  0x24   : > { %222 = vst [vmem:[%s2633_s8 + $0xd8] sm:$0xff] %v221_v18  ;;  %224 = vst [vmem:[%s2633_s8 + $0xe4] sm:$0xff] %v223_v19  ;;  %v227_v21 = vld [vmem:[%s2628_s7 + $0x2f4] sm:$0xff]  ;;  %v231_v23 = vld [vmem:[%s2628_s7 + $0x33c] sm:$0xff] }
  0x25   : > { %226 = vst [vmem:[%s2633_s8 + $0xf0] sm:$0xff] %v225_v20  ;;  %v229_v22 = vld [vmem:[%s2628_s7 + $0x318] sm:$0xff]  ;;  %228 = vst [vmem:[%s2633_s8 + $0xfc] sm:$0xff] %v227_v21  ;;  %v233_v24 = vld [vmem:[%s2628_s7 + $0x360] sm:$0xff] }
  0x26   : > { %230 = vst [vmem:[%s2633_s8 + $0x108] sm:$0xff] %v229_v22  ;;  %232 = vst [vmem:[%s2633_s8 + $0x114] sm:$0xff] %v231_v23  ;;  %v235_v25 = vld [vmem:[%s2628_s7 + $0x384] sm:$0xff]  ;;  %v239_v27 = vld [vmem:[%s2628_s7 + $0x3cc] sm:$0xff] }
  0x27   : > { %v237_v26 = vld [vmem:[%s2628_s7 + $0x3a8] sm:$0xff]  ;;  %234 = vst [vmem:[%s2633_s8 + $0x120] sm:$0xff] %v233_v24  ;;  %236 = vst [vmem:[%s2633_s8 + $0x12c] sm:$0xff] %v235_v25  ;;  %v241_v28 = vld [vmem:[%s2628_s7 + $0x3f0] sm:$0xff] }
  0x28   : > { %238 = vst [vmem:[%s2633_s8 + $0x138] sm:$0xff] %v237_v26  ;;  %v243_v29 = vld [vmem:[%s2628_s7 + $0x414] sm:$0xff]  ;;  %240 = vst [vmem:[%s2633_s8 + $0x144] sm:$0xff] %v239_v27  ;;  %v247_v31 = vld [vmem:[%s2628_s7 + $0x45c] sm:$0xff] }
  0x29   : > { %242 = vst [vmem:[%s2633_s8 + $0x150] sm:$0xff] %v241_v28  ;;  %244 = vst [vmem:[%s2633_s8 + $0x15c] sm:$0xff] %v243_v29  ;;  %v245_v30 = vld [vmem:[%s2628_s7 + $0x438] sm:$0xff]  ;;  %v1837_v32 = vld [vmem:[%s2628_s7 + $0x8] sm:$0xf] }
  0x2a   : > { %246 = vst [vmem:[%s2633_s8 + $0x168] sm:$0xff] %v245_v30  ;;  %248 = vst [vmem:[%s2633_s8 + $0x174] sm:$0xff] %v247_v31  ;;  %v1839_v33 = vld [vmem:[%s2628_s7 + $0x2c] sm:$0xf]  ;;  %v1841_v34 = vld [vmem:[%s2628_s7 + $0x50] sm:$0xf] }
  0x2b   : > { %1838 = vst [vmem:[%s2633_s8 + $0x8] sm:$0xf] %v1837_v32  ;;  %v1843_v35 = vld [vmem:[%s2628_s7 + $0x74] sm:$0xf]  ;;  %1840 = vst [vmem:[%s2633_s8 + $0x14] sm:$0xf] %v1839_v33 }
  0x2c   : > { %1842 = vst [vmem:[%s2633_s8 + $0x20] sm:$0xf] %v1841_v34  ;;  %1844 = vst [vmem:[%s2633_s8 + $0x2c] sm:$0xf] %v1843_v35  ;;  %v1845_v36 = vld [vmem:[%s2628_s7 + $0x98] sm:$0xf] }
  0x2d   : > { %v1847_v37 = vld [vmem:[%s2628_s7 + $0xbc] sm:$0xf]  ;;  %v1849_v38 = vld [vmem:[%s2628_s7 + $0xe0] sm:$0xf]  ;;  %1846 = vst [vmem:[%s2633_s8 + $0x38] sm:$0xf] %v1845_v36 }
  0x2e   : > { %1848 = vst [vmem:[%s2633_s8 + $0x44] sm:$0xf] %v1847_v37  ;;  %1850 = vst [vmem:[%s2633_s8 + $0x50] sm:$0xf] %v1849_v38  ;;  %v1851_v39 = vld [vmem:[%s2628_s7 + $0x104] sm:$0xf] }
  0x2f   : > { %v1853_v40 = vld [vmem:[%s2628_s7 + $0x128] sm:$0xf]  ;;  %v1855_v41 = vld [vmem:[%s2628_s7 + $0x14c] sm:$0xf]  ;;  %1852 = vst [vmem:[%s2633_s8 + $0x5c] sm:$0xf] %v1851_v39 }
  0x30   : > { %1854 = vst [vmem:[%s2633_s8 + $0x68] sm:$0xf] %v1853_v40  ;;  %1856 = vst [vmem:[%s2633_s8 + $0x74] sm:$0xf] %v1855_v41  ;;  %v1857_v42 = vld [vmem:[%s2628_s7 + $0x170] sm:$0xf] }
  0x31   : > { %v1859_v43 = vld [vmem:[%s2628_s7 + $0x194] sm:$0xf]  ;;  %v1861_v44 = vld [vmem:[%s2628_s7 + $0x1b8] sm:$0xf]  ;;  %1858 = vst [vmem:[%s2633_s8 + $0x80] sm:$0xf] %v1857_v42 }
  0x32   : > { %1860 = vst [vmem:[%s2633_s8 + $0x8c] sm:$0xf] %v1859_v43  ;;  %1862 = vst [vmem:[%s2633_s8 + $0x98] sm:$0xf] %v1861_v44  ;;  %v1863_v45 = vld [vmem:[%s2628_s7 + $0x1dc] sm:$0xf] }
  0x33   : > { %v1865_v46 = vld [vmem:[%s2628_s7 + $0x200] sm:$0xf]  ;;  %v1867_v47 = vld [vmem:[%s2628_s7 + $0x224] sm:$0xf]  ;;  %1864 = vst [vmem:[%s2633_s8 + $0xa4] sm:$0xf] %v1863_v45 }
  0x34   : > { %1866 = vst [vmem:[%s2633_s8 + $0xb0] sm:$0xf] %v1865_v46  ;;  %1868 = vst [vmem:[%s2633_s8 + $0xbc] sm:$0xf] %v1867_v47  ;;  %v1869_v48 = vld [vmem:[%s2628_s7 + $0x248] sm:$0xf] }
  0x35   : > { %v1871_v49 = vld [vmem:[%s2628_s7 + $0x26c] sm:$0xf]  ;;  %v1873_v50 = vld [vmem:[%s2628_s7 + $0x290] sm:$0xf]  ;;  %1870 = vst [vmem:[%s2633_s8 + $0xc8] sm:$0xf] %v1869_v48 }
  0x36   : > { %1872 = vst [vmem:[%s2633_s8 + $0xd4] sm:$0xf] %v1871_v49  ;;  %1874 = vst [vmem:[%s2633_s8 + $0xe0] sm:$0xf] %v1873_v50  ;;  %v1875_v51 = vld [vmem:[%s2628_s7 + $0x2b4] sm:$0xf] }
  0x37   : > { %v1877_v52 = vld [vmem:[%s2628_s7 + $0x2d8] sm:$0xf]  ;;  %v1879_v53 = vld [vmem:[%s2628_s7 + $0x2fc] sm:$0xf]  ;;  %1876 = vst [vmem:[%s2633_s8 + $0xec] sm:$0xf] %v1875_v51 }
  0x38   : > { %1878 = vst [vmem:[%s2633_s8 + $0xf8] sm:$0xf] %v1877_v52  ;;  %1880 = vst [vmem:[%s2633_s8 + $0x104] sm:$0xf] %v1879_v53  ;;  %v1881_v54 = vld [vmem:[%s2628_s7 + $0x320] sm:$0xf] }
  0x39   : > { %v1883_v55 = vld [vmem:[%s2628_s7 + $0x344] sm:$0xf]  ;;  %v1885_v56 = vld [vmem:[%s2628_s7 + $0x368] sm:$0xf]  ;;  %1882 = vst [vmem:[%s2633_s8 + $0x110] sm:$0xf] %v1881_v54 }
  0x3a   : > { %1884 = vst [vmem:[%s2633_s8 + $0x11c] sm:$0xf] %v1883_v55  ;;  %1886 = vst [vmem:[%s2633_s8 + $0x128] sm:$0xf] %v1885_v56  ;;  %v1887_v57 = vld [vmem:[%s2628_s7 + $0x38c] sm:$0xf] }
  0x3b   : > { %v1889_v58 = vld [vmem:[%s2628_s7 + $0x3b0] sm:$0xf]  ;;  %v1891_v59 = vld [vmem:[%s2628_s7 + $0x3d4] sm:$0xf]  ;;  %1888 = vst [vmem:[%s2633_s8 + $0x134] sm:$0xf] %v1887_v57 }
  0x3c   : > { %1890 = vst [vmem:[%s2633_s8 + $0x140] sm:$0xf] %v1889_v58  ;;  %1892 = vst [vmem:[%s2633_s8 + $0x14c] sm:$0xf] %v1891_v59  ;;  %v1893_v60 = vld [vmem:[%s2628_s7 + $0x3f8] sm:$0xf] }
  0x3d   : > { %v1895_v61 = vld [vmem:[%s2628_s7 + $0x41c] sm:$0xf]  ;;  %v1897_v62 = vld [vmem:[%s2628_s7 + $0x440] sm:$0xf]  ;;  %1894 = vst [vmem:[%s2633_s8 + $0x158] sm:$0xf] %v1893_v60 }
  0x3e   : > { %1896 = vst [vmem:[%s2633_s8 + $0x164] sm:$0xf] %v1895_v61  ;;  %1898 = vst [vmem:[%s2633_s8 + $0x170] sm:$0xf] %v1897_v62  ;;  %v1899_v63 = vld [vmem:[%s2628_s7 + $0x464] sm:$0xf] }
  0x3f   : > { %1900 = vst [vmem:[%s2633_s8 + $0x17c] sm:$0xf] %v1899_v63 }
  0x40 PF: > { %p1901_p7 = scmp.ge.s32.totalorder %s2545_s18, 1  ;;  %p336_p8 = scmp.lt.s32.totalorder %s2545_s18, 7 }
  0x42   : > { %p337_p9 = pnand %p1901_p7, %p336_p8 }
  0x43   : > { %s343_s9 = sand.u32 (!%p337_p9), 1, %s2521_s12   ;;  %s383_s10 = smul.u32 (!%p337_p9), 48, %s2529_s14 }
  0x44   : > { %340 = sbr.rel (%p337_p9) target bundleno = 520 (0x208), region = 50  ;;  %s1903_s21 = sshll.u32 (!%p337_p9), %s2533_s15, 5 }
  0x45   : > { %s2345_s11 = smul.u32 (!%p337_p9), 384, %s343_s9  ;;  %p384_p10 = scmp.lt.s32.totalorder (!%p337_p9), %s383_s10, 143 }
  0x46   : > { %p393_p11 = scmp.lt.s32.totalorder (!%p337_p9), %s1903_s21, 63  ;;  %p1905_p12 = scmp.ne.s32.totalorder (!%p337_p9), %s2529_s14, 0 }
  0x47   : > { %s2775_s12 = scalar_lea.vmem (!%p337_p9), [#allocation3], %s2345_s11 }
  0x4b   : > { %s3084_s10 = smov (!%p384_p10, %s383_s10), 143  ;;  %s3086_s21 = smov (!%p393_p11, %s1903_s21), 63 }
  0x4c   : > { %s1902_s22 = sshll.u32 %s3084_s10, 2  ;;  %s1904_s27 = sshll.u32 %s3086_s21, 2  ;;  %v2547_v0 = vmov (!%p1905_p12), 0.0  }
  0x4d   : > { %s2768_s26 = scalar_lea.vmem %s3068_s1, %s1902_s22  ;;  %s2773_s30 = scalar_lea.vmem %s3069_s2, %s1904_s27  ;;  %410 = vst [vmem:[#allocation2] sm:$0xff] (!%p1905_p12), %v2547_v0  ;;  %411 = vst [vmem:[#allocation2 + $0x8] sm:$0xff] (!%p1905_p12), %v2547_v0 }
  0x4e   : > { %409 = sbr.rel (%p1905_p12) target bundleno = 93 (0x5d), region = 58  ;;  %412 = vst [vmem:[#allocation2 + $0x10] sm:$0xff] (!%p1905_p12), %v2547_v0  ;;  %413 = vst [vmem:[#allocation2 + $0x18] sm:$0xff] (!%p1905_p12), %v2547_v0 }
  0x4f   : > { %414 = vst [vmem:[#allocation2 + $0x20] sm:$0xff] (!%p1905_p12), %v2547_v0  ;;  %415 = vst [vmem:[#allocation2 + $0x28] sm:$0xff] (!%p1905_p12), %v2547_v0 }
  0x50   : > { %416 = vst [vmem:[#allocation2 + $0x30] sm:$0xff] (!%p1905_p12), %v2547_v0  ;;  %417 = vst [vmem:[#allocation2 + $0x38] sm:$0xff] (!%p1905_p12), %v2547_v0 }
  0x51   : > { %418 = vst [vmem:[#allocation2 + $0x40] sm:$0xff] (!%p1905_p12), %v2547_v0  ;;  %419 = vst [vmem:[#allocation2 + $0x48] sm:$0xff] (!%p1905_p12), %v2547_v0 }
  0x52   : > { %420 = vst [vmem:[#allocation2 + $0x50] sm:$0xff] (!%p1905_p12), %v2547_v0  ;;  %421 = vst [vmem:[#allocation2 + $0x58] sm:$0xff] (!%p1905_p12), %v2547_v0 }
  0x53   : > { %422 = vst [vmem:[#allocation2 + $0x60] sm:$0xff] (!%p1905_p12), %v2547_v0  ;;  %423 = vst [vmem:[#allocation2 + $0x68] sm:$0xff] (!%p1905_p12), %v2547_v0 }
  0x54   : > { %424 = vst [vmem:[#allocation2 + $0x70] sm:$0xff] (!%p1905_p12), %v2547_v0  ;;  %425 = vst [vmem:[#allocation2 + $0x78] sm:$0xff] (!%p1905_p12), %v2547_v0 }
  0x55   : > { %426 = vst [vmem:[#allocation2 + $0x80] sm:$0xff] %v2547_v0  ;;  %427 = vst [vmem:[#allocation2 + $0x88] sm:$0xff] %v2547_v0 }
  0x56   : > { %428 = vst [vmem:[#allocation2 + $0x90] sm:$0xff] %v2547_v0  ;;  %429 = vst [vmem:[#allocation2 + $0x98] sm:$0xff] %v2547_v0 }
  0x57   : > { %430 = vst [vmem:[#allocation2 + $0xa0] sm:$0xff] %v2547_v0  ;;  %431 = vst [vmem:[#allocation2 + $0xa8] sm:$0xff] %v2547_v0 }
  0x58   : > { %432 = vst [vmem:[#allocation2 + $0xb0] sm:$0xff] %v2547_v0  ;;  %433 = vst [vmem:[#allocation2 + $0xb8] sm:$0xff] %v2547_v0 }
  0x59   : > { %434 = vst [vmem:[#allocation2 + $0xc0] sm:$0xff] %v2547_v0  ;;  %435 = vst [vmem:[#allocation2 + $0xc8] sm:$0xff] %v2547_v0 }
  0x5a   : > { %436 = vst [vmem:[#allocation2 + $0xd0] sm:$0xff] %v2547_v0  ;;  %437 = vst [vmem:[#allocation2 + $0xd8] sm:$0xff] %v2547_v0 }
  0x5b   : > { %438 = vst [vmem:[#allocation2 + $0xe0] sm:$0xff] %v2547_v0  ;;  %439 = vst [vmem:[#allocation2 + $0xe8] sm:$0xff] %v2547_v0 }
  0x5c   : > { %440 = vst [vmem:[#allocation2 + $0xf0] sm:$0xff] %v2547_v0  ;;  %441 = vst [vmem:[#allocation2 + $0xf8] sm:$0xff] %v2547_v0 }
  0x5d PF: > { %v2403_v1 = vld [vmem:[%s2768_s26 + $0x40] sm:$0xff]   ;;  %v2405_v3 = vld [vmem:[%s2768_s26 + $0x48] sm:$0xff]   ;;  %v2407_v5 = vld [vmem:[%s2768_s26 + $0x50] sm:$0xff]   ;;  %p1978_p13 = scmp.ne.s32.totalorder %s2529_s14, 2 }
  0x5e   : > { %v2404_v2 = vld [vmem:[%s2768_s26] sm:$0xff]   ;;  %2143 = vmatprep.subr.bf16.mxu0 %v2403_v1  ;;  %2327 = vmatprep.subr.bf16.mxu1 %v2403_v1  ;;  %v2406_v4 = vld [vmem:[%s2768_s26 + $0x8] sm:$0xff]   ;;  %v2408_v6 = vld [vmem:[%s2768_s26 + $0x10] sm:$0xff]   ;;  %p2011_p0 = scmp.ne.s32.totalorder (!%p1978_p13), %s2533_s15, 0 }
  0x5f   : > { %2144 = vmatpush3.bf16.msra.mxu0 %v2404_v2  ;;  %2335 = vmatpush3.bf16.msra.mxu1 %v2404_v2  ;;  %v2409_v7 = vld [vmem:[%s2768_s26 + $0x58] sm:$0xff]   ;;  %v2411_v9 = vld [vmem:[%s2768_s26 + $0x60] sm:$0xff]   ;;  %v2413_v11 = vld [vmem:[%s2768_s26 + $0x68] sm:$0xff]  }
  0x60   : > { %2145 = vmatprep.subr.bf16.mxu0 %v2405_v3  ;;  %2328 = vmatprep.subr.bf16.mxu1 %v2405_v3  ;;  %v2410_v8 = vld [vmem:[%s2768_s26 + $0x18] sm:$0xff]   ;;  %v2412_v10 = vld [vmem:[%s2768_s26 + $0x20] sm:$0xff]   ;;  %v2414_v14 = vld [vmem:[%s2768_s26 + $0x28] sm:$0xff]  }
  0x61   : > { %v2421_v12 = vld [vmem:[%s2775_s12 + $0x4] ss:$12 sps:$4 sm:$0xff]   ;;  %v2417_v17 = vld [vmem:[%s2768_s26 + $0x78] sm:$0xff]   ;;  %v2419_v20 = vld [vmem:[%s2775_s12] ss:$12 sps:$4 sm:$0xff]  }
  0x62   : > { %v2424_v13 = vld [vmem:[%s2775_s12 + $0x124] ss:$12 sps:$4 sm:$0xff]   ;;  %1018 = vmatprep.mubr.bf16.mxu0 %v2421_v12  ;;  %v2418_v18 = vld [vmem:[%s2768_s26 + $0x38] sm:$0xff]   ;;  %v2422_v21 = vld [vmem:[%s2775_s12 + $0x120] ss:$12 sps:$4 sm:$0xff]  }
  0x63   : > { %2146 = vmatpush3.bf16.msra.mxu0 %v2406_v4  ;;  %2336 = vmatpush3.bf16.msra.mxu1 %v2406_v4  ;;  %v2415_v15 = vld [vmem:[%s2768_s26 + $0x70] sm:$0xff]   ;;  %v2425_v19 = vld [vmem:[%s2768_s26 + $0x80] sm:$0xff]   ;;  %v2427_v22 = vld [vmem:[%s2775_s12 + $0x1c] ss:$12 sps:$4 sm:$0xff]  }
  0x64   : > { %2147 = vmatprep.subr.bf16.mxu0 %v2407_v5  ;;  %2329 = vmatprep.subr.bf16.mxu1 %v2407_v5  ;;  %v2416_v16 = vld [vmem:[%s2768_s26 + $0x30] sm:$0xff]   ;;  %v2426_v23 = vld [vmem:[%s2768_s26 + $0x88] sm:$0xff]   ;;  %v2431_v25 = vld [vmem:[%s2775_s12 + $0x18] ss:$12 sps:$4 sm:$0xff]  }
  0x65   : > { %1114 = vmatprep.mubr.bf16.mxu1 %v2424_v13  ;;  %v2429_v24 = vld [vmem:[%s2775_s12 + $0x13c] ss:$12 sps:$4 sm:$0xff]   ;;  %v2433_v26 = vld [vmem:[%s2768_s26 + $0x90] sm:$0xff]   ;;  %v2432_v27 = vld [vmem:[%s2775_s12 + $0x138] ss:$12 sps:$4 sm:$0xff]  }
  0x66   : > { %v2434_v28 = vld [vmem:[%s2768_s26 + $0x98] sm:$0xff]   ;;  %v2435_v29 = vld [vmem:[%s2775_s12 + $0x34] ss:$12 sps:$4 sm:$0xff]   ;;  %v2442_v34 = vld [vmem:[%s2768_s26 + $0xa8] sm:$0xff]  }
  0x67   : > { %2148 = vmatpush3.bf16.msra.mxu0 %v2408_v6  ;;  %2337 = vmatpush3.bf16.msra.mxu1 %v2408_v6  ;;  %v2437_v30 = vld [vmem:[%s2775_s12 + $0x154] ss:$12 sps:$4 sm:$0xff]   ;;  %v2439_v32 = vld [vmem:[%s2775_s12 + $0x30] ss:$12 sps:$4 sm:$0xff]   ;;  %v2443_v35 = vld [vmem:[%s2775_s12 + $0x4c] ss:$12 sps:$4 sm:$0xff]  }
  0x68   : > { %2149 = vmatprep.subr.bf16.mxu0 %v2409_v7  ;;  %2330 = vmatprep.subr.bf16.mxu1 %v2409_v7  ;;  %v2441_v31 = vld [vmem:[%s2768_s26 + $0xa0] sm:$0xff]   ;;  %v2440_v33 = vld [vmem:[%s2775_s12 + $0x150] ss:$12 sps:$4 sm:$0xff]   ;;  %v2445_v36 = vld [vmem:[%s2775_s12 + $0x16c] ss:$12 sps:$4 sm:$0xff]  }
  0x69   : > { %v2449_v37 = vld [vmem:[%s2768_s26 + $0xb0] sm:$0xff]   ;;  %v2450_v41 = vld [vmem:[%s2768_s26 + $0xb8] sm:$0xff]   ;;  %v2454_v43 = vld [vmem:[%s2775_s12 + $0x60] ss:$12 sps:$4 sm:$0xff]  }
  0x6a   : > { %v2447_v38 = vld [vmem:[%s2775_s12 + $0x48] ss:$12 sps:$4 sm:$0xff]   ;;  %v2451_v40 = vld [vmem:[%s2775_s12 + $0x64] ss:$12 sps:$4 sm:$0xff]   ;;  %v2455_v44 = vld [vmem:[%s2775_s12 + $0x20] ss:$12 sps:$4 sm:$0xff]  }
  0x6b   : > { %2150 = vmatpush3.bf16.msra.mxu0 %v2410_v8  ;;  %2338 = vmatpush3.bf16.msra.mxu1 %v2410_v8  ;;  %v2448_v39 = vld [vmem:[%s2775_s12 + $0x168] ss:$12 sps:$4 sm:$0xff]   ;;  %v2458_v46 = vld [vmem:[%s2775_s12 + $0x38] ss:$12 sps:$4 sm:$0xff]   ;;  %v2460_v48 = vld [vmem:[%s2775_s12 + $0x50] ss:$12 sps:$4 sm:$0xff]  }
  0x6c   : > { %2151 = vmatprep.subr.bf16.mxu0 %v2411_v9  ;;  %2331 = vmatprep.subr.bf16.mxu1 %v2411_v9  ;;  %v2453_v42 = vld [vmem:[%s2775_s12 + $0x8] ss:$12 sps:$4 sm:$0xff]   ;;  %v2459_v47 = vld [vmem:[%s2775_s12 + $0x78] ss:$12 sps:$4 sm:$0xff]   ;;  %v2464_v51 = vld [vmem:[%s2775_s12 + $0x90] ss:$12 sps:$4 sm:$0xff]  }
  0x6d   : > { %v2456_v45 = vld [vmem:[%s2775_s12 + $0x7c] ss:$12 sps:$4 sm:$0xff]   ;;  %v2461_v49 = vld [vmem:[%s2775_s12 + $0x94] ss:$12 sps:$4 sm:$0xff]   ;;  %v2466_v53 = vld [vmem:[%s2775_s12 + $0xac] ss:$12 sps:$4 sm:$0xff]  }
  0x6e   : > { %v2463_v50 = vld [vmem:[%s2775_s12 + $0x68] ss:$12 sps:$4 sm:$0xff]   ;;  %v2465_v52 = vld [vmem:[%s2775_s12 + $0x80] ss:$12 sps:$4 sm:$0xff]   ;;  %v2468_v54 = vld [vmem:[%s2775_s12 + $0x98] ss:$12 sps:$4 sm:$0xff]  }
  0x6f   : > { %2152 = vmatpush3.bf16.msra.mxu0 %v2412_v10  ;;  %2339 = vmatpush3.bf16.msra.mxu1 %v2412_v10  ;;  %v2469_v55 = vld [vmem:[%s2775_s12 + $0xa8] ss:$12 sps:$4 sm:$0xff]   ;;  %v2470_v56 = vld [vmem:[%s2775_s12 + $0xb0] ss:$12 sps:$4 sm:$0xff]   ;;  %v2474_v59 = vld [vmem:[%s2775_s12 + $0xc0] ss:$12 sps:$4 sm:$0xff]  }
  0x70   : > { %2153 = vmatprep.subr.bf16.mxu0 %v2413_v11  ;;  %2332 = vmatprep.subr.bf16.mxu1 %v2413_v11  ;;  %v2471_v57 = vld [vmem:[%s2775_s12 + $0xc4] ss:$12 sps:$4 sm:$0xff]   ;;  %v2473_v58 = vld [vmem:[%s2775_s12 + $0xc8] ss:$12 sps:$4 sm:$0xff]   ;;  %v2475_v60 = vld [vmem:[%s2775_s12 + $0xe0] ss:$12 sps:$4 sm:$0xff]  }
  0x71   : > { %v2476_v61 = vld [vmem:[%s2775_s12 + $0xdc] ss:$12 sps:$4 sm:$0xff]   ;;  %v2478_v62 = vld [vmem:[%s2775_s12 + $0xf8] ss:$12 sps:$4 sm:$0xff]   ;;  %v2481_v1 = vld [vmem:[%s2775_s12 + $0xf4] ss:$12 sps:$4 sm:$0xff]  }
  0x72   : > { %v2479_v63 = vld [vmem:[%s2775_s12 + $0xd8] ss:$12 sps:$4 sm:$0xff]   ;;  %v2480_v0 = vld [vmem:[%s2775_s12 + $0x110] ss:$12 sps:$4 sm:$0xff]   ;;  %v2483_v2 = vld [vmem:[%s2775_s12 + $0x128] ss:$12 sps:$4 sm:$0xff]  }
  0x73   : > { %2154 = vmatpush3.bf16.msra.mxu0 %v2414_v14  ;;  %2340 = vmatpush3.bf16.msra.mxu1 %v2414_v14  ;;  %v2484_v3 = vld [vmem:[%s2775_s12 + $0xf0] ss:$12 sps:$4 sm:$0xff]   ;;  %v2485_v4 = vld [vmem:[%s2775_s12 + $0x140] ss:$12 sps:$4 sm:$0xff]   ;;  %v2488_v6 = vld [vmem:[%s2775_s12 + $0x158] ss:$12 sps:$4 sm:$0xff]  }
  0x74   : > { %2155 = vmatprep.subr.bf16.mxu0 %v2415_v15  ;;  %2333 = vmatprep.subr.bf16.mxu1 %v2415_v15  ;;  %v2486_v5 = vld [vmem:[%s2775_s12 + $0x10c] ss:$12 sps:$4 sm:$0xff]   ;;  %v2489_v7 = vld [vmem:[%s2775_s12 + $0x108] ss:$12 sps:$4 sm:$0xff]   ;;  %v2490_v8 = vld [vmem:[%s2775_s12 + $0x170] ss:$12 sps:$4 sm:$0xff]  }
  0x77   : > { %2156 = vmatpush3.bf16.msra.mxu0 %v2416_v16  ;;  %2341 = vmatpush3.bf16.msra.mxu1 %v2416_v16 }
  0x78   : > { %2157 = vmatprep.subr.bf16.mxu0 %v2417_v17  ;;  %2334 = vmatprep.subr.bf16.mxu1 %v2417_v17 }
  0x7b   : > { %2158 = vmatpush3.bf16.msra.mxu0 %v2418_v18  ;;  %2342 = vmatpush3.bf16.msra.mxu1 %v2418_v18 }
  0x7c   : > { %2279 = vmatprep.subr.bf16.mxu1 %v2425_v19 }
  0x7e   : > { %1019 = vmatmul.mubr.bf16.vlgmr.msra.gmra.mrb[0].mxu0 %v2419_v20  ;;  %1115 = vmatmul.mubr.bf16.vlgmr.msra.gmra.mrb[0].mxu1 %v2422_v21 }
  0x7f   : > { %2280 = vmatpush3.bf16.msra.mxu1 %v2425_v19  ;;  %1026 = vmatprep.mubr.bf16.mxu0 %v2427_v22 }
  0x80   : > { %2281 = vmatprep.subr.bf16.mxu1 %v2426_v23  ;;  %1122 = vmatprep.mubr.bf16.mxu1 %v2429_v24 }
  0x83   : > { %2282 = vmatpush3.bf16.msra.mxu1 %v2426_v23 }
  0x84   : > { %2283 = vmatprep.subr.bf16.mxu1 %v2433_v26 }
  0x86   : > { %1027 = vmatmul.mubr.bf16.gmra.mrb[4].mxu0 %v2431_v25  ;;  %1123 = vmatmul.mubr.bf16.gmra.mrb[4].mxu1 %v2432_v27 }
  0x87   : > { %2284 = vmatpush3.bf16.msra.mxu1 %v2433_v26  ;;  %1034 = vmatprep.mubr.bf16.mxu0 %v2435_v29 }
  0x88   : > { %2285 = vmatprep.subr.bf16.mxu1 %v2434_v28  ;;  %1130 = vmatprep.mubr.bf16.mxu1 %v2437_v30 }
  0x8b   : > { %2286 = vmatpush3.bf16.msra.mxu1 %v2434_v28 }
  0x8c   : > { %2287 = vmatprep.subr.bf16.mxu1 %v2441_v31 }
  0x8e   : > { %1035 = vmatmul.mubr.bf16.gmra.mrb[8].mxu0 %v2439_v32  ;;  %1131 = vmatmul.mubr.bf16.gmra.mrb[8].mxu1 %v2440_v33 }
  0x8f   : > { %2288 = vmatpush3.bf16.msra.mxu1 %v2441_v31  ;;  %1042 = vmatprep.mubr.bf16.mxu0 %v2443_v35 }
  0x90   : > { %2289 = vmatprep.subr.bf16.mxu1 %v2442_v34  ;;  %1138 = vmatprep.mubr.bf16.mxu1 %v2445_v36 }
  0x93   : > { %2290 = vmatpush3.bf16.msra.mxu1 %v2442_v34 }
  0x94   : > { %2291 = vmatprep.subr.bf16.mxu1 %v2449_v37 }
  0x96   : > { %1043 = vmatmul.mubr.bf16.gmra.mrb[12].mxu0 %v2447_v38  ;;  %1139 = vmatmul.mubr.bf16.gmra.mrb[12].mxu1 %v2448_v39 }
  0x97   : > { %2292 = vmatpush3.bf16.msra.mxu1 %v2449_v37  ;;  %1050 = vmatprep.mubr.bf16.mxu0 %v2451_v40 }
  0x98   : > { %2293 = vmatprep.subr.bf16.mxu1 %v2450_v41  ;;  %2295 = vmatprep.mubr.bf16.mxu1 %v2453_v42 }
  0x9b   : > { %2294 = vmatpush3.bf16.msra.mxu1 %v2450_v41 }
  0x9e   : > { %1051 = vmatmul.mubr.bf16.gmra.mrb[16].mxu0 %v2454_v43  ;;  %2296 = vmatmul.mubr.bf16.vlgmr.msra.gmra.mrb[16].mxu1 %v2455_v44 }
  0x9f   : > { %1058 = vmatprep.mubr.bf16.mxu0 %v2456_v45  ;;  %2299 = vmatprep.mubr.bf16.mxu1 %v2458_v46 }
  0xa6   : > { %1059 = vmatmul.mubr.bf16.gmra.mrb[20].mxu0 %v2459_v47  ;;  %2300 = vmatmul.mubr.bf16.gmra.mrb[20].mxu1 %v2460_v48 }
  0xa7   : > { %1066 = vmatprep.mubr.bf16.mxu0 %v2461_v49  ;;  %2303 = vmatprep.mubr.bf16.mxu1 %v2463_v50 }
  0xae   : > { %1067 = vmatmul.mubr.bf16.gmra.mrb[24].mxu0 %v2464_v51  ;;  %2304 = vmatmul.mubr.bf16.gmra.mrb[24].mxu1 %v2465_v52 }
  0xaf   : > { %1074 = vmatprep.mubr.bf16.mxu0 %v2466_v53  ;;  %2307 = vmatprep.mubr.bf16.mxu1 %v2468_v54 }
  0xb6   : > { %1075 = vmatmul.mubr.bf16.gmra.mrb[28].mxu0 %v2469_v55  ;;  %2308 = vmatmul.mubr.bf16.gmra.mrb[28].mxu1 %v2470_v56 }
  0xb7   : > { %1082 = vmatprep.mubr.bf16.mxu0 %v2471_v57  ;;  %2311 = vmatprep.mubr.bf16.mxu1 %v2473_v58  ;;  %v444_v58 = vld [vmem:[#allocation2 + $0x10] sm:$0xff] }
  0xbe   : > { %1083 = vmatmul.mubr.bf16.gmra.mrb[32].mxu0 %v2474_v59  ;;  %2312 = vmatmul.mubr.bf16.gmra.mrb[32].mxu1 %v2475_v60 }
  0xbf   : > { %1090 = vmatprep.mubr.bf16.mxu0 %v2476_v61  ;;  %2315 = vmatprep.mubr.bf16.mxu1 %v2478_v62  ;;  %v442_v62 = vld [vmem:[#allocation2] sm:$0xff] }
  0xc6   : > { %1091 = vmatmul.mubr.bf16.gmra.mrb[36].mxu0 %v2479_v63  ;;  %2316 = vmatmul.mubr.bf16.gmra.mrb[36].mxu1 %v2480_v0 }
  0xc7   : > { %1098 = vmatprep.mubr.bf16.mxu0 %v2481_v1  ;;  %2319 = vmatprep.mubr.bf16.mxu1 %v2483_v2 }
  0xce   : > { %1099 = vmatmul.mubr.bf16.gmra.mrb[40].mxu0 %v2484_v3  ;;  %2320 = vmatmul.mubr.bf16.gmra.mrb[40].mxu1 %v2485_v4  ;;  %v445_v3 = vld [vmem:[#allocation2 + $0x18] sm:$0xff] }
  0xcf   : > { %1106 = vmatprep.mubr.bf16.mxu0 %v2486_v5  ;;  %2323 = vmatprep.mubr.bf16.mxu1 %v2488_v6 }
  0xd6   : > { %1107 = vmatmul.mubr.bf16.gmra.mrb[44].mxu0 %v2489_v7  ;;  %2324 = vmatmul.mubr.bf16.gmra.mrb[44].mxu1 %v2490_v8  ;;  %v443_v8 = vld [vmem:[#allocation2 + $0x8] sm:$0xff] }
 0x151   : > { %v2159_v9 = vpop.f32.mrb[0].mxu0  ;;  %v2231_v10 = vpop.f32.mrb[0].mxu1 }
 0x152   : > { %v2160_v11 = vpop.f32.mrb[1].mxu0  ;;  %v2232_v12 = vpop.f32.mrb[1].mxu1 }
 0x153   : > { %v2161_v13 = vadd.f32 %v2160_v11, %v2159_v9  ;;  %v2850_v14 = vadd.f32 %v2232_v12, %v2231_v10  ;;  %v2162_v15 = vpop.f32.mrb[2].mxu0  ;;  %v2234_v16 = vpop.f32.mrb[2].mxu1 }
 0x154   : > { %v2163_v17 = vpop.f32.mrb[3].mxu0  ;;  %v2235_v18 = vpop.f32.mrb[3].mxu1 }
 0x155   : > { %v2164_v19 = vadd.f32 %v2163_v17, %v2162_v15  ;;  %v2852_v20 = vadd.f32 %v2235_v18, %v2234_v16  ;;  %v448_v18 = vld [vmem:[#allocation2 + $0x30] sm:$0xff] }
 0x159   : > { %v2165_v21 = vpop.f32.mrb[4].mxu0  ;;  %v2237_v22 = vpop.f32.mrb[4].mxu1 }
 0x15a   : > { %v2166_v23 = vpop.f32.mrb[5].mxu0  ;;  %v2238_v24 = vpop.f32.mrb[5].mxu1 }
 0x15b   : > { %v2167_v25 = vadd.f32 %v2166_v23, %v2165_v21  ;;  %v2854_v26 = vadd.f32 %v2238_v24, %v2237_v22  ;;  %v2168_v27 = vpop.f32.mrb[6].mxu0  ;;  %v2240_v28 = vpop.f32.mrb[6].mxu1  ;;  %v446_v23 = vld [vmem:[#allocation2 + $0x20] sm:$0xff] }
 0x15c   : > { %v2169_v29 = vpop.f32.mrb[7].mxu0  ;;  %v2241_v30 = vpop.f32.mrb[7].mxu1 }
 0x15d   : > { %v2170_v31 = vadd.f32 %v2169_v29, %v2168_v27  ;;  %v2856_v32 = vadd.f32 %v2241_v30, %v2240_v28  ;;  %v449_v29 = vld [vmem:[#allocation2 + $0x38] sm:$0xff] }
 0x161   : > { %v2171_v33 = vpop.f32.mrb[8].mxu0  ;;  %v2243_v34 = vpop.f32.mrb[8].mxu1 }
 0x162   : > { %v2172_v35 = vpop.f32.mrb[9].mxu0  ;;  %v2244_v36 = vpop.f32.mrb[9].mxu1 }
 0x163   : > { %v2173_v37 = vadd.f32 %v2172_v35, %v2171_v33  ;;  %v2858_v38 = vadd.f32 %v2244_v36, %v2243_v34  ;;  %v2174_v39 = vpop.f32.mrb[10].mxu0  ;;  %v2246_v40 = vpop.f32.mrb[10].mxu1  ;;  %v447_v34 = vld [vmem:[#allocation2 + $0x28] sm:$0xff] }
 0x164   : > { %v2175_v41 = vpop.f32.mrb[11].mxu0  ;;  %v2247_v42 = vpop.f32.mrb[11].mxu1 }
 0x165   : > { %v2176_v43 = vadd.f32 %v2175_v41, %v2174_v39  ;;  %v2860_v44 = vadd.f32 %v2247_v42, %v2246_v40 }
 0x169   : > { %v2177_v45 = vpop.f32.mrb[12].mxu0  ;;  %v2249_v46 = vpop.f32.mrb[12].mxu1 }
 0x16a   : > { %v2178_v47 = vpop.f32.mrb[13].mxu0  ;;  %v2250_v48 = vpop.f32.mrb[13].mxu1 }
 0x16b   : > { %v2179_v49 = vadd.f32 %v2178_v47, %v2177_v45  ;;  %v2862_v50 = vadd.f32 %v2250_v48, %v2249_v46  ;;  %v2180_v51 = vpop.f32.mrb[14].mxu0  ;;  %v2252_v52 = vpop.f32.mrb[14].mxu1  ;;  %v452_v46 = vld [vmem:[#allocation2 + $0x50] sm:$0xff] }
 0x16c   : > { %v2181_v53 = vpop.f32.mrb[15].mxu0  ;;  %v2253_v54 = vpop.f32.mrb[15].mxu1 }
 0x16d   : > { %v2182_v55 = vadd.f32 %v2181_v53, %v2180_v51  ;;  %v2864_v56 = vadd.f32 %v2253_v54, %v2252_v52 }
 0x171   : > { %v2183_v57 = vpop.f32.mrb[16].mxu0  ;;  %v2297_v59 = vpop.f32.mrb[16].mxu1 }
 0x172   : > { %v1190_v60 = vadd.f32 %v2297_v59, %v2167_v25  ;;  %v2184_v61 = vpop.f32.mrb[17].mxu0  ;;  %v1181_v63 = vpop.f32.mrb[17].mxu1 }
 0x173   : > { %v2185_v0 = vadd.f32 %v2184_v61, %v2183_v57  ;;  %v1182_v1 = vadd.f32 %v2161_v13, %v1181_v63  ;;  %v2186_v2 = vpop.f32.mrb[18].mxu0  ;;  %v2298_v4 = vpop.f32.mrb[18].mxu1 }
 0x174   : > { %v1310_v5 = vadd.f32 %v1190_v60, %v444_v58  ;;  %v1193_v6 = vadd.f32 %v2298_v4, %v2170_v31  ;;  %v2187_v7 = vpop.f32.mrb[19].mxu0  ;;  %v1184_v9 = vpop.f32.mrb[19].mxu1  ;;  %v451_v60 = vld [vmem:[#allocation2 + $0x48] sm:$0xff] }
 0x175   : > { %v1308_v10 = vadd.f32 %v1182_v1, %v442_v62  ;;  %v2188_v11 = vadd.f32 %v2187_v7, %v2186_v2  ;;  %v1185_v12 = vadd.f32 %v2164_v19, %v1184_v9 }
 0x176   : > { %1342 = vst [vmem:[#allocation2 + $0x10] sm:$0xff] %v1310_v5  ;;  %v1311_v15 = vadd.f32 %v1193_v6, %v445_v3  ;;  %v454_v6 = vld [vmem:[#allocation2 + $0x60] sm:$0xff] }
 0x177   : > { %1340 = vst [vmem:[#allocation2] sm:$0xff] %v1308_v10  ;;  %v1309_v16 = vadd.f32 %v1185_v12, %v443_v8 }
 0x178   : > { %1343 = vst [vmem:[#allocation2 + $0x18] sm:$0xff] %v1311_v15  ;;  %v456_v15 = vld [vmem:[#allocation2 + $0x70] sm:$0xff] }
 0x179   : > { %1341 = vst [vmem:[#allocation2 + $0x8] sm:$0xff] %v1309_v16  ;;  %v2189_v17 = vpop.f32.mrb[20].mxu0  ;;  %v2301_v13 = vpop.f32.mrb[20].mxu1 }
 0x17a   : > { %v1206_v21 = vadd.f32 %v2301_v13, %v2179_v49  ;;  %v2190_v22 = vpop.f32.mrb[21].mxu0  ;;  %v1197_v24 = vpop.f32.mrb[21].mxu1  ;;  %v450_v49 = vld [vmem:[#allocation2 + $0x40] sm:$0xff] }
 0x17b   : > { %v2191_v25 = vadd.f32 %v2190_v22, %v2189_v17  ;;  %v1198_v27 = vadd.f32 %v2173_v37, %v1197_v24  ;;  %v2192_v28 = vpop.f32.mrb[22].mxu0  ;;  %v2302_v30 = vpop.f32.mrb[22].mxu1  ;;  %v455_v17 = vld [vmem:[#allocation2 + $0x68] sm:$0xff] }
 0x17c   : > { %v1314_v31 = vadd.f32 %v1206_v21, %v448_v18  ;;  %v1209_v19 = vadd.f32 %v2302_v30, %v2182_v55  ;;  %v2193_v33 = vpop.f32.mrb[23].mxu0  ;;  %v1200_v35 = vpop.f32.mrb[23].mxu1  ;;  %v453_v55 = vld [vmem:[#allocation2 + $0x58] sm:$0xff] }
 0x17d   : > { %v1312_v36 = vadd.f32 %v1198_v27, %v446_v23  ;;  %v2194_v39 = vadd.f32 %v2193_v33, %v2192_v28  ;;  %v1201_v40 = vadd.f32 %v2176_v43, %v1200_v35  ;;  %v457_v23 = vld [vmem:[#allocation2 + $0x78] sm:$0xff] }
 0x17e   : > { %1346 = vst [vmem:[#allocation2 + $0x30] sm:$0xff] %v1314_v31  ;;  %v1315_v41 = vadd.f32 %v1209_v19, %v449_v29 }
 0x17f   : > { %1344 = vst [vmem:[#allocation2 + $0x20] sm:$0xff] %v1312_v36  ;;  %v1313_v42 = vadd.f32 %v1201_v40, %v447_v34  ;;  %v458_v36 = vld [vmem:[#allocation2 + $0x80] sm:$0xff] }
 0x180   : > { %1347 = vst [vmem:[#allocation2 + $0x38] sm:$0xff] %v1315_v41 }
 0x181   : > { %1345 = vst [vmem:[#allocation2 + $0x28] sm:$0xff] %v1313_v42  ;;  %v2195_v45 = vpop.f32.mrb[24].mxu0  ;;  %v2305_v37 = vpop.f32.mrb[24].mxu1 }
 0x182   : > { %v1222_v47 = vadd.f32 %v2305_v37, %v2191_v25  ;;  %v2196_v48 = vpop.f32.mrb[25].mxu0  ;;  %v1213_v51 = vpop.f32.mrb[25].mxu1 }
 0x183   : > { %v2197_v52 = vadd.f32 %v2196_v48, %v2195_v45  ;;  %v1214_v53 = vadd.f32 %v2185_v0, %v1213_v51  ;;  %v2198_v54 = vpop.f32.mrb[26].mxu0  ;;  %v2306_v57 = vpop.f32.mrb[26].mxu1  ;;  %v459_v45 = vld [vmem:[#allocation2 + $0x88] sm:$0xff] }
 0x184   : > { %v1318_v58 = vadd.f32 %v1222_v47, %v452_v46  ;;  %v1225_v43 = vadd.f32 %v2306_v57, %v2194_v39  ;;  %v2199_v59 = vpop.f32.mrb[27].mxu0  ;;  %v1216_v61 = vpop.f32.mrb[27].mxu1  ;;  %v460_v57 = vld [vmem:[#allocation2 + $0x90] sm:$0xff] }
 0x185   : > { %v1316_v62 = vadd.f32 %v1214_v53, %v450_v49  ;;  %v2200_v63 = vadd.f32 %v2199_v59, %v2198_v54  ;;  %v1217_v1 = vadd.f32 %v2188_v11, %v1216_v61  ;;  %v461_v61 = vld [vmem:[#allocation2 + $0x98] sm:$0xff] }
 0x186   : > { %1350 = vst [vmem:[#allocation2 + $0x50] sm:$0xff] %v1318_v58  ;;  %v1319_v2 = vadd.f32 %v1225_v43, %v453_v55 }
 0x187   : > { %1348 = vst [vmem:[#allocation2 + $0x40] sm:$0xff] %v1316_v62  ;;  %v1317_v3 = vadd.f32 %v1217_v1, %v451_v60 }
 0x188   : > { %1351 = vst [vmem:[#allocation2 + $0x58] sm:$0xff] %v1319_v2 }
 0x189   : > { %1349 = vst [vmem:[#allocation2 + $0x48] sm:$0xff] %v1317_v3  ;;  %v2201_v4 = vpop.f32.mrb[28].mxu0  ;;  %v2309_v5 = vpop.f32.mrb[28].mxu1  ;;  %v468_v3 = vld [vmem:[#allocation2 + $0xd0] sm:$0xff] }
 0x18a   : > { %v2202_v0 = vpop.f32.mrb[29].mxu0  ;;  %v1229_v7 = vpop.f32.mrb[29].mxu1 }
 0x18b   : > { %v2203_v8 = vadd.f32 %v2202_v0, %v2201_v4  ;;  %v1230_v9 = vadd.f32 %v2197_v52, %v1229_v7  ;;  %v2204_v10 = vpop.f32.mrb[30].mxu0  ;;  %v2310_v12 = vpop.f32.mrb[30].mxu1 }
 0x18c   : > { %v2205_v16 = vpop.f32.mrb[31].mxu0  ;;  %v1232_v18 = vpop.f32.mrb[31].mxu1 }
 0x18d   : > { %v1238_v11 = vadd.f32 %v2309_v5, %v2203_v8  ;;  %v1320_v13 = vadd.f32 %v1230_v9, %v454_v6  ;;  %v2206_v21 = vadd.f32 %v2205_v16, %v2204_v10  ;;  %v1233_v22 = vadd.f32 %v2200_v63, %v1232_v18  ;;  %v466_v6 = vld [vmem:[#allocation2 + $0xc0] sm:$0xff] }
 0x18f   : > { %v1322_v24 = vadd.f32 %v1238_v11, %v456_v15  ;;  %1352 = vst [vmem:[#allocation2 + $0x60] sm:$0xff] %v1320_v13  ;;  %v1241_v25 = vadd.f32 %v2310_v12, %v2206_v21  ;;  %v1321_v27 = vadd.f32 %v1233_v22, %v455_v17  ;;  %v469_v12 = vld [vmem:[#allocation2 + $0xd8] sm:$0xff]  ;;  %v462_v17 = vld [vmem:[#allocation2 + $0xa0] sm:$0xff]  ;;  %v467_v13 = vld [vmem:[#allocation2 + $0xc8] sm:$0xff] }
 0x191   : > { %1354 = vst [vmem:[#allocation2 + $0x70] sm:$0xff] %v1322_v24  ;;  %v1323_v28 = vadd.f32 %v1241_v25, %v457_v23  ;;  %1353 = vst [vmem:[#allocation2 + $0x68] sm:$0xff] %v1321_v27  ;;  %v2207_v29 = vpop.f32.mrb[32].mxu0  ;;  %v2313_v30 = vpop.f32.mrb[32].mxu1  ;;  %v463_v27 = vld [vmem:[#allocation2 + $0xa8] sm:$0xff] }
 0x192   : > { %v2208_v31 = vpop.f32.mrb[33].mxu0  ;;  %v1245_v19 = vpop.f32.mrb[33].mxu1 }
 0x193   : > { %1355 = vst [vmem:[#allocation2 + $0x78] sm:$0xff] %v1323_v28  ;;  %v2209_v33 = vadd.f32 %v2208_v31, %v2207_v29  ;;  %v2210_v34 = vpop.f32.mrb[34].mxu0  ;;  %v2314_v35 = vpop.f32.mrb[34].mxu1  ;;  %v472_v31 = vld [vmem:[#allocation2 + $0xf0] sm:$0xff] }
 0x194   : > { %v2211_v39 = vpop.f32.mrb[35].mxu0  ;;  %v1248_v40 = vpop.f32.mrb[35].mxu1 }
 0x195   : > { %v1246_v41 = vadd.f32 %v2209_v33, %v1245_v19  ;;  %v2212_v42 = vadd.f32 %v2211_v39, %v2210_v34 }
 0x197   : > { %v1324_v46 = vadd.f32 %v1246_v41, %v458_v36  ;;  %v1249_v37 = vadd.f32 %v2212_v42, %v1248_v40  ;;  %v473_v41 = vld [vmem:[#allocation2 + $0xf8] sm:$0xff] }
 0x199   : > { %1356 = vst [vmem:[#allocation2 + $0x80] sm:$0xff] %v1324_v46  ;;  %v1325_v47 = vadd.f32 %v1249_v37, %v459_v45  ;;  %v2213_v48 = vpop.f32.mrb[36].mxu0  ;;  %v2866_v49 = vpop.f32.mrb[36].mxu1  ;;  %v464_v46 = vld [vmem:[#allocation2 + $0xb0] sm:$0xff] }
 0x19a   : > { %v2214_v51 = vpop.f32.mrb[37].mxu0  ;;  %v1261_v52 = vpop.f32.mrb[37].mxu1 }
 0x19b   : > { %1357 = vst [vmem:[#allocation2 + $0x88] sm:$0xff] %v1325_v47  ;;  %v2215_v53 = vadd.f32 %v2214_v51, %v2213_v48  ;;  %v2216_v54 = vpop.f32.mrb[38].mxu0  ;;  %v2868_v55 = vpop.f32.mrb[38].mxu1  ;;  %v471_v48 = vld [vmem:[#allocation2 + $0xe8] sm:$0xff] }
 0x19c   : > { %v2217_v58 = vpop.f32.mrb[39].mxu0  ;;  %v1264_v43 = vpop.f32.mrb[39].mxu1 }
 0x19d   : > { %v1254_v59 = vadd.f32 %v2313_v30, %v2215_v53  ;;  %v2218_v60 = vadd.f32 %v2217_v58, %v2216_v54  ;;  %v465_v58 = vld [vmem:[#allocation2 + $0xb8] sm:$0xff] }
 0x19f   : > { %v1326_v62 = vadd.f32 %v1254_v59, %v460_v57  ;;  %v1257_v63 = vadd.f32 %v2314_v35, %v2218_v60  ;;  %v470_v35 = vld [vmem:[#allocation2 + $0xe0] sm:$0xff]  ;;  %v1377_v60 = vld [vmem:[#allocation2 + $0x8] sm:$0xff] (!%p1978_p13) }
 0x1a1   : > { %1358 = vst [vmem:[#allocation2 + $0x90] sm:$0xff] %v1326_v62  ;;  %v1327_v1 = vadd.f32 %v1257_v63, %v461_v61  ;;  %v2219_v2 = vpop.f32.mrb[40].mxu0  ;;  %v2321_v4 = vpop.f32.mrb[40].mxu1 }
 0x1a2   : > { %v1286_v5 = vadd.f32 %v2321_v4, %v2854_v26  ;;  %v2220_v0 = vpop.f32.mrb[41].mxu0  ;;  %v1277_v7 = vpop.f32.mrb[41].mxu1 }
 0x1a3   : > { %1359 = vst [vmem:[#allocation2 + $0x98] sm:$0xff] %v1327_v1  ;;  %v2221_v8 = vadd.f32 %v2220_v0, %v2219_v2  ;;  %v1278_v9 = vadd.f32 %v2850_v14, %v1277_v7  ;;  %v2222_v10 = vpop.f32.mrb[42].mxu0  ;;  %v2322_v15 = vpop.f32.mrb[42].mxu1  ;;  %v1606_v1 = vmul.f32 (!%p1978_p13), %v1377_v60, %v1377_v60  ;;  %v1380_v2 = vld [vmem:[#allocation2 + $0x20] sm:$0xff] (!%p1978_p13) }
 0x1a4   : > { %v1334_v16 = vadd.f32 %v1286_v5, %v468_v3  ;;  %v1289_v18 = vadd.f32 %v2322_v15, %v2856_v32  ;;  %v2223_v11 = vpop.f32.mrb[43].mxu0  ;;  %v1280_v21 = vpop.f32.mrb[43].mxu1  ;;  %v1381_v3 = vld [vmem:[#allocation2 + $0x28] sm:$0xff] (!%p1978_p13) }
 0x1a5   : > { %v1262_v22 = vadd.f32 %v2221_v8, %v1261_v52  ;;  %v1332_v23 = vadd.f32 %v1278_v9, %v466_v6  ;;  %v2224_v26 = vadd.f32 %v2223_v11, %v2222_v10  ;;  %v1281_v24 = vadd.f32 %v2852_v20, %v1280_v21  ;;  %v1382_v6 = vld [vmem:[#allocation2 + $0x30] sm:$0xff] (!%p1978_p13)  ;;  %v1383_v10 = vld [vmem:[#allocation2 + $0x38] sm:$0xff] (!%p1978_p13)  ;;  %v2882_v15 = vld [vmem:[#allocation2 + $0x48] sm:$0xff] (!%p1978_p13) }
 0x1a6   : > { %1366 = vst [vmem:[#allocation2 + $0xd0] sm:$0xff] %v1334_v16  ;;  %v1335_v25 = vadd.f32 %v1289_v18, %v469_v12  ;;  %v2061_v0 = vpack.c.bf16 (!%p1978_p13), %v1381_v3, %v1380_v2  ;;  %v1384_v12 = vld [vmem:[#allocation2 + $0x40] sm:$0xff] (!%p1978_p13)  ;;  %v2066_v16 = vpack.c.bf16 (!%p1978_p13), %v1383_v10, %v1382_v6  ;;  %v2887_v18 = vld [vmem:[#allocation2 + $0x50] sm:$0xff] (!%p1978_p13)  ;;  %v1609_v21 = vmul.f32 (!%p1978_p13), %v1380_v2, %v1380_v2 }
 0x1a7   : > { %v1328_v28 = vadd.f32 %v1262_v22, %v462_v17  ;;  %1364 = vst [vmem:[#allocation2 + $0xc0] sm:$0xff] %v1332_v23  ;;  %v1265_v14 = vadd.f32 %v2224_v26, %v1264_v43  ;;  %v1333_v29 = vadd.f32 %v1281_v24, %v467_v13  ;;  %v2071_v17 = vpack.c.bf16 (!%p1978_p13), %v2882_v15, %v1384_v12  ;;  %v2889_v22 = vld [vmem:[#allocation2 + $0x58] sm:$0xff] (!%p1978_p13)  ;;  %v2891_v23 = vld [vmem:[#allocation2 + $0x60] sm:$0xff] (!%p1978_p13)  ;;  %v2893_v26 = vld [vmem:[#allocation2 + $0x68] sm:$0xff] (!%p1978_p13) }
 0x1a8   : > { %1367 = vst [vmem:[#allocation2 + $0xd8] sm:$0xff] %v1335_v25  ;;  %2129 = vst [vmem:[%s2773_s30 + $0x10] sm:$0xff] (!%p1978_p13), %v2061_v0   ;;  %v2076_v24 = vpack.c.bf16 (!%p1978_p13), %v2889_v22, %v2887_v18  ;;  %v2081_v25 = vpack.c.bf16 (!%p1978_p13), %v2893_v26, %v2891_v23 }
 0x1a9   : > { %1360 = vst [vmem:[#allocation2 + $0xa0] sm:$0xff] %v1328_v28  ;;  %v1329_v30 = vadd.f32 %v1265_v14, %v463_v27  ;;  %1365 = vst [vmem:[#allocation2 + $0xc8] sm:$0xff] %v1333_v29  ;;  %v2225_v32 = vpop.f32.mrb[44].mxu0  ;;  %v2325_v19 = vpop.f32.mrb[44].mxu1  ;;  %v2901_v27 = vld [vmem:[#allocation2 + $0x70] sm:$0xff] (!%p1978_p13)  ;;  %v1610_v29 = vmul.f32 (!%p1978_p13), %v1381_v3, %v1381_v3 }
 0x1aa   : > { %v1302_v33 = vadd.f32 %v2325_v19, %v2862_v50  ;;  %v2226_v34 = vpop.f32.mrb[45].mxu0  ;;  %v1293_v36 = vpop.f32.mrb[45].mxu1  ;;  %2130 = vst [vmem:[%s2773_s30 + $0x18] sm:$0xff] (!%p1978_p13), %v2066_v16   ;;  %2131 = vst [vmem:[%s2773_s30 + $0x20] sm:$0xff] (!%p1978_p13), %v2071_v17   ;;  %v1618_v16 = vmul.f32 (!%p1978_p13), %v2893_v26, %v2893_v26 }
 0x1ab   : > { %1361 = vst [vmem:[#allocation2 + $0xa8] sm:$0xff] %v1329_v30  ;;  %v2227_v20 = vadd.f32 %v2226_v34, %v2225_v32  ;;  %v1294_v39 = vadd.f32 %v2858_v38, %v1293_v36  ;;  %v2228_v40 = vpop.f32.mrb[46].mxu0  ;;  %v2326_v42 = vpop.f32.mrb[46].mxu1  ;;  %v2903_v30 = vld [vmem:[#allocation2 + $0x78] sm:$0xff] (!%p1978_p13)  ;;  %v2905_v32 = vld [vmem:[#allocation2 + $0x80] sm:$0xff] (!%p1978_p13)  ;;  %2132 = vst [vmem:[%s2773_s30 + $0x28] sm:$0xff] (!%p1978_p13), %v2076_v24  }
 0x1ac   : > { %v1338_v45 = vadd.f32 %v1302_v33, %v472_v31  ;;  %v1305_v37 = vadd.f32 %v2326_v42, %v2864_v56  ;;  %v2229_v47 = vpop.f32.mrb[47].mxu0  ;;  %v1296_v51 = vpop.f32.mrb[47].mxu1  ;;  %v2907_v31 = vld [vmem:[#allocation2 + $0x88] sm:$0xff] (!%p1978_p13)  ;;  %2133 = vst [vmem:[%s2773_s30 + $0x30] sm:$0xff] (!%p1978_p13), %v2081_v25   ;;  %v2086_v19 = vpack.c.bf16 (!%p1978_p13), %v2903_v30, %v2901_v27  ;;  %v2915_v34 = vld [vmem:[#allocation2 + $0x90] sm:$0xff] (!%p1978_p13) }
 0x1ad   : > { %v1270_v52 = vadd.f32 %v2866_v49, %v2227_v20  ;;  %v1336_v50 = vadd.f32 %v1294_v39, %v470_v35  ;;  %v2230_v53 = vadd.f32 %v2229_v47, %v2228_v40  ;;  %v1297_v54 = vadd.f32 %v2860_v44, %v1296_v51  ;;  %1375 = sbr.rel (%p1978_p13) target bundleno = 520 (0x208), region = 62  ;;  %v1376_v49 = vld [vmem:[#allocation2] sm:$0xff] (!%p1978_p13)  ;;  %v1378_v44 = vld [vmem:[#allocation2 + $0x10] sm:$0xff] (!%p1978_p13)  ;;  %v2917_v39 = vld [vmem:[#allocation2 + $0x98] sm:$0xff] (!%p1978_p13) }
 0x1ae   : > { %1370 = vst [vmem:[#allocation2 + $0xf0] sm:$0xff] %v1338_v45  ;;  %v1339_v57 = vadd.f32 %v1305_v37, %v473_v41  ;;  %v2051_v61 = vpack.c.bf16 (!%p1978_p13), %v1377_v60, %v1376_v49  ;;  %v1568_v62 = vadd.f32 (!%p1978_p13), %v1377_v60, %v1376_v49  ;;  %v1605_v63 = vmul.f32 (!%p1978_p13), %v1376_v49, %v1376_v49 }
 0x1af   : > { %v1330_v38 = vadd.f32 %v1270_v52, %v464_v46  ;;  %1368 = vst [vmem:[#allocation2 + $0xe0] sm:$0xff] %v1336_v50  ;;  %v1273_v43 = vadd.f32 %v2868_v55, %v2230_v53  ;;  %v1337_v59 = vadd.f32 %v1297_v54, %v471_v48  ;;  %v1379_v55 = vld [vmem:[#allocation2 + $0x18] sm:$0xff] (!%p1978_p13)  ;;  %v1607_v5 = vmul.f32 (!%p1978_p13), %v1378_v44, %v1378_v44  ;;  %v2933_v52 = vld [vmem:[#allocation2 + $0xc0] sm:$0xff] (!%p1978_p13) }
 0x1b0   : > { %1371 = vst [vmem:[#allocation2 + $0xf8] sm:$0xff] %v1339_v57  ;;  %v2056_v4 = vpack.c.bf16 (!%p1978_p13), %v1379_v55, %v1378_v44  ;;  %2052 = vst [vmem:[%s2773_s30] sm:$0xff] (!%p1978_p13), %v2051_v61   ;;  %v1637_v7 = vadd.f32 (!%p1978_p13), %v1606_v1, %v1605_v63  ;;  %v1569_v8 = vadd.f32 (!%p1978_p13), %v1568_v62, %v1378_v44  ;;  %v2919_v40 = vld [vmem:[#allocation2 + $0xa0] sm:$0xff] (!%p1978_p13)  ;;  %v2935_v50 = vld [vmem:[#allocation2 + $0xc8] sm:$0xff] (!%p1978_p13) }
 0x1b1   : > { %1362 = vst [vmem:[#allocation2 + $0xb0] sm:$0xff] %v1330_v38  ;;  %v1331_v56 = vadd.f32 %v1273_v43, %v465_v58  ;;  %1369 = vst [vmem:[#allocation2 + $0xe8] sm:$0xff] %v1337_v59  ;;  %v1608_v9 = vmul.f32 (!%p1978_p13), %v1379_v55, %v1379_v55  ;;  %v2091_v33 = vpack.c.bf16 (!%p1978_p13), %v2907_v31, %v2905_v32  ;;  %v2943_v57 = vld [vmem:[#allocation2 + $0xd0] sm:$0xff] (!%p1978_p13)  ;;  %v2945_v59 = vld [vmem:[#allocation2 + $0xd8] sm:$0xff] (!%p1978_p13) }
 0x1b2   : > { %2128 = vst [vmem:[%s2773_s30 + $0x8] sm:$0xff] (!%p1978_p13), %v2056_v4   ;;  %v1570_v11 = vadd.f32 (!%p1978_p13), %v1569_v8, %v1379_v55  ;;  %v1638_v13 = vadd.f32 (!%p1978_p13), %v1637_v7, %v1607_v5  ;;  %v1611_v20 = vmul.f32 (!%p1978_p13), %v1382_v6, %v1382_v6  ;;  %v2921_v41 = vld [vmem:[#allocation2 + $0xa8] sm:$0xff] (!%p1978_p13)  ;;  %2134 = vst [vmem:[%s2773_s30 + $0x38] sm:$0xff] (!%p1978_p13), %v2086_v19  }
 0x1b3   : > { %1363 = vst [vmem:[#allocation2 + $0xb8] sm:$0xff] %v1331_v56  ;;  %2135 = vst [vmem:[%s2773_s30 + $0x40] sm:$0xff] (!%p1978_p13), %v2091_v33   ;;  %v2096_v42 = vpack.c.bf16 (!%p1978_p13), %v2917_v39, %v2915_v34  ;;  %v2101_v45 = vpack.c.bf16 (!%p1978_p13), %v2921_v41, %v2919_v40  ;;  %v1612_v48 = vmul.f32 (!%p1978_p13), %v1383_v10, %v1383_v10 }
 0x1b4   : > { %v1639_v28 = vadd.f32 %v1638_v13, %v1608_v9  ;;  %v1571_v14 = vadd.f32 %v1570_v11, %v1380_v2  ;;  %v2111_v54 = vpack.c.bf16 %v2935_v50, %v2933_v52  ;;  %v1613_v43 = vmul.f32 %v1384_v12, %v1384_v12 }
 0x1b5   : > { %2136 = vst [vmem:[%s2773_s30 + $0x48] sm:$0xff] %v2096_v42   ;;  %2137 = vst [vmem:[%s2773_s30 + $0x50] sm:$0xff] %v2101_v45   ;;  %v2116_v60 = vpack.c.bf16 %v2945_v59, %v2943_v57  ;;  %v1614_v63 = vmul.f32 %v2882_v15, %v2882_v15  ;;  %v2959_v1 = vld [vmem:[#allocation2 + $0xf0] sm:$0xff]  ;;  %v1615_v5 = vmul.f32 %v2887_v18, %v2887_v18 }
 0x1b6   : > { %v1572_v35 = vadd.f32 %v1571_v14, %v1381_v3  ;;  %v1640_v36 = vadd.f32 %v1639_v28, %v1609_v21  ;;  %v2947_v56 = vld [vmem:[#allocation2 + $0xe0] sm:$0xff]  ;;  %2139 = vst [vmem:[%s2773_s30 + $0x60] sm:$0xff] %v2111_v54   ;;  %v1616_v7 = vmul.f32 %v2889_v22, %v2889_v22 }
 0x1b7   : > { %v2961_v55 = vld [vmem:[#allocation2 + $0xf8] sm:$0xff]  ;;  %2140 = vst [vmem:[%s2773_s30 + $0x68] sm:$0xff] %v2116_v60  }
 0x1b8   : > { %v2929_v46 = vld [vmem:[#allocation2 + $0xb0] sm:$0xff]  ;;  %v1641_v37 = vadd.f32 %v1640_v36, %v1610_v29  ;;  %v1573_v47 = vadd.f32 %v1572_v35, %v1382_v6  ;;  %v2949_v49 = vld [vmem:[#allocation2 + $0xe8] sm:$0xff]  ;;  %v2126_v2 = vpack.c.bf16 %v2961_v55, %v2959_v1 }
 0x1b9   : > { %v2121_v44 = vpack.c.bf16 %v2949_v49, %v2947_v56 }
 0x1ba   : > { %v2931_v51 = vld [vmem:[#allocation2 + $0xb8] sm:$0xff]  ;;  %v1574_v58 = vadd.f32 %v1573_v47, %v1383_v10  ;;  %v1642_v38 = vadd.f32 %v1641_v37, %v1611_v20  ;;  %2142 = vst [vmem:[%s2773_s30 + $0x78] sm:$0xff] %v2126_v2   ;;  %v1617_v10 = vmul.f32 %v2891_v23, %v2891_v23 }
 0x1bb   : > { %v2106_v53 = vpack.c.bf16 %v2931_v51, %v2929_v46  ;;  %2141 = vst [vmem:[%s2773_s30 + $0x70] sm:$0xff] %v2121_v44  }
 0x1bc   : > { %v1643_v61 = vadd.f32 %v1642_v38, %v1612_v48  ;;  %v1575_v62 = vadd.f32 %v1574_v58, %v1384_v12 }
 0x1bd   : > { %2138 = vst [vmem:[%s2773_s30 + $0x58] sm:$0xff] %v2106_v53  }
 0x1be   : > { %v1576_v3 = vadd.f32 %v1575_v62, %v2882_v15  ;;  %v1644_v4 = vadd.f32 %v1643_v61, %v1613_v43 }
 0x1c0   : > { %v1645_v0 = vadd.f32 %v1644_v4, %v1614_v63  ;;  %v1577_v6 = vadd.f32 %v1576_v3, %v2887_v18  ;;  %v1619_v18 = vmul.f32 %v2901_v27, %v2901_v27 }
 0x1c2   : > { %v1578_v8 = vadd.f32 %v1577_v6, %v2889_v22  ;;  %v1646_v9 = vadd.f32 %v1645_v0, %v1615_v5  ;;  %v1620_v22 = vmul.f32 %v2903_v30, %v2903_v30 }
 0x1c4   : > { %v1647_v12 = vadd.f32 %v1646_v9, %v1616_v7  ;;  %v1579_v15 = vadd.f32 %v1578_v8, %v2891_v23  ;;  %v1621_v23 = vmul.f32 %v2905_v32, %v2905_v32 }
 0x1c6   : > { %v1580_v17 = vadd.f32 %v1579_v15, %v2893_v26  ;;  %v1648_v11 = vadd.f32 %v1647_v12, %v1617_v10  ;;  %v1622_v26 = vmul.f32 %v2907_v31, %v2907_v31  ;;  %v1674_v12 = vlaneseq }
 0x1c8   : > { %v1649_v13 = vadd.f32 %v1648_v11, %v1618_v16  ;;  %v1581_v21 = vadd.f32 %v1580_v17, %v2901_v27  ;;  %v1623_v27 = vmul.f32 %v2915_v34, %v2915_v34  ;;  %v1675_v11 = vshrl.u32 %v1674_v12, 7 }
 0x1ca   : > { %v1582_v24 = vadd.f32 %v1581_v21, %v2903_v30  ;;  %v1650_v25 = vadd.f32 %v1649_v13, %v1619_v18  ;;  %v1624_v30 = vmul.f32 %v2917_v39, %v2917_v39  ;;  %vm1676_vm0 = vcmp.eq.s32.totalorder %v1675_v11, 0 }
 0x1cb   : > { %vm1678_vm1 = vcmp.eq.s32.totalorder %v1675_v11, 1 }
 0x1cc   : > { %v1651_v28 = vadd.f32 %v1650_v25, %v1620_v22  ;;  %v1583_v14 = vadd.f32 %v1582_v24, %v2905_v32  ;;  %v1625_v32 = vmul.f32 %v2919_v40, %v2919_v40 }
 0x1ce   : > { %v1584_v29 = vadd.f32 %v1583_v14, %v2907_v31  ;;  %v1652_v19 = vadd.f32 %v1651_v28, %v1621_v23  ;;  %v1626_v31 = vmul.f32 %v2921_v41, %v2921_v41 }
 0x1d0   : > { %v1653_v33 = vadd.f32 %v1652_v19, %v1622_v26  ;;  %v1585_v35 = vadd.f32 %v1584_v29, %v2915_v34  ;;  %v1627_v34 = vmul.f32 %v2929_v46, %v2929_v46 }
 0x1d2   : > { %v1586_v36 = vadd.f32 %v1585_v35, %v2917_v39  ;;  %v1654_v20 = vadd.f32 %v1653_v33, %v1623_v27  ;;  %v1628_v39 = vmul.f32 %v2931_v51, %v2931_v51 }
 0x1d4   : > { %v1655_v42 = vadd.f32 %v1654_v20, %v1624_v30  ;;  %v1587_v45 = vadd.f32 %v1586_v36, %v2919_v40  ;;  %v1629_v40 = vmul.f32 %v2933_v52, %v2933_v52 }
 0x1d6   : > { %v1588_v37 = vadd.f32 %v1587_v45, %v2921_v41  ;;  %v1656_v47 = vadd.f32 %v1655_v42, %v1625_v32  ;;  %v1630_v41 = vmul.f32 %v2935_v50, %v2935_v50 }
 0x1d8   : > { %v1657_v48 = vadd.f32 %v1656_v47, %v1626_v31  ;;  %v1589_v53 = vadd.f32 %v1588_v37, %v2929_v46  ;;  %v1631_v46 = vmul.f32 %v2943_v57, %v2943_v57 }
 0x1da   : > { %v1590_v54 = vadd.f32 %v1589_v53, %v2931_v51  ;;  %v1658_v58 = vadd.f32 %v1657_v48, %v1627_v34  ;;  %v1632_v51 = vmul.f32 %v2945_v59, %v2945_v59 }
 0x1dc   : > { %v1659_v38 = vadd.f32 %v1658_v58, %v1628_v39  ;;  %v1591_v43 = vadd.f32 %v1590_v54, %v2933_v52  ;;  %v1633_v52 = vmul.f32 %v2947_v56, %v2947_v56 }
 0x1de   : > { %v1592_v60 = vadd.f32 %v1591_v43, %v2935_v50  ;;  %v1660_v44 = vadd.f32 %v1659_v38, %v1629_v40  ;;  %v1634_v50 = vmul.f32 %v2949_v49, %v2949_v49 }
 0x1e0   : > { %v1661_v61 = vadd.f32 %v1660_v44, %v1630_v41  ;;  %v1593_v62 = vadd.f32 %v1592_v60, %v2943_v57  ;;  %v1635_v57 = vmul.f32 %v2959_v1, %v2959_v1 }
 0x1e2   : > { %v1594_v63 = vadd.f32 %v1593_v62, %v2945_v59  ;;  %v1662_v2 = vadd.f32 %v1661_v61, %v1631_v46  ;;  %v1636_v59 = vmul.f32 %v2961_v55, %v2961_v55 }
 0x1e4   : > { %v1663_v3 = vadd.f32 %v1662_v2, %v1632_v51  ;;  %v1595_v4 = vadd.f32 %v1594_v63, %v2947_v56 }
 0x1e6   : > { %v1596_v5 = vadd.f32 %v1595_v4, %v2949_v49  ;;  %v1664_v0 = vadd.f32 %v1663_v3, %v1633_v52 }
 0x1e8   : > { %v1665_v6 = vadd.f32 %v1664_v0, %v1634_v50  ;;  %v1597_v7 = vadd.f32 %v1596_v5, %v2959_v1 }
 0x1ea   : > { %v1598_v8 = vadd.f32 %v1597_v7, %v2961_v55  ;;  %v1666_v9 = vadd.f32 %v1665_v6, %v1635_v57 }
 0x1ec   : > { %v1599_v10 = vrot.slane %v1598_v8, 4  ;;  %v1667_v56 = vadd.f32 %v1666_v9, %v1636_v59 }
 0x1ee   : > { %v1600_v15 = vadd.f32 %v1599_v10, %v1598_v8  ;;  %v1668_v16 = vrot.slane %v1667_v56, 4 }
 0x1f0   : > { %v1601_v17 = vrot.slane %v1600_v15, 2  ;;  %v1669_v49 = vadd.f32 %v1668_v16, %v1667_v56 }
 0x1f2   : > { %v1602_v18 = vadd.f32 %v1601_v17, %v1600_v15  ;;  %v1670_v13 = vrot.slane %v1669_v49, 2 }
 0x1f4   : > { %v1603_v21 = vrot.slane %v1602_v18, 1  ;;  %v1671_v22 = vadd.f32 %v1670_v13, %v1669_v49 }
 0x1f5   : > { %1684 = sbr.rel (%p2011_p0) target bundleno = 510 (0x1fe), region = 66 }
 0x1f6   : > { %v1604_v1 = vadd.f32 %v1603_v21, %v1602_v18  ;;  %v1672_v24 = vrot.slane %v1671_v22, 1 }
 0x1f8   : > { %v1673_v25 = vadd.f32 %v1672_v24, %v1671_v22  ;;  %v1677_v23 = vsel %vm1676_vm0, %v1604_v1, 0.0 }
 0x1fa   : > { %v1679_v55 = vsel %vm1678_vm1, %v1673_v25, 0.0 }
 0x1fb   : > { %v1680_v28 = vadd.f32 %v1679_v55, %v1677_v23 }
 0x1fd   : > { %1685 = vst [vmem:[%s3070_s3] sm:$0xff] %v1680_v28 }
 0x1fe PF: > { %p2012_p1 = scmp.le.s32.totalorder %s2533_s15, 0 }
 0x200   : > { %1689 = sbr.rel (%p2012_p1) target bundleno = 520 (0x208), region = 70 }
 0x204   : > { %v1690_v14 = vld [vmem:[%s3070_s3] sm:$0xff] (!%p2012_p1) }
 0x205   : > { %v1691_v26 = vadd.f32 (!%p2012_p1), %v1690_v14, %v1680_v28 }
 0x207   : > { %1692 = vst [vmem:[%s3070_s3] sm:$0xff] %v1691_v26 }
 0x208 PF: > { %s14_s18 = sadd.s32 1, %s2545_s18   ;;  %s3071_s12 = smov %s2525_s13 }
 0x209   : > { %p11_p2 = scmp.ge.s32.totalorder %s14_s18, 8   ;;  %s3072_s13 = smov %s2619_s25 }
 0x20a   : > { %s3073_s14 = smov %s2537_s16  ;;  %s3074_s15 = smov %s2541_s17 }
 0x20b   : > { %s3075_s16 = smov %s3078_s19  ;;  %s3076_s17 = smov %s3082_s20 }
 0x20c   :  { %13 = sbr.rel (!%p11_p2) target bundleno = 4 (0x4), region = 126 }

// kernel: multihead_forward.36
= control target key start
LH: loop header
LB: loop body
LE: loop exit
PB: predicated region body
PF: predicated region fallthrough
CT: control target
= control target key end

     0   :  { %s1764_s15 = smov 0   ;;  %s1766_s16 = smov 0   ;;  %s2071_s0 = inlined_call_operand.vmem [shape: bf16[128,1152], index: 0, kind: input, shape index: {}]   ;;  %s2072_s1 = inlined_call_operand.vmem [shape: bf16[1152,128], index: 1, kind: input, shape index: {}]   ;;  %s2073_s2 = inlined_call_operand.vmem [shape: f32[1,128], index: 2, kind: input, shape index: {}]   ;;  %s2074_s3 = inlined_call_operand.vmem [shape: f32[1,128], index: 3, kind: input, shape index: {}]   ;;  %s2075_s4 = inlined_call_operand.vmem [shape: bf16[128,128], index: 4, kind: output, shape index: {}]  }
   0x1   :  { %s1768_s17 = smov 0   ;;  %s1770_s18 = smov 0  }
   0x2   :  { %s1772_s19 = smov 0  }
   0x3 LB: > { %s23_s20 = sadd.s32 1, %s1732_s18  ;;  %p40_p1 = scmp.ne.s32.totalorder %s1724_s16, %s1720_s15  ;;  %s1736_s19 = sphi %s1772_s19, %s14_s19   ;;  %s1732_s18 = sphi %s1770_s18, %s2079_s18   ;;  %s1728_s17 = sphi %s1768_s17, %s2078_s17   ;;  %s1724_s16 = sphi %s1766_s16, %s2077_s16   ;;  %s1720_s15 = sphi %s1764_s15, %s2076_s15  }
   0x4   : > { %p24_p0 = scmp.ge.s32.totalorder %s23_s20, 3  ;;  %p41_p2 = scmp.eq.s32.totalorder %s1736_s19, 0 }
   0x5   : > { %s33_s22 = sadd.s32 1, %s1724_s16  ;;  %p1316_p5 = scmp.ge.s32.totalorder %s1736_s19, 3 }
   0x6   : > { %s2081_s20 = smov (%p24_p0, %s23_s20), 0  ;;  %p42_p3 = por %p41_p2, %p40_p1 }
   0x7   : > { %s30_s21 = ssub.s32 %s1732_s18, %s2081_s20  ;;  %184 = sbr.rel (%p1316_p5) target bundleno = 37 (0x25), region = 24 }
   0x8   : > { %p31_p4 = scmp.eq.s32.totalorder %s30_s21, 0 }
   0xa   : > { %s1799_s23 = scalar_select %p31_p4, %s1724_s16, %s33_s22  }
   0xe   : > { %187 = sbr.rel (!%p42_p3) target bundleno = 37 (0x25), region = 28  ;;  %s189_s24 = sand.u32 (%p42_p3), 1, %s1724_s16  }
   0xf   : > { %s1421_s25 = smul.u32 (%p42_p3), 12, %s1732_s18 }
  0x10   : > { %s1597_s26 = smul.u32 (%p42_p3), 192, %s189_s24 }
  0x11   : > { %s1807_s29 = scalar_lea.vmem (%p42_p3), %s2071_s0, %s1421_s25 }
  0x12   : > { %v209_v0 = vld [vmem:[%s1807_s29] sm:$0xff] (%p42_p3)  ;;  %v213_v2 = vld [vmem:[%s1807_s29 + $0x48] sm:$0xff] (%p42_p3)  ;;  %s1812_s30 = scalar_lea.vmem (%p42_p3), [#allocation3], %s1597_s26  ;;  %v217_v4 = vld [vmem:[%s1807_s29 + $0x90] sm:$0xff] (%p42_p3) }
  0x13   : > { %v211_v1 = vld [vmem:[%s1807_s29 + $0x24] sm:$0xff] (%p42_p3)  ;;  %210 = vst [vmem:[%s1812_s30] sm:$0xff] (%p42_p3), %v209_v0  ;;  %214 = vst [vmem:[%s1812_s30 + $0x18] sm:$0xff] (%p42_p3), %v213_v2  ;;  %v215_v3 = vld [vmem:[%s1807_s29 + $0x6c] sm:$0xff] (%p42_p3) }
  0x14   : > { %212 = vst [vmem:[%s1812_s30 + $0xc] sm:$0xff] (%p42_p3), %v211_v1  ;;  %v219_v5 = vld [vmem:[%s1807_s29 + $0xb4] sm:$0xff] (%p42_p3)  ;;  %216 = vst [vmem:[%s1812_s30 + $0x24] sm:$0xff] (%p42_p3), %v215_v3  ;;  %v223_v7 = vld [vmem:[%s1807_s29 + $0xfc] sm:$0xff] (%p42_p3) }
  0x15   : > { %218 = vst [vmem:[%s1812_s30 + $0x30] sm:$0xff] %v217_v4  ;;  %220 = vst [vmem:[%s1812_s30 + $0x3c] sm:$0xff] %v219_v5  ;;  %v221_v6 = vld [vmem:[%s1807_s29 + $0xd8] sm:$0xff]  ;;  %v225_v8 = vld [vmem:[%s1807_s29 + $0x120] sm:$0xff] }
  0x16   : > { %222 = vst [vmem:[%s1812_s30 + $0x48] sm:$0xff] %v221_v6  ;;  %224 = vst [vmem:[%s1812_s30 + $0x54] sm:$0xff] %v223_v7  ;;  %v227_v9 = vld [vmem:[%s1807_s29 + $0x144] sm:$0xff]  ;;  %v231_v11 = vld [vmem:[%s1807_s29 + $0x18c] sm:$0xff] }
  0x17   : > { %226 = vst [vmem:[%s1812_s30 + $0x60] sm:$0xff] %v225_v8  ;;  %v229_v10 = vld [vmem:[%s1807_s29 + $0x168] sm:$0xff]  ;;  %228 = vst [vmem:[%s1812_s30 + $0x6c] sm:$0xff] %v227_v9  ;;  %v233_v12 = vld [vmem:[%s1807_s29 + $0x1b0] sm:$0xff] }
  0x18   : > { %230 = vst [vmem:[%s1812_s30 + $0x78] sm:$0xff] %v229_v10  ;;  %232 = vst [vmem:[%s1812_s30 + $0x84] sm:$0xff] %v231_v11  ;;  %v235_v13 = vld [vmem:[%s1807_s29 + $0x1d4] sm:$0xff]  ;;  %v239_v15 = vld [vmem:[%s1807_s29 + $0x21c] sm:$0xff] }
  0x19   : > { %v237_v14 = vld [vmem:[%s1807_s29 + $0x1f8] sm:$0xff]  ;;  %234 = vst [vmem:[%s1812_s30 + $0x90] sm:$0xff] %v233_v12  ;;  %236 = vst [vmem:[%s1812_s30 + $0x9c] sm:$0xff] %v235_v13  ;;  %v1318_v16 = vld [vmem:[%s1807_s29 + $0x8] sm:$0xf] }
  0x1a   : > { %238 = vst [vmem:[%s1812_s30 + $0xa8] sm:$0xff] %v237_v14  ;;  %v1320_v17 = vld [vmem:[%s1807_s29 + $0x2c] sm:$0xf]  ;;  %240 = vst [vmem:[%s1812_s30 + $0xb4] sm:$0xff] %v239_v15  ;;  %v1322_v18 = vld [vmem:[%s1807_s29 + $0x50] sm:$0xf] }
  0x1b   : > { %1319 = vst [vmem:[%s1812_s30 + $0x8] sm:$0xf] %v1318_v16  ;;  %1321 = vst [vmem:[%s1812_s30 + $0x14] sm:$0xf] %v1320_v17  ;;  %v1324_v19 = vld [vmem:[%s1807_s29 + $0x74] sm:$0xf] }
  0x1c   : > { %v1326_v20 = vld [vmem:[%s1807_s29 + $0x98] sm:$0xf]  ;;  %1323 = vst [vmem:[%s1812_s30 + $0x20] sm:$0xf] %v1322_v18  ;;  %1325 = vst [vmem:[%s1812_s30 + $0x2c] sm:$0xf] %v1324_v19 }
  0x1d   : > { %1327 = vst [vmem:[%s1812_s30 + $0x38] sm:$0xf] %v1326_v20  ;;  %v1328_v21 = vld [vmem:[%s1807_s29 + $0xbc] sm:$0xf]  ;;  %v1330_v22 = vld [vmem:[%s1807_s29 + $0xe0] sm:$0xf] }
  0x1e   : > { %v1332_v23 = vld [vmem:[%s1807_s29 + $0x104] sm:$0xf]  ;;  %1329 = vst [vmem:[%s1812_s30 + $0x44] sm:$0xf] %v1328_v21  ;;  %1331 = vst [vmem:[%s1812_s30 + $0x50] sm:$0xf] %v1330_v22 }
  0x1f   : > { %1333 = vst [vmem:[%s1812_s30 + $0x5c] sm:$0xf] %v1332_v23  ;;  %v1334_v24 = vld [vmem:[%s1807_s29 + $0x128] sm:$0xf]  ;;  %v1336_v25 = vld [vmem:[%s1807_s29 + $0x14c] sm:$0xf] }
  0x20   : > { %v1338_v26 = vld [vmem:[%s1807_s29 + $0x170] sm:$0xf]  ;;  %1335 = vst [vmem:[%s1812_s30 + $0x68] sm:$0xf] %v1334_v24  ;;  %1337 = vst [vmem:[%s1812_s30 + $0x74] sm:$0xf] %v1336_v25 }
  0x21   : > { %1339 = vst [vmem:[%s1812_s30 + $0x80] sm:$0xf] %v1338_v26  ;;  %v1340_v27 = vld [vmem:[%s1807_s29 + $0x194] sm:$0xf]  ;;  %v1342_v28 = vld [vmem:[%s1807_s29 + $0x1b8] sm:$0xf] }
  0x22   : > { %v1344_v29 = vld [vmem:[%s1807_s29 + $0x1dc] sm:$0xf]  ;;  %1341 = vst [vmem:[%s1812_s30 + $0x8c] sm:$0xf] %v1340_v27  ;;  %1343 = vst [vmem:[%s1812_s30 + $0x98] sm:$0xf] %v1342_v28 }
  0x23   : > { %1345 = vst [vmem:[%s1812_s30 + $0xa4] sm:$0xf] %v1344_v29  ;;  %v1346_v30 = vld [vmem:[%s1807_s29 + $0x200] sm:$0xf]  ;;  %v1348_v31 = vld [vmem:[%s1807_s29 + $0x224] sm:$0xf] }
  0x24   : > { %1347 = vst [vmem:[%s1812_s30 + $0xb0] sm:$0xf] %v1346_v30  ;;  %1349 = vst [vmem:[%s1812_s30 + $0xbc] sm:$0xf] %v1348_v31 }
  0x25 PF: > { %p1350_p6 = scmp.ge.s32.totalorder %s1736_s19, 1  ;;  %p296_p7 = scmp.lt.s32.totalorder %s1736_s19, 4 }
  0x27   : > { %p297_p8 = pnand %p1350_p6, %p296_p7 }
  0x28   : > { %s303_s5 = sand.u32 (!%p297_p8), 1, %s1720_s15   ;;  %s342_s6 = smul.u32 (!%p297_p8), 48, %s1728_s17 }
  0x29   : > { %300 = sbr.rel (%p297_p8) target bundleno = 449 (0x1c1), region = 58  ;;  %p1352_p10 = scmp.ne.s32.totalorder (!%p297_p8), %s1728_s17, 0 }
  0x2a   : > { %s1598_s7 = smul.u32 (!%p297_p8), 192, %s303_s5  ;;  %p343_p9 = scmp.lt.s32.totalorder (!%p297_p8), %s342_s6, 143 }
  0x2c   : > { %s1884_s12 = scalar_lea.vmem (!%p297_p8), [#allocation3], %s1598_s7 }
  0x30   : > { %s2083_s6 = smov (!%p343_p9, %s342_s6), 143  ;;  %365 = sbr.rel (%p1352_p10) target bundleno = 58 (0x3a), region = 66 }
  0x31   : > { %s1351_s8 = sshll.u32 %s2083_s6, 2  ;;  %v1738_v32 = vmov (!%p1352_p10), 0.0  }
  0x32   : > { %s1882_s11 = scalar_lea.vmem %s2072_s1, %s1351_s8  ;;  %366 = vst [vmem:[#allocation2] sm:$0xff] (!%p1352_p10), %v1738_v32  ;;  %367 = vst [vmem:[#allocation2 + $0x8] sm:$0xff] (!%p1352_p10), %v1738_v32 }
  0x33   : > { %368 = vst [vmem:[#allocation2 + $0x10] sm:$0xff] (!%p1352_p10), %v1738_v32  ;;  %369 = vst [vmem:[#allocation2 + $0x18] sm:$0xff] (!%p1352_p10), %v1738_v32 }
  0x34   : > { %370 = vst [vmem:[#allocation2 + $0x20] sm:$0xff] (!%p1352_p10), %v1738_v32  ;;  %371 = vst [vmem:[#allocation2 + $0x28] sm:$0xff] (!%p1352_p10), %v1738_v32 }
  0x35   : > { %372 = vst [vmem:[#allocation2 + $0x30] sm:$0xff] (!%p1352_p10), %v1738_v32  ;;  %373 = vst [vmem:[#allocation2 + $0x38] sm:$0xff] (!%p1352_p10), %v1738_v32 }
  0x36   : > { %374 = vst [vmem:[#allocation2 + $0x40] sm:$0xff] (!%p1352_p10), %v1738_v32  ;;  %375 = vst [vmem:[#allocation2 + $0x48] sm:$0xff] (!%p1352_p10), %v1738_v32 }
  0x37   : > { %376 = vst [vmem:[#allocation2 + $0x50] sm:$0xff] %v1738_v32  ;;  %377 = vst [vmem:[#allocation2 + $0x58] sm:$0xff] %v1738_v32 }
  0x38   : > { %378 = vst [vmem:[#allocation2 + $0x60] sm:$0xff] %v1738_v32  ;;  %379 = vst [vmem:[#allocation2 + $0x68] sm:$0xff] %v1738_v32 }
  0x39   : > { %380 = vst [vmem:[#allocation2 + $0x70] sm:$0xff] %v1738_v32  ;;  %381 = vst [vmem:[#allocation2 + $0x78] sm:$0xff] %v1738_v32 }
  0x3a PF: > { %v1640_v33 = vld [vmem:[%s1882_s11 + $0x40] sm:$0xff]   ;;  %v1643_v36 = vld [vmem:[%s1882_s11 + $0x48] sm:$0xff]   ;;  %v1646_v39 = vld [vmem:[%s1882_s11 + $0x50] sm:$0xff]   ;;  %p1401_p11 = scmp.ne.s32.totalorder %s1728_s17, 2 }
  0x3b   : > { %v1641_v34 = vld [vmem:[%s1882_s11] sm:$0xff]   ;;  %1485 = vmatprep.subr.bf16.mxu0 %v1640_v33  ;;  %v1644_v37 = vld [vmem:[%s1882_s11 + $0x8] sm:$0xff]   ;;  %v1647_v40 = vld [vmem:[%s1882_s11 + $0x10] sm:$0xff]  }
  0x3c   : > { %v1642_v35 = vld [vmem:[%s1882_s11 + $0x80] sm:$0xff]   ;;  %1486 = vmatpush3.bf16.msra.mxu0 %v1641_v34  ;;  %v1645_v38 = vld [vmem:[%s1882_s11 + $0x88] sm:$0xff]   ;;  %v1648_v41 = vld [vmem:[%s1882_s11 + $0x90] sm:$0xff]  }
  0x3d   : > { %1565 = vmatprep.subr.bf16.mxu1 %v1642_v35  ;;  %1487 = vmatprep.subr.bf16.mxu0 %v1643_v36  ;;  %v1649_v42 = vld [vmem:[%s1882_s11 + $0x58] sm:$0xff]   ;;  %v1652_v45 = vld [vmem:[%s1882_s11 + $0x60] sm:$0xff]   ;;  %v1655_v48 = vld [vmem:[%s1882_s11 + $0x68] sm:$0xff]  }
  0x3e   : > { %1566 = vmatpush3.bf16.msra.mxu1 %v1642_v35  ;;  %v1650_v43 = vld [vmem:[%s1882_s11 + $0x18] sm:$0xff]   ;;  %v1654_v46 = vld [vmem:[%s1882_s11 + $0xa0] sm:$0xff]   ;;  %v1657_v49 = vld [vmem:[%s1882_s11 + $0xa8] sm:$0xff]  }
  0x3f   : > { %1567 = vmatprep.subr.bf16.mxu1 %v1645_v38  ;;  %v1651_v44 = vld [vmem:[%s1882_s11 + $0x98] sm:$0xff]   ;;  %v1653_v47 = vld [vmem:[%s1882_s11 + $0x20] sm:$0xff]   ;;  %v1656_v50 = vld [vmem:[%s1882_s11 + $0x28] sm:$0xff]  }
  0x40   : > { %1488 = vmatpush3.bf16.msra.mxu0 %v1644_v37  ;;  %v1658_v51 = vld [vmem:[%s1882_s11 + $0x70] sm:$0xff]   ;;  %v1661_v54 = vld [vmem:[%s1882_s11 + $0x78] sm:$0xff]   ;;  %v1664_v59 = vld [vmem:[%s1884_s12] ss:$12 sps:$4 sm:$0xff]  }
  0x41   : > { %1489 = vmatprep.subr.bf16.mxu0 %v1646_v39  ;;  %v1659_v52 = vld [vmem:[%s1882_s11 + $0x30] sm:$0xff]   ;;  %v1663_v55 = vld [vmem:[%s1882_s11 + $0xb8] sm:$0xff]   ;;  %v1668_v61 = vld [vmem:[%s1884_s12 + $0x20] ss:$12 sps:$4 sm:$0xff]  }
  0x42   : > { %1568 = vmatpush3.bf16.msra.mxu1 %v1645_v38  ;;  %v1660_v53 = vld [vmem:[%s1882_s11 + $0xb0] sm:$0xff]   ;;  %v1662_v58 = vld [vmem:[%s1882_s11 + $0x38] sm:$0xff]   ;;  %v1684_v5 = vld [vmem:[%s1884_s12 + $0x80] ss:$12 sps:$4 sm:$0xff]  }
  0x43   : > { %1569 = vmatprep.subr.bf16.mxu1 %v1648_v41  ;;  %v1666_v56 = vld [vmem:[%s1884_s12 + $0x4] ss:$12 sps:$4 sm:$0xff]   ;;  %v1667_v57 = vld [vmem:[%s1884_s12 + $0x8] ss:$12 sps:$4 sm:$0xff]   ;;  %v1677_v4 = vld [vmem:[%s1884_s12 + $0x4c] ss:$12 sps:$4 sm:$0xff]  }
  0x44   : > { %1490 = vmatpush3.bf16.msra.mxu0 %v1647_v40  ;;  %782 = vmatprep.mubr.bf16.mxu0 %v1666_v56  ;;  %v1669_v60 = vld [vmem:[%s1884_s12 + $0x1c] ss:$12 sps:$4 sm:$0xff]   ;;  %v1675_v62 = vld [vmem:[%s1884_s12 + $0x38] ss:$12 sps:$4 sm:$0xff]   ;;  %v1672_v0 = vld [vmem:[%s1884_s12 + $0x34] ss:$12 sps:$4 sm:$0xff]  }
  0x45   : > { %1491 = vmatprep.subr.bf16.mxu0 %v1649_v42  ;;  %1581 = vmatprep.mubr.bf16.mxu1 %v1667_v57  ;;  %v1671_v63 = vld [vmem:[%s1884_s12 + $0x18] ss:$12 sps:$4 sm:$0xff]   ;;  %v1676_v1 = vld [vmem:[%s1884_s12 + $0x50] ss:$12 sps:$4 sm:$0xff]   ;;  %v1683_v2 = vld [vmem:[%s1884_s12 + $0x68] ss:$12 sps:$4 sm:$0xff]  }
  0x46   : > { %1570 = vmatpush3.bf16.msra.mxu1 %v1648_v41  ;;  %v1674_v3 = vld [vmem:[%s1884_s12 + $0x30] ss:$12 sps:$4 sm:$0xff]   ;;  %v1691_v6 = vld [vmem:[%s1884_s12 + $0x98] ss:$12 sps:$4 sm:$0xff]   ;;  %v1679_v7 = vld [vmem:[%s1884_s12 + $0x48] ss:$12 sps:$4 sm:$0xff]  }
  0x47   : > { %1571 = vmatprep.subr.bf16.mxu1 %v1651_v44  ;;  %v1680_v8 = vld [vmem:[%s1884_s12 + $0x64] ss:$12 sps:$4 sm:$0xff]   ;;  %v1682_v10 = vld [vmem:[%s1884_s12 + $0x60] ss:$12 sps:$4 sm:$0xff]   ;;  %v1685_v11 = vld [vmem:[%s1884_s12 + $0x7c] ss:$12 sps:$4 sm:$0xff]  }
  0x48   : > { %1492 = vmatpush3.bf16.msra.mxu0 %v1650_v43  ;;  %v1692_v9 = vld [vmem:[%s1884_s12 + $0xb0] ss:$12 sps:$4 sm:$0xff]   ;;  %v1687_v12 = vld [vmem:[%s1884_s12 + $0x78] ss:$12 sps:$4 sm:$0xff]   ;;  %v1688_v13 = vld [vmem:[%s1884_s12 + $0x94] ss:$12 sps:$4 sm:$0xff]  }
  0x49   : > { %1493 = vmatprep.subr.bf16.mxu0 %v1652_v45  ;;  %v1690_v14 = vld [vmem:[%s1884_s12 + $0x90] ss:$12 sps:$4 sm:$0xff]   ;;  %v1693_v15 = vld [vmem:[%s1884_s12 + $0xac] ss:$12 sps:$4 sm:$0xff]   ;;  %v1695_v16 = vld [vmem:[%s1884_s12 + $0xa8] ss:$12 sps:$4 sm:$0xff]  }
  0x4a   : > { %1572 = vmatpush3.bf16.msra.mxu1 %v1651_v44  ;;  %v382_v23 = vld [vmem:[#allocation2] sm:$0xff]  ;;  %v383_v28 = vld [vmem:[#allocation2 + $0x8] sm:$0xff]  ;;  %v384_v38 = vld [vmem:[#allocation2 + $0x10] sm:$0xff] }
  0x4b   : > { %1573 = vmatprep.subr.bf16.mxu1 %v1654_v46  ;;  %v385_v44 = vld [vmem:[#allocation2 + $0x18] sm:$0xff] }
  0x4c   : > { %1494 = vmatpush3.bf16.msra.mxu0 %v1653_v47 }
  0x4d   : > { %1495 = vmatprep.subr.bf16.mxu0 %v1655_v48 }
  0x4e   : > { %1574 = vmatpush3.bf16.msra.mxu1 %v1654_v46 }
  0x4f   : > { %1575 = vmatprep.subr.bf16.mxu1 %v1657_v49 }
  0x50   : > { %1496 = vmatpush3.bf16.msra.mxu0 %v1656_v50 }
  0x51   : > { %1497 = vmatprep.subr.bf16.mxu0 %v1658_v51 }
  0x52   : > { %1576 = vmatpush3.bf16.msra.mxu1 %v1657_v49 }
  0x53   : > { %1577 = vmatprep.subr.bf16.mxu1 %v1660_v53 }
  0x54   : > { %1498 = vmatpush3.bf16.msra.mxu0 %v1659_v52 }
  0x55   : > { %1499 = vmatprep.subr.bf16.mxu0 %v1661_v54 }
  0x56   : > { %1578 = vmatpush3.bf16.msra.mxu1 %v1660_v53 }
  0x57   : > { %1579 = vmatprep.subr.bf16.mxu1 %v1663_v55 }
  0x58   : > { %1500 = vmatpush3.bf16.msra.mxu0 %v1662_v58 }
  0x5a   : > { %1580 = vmatpush3.bf16.msra.mxu1 %v1663_v55  ;;  %v386_v55 = vld [vmem:[#allocation2 + $0x20] sm:$0xff] }
  0x5b   : > { %783 = vmatmul.mubr.bf16.vlgmr.msra.gmra.mrb[0].mxu0 %v1664_v59 }
  0x5c   : > { %790 = vmatprep.mubr.bf16.mxu0 %v1669_v60  ;;  %v387_v60 = vld [vmem:[#allocation2 + $0x28] sm:$0xff] }
  0x5d   : > { %1582 = vmatmul.mubr.bf16.vlgmr.msra.gmra.mrb[0].mxu1 %v1668_v61 }
  0x5e   : > { %1585 = vmatprep.mubr.bf16.mxu1 %v1675_v62 }
  0x63   : > { %791 = vmatmul.mubr.bf16.gmra.mrb[4].mxu0 %v1671_v63 }
  0x64   : > { %798 = vmatprep.mubr.bf16.mxu0 %v1672_v0 }
  0x65   : > { %1586 = vmatmul.mubr.bf16.gmra.mrb[4].mxu1 %v1676_v1 }
  0x66   : > { %1589 = vmatprep.mubr.bf16.mxu1 %v1683_v2 }
  0x6b   : > { %799 = vmatmul.mubr.bf16.gmra.mrb[8].mxu0 %v1674_v3 }
  0x6c   : > { %806 = vmatprep.mubr.bf16.mxu0 %v1677_v4 }
  0x6d   : > { %1590 = vmatmul.mubr.bf16.gmra.mrb[8].mxu1 %v1684_v5 }
  0x6e   : > { %1593 = vmatprep.mubr.bf16.mxu1 %v1691_v6  ;;  %v388_v6 = vld [vmem:[#allocation2 + $0x30] sm:$0xff] }
  0x73   : > { %807 = vmatmul.mubr.bf16.gmra.mrb[12].mxu0 %v1679_v7 }
  0x74   : > { %814 = vmatprep.mubr.bf16.mxu0 %v1680_v8 }
  0x75   : > { %1594 = vmatmul.mubr.bf16.gmra.mrb[12].mxu1 %v1692_v9 }
  0x7b   : > { %815 = vmatmul.mubr.bf16.gmra.mrb[16].mxu0 %v1682_v10 }
  0x7c   : > { %822 = vmatprep.mubr.bf16.mxu0 %v1685_v11 }
  0x83   : > { %823 = vmatmul.mubr.bf16.gmra.mrb[20].mxu0 %v1687_v12  ;;  %v389_v12 = vld [vmem:[#allocation2 + $0x38] sm:$0xff] }
  0x84   : > { %830 = vmatprep.mubr.bf16.mxu0 %v1688_v13 }
  0x8b   : > { %831 = vmatmul.mubr.bf16.gmra.mrb[24].mxu0 %v1690_v14 }
  0x8c   : > { %838 = vmatprep.mubr.bf16.mxu0 %v1693_v15 }
  0x93   : > { %839 = vmatmul.mubr.bf16.gmra.mrb[28].mxu0 %v1695_v16 }
 0x12e   : > { %v1501_v17 = vpop.f32.mrb[0].mxu0 }
 0x12f   : > { %v1502_v18 = vpop.f32.mrb[1].mxu0 }
 0x130   : > { %v1503_v19 = vadd.f32 %v1502_v18, %v1501_v17  ;;  %v1504_v20 = vpop.f32.mrb[2].mxu0  ;;  %v1583_v21 = vpop.f32.mrb[0].mxu1 }
 0x131   : > { %v1505_v22 = vpop.f32.mrb[3].mxu0  ;;  %v881_v24 = vpop.f32.mrb[1].mxu1 }
 0x132   : > { %v1506_v25 = vadd.f32 %v1505_v22, %v1504_v20  ;;  %v882_v26 = vadd.f32 %v1503_v19, %v881_v24  ;;  %v1584_v27 = vpop.f32.mrb[2].mxu1  ;;  %v390_v22 = vld [vmem:[#allocation2 + $0x40] sm:$0xff] }
 0x133   : > { %v884_v29 = vpop.f32.mrb[3].mxu1 }
 0x134   : > { %v944_v30 = vadd.f32 %v882_v26, %v382_v23  ;;  %v885_v31 = vadd.f32 %v1506_v25, %v884_v29  ;;  %v391_v25 = vld [vmem:[#allocation2 + $0x48] sm:$0xff] }
 0x136   : > { %960 = vst [vmem:[#allocation2] sm:$0xff] %v944_v30  ;;  %v945_v32 = vadd.f32 %v885_v31, %v383_v28  ;;  %v1507_v33 = vpop.f32.mrb[4].mxu0 }
 0x137   : > { %v1508_v34 = vpop.f32.mrb[5].mxu0 }
 0x138   : > { %961 = vst [vmem:[#allocation2 + $0x8] sm:$0xff] %v945_v32  ;;  %v1509_v35 = vadd.f32 %v1508_v34, %v1507_v33  ;;  %v1510_v36 = vpop.f32.mrb[6].mxu0  ;;  %v1587_v37 = vpop.f32.mrb[4].mxu1  ;;  %v392_v33 = vld [vmem:[#allocation2 + $0x50] sm:$0xff] }
 0x139   : > { %v1511_v39 = vpop.f32.mrb[7].mxu0  ;;  %v897_v40 = vpop.f32.mrb[5].mxu1 }
 0x13a   : > { %v890_v41 = vadd.f32 %v1583_v21, %v1509_v35  ;;  %v1512_v42 = vadd.f32 %v1511_v39, %v1510_v36  ;;  %v1588_v43 = vpop.f32.mrb[6].mxu1 }
 0x13b   : > { %v900_v45 = vpop.f32.mrb[7].mxu1 }
 0x13c   : > { %v946_v46 = vadd.f32 %v890_v41, %v384_v38  ;;  %v893_v47 = vadd.f32 %v1584_v27, %v1512_v42 }
 0x13e   : > { %962 = vst [vmem:[#allocation2 + $0x10] sm:$0xff] %v946_v46  ;;  %v947_v48 = vadd.f32 %v893_v47, %v385_v44  ;;  %v1513_v49 = vpop.f32.mrb[8].mxu0  ;;  %v394_v46 = vld [vmem:[#allocation2 + $0x60] sm:$0xff] }
 0x13f   : > { %v1514_v50 = vpop.f32.mrb[9].mxu0 }
 0x140   : > { %963 = vst [vmem:[#allocation2 + $0x18] sm:$0xff] %v947_v48  ;;  %v1515_v51 = vadd.f32 %v1514_v50, %v1513_v49  ;;  %v1516_v52 = vpop.f32.mrb[10].mxu0  ;;  %v1591_v53 = vpop.f32.mrb[8].mxu1  ;;  %v395_v49 = vld [vmem:[#allocation2 + $0x68] sm:$0xff] }
 0x141   : > { %v1517_v54 = vpop.f32.mrb[11].mxu0  ;;  %v913_v56 = vpop.f32.mrb[9].mxu1 }
 0x142   : > { %v1518_v57 = vadd.f32 %v1517_v54, %v1516_v52  ;;  %v898_v58 = vadd.f32 %v1515_v51, %v897_v40  ;;  %v1592_v59 = vpop.f32.mrb[10].mxu1 }
 0x143   : > { %v916_v61 = vpop.f32.mrb[11].mxu1 }
 0x144   : > { %v948_v62 = vadd.f32 %v898_v58, %v386_v55  ;;  %v901_v63 = vadd.f32 %v1518_v57, %v900_v45  ;;  %v396_v57 = vld [vmem:[#allocation2 + $0x70] sm:$0xff] }
 0x146   : > { %964 = vst [vmem:[#allocation2 + $0x20] sm:$0xff] %v948_v62  ;;  %v949_v0 = vadd.f32 %v901_v63, %v387_v60  ;;  %v1519_v1 = vpop.f32.mrb[12].mxu0 }
 0x147   : > { %v1520_v2 = vpop.f32.mrb[13].mxu0 }
 0x148   : > { %965 = vst [vmem:[#allocation2 + $0x28] sm:$0xff] %v949_v0  ;;  %v1521_v3 = vadd.f32 %v1520_v2, %v1519_v1  ;;  %v1522_v4 = vpop.f32.mrb[14].mxu0  ;;  %v1595_v5 = vpop.f32.mrb[12].mxu1  ;;  %v1936_v1 = vld [vmem:[#allocation2] sm:$0xff] (!%p1401_p11)  ;;  %v1938_v2 = vld [vmem:[#allocation2 + $0x8] sm:$0xff] (!%p1401_p11) }
 0x149   : > { %v1523_v7 = vpop.f32.mrb[15].mxu0  ;;  %v929_v8 = vpop.f32.mrb[13].mxu1 }
 0x14a   : > { %v906_v9 = vadd.f32 %v1587_v37, %v1521_v3  ;;  %v1524_v10 = vadd.f32 %v1523_v7, %v1522_v4  ;;  %v1596_v11 = vpop.f32.mrb[14].mxu1  ;;  %v393_v37 = vld [vmem:[#allocation2 + $0x58] sm:$0xff]  ;;  %v1940_v3 = vld [vmem:[#allocation2 + $0x10] sm:$0xff] (!%p1401_p11)  ;;  %v1019_v7 = vmul.f32 (!%p1401_p11), %v1938_v2, %v1938_v2 }
 0x14b   : > { %v932_v13 = vpop.f32.mrb[15].mxu1  ;;  %v1942_v4 = vld [vmem:[#allocation2 + $0x18] sm:$0xff] (!%p1401_p11) }
 0x14c   : > { %v950_v14 = vadd.f32 %v906_v9, %v388_v6  ;;  %v909_v15 = vadd.f32 %v1588_v43, %v1524_v10  ;;  %v1018_v6 = vmul.f32 (!%p1401_p11), %v1936_v1, %v1936_v1 }
 0x14d   : > { %v1952_v9 = vld [vmem:[#allocation2 + $0x20] sm:$0xff] (!%p1401_p11) }
 0x14e   : > { %966 = vst [vmem:[#allocation2 + $0x30] sm:$0xff] %v950_v14  ;;  %v951_v16 = vadd.f32 %v909_v15, %v389_v12  ;;  %v1525_v17 = vpop.f32.mrb[16].mxu0  ;;  %v1034_v12 = vadd.f32 (!%p1401_p11), %v1019_v7, %v1018_v6  ;;  %v1022_v15 = vmul.f32 (!%p1401_p11), %v1952_v9, %v1952_v9 }
 0x14f   : > { %v1526_v18 = vpop.f32.mrb[17].mxu0 }
 0x150   : > { %967 = vst [vmem:[#allocation2 + $0x38] sm:$0xff] %v951_v16  ;;  %v1527_v19 = vadd.f32 %v1526_v18, %v1525_v17  ;;  %v1528_v20 = vpop.f32.mrb[18].mxu0 }
 0x151   : > { %v1529_v21 = vpop.f32.mrb[19].mxu0 }
 0x152   : > { %v1530_v23 = vadd.f32 %v1529_v21, %v1528_v20  ;;  %v914_v24 = vadd.f32 %v1527_v19, %v913_v56 }
 0x154   : > { %v952_v26 = vadd.f32 %v914_v24, %v390_v22  ;;  %v917_v27 = vadd.f32 %v1530_v23, %v916_v61  ;;  %v397_v61 = vld [vmem:[#allocation2 + $0x78] sm:$0xff] }
 0x155   : > { %v1962_v17 = vld [vmem:[#allocation2 + $0x30] sm:$0xff] (!%p1401_p11) }
 0x156   : > { %968 = vst [vmem:[#allocation2 + $0x40] sm:$0xff] %v952_v26  ;;  %v953_v28 = vadd.f32 %v917_v27, %v391_v25  ;;  %v1531_v29 = vpop.f32.mrb[20].mxu0  ;;  %v1024_v23 = vmul.f32 (!%p1401_p11), %v1962_v17, %v1962_v17 }
 0x157   : > { %v1532_v30 = vpop.f32.mrb[21].mxu0  ;;  %v1967_v21 = vld [vmem:[#allocation2 + $0x38] sm:$0xff] (!%p1401_p11) }
 0x158   : > { %969 = vst [vmem:[#allocation2 + $0x48] sm:$0xff] %v953_v28  ;;  %v1533_v31 = vadd.f32 %v1532_v30, %v1531_v29  ;;  %v1534_v32 = vpop.f32.mrb[22].mxu0  ;;  %v1025_v27 = vmul.f32 (!%p1401_p11), %v1967_v21, %v1967_v21 }
 0x159   : > { %v1535_v34 = vpop.f32.mrb[23].mxu0 }
 0x15a   : > { %v922_v35 = vadd.f32 %v1591_v53, %v1533_v31  ;;  %v1536_v36 = vadd.f32 %v1535_v34, %v1534_v32 }
 0x15c   : > { %v954_v38 = vadd.f32 %v922_v35, %v392_v33  ;;  %v925_v39 = vadd.f32 %v1592_v59, %v1536_v36 }
 0x15d   : > { %v1972_v25 = vld [vmem:[#allocation2 + $0x40] sm:$0xff] (!%p1401_p11) }
 0x15e   : > { %970 = vst [vmem:[#allocation2 + $0x50] sm:$0xff] %v954_v38  ;;  %v955_v40 = vadd.f32 %v925_v39, %v393_v37  ;;  %v1537_v41 = vpop.f32.mrb[24].mxu0  ;;  %v1026_v31 = vmul.f32 (!%p1401_p11), %v1972_v25, %v1972_v25 }
 0x15f   : > { %v1538_v42 = vpop.f32.mrb[25].mxu0  ;;  %v1977_v29 = vld [vmem:[#allocation2 + $0x48] sm:$0xff] (!%p1401_p11) }
 0x160   : > { %971 = vst [vmem:[#allocation2 + $0x58] sm:$0xff] %v955_v40  ;;  %v1539_v43 = vadd.f32 %v1538_v42, %v1537_v41  ;;  %v1540_v44 = vpop.f32.mrb[26].mxu0  ;;  %v1027_v35 = vmul.f32 (!%p1401_p11), %v1977_v29, %v1977_v29 }
 0x161   : > { %v1541_v45 = vpop.f32.mrb[27].mxu0 }
 0x162   : > { %v1542_v47 = vadd.f32 %v1541_v45, %v1540_v44  ;;  %v930_v48 = vadd.f32 %v1539_v43, %v929_v8  ;;  %v1020_v8 = vmul.f32 (!%p1401_p11), %v1940_v3, %v1940_v3 }
 0x164   : > { %v956_v50 = vadd.f32 %v930_v48, %v394_v46  ;;  %v933_v51 = vadd.f32 %v1542_v47, %v932_v13  ;;  %v1957_v13 = vld [vmem:[#allocation2 + $0x28] sm:$0xff] (!%p1401_p11)  ;;  %v1035_v16 = vadd.f32 (!%p1401_p11), %v1034_v12, %v1020_v8 }
 0x165   : > { %v1023_v19 = vmul.f32 (!%p1401_p11), %v1957_v13, %v1957_v13  ;;  %v1982_v33 = vld [vmem:[#allocation2 + $0x50] sm:$0xff] (!%p1401_p11) }
 0x166   : > { %972 = vst [vmem:[#allocation2 + $0x60] sm:$0xff] %v956_v50  ;;  %v957_v52 = vadd.f32 %v933_v51, %v395_v49  ;;  %v1543_v53 = vpop.f32.mrb[28].mxu0  ;;  %v1028_v39 = vmul.f32 (!%p1401_p11), %v1982_v33, %v1982_v33 }
 0x167   : > { %v1544_v54 = vpop.f32.mrb[29].mxu0  ;;  %v1987_v37 = vld [vmem:[#allocation2 + $0x58] sm:$0xff] (!%p1401_p11) }
 0x168   : > { %973 = vst [vmem:[#allocation2 + $0x68] sm:$0xff] %v957_v52  ;;  %v1545_v55 = vadd.f32 %v1544_v54, %v1543_v53  ;;  %v1546_v56 = vpop.f32.mrb[30].mxu0  ;;  %v1029_v43 = vmul.f32 (!%p1401_p11), %v1987_v37, %v1987_v37 }
 0x169   : > { %v1547_v58 = vpop.f32.mrb[31].mxu0 }
 0x16a   : > { %v938_v59 = vadd.f32 %v1595_v5, %v1545_v55  ;;  %v1548_v60 = vadd.f32 %v1547_v58, %v1546_v56  ;;  %979 = sbr.rel (%p1401_p11) target bundleno = 449 (0x1c1), region = 70  ;;  %v996_v5 = vadd.f32 (!%p1401_p11), %v1938_v2, %v1936_v1 }
 0x16c   : > { %v958_v62 = vadd.f32 %v938_v59, %v396_v57  ;;  %v941_v63 = vadd.f32 %v1596_v11, %v1548_v60  ;;  %v997_v10 = vadd.f32 (!%p1401_p11), %v996_v5, %v1940_v3  ;;  %v1021_v11 = vmul.f32 (!%p1401_p11), %v1942_v4, %v1942_v4 }
 0x16d   : > { %v1992_v41 = vld [vmem:[#allocation2 + $0x60] sm:$0xff] (!%p1401_p11) }
 0x16e   : > { %974 = vst [vmem:[#allocation2 + $0x70] sm:$0xff] %v958_v62  ;;  %v959_v0 = vadd.f32 %v941_v63, %v397_v61  ;;  %v998_v14 = vadd.f32 (!%p1401_p11), %v997_v10, %v1942_v4  ;;  %v1036_v20 = vadd.f32 (!%p1401_p11), %v1035_v16, %v1021_v11  ;;  %v1030_v47 = vmul.f32 (!%p1401_p11), %v1992_v41, %v1992_v41 }
 0x16f   : > { %v993_v45 = vld [vmem:[#allocation2 + $0x68] sm:$0xff] (!%p1401_p11) }
 0x170   : > { %975 = vst [vmem:[#allocation2 + $0x78] sm:$0xff] %v959_v0  ;;  %v999_v18 = vadd.f32 (!%p1401_p11), %v998_v14, %v1952_v9  ;;  %v1037_v24 = vadd.f32 (!%p1401_p11), %v1036_v20, %v1022_v15  ;;  %v1031_v51 = vmul.f32 (!%p1401_p11), %v993_v45, %v993_v45 }
 0x172   : > { %v1000_v22 = vadd.f32 %v999_v18, %v1957_v13  ;;  %v1038_v28 = vadd.f32 %v1037_v24, %v1023_v19 }
 0x174   : > { %v1001_v26 = vadd.f32 %v1000_v22, %v1962_v17  ;;  %v1039_v32 = vadd.f32 %v1038_v28, %v1024_v23  ;;  %v1061_v28 = vld [vmem:[%s2073_s2] sm:$0x1] }
 0x175   : > { %v2000_v49 = vld [vmem:[#allocation2 + $0x70] sm:$0xff] }
 0x176   : > { %v1002_v30 = vadd.f32 %v1001_v26, %v1967_v21  ;;  %v1040_v36 = vadd.f32 %v1039_v32, %v1025_v27  ;;  %v1032_v55 = vmul.f32 %v2000_v49, %v2000_v49  ;;  %v1066_v26 = vlaneseq }
 0x177   : > { %v2003_v53 = vld [vmem:[#allocation2 + $0x78] sm:$0xff] }
 0x178   : > { %v1003_v34 = vadd.f32 %v1002_v30, %v1972_v25  ;;  %v1041_v40 = vadd.f32 %v1040_v36, %v1026_v31  ;;  %v1033_v58 = vmul.f32 %v2003_v53, %v2003_v53  ;;  %v1067_v27 = vshrl.u32 %v1066_v26, 7 }
 0x17a   : > { %v1004_v38 = vadd.f32 %v1003_v34, %v1977_v29  ;;  %v1042_v44 = vadd.f32 %v1041_v40, %v1027_v35  ;;  %v1068_v30 = vsub.s32 0, %v1067_v27  ;;  %v1063_v34 = vld [vmem:[%s2074_s3] sm:$0x1] }
 0x17c   : > { %v1005_v42 = vadd.f32 %v1004_v38, %v1982_v33  ;;  %v1043_v48 = vadd.f32 %v1042_v44, %v1028_v39 }
 0x17e   : > { %v1006_v46 = vadd.f32 %v1005_v42, %v1987_v37  ;;  %v1044_v52 = vadd.f32 %v1043_v48, %v1029_v43 }
 0x180   : > { %v1007_v50 = vadd.f32 %v1006_v46, %v1992_v41  ;;  %v1045_v56 = vadd.f32 %v1044_v52, %v1030_v47 }
 0x182   : > { %v1008_v54 = vadd.f32 %v1007_v50, %v993_v45  ;;  %v1046_v59 = vadd.f32 %v1045_v56, %v1031_v51 }
 0x184   : > { %v1009_v57 = vadd.f32 %v1008_v54, %v2000_v49  ;;  %v1047_v61 = vadd.f32 %v1046_v59, %v1032_v55 }
 0x186   : > { %v1010_v60 = vadd.f32 %v1009_v57, %v2003_v53  ;;  %v1048_v63 = vadd.f32 %v1047_v61, %v1033_v58 }
 0x188   : > { %v1011_v62 = vrot.slane %v1010_v60, 4  ;;  %v1049_v5 = vrot.slane %v1048_v63, 4 }
 0x18a   : > { %v1012_v0 = vadd.f32 %v1011_v62, %v1010_v60  ;;  %v1050_v7 = vadd.f32 %v1049_v5, %v1048_v63 }
 0x18c   : > { %v1013_v6 = vrot.slane %v1012_v0, 2  ;;  %v1051_v10 = vrot.slane %v1050_v7, 2 }
 0x18e   : > { %v1014_v8 = vadd.f32 %v1013_v6, %v1012_v0  ;;  %v1052_v12 = vadd.f32 %v1051_v10, %v1050_v7 }
 0x190   : > { %v1015_v11 = vrot.slane %v1014_v8, 1  ;;  %v1053_v15 = vrot.slane %v1052_v12, 1 }
 0x192   : > { %v1016_v14 = vadd.f32 %v1015_v11, %v1014_v8  ;;  %v1054_v18 = vadd.f32 %v1053_v15, %v1052_v12 }
 0x194   : > { %v1017_v16 = vmul.f32 0.0078125, %v1016_v14  ;;  %v1055_v20 = vmul.f32 0.0078125, %v1054_v18 }
 0x196   : > { %v1056_v19 = vmul.f32 %v1017_v16, %v1017_v16 }
 0x198   : > { %v1057_v22 = vsub.f32 %v1055_v20, %v1056_v19 }
 0x19a   : > { %v1058_v23 = vmax.f32 %v1057_v22, 0.0 }
 0x19c   : > { %v1059_v24 = vadd.f32 1e-05, %v1058_v23 }
 0x19e   : > { %1696 = vrsqrt.f32 %v1059_v24 }
 0x1a8   : > { %v1697_v31 = vpop.eup %1696 }
 0x1a9   : > { %v1062_v32 = vmul.f32 %v1697_v31, %v1061_v28 }
 0x1ab   : > { %v1064_v35 = vmul.f32 %v1062_v32, %v1017_v16  ;;  %v1069_v36 = vrot.slane %v1062_v32, %v1068_v30 }
 0x1ad   : > { %v1065_v38 = vsub.f32 %v1063_v34, %v1064_v35  ;;  %v1070_v39 = vmul.f32 %v1069_v36, %v1936_v1  ;;  %v1071_v40 = vmul.f32 %v1069_v36, %v1938_v2  ;;  %v1072_v42 = vmul.f32 %v1069_v36, %v1940_v3 }
 0x1ae   : > { %v1073_v43 = vmul.f32 %v1069_v36, %v1942_v4  ;;  %v1074_v44 = vmul.f32 %v1069_v36, %v1952_v9  ;;  %v1075_v46 = vmul.f32 %v1069_v36, %v1957_v13  ;;  %v1076_v47 = vmul.f32 %v1069_v36, %v1962_v17 }
 0x1af   : > { %v1090_v48 = vrot.slane %v1065_v38, %v1068_v30  ;;  %v1077_v50 = vmul.f32 %v1069_v36, %v1967_v21  ;;  %v1078_v51 = vmul.f32 %v1069_v36, %v1972_v25  ;;  %v1079_v52 = vmul.f32 %v1069_v36, %v1977_v29 }
 0x1b0   : > { %v1080_v1 = vmul.f32 %v1069_v36, %v1982_v33  ;;  %v1081_v2 = vmul.f32 %v1069_v36, %v1987_v37  ;;  %v1082_v3 = vmul.f32 %v1069_v36, %v1992_v41  ;;  %v1083_v4 = vmul.f32 %v1069_v36, %v993_v45 }
 0x1b1   : > { %v1092_v54 = vadd.f32 %v1090_v48, %v1070_v39  ;;  %v1093_v9 = vadd.f32 %v1090_v48, %v1071_v40  ;;  %v1094_v55 = vadd.f32 %v1090_v48, %v1072_v42  ;;  %v1095_v13 = vadd.f32 %v1090_v48, %v1073_v43 }
 0x1b2   : > { %v1096_v56 = vadd.f32 %v1090_v48, %v1074_v44  ;;  %v1097_v17 = vadd.f32 %v1090_v48, %v1075_v46  ;;  %v1098_v57 = vadd.f32 %v1090_v48, %v1076_v47  ;;  %v1099_v58 = vadd.f32 %v1090_v48, %v1077_v50 }
 0x1b3   : > { %v1108_v21 = vmax.f32 %v1092_v54, 0.0  ;;  %v1109_v59 = vmax.f32 %v1093_v9, 0.0  ;;  %v1110_v25 = vmax.f32 %v1094_v55, 0.0  ;;  %v1111_v60 = vmax.f32 %v1095_v13, 0.0 }
 0x1b4   : > { %v1112_v29 = vmax.f32 %v1096_v56, 0.0  ;;  %v1113_v61 = vmax.f32 %v1097_v17, 0.0  ;;  %v1114_v33 = vmax.f32 %v1098_v57, 0.0  ;;  %v1115_v62 = vmax.f32 %v1099_v58, 0.0 }
 0x1b5   : > { %v1441_v37 = vpack.c.bf16 %v1109_v59, %v1108_v21  ;;  %v1446_v63 = vpack.c.bf16 %v1111_v60, %v1110_v25  ;;  %v1100_v41 = vadd.f32 %v1090_v48, %v1078_v51  ;;  %v1101_v45 = vadd.f32 %v1090_v48, %v1079_v52 }
 0x1b6   : > { %v1451_v0 = vpack.c.bf16 %v1113_v61, %v1112_v29  ;;  %v1456_v5 = vpack.c.bf16 %v1115_v62, %v1114_v33  ;;  %v1102_v6 = vadd.f32 %v1090_v48, %v1080_v1  ;;  %v1103_v7 = vadd.f32 %v1090_v48, %v1081_v2 }
 0x1b7   : > { %1442 = vst [vmem:[%s2075_s4] sm:$0xff] %v1441_v37   ;;  %1478 = vst [vmem:[%s2075_s4 + $0x8] sm:$0xff] %v1446_v63   ;;  %v1116_v8 = vmax.f32 %v1100_v41, 0.0  ;;  %v1117_v10 = vmax.f32 %v1101_v45, 0.0  ;;  %v1104_v11 = vadd.f32 %v1090_v48, %v1082_v3  ;;  %v1105_v12 = vadd.f32 %v1090_v48, %v1083_v4 }
 0x1b8   : > { %1479 = vst [vmem:[%s2075_s4 + $0x10] sm:$0xff] %v1451_v0   ;;  %1480 = vst [vmem:[%s2075_s4 + $0x18] sm:$0xff] %v1456_v5   ;;  %v1118_v14 = vmax.f32 %v1102_v6, 0.0  ;;  %v1119_v15 = vmax.f32 %v1103_v7, 0.0  ;;  %v1084_v16 = vmul.f32 %v1069_v36, %v2000_v49  ;;  %v1085_v18 = vmul.f32 %v1069_v36, %v2003_v53 }
 0x1b9   : > { %v1461_v19 = vpack.c.bf16 %v1117_v10, %v1116_v8  ;;  %v1120_v20 = vmax.f32 %v1104_v11, 0.0  ;;  %v1121_v22 = vmax.f32 %v1105_v12, 0.0 }
 0x1ba   : > { %v1466_v23 = vpack.c.bf16 %v1119_v15, %v1118_v14  ;;  %v1106_v24 = vadd.f32 %v1090_v48, %v1084_v16  ;;  %v1107_v26 = vadd.f32 %v1090_v48, %v1085_v18 }
 0x1bb   : > { %1481 = vst [vmem:[%s2075_s4 + $0x20] sm:$0xff] %v1461_v19   ;;  %v1471_v27 = vpack.c.bf16 %v1121_v22, %v1120_v20 }
 0x1bc   : > { %1482 = vst [vmem:[%s2075_s4 + $0x28] sm:$0xff] %v1466_v23   ;;  %v1122_v28 = vmax.f32 %v1106_v24, 0.0  ;;  %v1123_v30 = vmax.f32 %v1107_v26, 0.0 }
 0x1bd   : > { %1483 = vst [vmem:[%s2075_s4 + $0x30] sm:$0xff] %v1471_v27  }
 0x1be   : > { %v1476_v49 = vpack.c.bf16 %v1123_v30, %v1122_v28 }
 0x1c0   : > { %1484 = vst [vmem:[%s2075_s4 + $0x38] sm:$0xff] %v1476_v49  }
 0x1c1 PF: > { %s14_s19 = sadd.s32 1, %s1736_s19   ;;  %s2076_s15 = smov %s1724_s16 }
 0x1c2   : > { %p11_p12 = scmp.ge.s32.totalorder %s14_s19, 5   ;;  %s2077_s16 = smov %s1799_s23 }
 0x1c3   : > { %s2078_s17 = smov %s1732_s18  ;;  %s2079_s18 = smov %s2081_s20 }
 0x1c4   :  { %13 = sbr.rel (!%p11_p12) target bundleno = 3 (0x3), region = 120 }

// kernel: multihead_forward.37
= control target key start
LH: loop header
LB: loop body
LE: loop exit
PB: predicated region body
PF: predicated region fallthrough
CT: control target
= control target key end

     0   :  { %s902_s1 = inlined_call_operand.vmem [shape: bf16[128,128], index: 1, kind: input, shape index: {}]   ;;  %s903_s0 = inlined_call_operand.vmem [shape: bf16[128,128], index: 0, kind: input, shape index: {}]   ;;  %s904_s2 = inlined_call_operand.vmem [shape: f32[1,128], index: 2, kind: input, shape index: {}]   ;;  %s905_s3 = inlined_call_operand.vmem [shape: f32[1,128], index: 3, kind: input, shape index: {}]   ;;  %s906_s4 = inlined_call_operand.vmem [shape: bf16[128,128], index: 4, kind: output, shape index: {}]  }
   0x1   :  { %v685_v0 = vld [vmem:[%s902_s1] sm:$0xff]   ;;  %v686_v1 = vld [vmem:[%s902_s1 + $0x8] sm:$0xff]   ;;  %v687_v2 = vld [vmem:[%s902_s1 + $0x10] sm:$0xff]  }
   0x2   :  { %637 = vmatprep.subr.bf16.mxu0 %v685_v0  ;;  %669 = vmatprep.subr.bf16.mxu1 %v685_v0  ;;  %v688_v3 = vld [vmem:[%s902_s1 + $0x18] sm:$0xff]   ;;  %v693_v4 = vld [vmem:[%s903_s0] sm:$0xff]   ;;  %v690_v7 = vld [vmem:[%s902_s1 + $0x28] sm:$0xff]  }
   0x3   :  { %638 = vmatpush3.bf16.msra.mxu0 %v685_v0  ;;  %677 = vmatpush3.bf16.msra.mxu1 %v685_v0  ;;  %v689_v5 = vld [vmem:[%s902_s1 + $0x20] sm:$0xff]   ;;  %v691_v8 = vld [vmem:[%s902_s1 + $0x30] sm:$0xff]   ;;  %v692_v9 = vld [vmem:[%s902_s1 + $0x38] sm:$0xff]  }
   0x4   :  { %639 = vmatprep.subr.bf16.mxu0 %v686_v1  ;;  %670 = vmatprep.subr.bf16.mxu1 %v686_v1  ;;  %v697_v6 = vld [vmem:[%s903_s0 + $0x20] sm:$0xff]   ;;  %v694_v10 = vld [vmem:[%s903_s0 + $0x8] sm:$0xff]   ;;  %v695_v12 = vld [vmem:[%s903_s0 + $0x10] sm:$0xff]  }
   0x5   :  { %653 = vmatprep.mubr.bf16.mxu0 %v693_v4  ;;  %661 = vmatprep.mubr.bf16.mxu1 %v697_v6  ;;  %v698_v11 = vld [vmem:[%s903_s0 + $0x28] sm:$0xff]   ;;  %v699_v13 = vld [vmem:[%s903_s0 + $0x30] sm:$0xff]   ;;  %v696_v14 = vld [vmem:[%s903_s0 + $0x18] sm:$0xff]  }
   0x6   :  { %v700_v15 = vld [vmem:[%s903_s0 + $0x38] sm:$0xff]  }
   0x7   :  { %640 = vmatpush3.bf16.msra.mxu0 %v686_v1  ;;  %678 = vmatpush3.bf16.msra.mxu1 %v686_v1 }
   0x8   :  { %641 = vmatprep.subr.bf16.mxu0 %v687_v2  ;;  %671 = vmatprep.subr.bf16.mxu1 %v687_v2 }
   0xb   :  { %642 = vmatpush3.bf16.msra.mxu0 %v687_v2  ;;  %679 = vmatpush3.bf16.msra.mxu1 %v687_v2 }
   0xc   :  { %643 = vmatprep.subr.bf16.mxu0 %v688_v3  ;;  %672 = vmatprep.subr.bf16.mxu1 %v688_v3 }
   0xf   :  { %644 = vmatpush3.bf16.msra.mxu0 %v688_v3  ;;  %680 = vmatpush3.bf16.msra.mxu1 %v688_v3 }
  0x10   :  { %645 = vmatprep.subr.bf16.mxu0 %v689_v5  ;;  %673 = vmatprep.subr.bf16.mxu1 %v689_v5 }
  0x13   :  { %646 = vmatpush3.bf16.msra.mxu0 %v689_v5  ;;  %681 = vmatpush3.bf16.msra.mxu1 %v689_v5 }
  0x14   :  { %647 = vmatprep.subr.bf16.mxu0 %v690_v7  ;;  %674 = vmatprep.subr.bf16.mxu1 %v690_v7 }
  0x17   :  { %648 = vmatpush3.bf16.msra.mxu0 %v690_v7  ;;  %682 = vmatpush3.bf16.msra.mxu1 %v690_v7 }
  0x18   :  { %649 = vmatprep.subr.bf16.mxu0 %v691_v8  ;;  %675 = vmatprep.subr.bf16.mxu1 %v691_v8 }
  0x1b   :  { %650 = vmatpush3.bf16.msra.mxu0 %v691_v8  ;;  %683 = vmatpush3.bf16.msra.mxu1 %v691_v8 }
  0x1c   :  { %651 = vmatprep.subr.bf16.mxu0 %v692_v9  ;;  %676 = vmatprep.subr.bf16.mxu1 %v692_v9 }
  0x1f   :  { %652 = vmatpush3.bf16.msra.mxu0 %v692_v9  ;;  %684 = vmatpush3.bf16.msra.mxu1 %v692_v9 }
  0x22   :  { %654 = vmatmul.mubr.bf16.vlgmr.msra.gmra.mrb[0].mxu0 %v694_v10  ;;  %662 = vmatmul.mubr.bf16.vlgmr.msra.gmra.mrb[0].mxu1 %v698_v11 }
  0x23   :  { %657 = vmatprep.mubr.bf16.mxu0 %v695_v12  ;;  %665 = vmatprep.mubr.bf16.mxu1 %v699_v13 }
  0x2a   :  { %658 = vmatmul.mubr.bf16.gmra.mrb[4].mxu0 %v696_v14  ;;  %666 = vmatmul.mubr.bf16.gmra.mrb[4].mxu1 %v700_v15 }
  0xf5   :  { %v776_v16 = vpop.f32.mrb[0].mxu0  ;;  %v778_v17 = vpop.f32.mrb[0].mxu1 }
  0xf6   :  { %v780_v18 = vpop.f32.mrb[1].mxu0  ;;  %v782_v19 = vpop.f32.mrb[1].mxu1  ;;  %v354_v27 = vmul.f32 %v776_v16, %v776_v16  ;;  %v362_v59 = vmul.f32 %v778_v17, %v778_v17 }
  0xf7   :  { %v784_v20 = vpop.f32.mrb[2].mxu0  ;;  %v786_v21 = vpop.f32.mrb[2].mxu1  ;;  %v352_v24 = vmul.f32 %v780_v18, %v780_v18  ;;  %v360_v53 = vmul.f32 %v782_v19, %v782_v19 }
  0xf8   :  { %v788_v22 = vpop.f32.mrb[3].mxu0  ;;  %v790_v23 = vpop.f32.mrb[3].mxu1  ;;  %v355_v30 = vmul.f32 %v784_v20, %v784_v20  ;;  %v363_v62 = vmul.f32 %v786_v21, %v786_v21 }
  0xf9   :  { %v330_v25 = vadd.f32 %v788_v22, %v780_v18  ;;  %v353_v26 = vmul.f32 %v788_v22, %v788_v22  ;;  %v361_v58 = vmul.f32 %v790_v23, %v790_v23 }
  0xfb   :  { %v331_v28 = vadd.f32 %v776_v16, %v330_v25  ;;  %v368_v29 = vadd.f32 %v353_v26, %v352_v24 }
  0xfd   :  { %v369_v31 = vadd.f32 %v368_v29, %v354_v27  ;;  %v803_v32 = vpop.f32.mrb[4].mxu0  ;;  %v332_v33 = vadd.f32 %v784_v20, %v331_v28  ;;  %v806_v34 = vpop.f32.mrb[4].mxu1 }
  0xfe   :  { %v808_v35 = vpop.f32.mrb[5].mxu0  ;;  %v810_v36 = vpop.f32.mrb[5].mxu1  ;;  %v358_v47 = vmul.f32 %v803_v32, %v803_v32  ;;  %v366_v7 = vmul.f32 %v806_v34, %v806_v34 }
  0xff   :  { %v333_v37 = vadd.f32 %v332_v33, %v808_v35  ;;  %v356_v38 = vmul.f32 %v808_v35, %v808_v35  ;;  %v370_v39 = vadd.f32 %v369_v31, %v355_v30  ;;  %v815_v40 = vpop.f32.mrb[6].mxu0  ;;  %v817_v41 = vpop.f32.mrb[6].mxu1  ;;  %v364_v1 = vmul.f32 %v810_v36, %v810_v36 }
 0x100   :  { %v819_v42 = vpop.f32.mrb[7].mxu0  ;;  %v821_v43 = vpop.f32.mrb[7].mxu1  ;;  %v359_v50 = vmul.f32 %v815_v40, %v815_v40  ;;  %v367_v10 = vmul.f32 %v817_v41, %v817_v41 }
 0x101   :  { %v371_v44 = vadd.f32 %v370_v39, %v356_v38  ;;  %v334_v45 = vadd.f32 %v333_v37, %v819_v42  ;;  %v357_v46 = vmul.f32 %v819_v42, %v819_v42  ;;  %v365_v6 = vmul.f32 %v821_v43, %v821_v43 }
 0x103   :  { %v335_v48 = vadd.f32 %v803_v32, %v334_v45  ;;  %v372_v49 = vadd.f32 %v371_v44, %v357_v46 }
 0x105   :  { %v373_v51 = vadd.f32 %v372_v49, %v358_v47  ;;  %v336_v52 = vadd.f32 %v815_v40, %v335_v48  ;;  %v400_v48 = vlaneseq }
 0x107   :  { %v337_v54 = vadd.f32 %v336_v52, %v782_v19  ;;  %v374_v55 = vadd.f32 %v373_v51, %v359_v50  ;;  %v401_v49 = vshrl.u32 %v400_v48, 7  ;;  %v395_v50 = vld [vmem:[%s904_s2] sm:$0x1] }
 0x109   :  { %v375_v56 = vadd.f32 %v374_v55, %v360_v53  ;;  %v338_v57 = vadd.f32 %v337_v54, %v790_v23  ;;  %v402_v51 = vsub.s32 0, %v401_v49  ;;  %v397_v54 = vld [vmem:[%s905_s3] sm:$0x1] }
 0x10b   :  { %v339_v60 = vadd.f32 %v778_v17, %v338_v57  ;;  %v376_v61 = vadd.f32 %v375_v56, %v361_v58 }
 0x10d   :  { %v377_v63 = vadd.f32 %v376_v61, %v362_v59  ;;  %v340_v0 = vadd.f32 %v786_v21, %v339_v60 }
 0x10f   :  { %v341_v2 = vadd.f32 %v340_v0, %v810_v36  ;;  %v378_v3 = vadd.f32 %v377_v63, %v363_v62 }
 0x111   :  { %v379_v4 = vadd.f32 %v378_v3, %v364_v1  ;;  %v342_v5 = vadd.f32 %v341_v2, %v821_v43 }
 0x113   :  { %v343_v8 = vadd.f32 %v806_v34, %v342_v5  ;;  %v380_v9 = vadd.f32 %v379_v4, %v365_v6 }
 0x115   :  { %v344_v11 = vadd.f32 %v817_v41, %v343_v8  ;;  %v381_v12 = vadd.f32 %v380_v9, %v366_v7 }
 0x117   :  { %v345_v13 = vrot.slane %v344_v11, 4  ;;  %v382_v14 = vadd.f32 %v381_v12, %v367_v10 }
 0x119   :  { %v346_v15 = vadd.f32 %v345_v13, %v344_v11  ;;  %v383_v24 = vrot.slane %v382_v14, 4 }
 0x11b   :  { %v347_v25 = vrot.slane %v346_v15, 2  ;;  %v384_v26 = vadd.f32 %v383_v24, %v382_v14 }
 0x11d   :  { %v348_v27 = vadd.f32 %v347_v25, %v346_v15  ;;  %v385_v28 = vrot.slane %v384_v26, 2 }
 0x11f   :  { %v349_v29 = vrot.slane %v348_v27, 1  ;;  %v386_v30 = vadd.f32 %v385_v28, %v384_v26 }
 0x121   :  { %v350_v31 = vadd.f32 %v349_v29, %v348_v27  ;;  %v387_v33 = vrot.slane %v386_v30, 1 }
 0x123   :  { %v351_v37 = vmul.f32 0.0078125, %v350_v31  ;;  %v388_v38 = vadd.f32 %v387_v33, %v386_v30 }
 0x125   :  { %v389_v39 = vmul.f32 0.0078125, %v388_v38  ;;  %v390_v44 = vmul.f32 %v351_v37, %v351_v37 }
 0x127   :  { %v391_v45 = vsub.f32 %v389_v39, %v390_v44 }
 0x129   :  { %v392_v46 = vmax.f32 %v391_v45, 0.0 }
 0x12b   :  { %v393_v47 = vadd.f32 1e-05, %v392_v46 }
 0x12d   :  { %701 = vrsqrt.f32 %v393_v47 }
 0x137   :  { %v702_v52 = vpop.eup %701 }
 0x138   :  { %v396_v53 = vmul.f32 %v702_v52, %v395_v50 }
 0x13a   :  { %v398_v55 = vmul.f32 %v396_v53, %v351_v37  ;;  %v403_v56 = vrot.slane %v396_v53, %v402_v51 }
 0x13c   :  { %v399_v57 = vsub.f32 %v397_v54, %v398_v55  ;;  %v404_v58 = vmul.f32 %v403_v56, %v780_v18  ;;  %v405_v59 = vmul.f32 %v403_v56, %v788_v22  ;;  %v406_v60 = vmul.f32 %v776_v16, %v403_v56 }
 0x13d   :  { %v407_v61 = vmul.f32 %v784_v20, %v403_v56  ;;  %v408_v62 = vmul.f32 %v403_v56, %v808_v35  ;;  %v409_v63 = vmul.f32 %v403_v56, %v819_v42  ;;  %v410_v0 = vmul.f32 %v803_v32, %v403_v56 }
 0x13e   :  { %v411_v1 = vmul.f32 %v815_v40, %v403_v56  ;;  %v412_v2 = vmul.f32 %v403_v56, %v782_v19  ;;  %v413_v3 = vmul.f32 %v403_v56, %v790_v23  ;;  %v414_v18 = vmul.f32 %v778_v17, %v403_v56 }
 0x13f   :  { %v415_v22 = vmul.f32 %v786_v21, %v403_v56  ;;  %v416_v16 = vmul.f32 %v403_v56, %v810_v36  ;;  %v417_v20 = vmul.f32 %v403_v56, %v821_v43  ;;  %v418_v35 = vmul.f32 %v806_v34, %v403_v56 }
 0x140   :  { %v419_v42 = vmul.f32 %v817_v41, %v403_v56  ;;  %v424_v4 = vrot.slane %v399_v57, %v402_v51 }
 0x142   :  { %v426_v32 = vadd.f32 %v424_v4, %v404_v58  ;;  %v427_v5 = vadd.f32 %v424_v4, %v405_v59  ;;  %v428_v40 = vadd.f32 %v424_v4, %v406_v60  ;;  %v429_v6 = vadd.f32 %v424_v4, %v407_v61 }
 0x143   :  { %v430_v19 = vadd.f32 %v424_v4, %v408_v62  ;;  %v431_v7 = vadd.f32 %v424_v4, %v409_v63  ;;  %v432_v23 = vadd.f32 %v424_v4, %v410_v0  ;;  %v433_v8 = vadd.f32 %v424_v4, %v411_v1 }
 0x144   :  { %v434_v17 = vadd.f32 %v424_v4, %v412_v2  ;;  %v435_v9 = vadd.f32 %v424_v4, %v413_v3  ;;  %v436_v21 = vadd.f32 %v424_v4, %v414_v18  ;;  %v437_v10 = vadd.f32 %v424_v4, %v415_v22 }
 0x145   :  { %v438_v36 = vadd.f32 %v424_v4, %v416_v16  ;;  %v439_v11 = vadd.f32 %v424_v4, %v417_v20  ;;  %v440_v43 = vadd.f32 %v424_v4, %v418_v35  ;;  %v441_v12 = vadd.f32 %v424_v4, %v419_v42 }
 0x146   :  { %v577_v34 = vpack.c.bf16 %v427_v5, %v426_v32  ;;  %v582_v13 = vpack.c.bf16 %v429_v6, %v428_v40  ;;  %v587_v41 = vpack.c.bf16 %v431_v7, %v430_v19  ;;  %v592_v14 = vpack.c.bf16 %v433_v8, %v432_v23 }
 0x147   :  { %v597_v15 = vpack.c.bf16 %v435_v9, %v434_v17  ;;  %v602_v24 = vpack.c.bf16 %v437_v10, %v436_v21  ;;  %v607_v25 = vpack.c.bf16 %v439_v11, %v438_v36  ;;  %v612_v26 = vpack.c.bf16 %v441_v12, %v440_v43 }
 0x148   :  { %578 = vst [vmem:[%s906_s4] sm:$0xff] %v577_v34   ;;  %614 = vst [vmem:[%s906_s4 + $0x8] sm:$0xff] %v582_v13  }
 0x149   :  { %615 = vst [vmem:[%s906_s4 + $0x10] sm:$0xff] %v587_v41   ;;  %616 = vst [vmem:[%s906_s4 + $0x18] sm:$0xff] %v592_v14  }
 0x14a   :  { %617 = vst [vmem:[%s906_s4 + $0x20] sm:$0xff] %v597_v15   ;;  %618 = vst [vmem:[%s906_s4 + $0x28] sm:$0xff] %v602_v24  }
 0x14b   :  { %619 = vst [vmem:[%s906_s4 + $0x30] sm:$0xff] %v607_v25   ;;  %620 = vst [vmem:[%s906_s4 + $0x38] sm:$0xff] %v612_v26  }

// kernel: multihead_forward.38
= control target key start
LH: loop header
LB: loop body
LE: loop exit
PB: predicated region body
PF: predicated region fallthrough
CT: control target
= control target key end

     0   :  { %s1916_s18 = smov 0   ;;  %s1918_s19 = smov 0   ;;  %s2295_s0 = inlined_call_operand.vmem [shape: bf16[128,1152], index: 0, kind: input, shape index: {}]   ;;  %s2296_s1 = inlined_call_operand.vmem [shape: bf16[1152,128], index: 1, kind: input, shape index: {}]   ;;  %s2297_s2 = inlined_call_operand.vmem [shape: f32[1,128], index: 2, kind: input, shape index: {}]   ;;  %s2298_s3 = inlined_call_operand.vmem [shape: f32[1,128], index: 3, kind: input, shape index: {}]   ;;  %s2299_s4 = inlined_call_operand.vmem [shape: bf16[128,128], index: 4, kind: input, shape index: {}]   ;;  %s2300_s5 = inlined_call_operand.vmem [shape: bf16[128,128], index: 5, kind: output, shape index: {}]  }
   0x1   :  { %s1920_s20 = smov 0   ;;  %s1922_s21 = smov 0  }
   0x2   :  { %s1924_s22 = smov 0  }
   0x3 LB: > { %s24_s23 = sadd.s32 1, %s1879_s21  ;;  %p41_p1 = scmp.ne.s32.totalorder %s1871_s19, %s1867_s18  ;;  %s1883_s22 = sphi %s1924_s22, %s15_s22   ;;  %s1879_s21 = sphi %s1922_s21, %s2304_s21   ;;  %s1875_s20 = sphi %s1920_s20, %s2303_s20   ;;  %s1871_s19 = sphi %s1918_s19, %s2302_s19   ;;  %s1867_s18 = sphi %s1916_s18, %s2301_s18  }
   0x4   : > { %p25_p0 = scmp.ge.s32.totalorder %s24_s23, 3  ;;  %p42_p2 = scmp.eq.s32.totalorder %s1883_s22, 0 }
   0x5   : > { %s34_s25 = sadd.s32 1, %s1871_s19  ;;  %p1424_p5 = scmp.ge.s32.totalorder %s1883_s22, 3 }
   0x6   : > { %s2306_s23 = smov (%p25_p0, %s24_s23), 0  ;;  %p43_p3 = por %p42_p2, %p41_p1 }
   0x7   : > { %s31_s24 = ssub.s32 %s1879_s21, %s2306_s23  ;;  %218 = sbr.rel (%p1424_p5) target bundleno = 37 (0x25), region = 28 }
   0x8   : > { %p32_p4 = scmp.eq.s32.totalorder %s31_s24, 0 }
   0xa   : > { %s1951_s26 = scalar_select %p32_p4, %s1871_s19, %s34_s25  }
   0xe   : > { %221 = sbr.rel (!%p43_p3) target bundleno = 37 (0x25), region = 32  ;;  %s223_s27 = sand.u32 (%p43_p3), 1, %s1871_s19  }
   0xf   : > { %s1529_s28 = smul.u32 (%p43_p3), 12, %s1879_s21 }
  0x10   : > { %s1744_s29 = smul.u32 (%p43_p3), 192, %s223_s27 }
  0x11   : > { %s1959_s7 = scalar_lea.vmem (%p43_p3), %s2295_s0, %s1529_s28 }
  0x12   : > { %v243_v0 = vld [vmem:[%s1959_s7] sm:$0xff] (%p43_p3)  ;;  %v247_v2 = vld [vmem:[%s1959_s7 + $0x48] sm:$0xff] (%p43_p3)  ;;  %s1964_s8 = scalar_lea.vmem (%p43_p3), [#allocation3], %s1744_s29  ;;  %v251_v4 = vld [vmem:[%s1959_s7 + $0x90] sm:$0xff] (%p43_p3) }
  0x13   : > { %v245_v1 = vld [vmem:[%s1959_s7 + $0x24] sm:$0xff] (%p43_p3)  ;;  %244 = vst [vmem:[%s1964_s8] sm:$0xff] (%p43_p3), %v243_v0  ;;  %248 = vst [vmem:[%s1964_s8 + $0x18] sm:$0xff] (%p43_p3), %v247_v2  ;;  %v249_v3 = vld [vmem:[%s1959_s7 + $0x6c] sm:$0xff] (%p43_p3) }
  0x14   : > { %246 = vst [vmem:[%s1964_s8 + $0xc] sm:$0xff] (%p43_p3), %v245_v1  ;;  %v253_v5 = vld [vmem:[%s1959_s7 + $0xb4] sm:$0xff] (%p43_p3)  ;;  %250 = vst [vmem:[%s1964_s8 + $0x24] sm:$0xff] (%p43_p3), %v249_v3  ;;  %v257_v7 = vld [vmem:[%s1959_s7 + $0xfc] sm:$0xff] (%p43_p3) }
  0x15   : > { %252 = vst [vmem:[%s1964_s8 + $0x30] sm:$0xff] %v251_v4  ;;  %254 = vst [vmem:[%s1964_s8 + $0x3c] sm:$0xff] %v253_v5  ;;  %v255_v6 = vld [vmem:[%s1959_s7 + $0xd8] sm:$0xff]  ;;  %v259_v8 = vld [vmem:[%s1959_s7 + $0x120] sm:$0xff] }
  0x16   : > { %256 = vst [vmem:[%s1964_s8 + $0x48] sm:$0xff] %v255_v6  ;;  %258 = vst [vmem:[%s1964_s8 + $0x54] sm:$0xff] %v257_v7  ;;  %v261_v9 = vld [vmem:[%s1959_s7 + $0x144] sm:$0xff]  ;;  %v265_v11 = vld [vmem:[%s1959_s7 + $0x18c] sm:$0xff] }
  0x17   : > { %260 = vst [vmem:[%s1964_s8 + $0x60] sm:$0xff] %v259_v8  ;;  %v263_v10 = vld [vmem:[%s1959_s7 + $0x168] sm:$0xff]  ;;  %262 = vst [vmem:[%s1964_s8 + $0x6c] sm:$0xff] %v261_v9  ;;  %v267_v12 = vld [vmem:[%s1959_s7 + $0x1b0] sm:$0xff] }
  0x18   : > { %264 = vst [vmem:[%s1964_s8 + $0x78] sm:$0xff] %v263_v10  ;;  %266 = vst [vmem:[%s1964_s8 + $0x84] sm:$0xff] %v265_v11  ;;  %v269_v13 = vld [vmem:[%s1959_s7 + $0x1d4] sm:$0xff]  ;;  %v273_v15 = vld [vmem:[%s1959_s7 + $0x21c] sm:$0xff] }
  0x19   : > { %v271_v14 = vld [vmem:[%s1959_s7 + $0x1f8] sm:$0xff]  ;;  %268 = vst [vmem:[%s1964_s8 + $0x90] sm:$0xff] %v267_v12  ;;  %270 = vst [vmem:[%s1964_s8 + $0x9c] sm:$0xff] %v269_v13  ;;  %v1426_v16 = vld [vmem:[%s1959_s7 + $0x8] sm:$0xf] }
  0x1a   : > { %272 = vst [vmem:[%s1964_s8 + $0xa8] sm:$0xff] %v271_v14  ;;  %v1428_v17 = vld [vmem:[%s1959_s7 + $0x2c] sm:$0xf]  ;;  %274 = vst [vmem:[%s1964_s8 + $0xb4] sm:$0xff] %v273_v15  ;;  %v1430_v18 = vld [vmem:[%s1959_s7 + $0x50] sm:$0xf] }
  0x1b   : > { %1427 = vst [vmem:[%s1964_s8 + $0x8] sm:$0xf] %v1426_v16  ;;  %1429 = vst [vmem:[%s1964_s8 + $0x14] sm:$0xf] %v1428_v17  ;;  %v1432_v19 = vld [vmem:[%s1959_s7 + $0x74] sm:$0xf] }
  0x1c   : > { %v1434_v20 = vld [vmem:[%s1959_s7 + $0x98] sm:$0xf]  ;;  %1431 = vst [vmem:[%s1964_s8 + $0x20] sm:$0xf] %v1430_v18  ;;  %1433 = vst [vmem:[%s1964_s8 + $0x2c] sm:$0xf] %v1432_v19 }
  0x1d   : > { %1435 = vst [vmem:[%s1964_s8 + $0x38] sm:$0xf] %v1434_v20  ;;  %v1436_v21 = vld [vmem:[%s1959_s7 + $0xbc] sm:$0xf]  ;;  %v1438_v22 = vld [vmem:[%s1959_s7 + $0xe0] sm:$0xf] }
  0x1e   : > { %v1440_v23 = vld [vmem:[%s1959_s7 + $0x104] sm:$0xf]  ;;  %1437 = vst [vmem:[%s1964_s8 + $0x44] sm:$0xf] %v1436_v21  ;;  %1439 = vst [vmem:[%s1964_s8 + $0x50] sm:$0xf] %v1438_v22 }
  0x1f   : > { %1441 = vst [vmem:[%s1964_s8 + $0x5c] sm:$0xf] %v1440_v23  ;;  %v1442_v24 = vld [vmem:[%s1959_s7 + $0x128] sm:$0xf]  ;;  %v1444_v25 = vld [vmem:[%s1959_s7 + $0x14c] sm:$0xf] }
  0x20   : > { %v1446_v26 = vld [vmem:[%s1959_s7 + $0x170] sm:$0xf]  ;;  %1443 = vst [vmem:[%s1964_s8 + $0x68] sm:$0xf] %v1442_v24  ;;  %1445 = vst [vmem:[%s1964_s8 + $0x74] sm:$0xf] %v1444_v25 }
  0x21   : > { %1447 = vst [vmem:[%s1964_s8 + $0x80] sm:$0xf] %v1446_v26  ;;  %v1448_v27 = vld [vmem:[%s1959_s7 + $0x194] sm:$0xf]  ;;  %v1450_v28 = vld [vmem:[%s1959_s7 + $0x1b8] sm:$0xf] }
  0x22   : > { %v1452_v29 = vld [vmem:[%s1959_s7 + $0x1dc] sm:$0xf]  ;;  %1449 = vst [vmem:[%s1964_s8 + $0x8c] sm:$0xf] %v1448_v27  ;;  %1451 = vst [vmem:[%s1964_s8 + $0x98] sm:$0xf] %v1450_v28 }
  0x23   : > { %1453 = vst [vmem:[%s1964_s8 + $0xa4] sm:$0xf] %v1452_v29  ;;  %v1454_v30 = vld [vmem:[%s1959_s7 + $0x200] sm:$0xf]  ;;  %v1456_v31 = vld [vmem:[%s1959_s7 + $0x224] sm:$0xf] }
  0x24   : > { %1455 = vst [vmem:[%s1964_s8 + $0xb0] sm:$0xf] %v1454_v30  ;;  %1457 = vst [vmem:[%s1964_s8 + $0xbc] sm:$0xf] %v1456_v31 }
  0x25 PF: > { %p1458_p6 = scmp.ge.s32.totalorder %s1883_s22, 1  ;;  %p330_p7 = scmp.lt.s32.totalorder %s1883_s22, 4 }
  0x27   : > { %p331_p8 = pnand %p1458_p6, %p330_p7 }
  0x28   : > { %s337_s9 = sand.u32 (!%p331_p8), 1, %s1867_s18   ;;  %s382_s10 = smul.u32 (!%p331_p8), 48, %s1875_s20 }
  0x29   : > { %334 = sbr.rel (%p331_p8) target bundleno = 454 (0x1c6), region = 62  ;;  %p1460_p10 = scmp.ne.s32.totalorder (!%p331_p8), %s1875_s20, 0 }
  0x2a   : > { %s1745_s11 = smul.u32 (!%p331_p8), 192, %s337_s9  ;;  %p383_p9 = scmp.lt.s32.totalorder (!%p331_p8), %s382_s10, 143 }
  0x2c   : > { %s2036_s16 = scalar_lea.vmem (!%p331_p8), [#allocation3], %s1745_s11 }
  0x30   : > { %s2308_s10 = smov (!%p383_p9, %s382_s10), 143  ;;  %409 = sbr.rel (%p1460_p10) target bundleno = 58 (0x3a), region = 70 }
  0x31   : > { %s1459_s12 = sshll.u32 %s2308_s10, 2  ;;  %v1885_v32 = vmov (!%p1460_p10), 0.0  }
  0x32   : > { %s2034_s15 = scalar_lea.vmem %s2296_s1, %s1459_s12  ;;  %410 = vst [vmem:[#allocation2] sm:$0xff] (!%p1460_p10), %v1885_v32  ;;  %411 = vst [vmem:[#allocation2 + $0x8] sm:$0xff] (!%p1460_p10), %v1885_v32 }
  0x33   : > { %412 = vst [vmem:[#allocation2 + $0x10] sm:$0xff] (!%p1460_p10), %v1885_v32  ;;  %413 = vst [vmem:[#allocation2 + $0x18] sm:$0xff] (!%p1460_p10), %v1885_v32 }
  0x34   : > { %414 = vst [vmem:[#allocation2 + $0x20] sm:$0xff] (!%p1460_p10), %v1885_v32  ;;  %415 = vst [vmem:[#allocation2 + $0x28] sm:$0xff] (!%p1460_p10), %v1885_v32 }
  0x35   : > { %416 = vst [vmem:[#allocation2 + $0x30] sm:$0xff] (!%p1460_p10), %v1885_v32  ;;  %417 = vst [vmem:[#allocation2 + $0x38] sm:$0xff] (!%p1460_p10), %v1885_v32 }
  0x36   : > { %418 = vst [vmem:[#allocation2 + $0x40] sm:$0xff] (!%p1460_p10), %v1885_v32  ;;  %419 = vst [vmem:[#allocation2 + $0x48] sm:$0xff] (!%p1460_p10), %v1885_v32 }
  0x37   : > { %420 = vst [vmem:[#allocation2 + $0x50] sm:$0xff] %v1885_v32  ;;  %421 = vst [vmem:[#allocation2 + $0x58] sm:$0xff] %v1885_v32 }
  0x38   : > { %422 = vst [vmem:[#allocation2 + $0x60] sm:$0xff] %v1885_v32  ;;  %423 = vst [vmem:[#allocation2 + $0x68] sm:$0xff] %v1885_v32 }
  0x39   : > { %424 = vst [vmem:[#allocation2 + $0x70] sm:$0xff] %v1885_v32  ;;  %425 = vst [vmem:[#allocation2 + $0x78] sm:$0xff] %v1885_v32 }
  0x3a PF: > { %v1787_v33 = vld [vmem:[%s2034_s15 + $0x40] sm:$0xff]   ;;  %v1790_v36 = vld [vmem:[%s2034_s15 + $0x48] sm:$0xff]   ;;  %v1793_v39 = vld [vmem:[%s2034_s15 + $0x50] sm:$0xff]   ;;  %p1509_p11 = scmp.ne.s32.totalorder %s1875_s20, 2 }
  0x3b   : > { %v1788_v34 = vld [vmem:[%s2034_s15] sm:$0xff]   ;;  %1632 = vmatprep.subr.bf16.mxu0 %v1787_v33  ;;  %v1791_v37 = vld [vmem:[%s2034_s15 + $0x8] sm:$0xff]   ;;  %v1794_v40 = vld [vmem:[%s2034_s15 + $0x10] sm:$0xff]  }
  0x3c   : > { %v1789_v35 = vld [vmem:[%s2034_s15 + $0x80] sm:$0xff]   ;;  %1633 = vmatpush3.bf16.msra.mxu0 %v1788_v34  ;;  %v1792_v38 = vld [vmem:[%s2034_s15 + $0x88] sm:$0xff]   ;;  %v1795_v41 = vld [vmem:[%s2034_s15 + $0x90] sm:$0xff]  }
  0x3d   : > { %1712 = vmatprep.subr.bf16.mxu1 %v1789_v35  ;;  %1634 = vmatprep.subr.bf16.mxu0 %v1790_v36  ;;  %v1796_v42 = vld [vmem:[%s2034_s15 + $0x58] sm:$0xff]   ;;  %v1799_v45 = vld [vmem:[%s2034_s15 + $0x60] sm:$0xff]   ;;  %v1802_v48 = vld [vmem:[%s2034_s15 + $0x68] sm:$0xff]  }
  0x3e   : > { %1713 = vmatpush3.bf16.msra.mxu1 %v1789_v35  ;;  %v1797_v43 = vld [vmem:[%s2034_s15 + $0x18] sm:$0xff]   ;;  %v1801_v46 = vld [vmem:[%s2034_s15 + $0xa0] sm:$0xff]   ;;  %v1804_v49 = vld [vmem:[%s2034_s15 + $0xa8] sm:$0xff]  }
  0x3f   : > { %1714 = vmatprep.subr.bf16.mxu1 %v1792_v38  ;;  %v1798_v44 = vld [vmem:[%s2034_s15 + $0x98] sm:$0xff]   ;;  %v1800_v47 = vld [vmem:[%s2034_s15 + $0x20] sm:$0xff]   ;;  %v1803_v50 = vld [vmem:[%s2034_s15 + $0x28] sm:$0xff]  }
  0x40   : > { %1635 = vmatpush3.bf16.msra.mxu0 %v1791_v37  ;;  %v1805_v51 = vld [vmem:[%s2034_s15 + $0x70] sm:$0xff]   ;;  %v1808_v54 = vld [vmem:[%s2034_s15 + $0x78] sm:$0xff]   ;;  %v1811_v59 = vld [vmem:[%s2036_s16] ss:$12 sps:$4 sm:$0xff]  }
  0x41   : > { %1636 = vmatprep.subr.bf16.mxu0 %v1793_v39  ;;  %v1806_v52 = vld [vmem:[%s2034_s15 + $0x30] sm:$0xff]   ;;  %v1810_v55 = vld [vmem:[%s2034_s15 + $0xb8] sm:$0xff]   ;;  %v1815_v61 = vld [vmem:[%s2036_s16 + $0x20] ss:$12 sps:$4 sm:$0xff]  }
  0x42   : > { %1715 = vmatpush3.bf16.msra.mxu1 %v1792_v38  ;;  %v1807_v53 = vld [vmem:[%s2034_s15 + $0xb0] sm:$0xff]   ;;  %v1809_v58 = vld [vmem:[%s2034_s15 + $0x38] sm:$0xff]   ;;  %v1831_v5 = vld [vmem:[%s2036_s16 + $0x80] ss:$12 sps:$4 sm:$0xff]  }
  0x43   : > { %1716 = vmatprep.subr.bf16.mxu1 %v1795_v41  ;;  %v1813_v56 = vld [vmem:[%s2036_s16 + $0x4] ss:$12 sps:$4 sm:$0xff]   ;;  %v1814_v57 = vld [vmem:[%s2036_s16 + $0x8] ss:$12 sps:$4 sm:$0xff]   ;;  %v1824_v4 = vld [vmem:[%s2036_s16 + $0x4c] ss:$12 sps:$4 sm:$0xff]  }
  0x44   : > { %1637 = vmatpush3.bf16.msra.mxu0 %v1794_v40  ;;  %826 = vmatprep.mubr.bf16.mxu0 %v1813_v56  ;;  %v1816_v60 = vld [vmem:[%s2036_s16 + $0x1c] ss:$12 sps:$4 sm:$0xff]   ;;  %v1822_v62 = vld [vmem:[%s2036_s16 + $0x38] ss:$12 sps:$4 sm:$0xff]   ;;  %v1819_v0 = vld [vmem:[%s2036_s16 + $0x34] ss:$12 sps:$4 sm:$0xff]  }
  0x45   : > { %1638 = vmatprep.subr.bf16.mxu0 %v1796_v42  ;;  %1728 = vmatprep.mubr.bf16.mxu1 %v1814_v57  ;;  %v1818_v63 = vld [vmem:[%s2036_s16 + $0x18] ss:$12 sps:$4 sm:$0xff]   ;;  %v1823_v1 = vld [vmem:[%s2036_s16 + $0x50] ss:$12 sps:$4 sm:$0xff]   ;;  %v1830_v2 = vld [vmem:[%s2036_s16 + $0x68] ss:$12 sps:$4 sm:$0xff]  }
  0x46   : > { %1717 = vmatpush3.bf16.msra.mxu1 %v1795_v41  ;;  %v1821_v3 = vld [vmem:[%s2036_s16 + $0x30] ss:$12 sps:$4 sm:$0xff]   ;;  %v1838_v6 = vld [vmem:[%s2036_s16 + $0x98] ss:$12 sps:$4 sm:$0xff]   ;;  %v1826_v7 = vld [vmem:[%s2036_s16 + $0x48] ss:$12 sps:$4 sm:$0xff]  }
  0x47   : > { %1718 = vmatprep.subr.bf16.mxu1 %v1798_v44  ;;  %v1827_v8 = vld [vmem:[%s2036_s16 + $0x64] ss:$12 sps:$4 sm:$0xff]   ;;  %v1829_v10 = vld [vmem:[%s2036_s16 + $0x60] ss:$12 sps:$4 sm:$0xff]   ;;  %v1832_v11 = vld [vmem:[%s2036_s16 + $0x7c] ss:$12 sps:$4 sm:$0xff]  }
  0x48   : > { %1639 = vmatpush3.bf16.msra.mxu0 %v1797_v43  ;;  %v1839_v9 = vld [vmem:[%s2036_s16 + $0xb0] ss:$12 sps:$4 sm:$0xff]   ;;  %v1834_v12 = vld [vmem:[%s2036_s16 + $0x78] ss:$12 sps:$4 sm:$0xff]   ;;  %v1835_v13 = vld [vmem:[%s2036_s16 + $0x94] ss:$12 sps:$4 sm:$0xff]  }
  0x49   : > { %1640 = vmatprep.subr.bf16.mxu0 %v1799_v45  ;;  %v1837_v14 = vld [vmem:[%s2036_s16 + $0x90] ss:$12 sps:$4 sm:$0xff]   ;;  %v1840_v15 = vld [vmem:[%s2036_s16 + $0xac] ss:$12 sps:$4 sm:$0xff]   ;;  %v1842_v16 = vld [vmem:[%s2036_s16 + $0xa8] ss:$12 sps:$4 sm:$0xff]  }
  0x4a   : > { %1719 = vmatpush3.bf16.msra.mxu1 %v1798_v44  ;;  %v426_v23 = vld [vmem:[#allocation2] sm:$0xff]  ;;  %v427_v28 = vld [vmem:[#allocation2 + $0x8] sm:$0xff]  ;;  %v428_v38 = vld [vmem:[#allocation2 + $0x10] sm:$0xff] }
  0x4b   : > { %1720 = vmatprep.subr.bf16.mxu1 %v1801_v46  ;;  %v429_v44 = vld [vmem:[#allocation2 + $0x18] sm:$0xff] }
  0x4c   : > { %1641 = vmatpush3.bf16.msra.mxu0 %v1800_v47 }
  0x4d   : > { %1642 = vmatprep.subr.bf16.mxu0 %v1802_v48 }
  0x4e   : > { %1721 = vmatpush3.bf16.msra.mxu1 %v1801_v46 }
  0x4f   : > { %1722 = vmatprep.subr.bf16.mxu1 %v1804_v49 }
  0x50   : > { %1643 = vmatpush3.bf16.msra.mxu0 %v1803_v50 }
  0x51   : > { %1644 = vmatprep.subr.bf16.mxu0 %v1805_v51 }
  0x52   : > { %1723 = vmatpush3.bf16.msra.mxu1 %v1804_v49 }
  0x53   : > { %1724 = vmatprep.subr.bf16.mxu1 %v1807_v53 }
  0x54   : > { %1645 = vmatpush3.bf16.msra.mxu0 %v1806_v52 }
  0x55   : > { %1646 = vmatprep.subr.bf16.mxu0 %v1808_v54 }
  0x56   : > { %1725 = vmatpush3.bf16.msra.mxu1 %v1807_v53 }
  0x57   : > { %1726 = vmatprep.subr.bf16.mxu1 %v1810_v55 }
  0x58   : > { %1647 = vmatpush3.bf16.msra.mxu0 %v1809_v58 }
  0x5a   : > { %1727 = vmatpush3.bf16.msra.mxu1 %v1810_v55  ;;  %v430_v55 = vld [vmem:[#allocation2 + $0x20] sm:$0xff] }
  0x5b   : > { %827 = vmatmul.mubr.bf16.vlgmr.msra.gmra.mrb[0].mxu0 %v1811_v59 }
  0x5c   : > { %834 = vmatprep.mubr.bf16.mxu0 %v1816_v60  ;;  %v431_v60 = vld [vmem:[#allocation2 + $0x28] sm:$0xff] }
  0x5d   : > { %1729 = vmatmul.mubr.bf16.vlgmr.msra.gmra.mrb[0].mxu1 %v1815_v61 }
  0x5e   : > { %1732 = vmatprep.mubr.bf16.mxu1 %v1822_v62 }
  0x63   : > { %835 = vmatmul.mubr.bf16.gmra.mrb[4].mxu0 %v1818_v63 }
  0x64   : > { %842 = vmatprep.mubr.bf16.mxu0 %v1819_v0 }
  0x65   : > { %1733 = vmatmul.mubr.bf16.gmra.mrb[4].mxu1 %v1823_v1 }
  0x66   : > { %1736 = vmatprep.mubr.bf16.mxu1 %v1830_v2 }
  0x6b   : > { %843 = vmatmul.mubr.bf16.gmra.mrb[8].mxu0 %v1821_v3 }
  0x6c   : > { %850 = vmatprep.mubr.bf16.mxu0 %v1824_v4 }
  0x6d   : > { %1737 = vmatmul.mubr.bf16.gmra.mrb[8].mxu1 %v1831_v5 }
  0x6e   : > { %1740 = vmatprep.mubr.bf16.mxu1 %v1838_v6  ;;  %v432_v6 = vld [vmem:[#allocation2 + $0x30] sm:$0xff] }
  0x73   : > { %851 = vmatmul.mubr.bf16.gmra.mrb[12].mxu0 %v1826_v7 }
  0x74   : > { %858 = vmatprep.mubr.bf16.mxu0 %v1827_v8 }
  0x75   : > { %1741 = vmatmul.mubr.bf16.gmra.mrb[12].mxu1 %v1839_v9 }
  0x7b   : > { %859 = vmatmul.mubr.bf16.gmra.mrb[16].mxu0 %v1829_v10 }
  0x7c   : > { %866 = vmatprep.mubr.bf16.mxu0 %v1832_v11 }
  0x83   : > { %867 = vmatmul.mubr.bf16.gmra.mrb[20].mxu0 %v1834_v12  ;;  %v433_v12 = vld [vmem:[#allocation2 + $0x38] sm:$0xff] }
  0x84   : > { %874 = vmatprep.mubr.bf16.mxu0 %v1835_v13 }
  0x8b   : > { %875 = vmatmul.mubr.bf16.gmra.mrb[24].mxu0 %v1837_v14 }
  0x8c   : > { %882 = vmatprep.mubr.bf16.mxu0 %v1840_v15 }
  0x93   : > { %883 = vmatmul.mubr.bf16.gmra.mrb[28].mxu0 %v1842_v16 }
 0x12e   : > { %v1648_v17 = vpop.f32.mrb[0].mxu0 }
 0x12f   : > { %v1649_v18 = vpop.f32.mrb[1].mxu0 }
 0x130   : > { %v1650_v19 = vadd.f32 %v1649_v18, %v1648_v17  ;;  %v1651_v20 = vpop.f32.mrb[2].mxu0  ;;  %v1730_v21 = vpop.f32.mrb[0].mxu1 }
 0x131   : > { %v1652_v22 = vpop.f32.mrb[3].mxu0  ;;  %v925_v24 = vpop.f32.mrb[1].mxu1 }
 0x132   : > { %v1653_v25 = vadd.f32 %v1652_v22, %v1651_v20  ;;  %v926_v26 = vadd.f32 %v1650_v19, %v925_v24  ;;  %v1731_v27 = vpop.f32.mrb[2].mxu1  ;;  %v434_v22 = vld [vmem:[#allocation2 + $0x40] sm:$0xff] }
 0x133   : > { %v928_v29 = vpop.f32.mrb[3].mxu1 }
 0x134   : > { %v988_v30 = vadd.f32 %v926_v26, %v426_v23  ;;  %v929_v31 = vadd.f32 %v1653_v25, %v928_v29  ;;  %v435_v25 = vld [vmem:[#allocation2 + $0x48] sm:$0xff] }
 0x136   : > { %1004 = vst [vmem:[#allocation2] sm:$0xff] %v988_v30  ;;  %v989_v32 = vadd.f32 %v929_v31, %v427_v28  ;;  %v1654_v33 = vpop.f32.mrb[4].mxu0 }
 0x137   : > { %v1655_v34 = vpop.f32.mrb[5].mxu0 }
 0x138   : > { %1005 = vst [vmem:[#allocation2 + $0x8] sm:$0xff] %v989_v32  ;;  %v1656_v35 = vadd.f32 %v1655_v34, %v1654_v33  ;;  %v1657_v36 = vpop.f32.mrb[6].mxu0  ;;  %v1734_v37 = vpop.f32.mrb[4].mxu1  ;;  %v436_v33 = vld [vmem:[#allocation2 + $0x50] sm:$0xff] }
 0x139   : > { %v1658_v39 = vpop.f32.mrb[7].mxu0  ;;  %v941_v40 = vpop.f32.mrb[5].mxu1 }
 0x13a   : > { %v934_v41 = vadd.f32 %v1730_v21, %v1656_v35  ;;  %v1659_v42 = vadd.f32 %v1658_v39, %v1657_v36  ;;  %v1735_v43 = vpop.f32.mrb[6].mxu1 }
 0x13b   : > { %v944_v45 = vpop.f32.mrb[7].mxu1 }
 0x13c   : > { %v990_v46 = vadd.f32 %v934_v41, %v428_v38  ;;  %v937_v47 = vadd.f32 %v1731_v27, %v1659_v42 }
 0x13e   : > { %1006 = vst [vmem:[#allocation2 + $0x10] sm:$0xff] %v990_v46  ;;  %v991_v48 = vadd.f32 %v937_v47, %v429_v44  ;;  %v1660_v49 = vpop.f32.mrb[8].mxu0  ;;  %v438_v46 = vld [vmem:[#allocation2 + $0x60] sm:$0xff] }
 0x13f   : > { %v1661_v50 = vpop.f32.mrb[9].mxu0 }
 0x140   : > { %1007 = vst [vmem:[#allocation2 + $0x18] sm:$0xff] %v991_v48  ;;  %v1662_v51 = vadd.f32 %v1661_v50, %v1660_v49  ;;  %v1663_v52 = vpop.f32.mrb[10].mxu0  ;;  %v1738_v53 = vpop.f32.mrb[8].mxu1  ;;  %v439_v49 = vld [vmem:[#allocation2 + $0x68] sm:$0xff] }
 0x141   : > { %v1664_v54 = vpop.f32.mrb[11].mxu0  ;;  %v957_v56 = vpop.f32.mrb[9].mxu1 }
 0x142   : > { %v1665_v57 = vadd.f32 %v1664_v54, %v1663_v52  ;;  %v942_v58 = vadd.f32 %v1662_v51, %v941_v40  ;;  %v1739_v59 = vpop.f32.mrb[10].mxu1 }
 0x143   : > { %v960_v61 = vpop.f32.mrb[11].mxu1 }
 0x144   : > { %v992_v62 = vadd.f32 %v942_v58, %v430_v55  ;;  %v945_v63 = vadd.f32 %v1665_v57, %v944_v45  ;;  %v440_v57 = vld [vmem:[#allocation2 + $0x70] sm:$0xff] }
 0x146   : > { %1008 = vst [vmem:[#allocation2 + $0x20] sm:$0xff] %v992_v62  ;;  %v993_v0 = vadd.f32 %v945_v63, %v431_v60  ;;  %v1666_v1 = vpop.f32.mrb[12].mxu0 }
 0x147   : > { %v1667_v2 = vpop.f32.mrb[13].mxu0 }
 0x148   : > { %1009 = vst [vmem:[#allocation2 + $0x28] sm:$0xff] %v993_v0  ;;  %v1668_v3 = vadd.f32 %v1667_v2, %v1666_v1  ;;  %v1669_v4 = vpop.f32.mrb[14].mxu0  ;;  %v1742_v5 = vpop.f32.mrb[12].mxu1  ;;  %v2088_v1 = vld [vmem:[#allocation2] sm:$0xff] (!%p1509_p11)  ;;  %v2090_v2 = vld [vmem:[#allocation2 + $0x8] sm:$0xff] (!%p1509_p11) }
 0x149   : > { %v1670_v7 = vpop.f32.mrb[15].mxu0  ;;  %v973_v8 = vpop.f32.mrb[13].mxu1 }
 0x14a   : > { %v950_v9 = vadd.f32 %v1734_v37, %v1668_v3  ;;  %v1671_v10 = vadd.f32 %v1670_v7, %v1669_v4  ;;  %v1743_v11 = vpop.f32.mrb[14].mxu1  ;;  %v437_v37 = vld [vmem:[#allocation2 + $0x58] sm:$0xff]  ;;  %v2092_v3 = vld [vmem:[#allocation2 + $0x10] sm:$0xff] (!%p1509_p11)  ;;  %v1063_v7 = vmul.f32 (!%p1509_p11), %v2090_v2, %v2090_v2 }
 0x14b   : > { %v976_v13 = vpop.f32.mrb[15].mxu1  ;;  %v2094_v4 = vld [vmem:[#allocation2 + $0x18] sm:$0xff] (!%p1509_p11) }
 0x14c   : > { %v994_v14 = vadd.f32 %v950_v9, %v432_v6  ;;  %v953_v15 = vadd.f32 %v1735_v43, %v1671_v10  ;;  %v1062_v6 = vmul.f32 (!%p1509_p11), %v2088_v1, %v2088_v1 }
 0x14d   : > { %v2104_v9 = vld [vmem:[#allocation2 + $0x20] sm:$0xff] (!%p1509_p11) }
 0x14e   : > { %1010 = vst [vmem:[#allocation2 + $0x30] sm:$0xff] %v994_v14  ;;  %v995_v16 = vadd.f32 %v953_v15, %v433_v12  ;;  %v1672_v17 = vpop.f32.mrb[16].mxu0  ;;  %v1078_v12 = vadd.f32 (!%p1509_p11), %v1063_v7, %v1062_v6  ;;  %v1066_v15 = vmul.f32 (!%p1509_p11), %v2104_v9, %v2104_v9 }
 0x14f   : > { %v1673_v18 = vpop.f32.mrb[17].mxu0 }
 0x150   : > { %1011 = vst [vmem:[#allocation2 + $0x38] sm:$0xff] %v995_v16  ;;  %v1674_v19 = vadd.f32 %v1673_v18, %v1672_v17  ;;  %v1675_v20 = vpop.f32.mrb[18].mxu0 }
 0x151   : > { %v1676_v21 = vpop.f32.mrb[19].mxu0 }
 0x152   : > { %v1677_v23 = vadd.f32 %v1676_v21, %v1675_v20  ;;  %v958_v24 = vadd.f32 %v1674_v19, %v957_v56 }
 0x154   : > { %v996_v26 = vadd.f32 %v958_v24, %v434_v22  ;;  %v961_v27 = vadd.f32 %v1677_v23, %v960_v61  ;;  %v441_v61 = vld [vmem:[#allocation2 + $0x78] sm:$0xff] }
 0x155   : > { %v2114_v17 = vld [vmem:[#allocation2 + $0x30] sm:$0xff] (!%p1509_p11) }
 0x156   : > { %1012 = vst [vmem:[#allocation2 + $0x40] sm:$0xff] %v996_v26  ;;  %v997_v28 = vadd.f32 %v961_v27, %v435_v25  ;;  %v1678_v29 = vpop.f32.mrb[20].mxu0  ;;  %v1068_v23 = vmul.f32 (!%p1509_p11), %v2114_v17, %v2114_v17 }
 0x157   : > { %v1679_v30 = vpop.f32.mrb[21].mxu0  ;;  %v2119_v21 = vld [vmem:[#allocation2 + $0x38] sm:$0xff] (!%p1509_p11) }
 0x158   : > { %1013 = vst [vmem:[#allocation2 + $0x48] sm:$0xff] %v997_v28  ;;  %v1680_v31 = vadd.f32 %v1679_v30, %v1678_v29  ;;  %v1681_v32 = vpop.f32.mrb[22].mxu0  ;;  %v1069_v27 = vmul.f32 (!%p1509_p11), %v2119_v21, %v2119_v21 }
 0x159   : > { %v1682_v34 = vpop.f32.mrb[23].mxu0 }
 0x15a   : > { %v966_v35 = vadd.f32 %v1738_v53, %v1680_v31  ;;  %v1683_v36 = vadd.f32 %v1682_v34, %v1681_v32 }
 0x15c   : > { %v998_v38 = vadd.f32 %v966_v35, %v436_v33  ;;  %v969_v39 = vadd.f32 %v1739_v59, %v1683_v36 }
 0x15d   : > { %v2124_v25 = vld [vmem:[#allocation2 + $0x40] sm:$0xff] (!%p1509_p11) }
 0x15e   : > { %1014 = vst [vmem:[#allocation2 + $0x50] sm:$0xff] %v998_v38  ;;  %v999_v40 = vadd.f32 %v969_v39, %v437_v37  ;;  %v1684_v41 = vpop.f32.mrb[24].mxu0  ;;  %v1070_v31 = vmul.f32 (!%p1509_p11), %v2124_v25, %v2124_v25 }
 0x15f   : > { %v1685_v42 = vpop.f32.mrb[25].mxu0  ;;  %v2129_v29 = vld [vmem:[#allocation2 + $0x48] sm:$0xff] (!%p1509_p11) }
 0x160   : > { %1015 = vst [vmem:[#allocation2 + $0x58] sm:$0xff] %v999_v40  ;;  %v1686_v43 = vadd.f32 %v1685_v42, %v1684_v41  ;;  %v1687_v44 = vpop.f32.mrb[26].mxu0  ;;  %v1071_v35 = vmul.f32 (!%p1509_p11), %v2129_v29, %v2129_v29 }
 0x161   : > { %v1688_v45 = vpop.f32.mrb[27].mxu0 }
 0x162   : > { %v1689_v47 = vadd.f32 %v1688_v45, %v1687_v44  ;;  %v974_v48 = vadd.f32 %v1686_v43, %v973_v8  ;;  %v1064_v8 = vmul.f32 (!%p1509_p11), %v2092_v3, %v2092_v3 }
 0x164   : > { %v1000_v50 = vadd.f32 %v974_v48, %v438_v46  ;;  %v977_v51 = vadd.f32 %v1689_v47, %v976_v13  ;;  %v2109_v13 = vld [vmem:[#allocation2 + $0x28] sm:$0xff] (!%p1509_p11)  ;;  %v1079_v16 = vadd.f32 (!%p1509_p11), %v1078_v12, %v1064_v8 }
 0x165   : > { %v1067_v19 = vmul.f32 (!%p1509_p11), %v2109_v13, %v2109_v13  ;;  %v2134_v33 = vld [vmem:[#allocation2 + $0x50] sm:$0xff] (!%p1509_p11) }
 0x166   : > { %1016 = vst [vmem:[#allocation2 + $0x60] sm:$0xff] %v1000_v50  ;;  %v1001_v52 = vadd.f32 %v977_v51, %v439_v49  ;;  %v1690_v53 = vpop.f32.mrb[28].mxu0  ;;  %v1072_v39 = vmul.f32 (!%p1509_p11), %v2134_v33, %v2134_v33 }
 0x167   : > { %v1691_v54 = vpop.f32.mrb[29].mxu0  ;;  %v2139_v37 = vld [vmem:[#allocation2 + $0x58] sm:$0xff] (!%p1509_p11) }
 0x168   : > { %1017 = vst [vmem:[#allocation2 + $0x68] sm:$0xff] %v1001_v52  ;;  %v1692_v55 = vadd.f32 %v1691_v54, %v1690_v53  ;;  %v1693_v56 = vpop.f32.mrb[30].mxu0  ;;  %v1073_v43 = vmul.f32 (!%p1509_p11), %v2139_v37, %v2139_v37 }
 0x169   : > { %v1694_v58 = vpop.f32.mrb[31].mxu0 }
 0x16a   : > { %v982_v59 = vadd.f32 %v1742_v5, %v1692_v55  ;;  %v1695_v60 = vadd.f32 %v1694_v58, %v1693_v56  ;;  %1023 = sbr.rel (%p1509_p11) target bundleno = 454 (0x1c6), region = 74  ;;  %v1040_v5 = vadd.f32 (!%p1509_p11), %v2090_v2, %v2088_v1 }
 0x16c   : > { %v1002_v62 = vadd.f32 %v982_v59, %v440_v57  ;;  %v985_v63 = vadd.f32 %v1743_v11, %v1695_v60  ;;  %v1041_v10 = vadd.f32 (!%p1509_p11), %v1040_v5, %v2092_v3  ;;  %v1065_v11 = vmul.f32 (!%p1509_p11), %v2094_v4, %v2094_v4 }
 0x16d   : > { %v2144_v41 = vld [vmem:[#allocation2 + $0x60] sm:$0xff] (!%p1509_p11) }
 0x16e   : > { %1018 = vst [vmem:[#allocation2 + $0x70] sm:$0xff] %v1002_v62  ;;  %v1003_v0 = vadd.f32 %v985_v63, %v441_v61  ;;  %v1042_v14 = vadd.f32 (!%p1509_p11), %v1041_v10, %v2094_v4  ;;  %v1080_v20 = vadd.f32 (!%p1509_p11), %v1079_v16, %v1065_v11  ;;  %v1074_v47 = vmul.f32 (!%p1509_p11), %v2144_v41, %v2144_v41 }
 0x16f   : > { %v2149_v45 = vld [vmem:[#allocation2 + $0x68] sm:$0xff] (!%p1509_p11) }
 0x170   : > { %1019 = vst [vmem:[#allocation2 + $0x78] sm:$0xff] %v1003_v0  ;;  %v1043_v18 = vadd.f32 (!%p1509_p11), %v1042_v14, %v2104_v9  ;;  %v1081_v24 = vadd.f32 (!%p1509_p11), %v1080_v20, %v1066_v15  ;;  %v1075_v51 = vmul.f32 (!%p1509_p11), %v2149_v45, %v2149_v45 }
 0x172   : > { %v1044_v22 = vadd.f32 %v1043_v18, %v2109_v13  ;;  %v1082_v28 = vadd.f32 %v1081_v24, %v1067_v19 }
 0x174   : > { %v1045_v26 = vadd.f32 %v1044_v22, %v2114_v17  ;;  %v1083_v32 = vadd.f32 %v1082_v28, %v1068_v23  ;;  %v1547_v28 = vld [vmem:[%s2299_s4] sm:$0xff]  }
 0x175   : > { %v2154_v49 = vld [vmem:[#allocation2 + $0x70] sm:$0xff] }
 0x176   : > { %v1046_v30 = vadd.f32 %v1045_v26, %v2119_v21  ;;  %v1084_v36 = vadd.f32 %v1083_v32, %v1069_v27  ;;  %v1076_v55 = vmul.f32 %v2154_v49, %v2154_v49  ;;  %v1110_v26 = vlaneseq  ;;  %v1619_v32 = vld [vmem:[%s2299_s4 + $0x10] sm:$0xff]  }
 0x177   : > { %v2159_v53 = vld [vmem:[#allocation2 + $0x78] sm:$0xff] }
 0x178   : > { %v1047_v34 = vadd.f32 %v1046_v30, %v2124_v25  ;;  %v1085_v40 = vadd.f32 %v1084_v36, %v1070_v31  ;;  %v1077_v58 = vmul.f32 %v2159_v53, %v2159_v53  ;;  %v1111_v27 = vshrl.u32 %v1110_v26, 7  ;;  %v1618_v30 = vld [vmem:[%s2299_s4 + $0x8] sm:$0xff]   ;;  %v1105_v31 = vld [vmem:[%s2297_s2] sm:$0x1] }
 0x179   : > { %v2186_v36 = vld [vmem:[%s2299_s4 + $0x20] sm:$0xff]  }
 0x17a   : > { %v1048_v38 = vadd.f32 %v1047_v34, %v2129_v29  ;;  %v1086_v44 = vadd.f32 %v1085_v40, %v1071_v35  ;;  %v1112_v34 = vsub.s32 0, %v1111_v27  ;;  %v1620_v35 = vld [vmem:[%s2299_s4 + $0x18] sm:$0xff]   ;;  %v1549_v40 = vunpack.c.h.bf16 %v1547_v28 }
 0x17c   : > { %v1049_v42 = vadd.f32 %v1048_v38, %v2134_v33  ;;  %v1087_v48 = vadd.f32 %v1086_v44, %v1072_v39  ;;  %v1548_v39 = vunpack.c.l.bf16 %v1547_v28 }
 0x17e   : > { %v1050_v46 = vadd.f32 %v1049_v42, %v2139_v37  ;;  %v1088_v52 = vadd.f32 %v1087_v48, %v1073_v43  ;;  %v1552_v42 = vunpack.c.l.bf16 %v1618_v30  ;;  %v2191_v43 = vld [vmem:[%s2299_s4 + $0x28] sm:$0xff]   ;;  %v1557_v48 = vunpack.c.h.bf16 %v1619_v32 }
 0x180   : > { %v1051_v50 = vadd.f32 %v1050_v46, %v2144_v41  ;;  %v1089_v56 = vadd.f32 %v1088_v52, %v1074_v47  ;;  %v1553_v46 = vunpack.c.h.bf16 %v1618_v30  ;;  %v1556_v47 = vunpack.c.l.bf16 %v1619_v32  ;;  %v1107_v52 = vld [vmem:[%s2298_s3] sm:$0x1] }
 0x182   : > { %v1052_v54 = vadd.f32 %v1051_v50, %v2149_v45  ;;  %v1090_v59 = vadd.f32 %v1089_v56, %v1075_v51  ;;  %v2196_v50 = vld [vmem:[%s2299_s4 + $0x30] sm:$0xff]   ;;  %v2201_v51 = vld [vmem:[%s2299_s4 + $0x38] sm:$0xff]   ;;  %v1564_v56 = vunpack.c.l.bf16 %v2186_v36 }
 0x184   : > { %v1053_v57 = vadd.f32 %v1052_v54, %v2154_v49  ;;  %v1091_v61 = vadd.f32 %v1090_v59, %v1076_v55  ;;  %v1560_v54 = vunpack.c.l.bf16 %v1620_v35  ;;  %v1561_v55 = vunpack.c.h.bf16 %v1620_v35 }
 0x186   : > { %v1054_v60 = vadd.f32 %v1053_v57, %v2159_v53  ;;  %v1092_v63 = vadd.f32 %v1091_v61, %v1077_v58  ;;  %v1565_v57 = vunpack.c.h.bf16 %v2186_v36  ;;  %v1569_v61 = vunpack.c.h.bf16 %v2191_v43 }
 0x188   : > { %v1055_v62 = vrot.slane %v1054_v60, 4  ;;  %v1093_v5 = vrot.slane %v1092_v63, 4 }
 0x18a   : > { %v1056_v0 = vadd.f32 %v1055_v62, %v1054_v60  ;;  %v1094_v7 = vadd.f32 %v1093_v5, %v1092_v63  ;;  %v1568_v60 = vunpack.c.l.bf16 %v2191_v43  ;;  %v1572_v62 = vunpack.c.l.bf16 %v2196_v50 }
 0x18b   : > { %v1573_v63 = vunpack.c.h.bf16 %v2196_v50  ;;  %v1577_v5 = vunpack.c.h.bf16 %v2201_v51 }
 0x18c   : > { %v1057_v6 = vrot.slane %v1056_v0, 2  ;;  %v1095_v10 = vrot.slane %v1094_v7, 2 }
 0x18e   : > { %v1058_v8 = vadd.f32 %v1057_v6, %v1056_v0  ;;  %v1096_v12 = vadd.f32 %v1095_v10, %v1094_v7  ;;  %v1576_v0 = vunpack.c.l.bf16 %v2201_v51 }
 0x190   : > { %v1059_v11 = vrot.slane %v1058_v8, 1  ;;  %v1097_v15 = vrot.slane %v1096_v12, 1 }
 0x192   : > { %v1060_v14 = vadd.f32 %v1059_v11, %v1058_v8  ;;  %v1098_v18 = vadd.f32 %v1097_v15, %v1096_v12 }
 0x194   : > { %v1061_v16 = vmul.f32 0.0078125, %v1060_v14  ;;  %v1099_v20 = vmul.f32 0.0078125, %v1098_v18 }
 0x196   : > { %v1100_v19 = vmul.f32 %v1061_v16, %v1061_v16 }
 0x198   : > { %v1101_v22 = vsub.f32 %v1099_v20, %v1100_v19 }
 0x19a   : > { %v1102_v23 = vmax.f32 %v1101_v22, 0.0 }
 0x19c   : > { %v1103_v24 = vadd.f32 1e-05, %v1102_v23 }
 0x19e   : > { %1843 = vrsqrt.f32 %v1103_v24 }
 0x1a8   : > { %v1844_v38 = vpop.eup %1843 }
 0x1a9   : > { %v1106_v44 = vmul.f32 %v1844_v38, %v1105_v31 }
 0x1ab   : > { %v1108_v58 = vmul.f32 %v1106_v44, %v1061_v16  ;;  %v2208_v59 = vrot.slane %v1106_v44, %v1112_v34 }
 0x1ad   : > { %v1109_v6 = vsub.f32 %v1107_v52, %v1108_v58  ;;  %v1114_v7 = vmul.f32 %v2208_v59, %v2088_v1  ;;  %v1115_v8 = vmul.f32 %v2208_v59, %v2090_v2  ;;  %v1116_v10 = vmul.f32 %v2208_v59, %v2092_v3 }
 0x1ae   : > { %v1117_v11 = vmul.f32 %v2208_v59, %v2094_v4  ;;  %v1118_v12 = vmul.f32 %v2208_v59, %v2104_v9  ;;  %v1119_v14 = vmul.f32 %v2208_v59, %v2109_v13  ;;  %v1120_v15 = vmul.f32 %v2208_v59, %v2114_v17 }
 0x1af   : > { %v1134_v16 = vrot.slane %v1109_v6, %v1112_v34  ;;  %v1121_v1 = vmul.f32 %v2208_v59, %v2119_v21  ;;  %v1122_v2 = vmul.f32 %v2208_v59, %v2124_v25  ;;  %v1123_v3 = vmul.f32 %v2208_v59, %v2129_v29 }
 0x1b0   : > { %v1124_v4 = vmul.f32 %v2208_v59, %v2134_v33  ;;  %v1125_v9 = vmul.f32 %v2208_v59, %v2139_v37  ;;  %v1126_v13 = vmul.f32 %v2208_v59, %v2144_v41  ;;  %v1127_v17 = vmul.f32 %v2208_v59, %v2149_v45 }
 0x1b1   : > { %v1136_v18 = vadd.f32 %v1134_v16, %v1114_v7  ;;  %v1137_v21 = vadd.f32 %v1134_v16, %v1115_v8  ;;  %v1138_v19 = vadd.f32 %v1134_v16, %v1116_v10  ;;  %v1139_v20 = vadd.f32 %v1134_v16, %v1117_v11 }
 0x1b2   : > { %v1140_v25 = vadd.f32 %v1134_v16, %v1118_v12  ;;  %v1141_v22 = vadd.f32 %v1134_v16, %v1119_v14  ;;  %v1142_v23 = vadd.f32 %v1134_v16, %v1120_v15  ;;  %v1143_v29 = vadd.f32 %v1134_v16, %v1121_v1 }
 0x1b3   : > { %v1184_v24 = vadd.f32 %v1548_v39, %v1136_v18  ;;  %v1185_v26 = vadd.f32 %v1549_v40, %v1137_v21  ;;  %v1186_v33 = vadd.f32 %v1552_v42, %v1138_v19  ;;  %v1187_v27 = vadd.f32 %v1553_v46, %v1139_v20 }
 0x1b4   : > { %v1188_v28 = vadd.f32 %v1556_v47, %v1140_v25  ;;  %v1189_v37 = vadd.f32 %v1557_v48, %v1141_v22  ;;  %v1190_v30 = vadd.f32 %v1560_v54, %v1142_v23  ;;  %v1191_v31 = vadd.f32 %v1561_v55, %v1143_v29 }
 0x1b5   : > { %v1200_v41 = vmax.f32 %v1184_v24, 0.0  ;;  %v1201_v32 = vmax.f32 %v1185_v26, 0.0  ;;  %v1202_v34 = vmax.f32 %v1186_v33, 0.0  ;;  %v1203_v45 = vmax.f32 %v1187_v27, 0.0 }
 0x1b6   : > { %v1204_v35 = vmax.f32 %v1188_v28, 0.0  ;;  %v1205_v36 = vmax.f32 %v1189_v37, 0.0  ;;  %v1206_v38 = vmax.f32 %v1190_v30, 0.0  ;;  %v1207_v43 = vmax.f32 %v1191_v31, 0.0 }
 0x1b7   : > { %v1581_v44 = vpack.c.bf16 %v1201_v32, %v1200_v41  ;;  %v1586_v52 = vpack.c.bf16 %v1203_v45, %v1202_v34  ;;  %v1144_v58 = vadd.f32 %v1134_v16, %v1122_v2  ;;  %v1145_v6 = vadd.f32 %v1134_v16, %v1123_v3 }
 0x1b8   : > { %v1591_v39 = vpack.c.bf16 %v1205_v36, %v1204_v35  ;;  %v1596_v40 = vpack.c.bf16 %v1207_v43, %v1206_v38  ;;  %v1146_v42 = vadd.f32 %v1134_v16, %v1124_v4  ;;  %v1147_v46 = vadd.f32 %v1134_v16, %v1125_v9 }
 0x1b9   : > { %1582 = vst [vmem:[%s2300_s5] sm:$0xff] %v1581_v44   ;;  %1625 = vst [vmem:[%s2300_s5 + $0x8] sm:$0xff] %v1586_v52   ;;  %v1192_v47 = vadd.f32 %v1564_v56, %v1144_v58  ;;  %v1193_v48 = vadd.f32 %v1565_v57, %v1145_v6  ;;  %v1148_v54 = vadd.f32 %v1134_v16, %v1126_v13 }
 0x1ba   : > { %v1149_v55 = vadd.f32 %v1134_v16, %v1127_v17  ;;  %1626 = vst [vmem:[%s2300_s5 + $0x10] sm:$0xff] %v1591_v39   ;;  %1627 = vst [vmem:[%s2300_s5 + $0x18] sm:$0xff] %v1596_v40   ;;  %v1194_v7 = vadd.f32 %v1568_v60, %v1146_v42  ;;  %v1195_v8 = vadd.f32 %v1569_v61, %v1147_v46 }
 0x1bb   : > { %v1128_v10 = vmul.f32 %v2208_v59, %v2154_v49  ;;  %v1129_v11 = vmul.f32 %v2208_v59, %v2159_v53  ;;  %v1208_v56 = vmax.f32 %v1192_v47, 0.0  ;;  %v1209_v57 = vmax.f32 %v1193_v48, 0.0 }
 0x1bc   : > { %v1196_v12 = vadd.f32 %v1572_v62, %v1148_v54  ;;  %v1197_v14 = vadd.f32 %v1573_v63, %v1149_v55  ;;  %v1210_v15 = vmax.f32 %v1194_v7, 0.0  ;;  %v1211_v1 = vmax.f32 %v1195_v8, 0.0 }
 0x1bd   : > { %v1150_v2 = vadd.f32 %v1134_v16, %v1128_v10  ;;  %v1151_v3 = vadd.f32 %v1134_v16, %v1129_v11  ;;  %v1601_v60 = vpack.c.bf16 %v1209_v57, %v1208_v56 }
 0x1be   : > { %v1212_v61 = vmax.f32 %v1196_v12, 0.0  ;;  %v1213_v4 = vmax.f32 %v1197_v14, 0.0  ;;  %v1606_v9 = vpack.c.bf16 %v1211_v1, %v1210_v15 }
 0x1bf   : > { %v1198_v49 = vadd.f32 %v1576_v0, %v1150_v2  ;;  %v1199_v53 = vadd.f32 %v1577_v5, %v1151_v3  ;;  %1628 = vst [vmem:[%s2300_s5 + $0x20] sm:$0xff] %v1601_v60  }
 0x1c0   : > { %v1611_v50 = vpack.c.bf16 %v1213_v4, %v1212_v61  ;;  %1629 = vst [vmem:[%s2300_s5 + $0x28] sm:$0xff] %v1606_v9  }
 0x1c1   : > { %v1214_v59 = vmax.f32 %v1198_v49, 0.0  ;;  %v1215_v62 = vmax.f32 %v1199_v53, 0.0 }
 0x1c2   : > { %1630 = vst [vmem:[%s2300_s5 + $0x30] sm:$0xff] %v1611_v50  }
 0x1c3   : > { %v1616_v63 = vpack.c.bf16 %v1215_v62, %v1214_v59 }
 0x1c5   : > { %1631 = vst [vmem:[%s2300_s5 + $0x38] sm:$0xff] %v1616_v63  }
 0x1c6 PF: > { %s15_s22 = sadd.s32 1, %s1883_s22   ;;  %s2301_s18 = smov %s1871_s19 }
 0x1c7   : > { %p12_p12 = scmp.ge.s32.totalorder %s15_s22, 5   ;;  %s2302_s19 = smov %s1951_s26 }
 0x1c8   : > { %s2303_s20 = smov %s1879_s21  ;;  %s2304_s21 = smov %s2306_s23 }
 0x1c9   :  { %14 = sbr.rel (!%p12_p12) target bundleno = 3 (0x3), region = 127 }

// kernel: multihead_forward.41
= control target key start
LH: loop header
LB: loop body
LE: loop exit
PB: predicated region body
PF: predicated region fallthrough
CT: control target
= control target key end

     0   :  { %s1128_s15 = smov 0   ;;  %s1130_s16 = smov 0   ;;  %s1241_s0 = inlined_call_operand.vmem [shape: bf16[32,1152], index: 0, kind: input, shape index: {}]   ;;  %s1242_s1 = inlined_call_operand.vmem [shape: bf16[1152,128], index: 1, kind: input, shape index: {}]   ;;  %s1243_s2 = inlined_call_operand.vmem [shape: f32[1,128], index: 2, kind: input, shape index: {}]   ;;  %s1244_s3 = inlined_call_operand.vmem [shape: f32[1,128], index: 3, kind: input, shape index: {}]   ;;  %s1245_s4 = inlined_call_operand.vmem [shape: bf16[32,128], index: 4, kind: output, shape index: {}]  }
   0x1   :  { %s1132_s17 = smov 0   ;;  %s1134_s18 = smov 0  }
   0x2   :  { %s1136_s19 = smov 0  }
   0x3 LB: > { %s23_s20 = sadd.s32 1, %s1096_s18  ;;  %p40_p1 = scmp.ne.s32.totalorder %s1088_s16, %s1084_s15  ;;  %s1100_s19 = sphi %s1136_s19, %s14_s19   ;;  %s1096_s18 = sphi %s1134_s18, %s1249_s18   ;;  %s1092_s17 = sphi %s1132_s17, %s1248_s17   ;;  %s1088_s16 = sphi %s1130_s16, %s1247_s16   ;;  %s1084_s15 = sphi %s1128_s15, %s1246_s15  }
   0x4   : > { %p24_p0 = scmp.ge.s32.totalorder %s23_s20, 3  ;;  %p41_p2 = scmp.eq.s32.totalorder %s1100_s19, 0 }
   0x5   : > { %s33_s22 = sadd.s32 1, %s1088_s16  ;;  %p860_p5 = scmp.ge.s32.totalorder %s1100_s19, 3 }
   0x6   : > { %s1251_s20 = smov (%p24_p0, %s23_s20), 0  ;;  %p42_p3 = por %p41_p2, %p40_p1 }
   0x7   : > { %s30_s21 = ssub.s32 %s1096_s18, %s1251_s20  ;;  %184 = sbr.rel (%p860_p5) target bundleno = 23 (0x17), region = 24 }
   0x8   : > { %p31_p4 = scmp.eq.s32.totalorder %s30_s21, 0 }
   0xa   : > { %s1163_s23 = scalar_select %p31_p4, %s1088_s16, %s33_s22  }
   0xe   : > { %187 = sbr.rel (!%p42_p3) target bundleno = 23 (0x17), region = 28  ;;  %s189_s24 = sand.u32 (%p42_p3), 1, %s1088_s16  }
   0xf   : > { %s911_s25 = smul.u32 (%p42_p3), 12, %s1096_s18 }
  0x10   : > { %s985_s26 = smul.u32 (%p42_p3), 48, %s189_s24 }
  0x11   : > { %s194_s29 = scalar_lea.vmem (%p42_p3), %s1241_s0, %s911_s25 }
  0x12   : > { %v209_v0 = vld [vmem:[%s194_s29] sm:$0xff] (%p42_p3)  ;;  %v213_v2 = vld [vmem:[%s194_s29 + $0x48] sm:$0xff] (%p42_p3)  ;;  %s191_s30 = scalar_lea.vmem (%p42_p3), [#allocation3], %s985_s26  ;;  %v866_v6 = vld [vmem:[%s194_s29 + $0x50] sm:$0xf] (%p42_p3) }
  0x13   : > { %v211_v1 = vld [vmem:[%s194_s29 + $0x24] sm:$0xff] (%p42_p3)  ;;  %210 = vst [vmem:[%s191_s30] sm:$0xff] (%p42_p3), %v209_v0  ;;  %214 = vst [vmem:[%s191_s30 + $0x18] sm:$0xff] (%p42_p3), %v213_v2  ;;  %v215_v3 = vld [vmem:[%s194_s29 + $0x6c] sm:$0xff] (%p42_p3) }
  0x14   : > { %212 = vst [vmem:[%s191_s30 + $0xc] sm:$0xff] (%p42_p3), %v211_v1  ;;  %v862_v4 = vld [vmem:[%s194_s29 + $0x8] sm:$0xf] (%p42_p3)  ;;  %v864_v5 = vld [vmem:[%s194_s29 + $0x2c] sm:$0xf] (%p42_p3)  ;;  %216 = vst [vmem:[%s191_s30 + $0x24] sm:$0xff] (%p42_p3), %v215_v3 }
  0x15   : > { %863 = vst [vmem:[%s191_s30 + $0x8] sm:$0xf] %v862_v4  ;;  %865 = vst [vmem:[%s191_s30 + $0x14] sm:$0xf] %v864_v5  ;;  %v868_v7 = vld [vmem:[%s194_s29 + $0x74] sm:$0xf] }
  0x16   : > { %867 = vst [vmem:[%s191_s30 + $0x20] sm:$0xf] %v866_v6  ;;  %869 = vst [vmem:[%s191_s30 + $0x2c] sm:$0xf] %v868_v7 }
  0x17 PF: > { %p870_p6 = scmp.ge.s32.totalorder %s1100_s19, 1  ;;  %p248_p7 = scmp.lt.s32.totalorder %s1100_s19, 4 }
  0x19   : > { %p249_p8 = pnand %p870_p6, %p248_p7 }
  0x1a   : > { %s255_s5 = sand.u32 (!%p249_p8), 1, %s1084_s15   ;;  %s294_s6 = smul.u32 (!%p249_p8), 48, %s1092_s17 }
  0x1b   : > { %252 = sbr.rel (%p249_p8) target bundleno = 361 (0x169), region = 58  ;;  %p872_p10 = scmp.ne.s32.totalorder (!%p249_p8), %s1092_s17, 0 }
  0x1c   : > { %s986_s7 = smul.u32 (!%p249_p8), 48, %s255_s5  ;;  %p295_p9 = scmp.lt.s32.totalorder (!%p249_p8), %s294_s6, 143 }
  0x1e   : > { %s1180_s12 = scalar_lea.vmem (!%p249_p8), [#allocation3], %s986_s7 }
  0x22   : > { %s1253_s6 = smov (!%p295_p9, %s294_s6), 143  ;;  %317 = sbr.rel (%p872_p10) target bundleno = 41 (0x29), region = 66 }
  0x23   : > { %s871_s8 = sshll.u32 %s1253_s6, 2  ;;  %v1102_v8 = vmov (!%p872_p10), 0.0  }
  0x24   : > { %s1178_s11 = scalar_lea.vmem %s1242_s1, %s871_s8  ;;  %318 = vst [vmem:[#allocation2] sm:$0xff] (!%p872_p10), %v1102_v8  ;;  %319 = vst [vmem:[#allocation2 + $0x8] sm:$0xff] (!%p872_p10), %v1102_v8 }
  0x25   : > { %320 = vst [vmem:[#allocation2 + $0x10] sm:$0xff] (!%p872_p10), %v1102_v8  ;;  %321 = vst [vmem:[#allocation2 + $0x18] sm:$0xff] (!%p872_p10), %v1102_v8 }
  0x29 PF: > { %v1028_v9 = vld [vmem:[%s1178_s11 + $0x40] sm:$0xff]   ;;  %v1031_v12 = vld [vmem:[%s1178_s11 + $0x48] sm:$0xff]   ;;  %v1034_v15 = vld [vmem:[%s1178_s11 + $0x50] sm:$0xff]   ;;  %p903_p11 = scmp.ne.s32.totalorder %s1092_s17, 2 }
  0x2a   : > { %v1029_v10 = vld [vmem:[%s1178_s11] sm:$0xff]   ;;  %927 = vmatprep.subr.bf16.mxu0 %v1028_v9  ;;  %v1032_v13 = vld [vmem:[%s1178_s11 + $0x8] sm:$0xff]   ;;  %v1035_v16 = vld [vmem:[%s1178_s11 + $0x10] sm:$0xff]  }
  0x2b   : > { %v1030_v11 = vld [vmem:[%s1178_s11 + $0x80] sm:$0xff]   ;;  %928 = vmatpush3.bf16.msra.mxu0 %v1029_v10  ;;  %v1033_v14 = vld [vmem:[%s1178_s11 + $0x88] sm:$0xff]   ;;  %v1036_v17 = vld [vmem:[%s1178_s11 + $0x90] sm:$0xff]  }
  0x2c   : > { %965 = vmatprep.subr.bf16.mxu1 %v1030_v11  ;;  %929 = vmatprep.subr.bf16.mxu0 %v1031_v12  ;;  %v1037_v18 = vld [vmem:[%s1178_s11 + $0x58] sm:$0xff]   ;;  %v1040_v21 = vld [vmem:[%s1178_s11 + $0x60] sm:$0xff]   ;;  %v1043_v24 = vld [vmem:[%s1178_s11 + $0x68] sm:$0xff]  }
  0x2d   : > { %966 = vmatpush3.bf16.msra.mxu1 %v1030_v11  ;;  %v1038_v19 = vld [vmem:[%s1178_s11 + $0x18] sm:$0xff]   ;;  %v1042_v22 = vld [vmem:[%s1178_s11 + $0xa0] sm:$0xff]   ;;  %v1045_v25 = vld [vmem:[%s1178_s11 + $0xa8] sm:$0xff]  }
  0x2e   : > { %967 = vmatprep.subr.bf16.mxu1 %v1033_v14  ;;  %v1039_v20 = vld [vmem:[%s1178_s11 + $0x98] sm:$0xff]   ;;  %v1041_v23 = vld [vmem:[%s1178_s11 + $0x20] sm:$0xff]   ;;  %v1044_v26 = vld [vmem:[%s1178_s11 + $0x28] sm:$0xff]  }
  0x2f   : > { %930 = vmatpush3.bf16.msra.mxu0 %v1032_v13  ;;  %v1046_v27 = vld [vmem:[%s1178_s11 + $0x70] sm:$0xff]   ;;  %v1049_v30 = vld [vmem:[%s1178_s11 + $0x78] sm:$0xff]   ;;  %v322_v45 = vld [vmem:[#allocation2] sm:$0xff] }
  0x30   : > { %931 = vmatprep.subr.bf16.mxu0 %v1034_v15  ;;  %v1047_v28 = vld [vmem:[%s1178_s11 + $0x30] sm:$0xff]   ;;  %v1051_v31 = vld [vmem:[%s1178_s11 + $0xb8] sm:$0xff]   ;;  %v323_v50 = vld [vmem:[#allocation2 + $0x8] sm:$0xff] }
  0x31   : > { %968 = vmatpush3.bf16.msra.mxu1 %v1033_v14  ;;  %v1048_v29 = vld [vmem:[%s1178_s11 + $0xb0] sm:$0xff]   ;;  %v1050_v34 = vld [vmem:[%s1178_s11 + $0x38] sm:$0xff]  }
  0x32   : > { %969 = vmatprep.subr.bf16.mxu1 %v1036_v17  ;;  %v1054_v32 = vld [vmem:[%s1180_s12 + $0x4] ss:$12 sps:$4 sm:$0xff]   ;;  %v1055_v33 = vld [vmem:[%s1180_s12 + $0x8] ss:$12 sps:$4 sm:$0xff]   ;;  %v1052_v35 = vld [vmem:[%s1180_s12] ss:$12 sps:$4 sm:$0xff]  }
  0x33   : > { %932 = vmatpush3.bf16.msra.mxu0 %v1035_v16  ;;  %590 = vmatprep.mubr.bf16.mxu0 %v1054_v32  ;;  %v1057_v36 = vld [vmem:[%s1180_s12 + $0x1c] ss:$12 sps:$4 sm:$0xff]   ;;  %v1056_v37 = vld [vmem:[%s1180_s12 + $0x20] ss:$12 sps:$4 sm:$0xff]   ;;  %v1059_v38 = vld [vmem:[%s1180_s12 + $0x18] ss:$12 sps:$4 sm:$0xff]  }
  0x34   : > { %933 = vmatprep.subr.bf16.mxu0 %v1037_v18  ;;  %981 = vmatprep.mubr.bf16.mxu1 %v1055_v33  ;;  %v324_v59 = vld [vmem:[#allocation2 + $0x10] sm:$0xff]  ;;  %v325_v63 = vld [vmem:[#allocation2 + $0x18] sm:$0xff] }
  0x35   : > { %970 = vmatpush3.bf16.msra.mxu1 %v1036_v17 }
  0x36   : > { %971 = vmatprep.subr.bf16.mxu1 %v1039_v20 }
  0x37   : > { %934 = vmatpush3.bf16.msra.mxu0 %v1038_v19 }
  0x38   : > { %935 = vmatprep.subr.bf16.mxu0 %v1040_v21 }
  0x39   : > { %972 = vmatpush3.bf16.msra.mxu1 %v1039_v20 }
  0x3a   : > { %973 = vmatprep.subr.bf16.mxu1 %v1042_v22 }
  0x3b   : > { %936 = vmatpush3.bf16.msra.mxu0 %v1041_v23 }
  0x3c   : > { %937 = vmatprep.subr.bf16.mxu0 %v1043_v24 }
  0x3d   : > { %974 = vmatpush3.bf16.msra.mxu1 %v1042_v22 }
  0x3e   : > { %975 = vmatprep.subr.bf16.mxu1 %v1045_v25 }
  0x3f   : > { %938 = vmatpush3.bf16.msra.mxu0 %v1044_v26 }
  0x40   : > { %939 = vmatprep.subr.bf16.mxu0 %v1046_v27 }
  0x41   : > { %976 = vmatpush3.bf16.msra.mxu1 %v1045_v25 }
  0x42   : > { %977 = vmatprep.subr.bf16.mxu1 %v1048_v29 }
  0x43   : > { %940 = vmatpush3.bf16.msra.mxu0 %v1047_v28 }
  0x44   : > { %941 = vmatprep.subr.bf16.mxu0 %v1049_v30 }
  0x45   : > { %978 = vmatpush3.bf16.msra.mxu1 %v1048_v29 }
  0x46   : > { %979 = vmatprep.subr.bf16.mxu1 %v1051_v31 }
  0x47   : > { %942 = vmatpush3.bf16.msra.mxu0 %v1050_v34 }
  0x49   : > { %980 = vmatpush3.bf16.msra.mxu1 %v1051_v31 }
  0x4a   : > { %591 = vmatmul.mubr.bf16.vlgmr.msra.gmra.mrb[0].mxu0 %v1052_v35  ;;  %v706_v35 = vlaneseq (!%p903_p11) }
  0x4b   : > { %598 = vmatprep.mubr.bf16.mxu0 %v1057_v36 }
  0x4c   : > { %982 = vmatmul.mubr.bf16.vlgmr.msra.gmra.mrb[0].mxu1 %v1056_v37  ;;  %v707_v36 = vshrl.u32 (!%p903_p11), %v706_v35, 7  ;;  %v701_v37 = vld [vmem:[%s1243_s2] sm:$0x1] (!%p903_p11) }
  0x52   : > { %599 = vmatmul.mubr.bf16.gmra.mrb[4].mxu0 %v1059_v38  ;;  %v708_v38 = vsub.s32 (!%p903_p11), 0, %v707_v36 }
 0x11d   : > { %v943_v39 = vpop.f32.mrb[0].mxu0 }
 0x11e   : > { %v944_v40 = vpop.f32.mrb[1].mxu0 }
 0x11f   : > { %v945_v41 = vadd.f32 %v944_v40, %v943_v39  ;;  %v946_v42 = vpop.f32.mrb[2].mxu0  ;;  %v983_v43 = vpop.f32.mrb[0].mxu1 }
 0x120   : > { %v947_v44 = vpop.f32.mrb[3].mxu0  ;;  %v641_v46 = vpop.f32.mrb[1].mxu1 }
 0x121   : > { %v948_v47 = vadd.f32 %v947_v44, %v946_v42  ;;  %v642_v48 = vadd.f32 %v945_v41, %v641_v46  ;;  %v984_v49 = vpop.f32.mrb[2].mxu1  ;;  %v703_v41 = vld [vmem:[%s1244_s3] sm:$0x1] (!%p903_p11) }
 0x122   : > { %v644_v51 = vpop.f32.mrb[3].mxu1 }
 0x123   : > { %v656_v52 = vadd.f32 %v642_v48, %v322_v45  ;;  %v645_v53 = vadd.f32 %v948_v47, %v644_v51 }
 0x125   : > { %660 = vst [vmem:[#allocation2] sm:$0xff] %v656_v52  ;;  %v657_v54 = vadd.f32 %v645_v53, %v323_v50  ;;  %v949_v55 = vpop.f32.mrb[4].mxu0 }
 0x126   : > { %v950_v56 = vpop.f32.mrb[5].mxu0 }
 0x127   : > { %661 = vst [vmem:[#allocation2 + $0x8] sm:$0xff] %v657_v54  ;;  %v951_v57 = vadd.f32 %v950_v56, %v949_v55  ;;  %v952_v58 = vpop.f32.mrb[6].mxu0 }
 0x128   : > { %v953_v60 = vpop.f32.mrb[7].mxu0 }
 0x129   : > { %v650_v61 = vadd.f32 %v983_v43, %v951_v57  ;;  %v954_v62 = vadd.f32 %v953_v60, %v952_v58  ;;  %667 = sbr.rel (%p903_p11) target bundleno = 361 (0x169), region = 70 }
 0x12b   : > { %v658_v0 = vadd.f32 %v650_v61, %v324_v59  ;;  %v653_v1 = vadd.f32 %v984_v49, %v954_v62 }
 0x12c   : > { %v668_v3 = vld [vmem:[#allocation2] sm:$0xff] (!%p903_p11) }
 0x12d   : > { %662 = vst [vmem:[#allocation2 + $0x10] sm:$0xff] %v658_v0  ;;  %v659_v2 = vadd.f32 %v653_v1, %v325_v63  ;;  %v682_v8 = vmul.f32 (!%p903_p11), %v668_v3, %v668_v3 }
 0x12e   : > { %v669_v4 = vld [vmem:[#allocation2 + $0x8] sm:$0xff] (!%p903_p11) }
 0x12f   : > { %663 = vst [vmem:[#allocation2 + $0x18] sm:$0xff] %v659_v2  ;;  %v672_v7 = vadd.f32 (!%p903_p11), %v669_v4, %v668_v3  ;;  %v683_v9 = vmul.f32 (!%p903_p11), %v669_v4, %v669_v4 }
 0x131   : > { %v686_v13 = vadd.f32 %v683_v9, %v682_v8 }
 0x134   : > { %v670_v5 = vld [vmem:[#allocation2 + $0x10] sm:$0xff] }
 0x135   : > { %v684_v10 = vmul.f32 %v670_v5, %v670_v5  ;;  %v673_v11 = vadd.f32 %v672_v7, %v670_v5 }
 0x136   : > { %v671_v6 = vld [vmem:[#allocation2 + $0x18] sm:$0xff] }
 0x137   : > { %v685_v12 = vmul.f32 %v671_v6, %v671_v6  ;;  %v674_v14 = vadd.f32 %v673_v11, %v671_v6  ;;  %v687_v15 = vadd.f32 %v686_v13, %v684_v10 }
 0x139   : > { %v675_v16 = vrot.slane %v674_v14, 4  ;;  %v688_v17 = vadd.f32 %v687_v15, %v685_v12 }
 0x13b   : > { %v676_v18 = vadd.f32 %v675_v16, %v674_v14  ;;  %v689_v19 = vrot.slane %v688_v17, 4 }
 0x13d   : > { %v677_v20 = vrot.slane %v676_v18, 2  ;;  %v690_v21 = vadd.f32 %v689_v19, %v688_v17 }
 0x13f   : > { %v678_v22 = vadd.f32 %v677_v20, %v676_v18  ;;  %v691_v23 = vrot.slane %v690_v21, 2 }
 0x141   : > { %v679_v24 = vrot.slane %v678_v22, 1  ;;  %v692_v25 = vadd.f32 %v691_v23, %v690_v21 }
 0x143   : > { %v680_v26 = vadd.f32 %v679_v24, %v678_v22  ;;  %v693_v27 = vrot.slane %v692_v25, 1 }
 0x145   : > { %v681_v28 = vmul.f32 0.03125, %v680_v26  ;;  %v694_v29 = vadd.f32 %v693_v27, %v692_v25 }
 0x147   : > { %v695_v30 = vmul.f32 0.03125, %v694_v29  ;;  %v696_v31 = vmul.f32 %v681_v28, %v681_v28 }
 0x149   : > { %v697_v32 = vsub.f32 %v695_v30, %v696_v31 }
 0x14b   : > { %v698_v33 = vmax.f32 %v697_v32, 0.0 }
 0x14d   : > { %v699_v34 = vadd.f32 1e-05, %v698_v33 }
 0x14f   : > { %1060 = vrsqrt.f32 %v699_v34 }
 0x159   : > { %v1061_v39 = vpop.eup %1060 }
 0x15a   : > { %v702_v40 = vmul.f32 %v1061_v39, %v701_v37 }
 0x15c   : > { %v704_v42 = vmul.f32 %v702_v40, %v681_v28  ;;  %v709_v43 = vrot.slane %v702_v40, %v708_v38 }
 0x15e   : > { %v705_v44 = vsub.f32 %v703_v41, %v704_v42  ;;  %v710_v45 = vmul.f32 %v709_v43, %v668_v3  ;;  %v711_v46 = vmul.f32 %v709_v43, %v669_v4  ;;  %v712_v47 = vmul.f32 %v709_v43, %v670_v5 }
 0x15f   : > { %v713_v48 = vmul.f32 %v709_v43, %v671_v6 }
 0x160   : > { %v718_v49 = vrot.slane %v705_v44, %v708_v38 }
 0x162   : > { %v720_v50 = vadd.f32 %v718_v49, %v710_v45  ;;  %v721_v51 = vadd.f32 %v718_v49, %v711_v46  ;;  %v722_v52 = vadd.f32 %v718_v49, %v712_v47  ;;  %v723_v53 = vadd.f32 %v718_v49, %v713_v48 }
 0x164   : > { %v724_v54 = vmax.f32 %v720_v50, 0.0  ;;  %v725_v55 = vmax.f32 %v721_v51, 0.0  ;;  %v726_v56 = vmax.f32 %v722_v52, 0.0  ;;  %v727_v57 = vmax.f32 %v723_v53, 0.0 }
 0x166   : > { %v919_v58 = vpack.c.bf16 %v725_v55, %v724_v54  ;;  %v924_v59 = vpack.c.bf16 %v727_v57, %v726_v56 }
 0x168   : > { %920 = vst [vmem:[%s1245_s4] sm:$0xff] %v919_v58   ;;  %926 = vst [vmem:[%s1245_s4 + $0x8] sm:$0xff] %v924_v59  }
 0x169 PF: > { %s14_s19 = sadd.s32 1, %s1100_s19   ;;  %s1246_s15 = smov %s1088_s16 }
 0x16a   : > { %p11_p12 = scmp.ge.s32.totalorder %s14_s19, 5   ;;  %s1247_s16 = smov %s1163_s23 }
 0x16b   : > { %s1248_s17 = smov %s1096_s18  ;;  %s1249_s18 = smov %s1251_s20 }
 0x16c   :  { %13 = sbr.rel (!%p11_p12) target bundleno = 3 (0x3), region = 120 }

// kernel: multihead_forward.43
= control target key start
LH: loop header
LB: loop body
LE: loop exit
PB: predicated region body
PF: predicated region fallthrough
CT: control target
= control target key end

     0   :  { %s1214_s18 = smov 0   ;;  %s1216_s19 = smov 0   ;;  %s1333_s0 = inlined_call_operand.vmem [shape: bf16[32,1152], index: 0, kind: input, shape index: {}]   ;;  %s1334_s1 = inlined_call_operand.vmem [shape: bf16[1152,128], index: 1, kind: input, shape index: {}]   ;;  %s1335_s2 = inlined_call_operand.vmem [shape: f32[1,128], index: 2, kind: input, shape index: {}]   ;;  %s1336_s3 = inlined_call_operand.vmem [shape: f32[1,128], index: 3, kind: input, shape index: {}]   ;;  %s1337_s4 = inlined_call_operand.vmem [shape: bf16[32,128], index: 4, kind: input, shape index: {}]   ;;  %s1338_s5 = inlined_call_operand.vmem [shape: bf16[32,128], index: 5, kind: output, shape index: {}]  }
   0x1   :  { %s1218_s20 = smov 0   ;;  %s1220_s21 = smov 0  }
   0x2   :  { %s1222_s22 = smov 0  }
   0x3 LB: > { %s24_s23 = sadd.s32 1, %s1177_s21  ;;  %p41_p1 = scmp.ne.s32.totalorder %s1169_s19, %s1165_s18  ;;  %s1181_s22 = sphi %s1222_s22, %s15_s22   ;;  %s1177_s21 = sphi %s1220_s21, %s1342_s21   ;;  %s1173_s20 = sphi %s1218_s20, %s1341_s20   ;;  %s1169_s19 = sphi %s1216_s19, %s1340_s19   ;;  %s1165_s18 = sphi %s1214_s18, %s1339_s18  }
   0x4   : > { %p25_p0 = scmp.ge.s32.totalorder %s24_s23, 3  ;;  %p42_p2 = scmp.eq.s32.totalorder %s1181_s22, 0 }
   0x5   : > { %s34_s25 = sadd.s32 1, %s1169_s19  ;;  %p932_p5 = scmp.ge.s32.totalorder %s1181_s22, 3 }
   0x6   : > { %s1344_s23 = smov (%p25_p0, %s24_s23), 0  ;;  %p43_p3 = por %p42_p2, %p41_p1 }
   0x7   : > { %s31_s24 = ssub.s32 %s1177_s21, %s1344_s23  ;;  %218 = sbr.rel (%p932_p5) target bundleno = 23 (0x17), region = 28 }
   0x8   : > { %p32_p4 = scmp.eq.s32.totalorder %s31_s24, 0 }
   0xa   : > { %s1249_s26 = scalar_select %p32_p4, %s1169_s19, %s34_s25  }
   0xe   : > { %221 = sbr.rel (!%p43_p3) target bundleno = 23 (0x17), region = 32  ;;  %s223_s27 = sand.u32 (%p43_p3), 1, %s1169_s19  }
   0xf   : > { %s983_s28 = smul.u32 (%p43_p3), 12, %s1177_s21 }
  0x10   : > { %s1066_s29 = smul.u32 (%p43_p3), 48, %s223_s27 }
  0x11   : > { %s228_s7 = scalar_lea.vmem (%p43_p3), %s1333_s0, %s983_s28 }
  0x12   : > { %v243_v0 = vld [vmem:[%s228_s7] sm:$0xff] (%p43_p3)  ;;  %v247_v2 = vld [vmem:[%s228_s7 + $0x48] sm:$0xff] (%p43_p3)  ;;  %s225_s8 = scalar_lea.vmem (%p43_p3), [#allocation3], %s1066_s29  ;;  %v938_v6 = vld [vmem:[%s228_s7 + $0x50] sm:$0xf] (%p43_p3) }
  0x13   : > { %v245_v1 = vld [vmem:[%s228_s7 + $0x24] sm:$0xff] (%p43_p3)  ;;  %244 = vst [vmem:[%s225_s8] sm:$0xff] (%p43_p3), %v243_v0  ;;  %248 = vst [vmem:[%s225_s8 + $0x18] sm:$0xff] (%p43_p3), %v247_v2  ;;  %v249_v3 = vld [vmem:[%s228_s7 + $0x6c] sm:$0xff] (%p43_p3) }
  0x14   : > { %246 = vst [vmem:[%s225_s8 + $0xc] sm:$0xff] (%p43_p3), %v245_v1  ;;  %v934_v4 = vld [vmem:[%s228_s7 + $0x8] sm:$0xf] (%p43_p3)  ;;  %v936_v5 = vld [vmem:[%s228_s7 + $0x2c] sm:$0xf] (%p43_p3)  ;;  %250 = vst [vmem:[%s225_s8 + $0x24] sm:$0xff] (%p43_p3), %v249_v3 }
  0x15   : > { %935 = vst [vmem:[%s225_s8 + $0x8] sm:$0xf] %v934_v4  ;;  %937 = vst [vmem:[%s225_s8 + $0x14] sm:$0xf] %v936_v5  ;;  %v940_v7 = vld [vmem:[%s228_s7 + $0x74] sm:$0xf] }
  0x16   : > { %939 = vst [vmem:[%s225_s8 + $0x20] sm:$0xf] %v938_v6  ;;  %941 = vst [vmem:[%s225_s8 + $0x2c] sm:$0xf] %v940_v7 }
  0x17 PF: > { %p942_p6 = scmp.ge.s32.totalorder %s1181_s22, 1  ;;  %p282_p7 = scmp.lt.s32.totalorder %s1181_s22, 4 }
  0x19   : > { %p283_p8 = pnand %p942_p6, %p282_p7 }
  0x1a   : > { %s289_s9 = sand.u32 (!%p283_p8), 1, %s1165_s18   ;;  %s334_s10 = smul.u32 (!%p283_p8), 48, %s1173_s20 }
  0x1b   : > { %286 = sbr.rel (%p283_p8) target bundleno = 363 (0x16b), region = 62  ;;  %p944_p10 = scmp.ne.s32.totalorder (!%p283_p8), %s1173_s20, 0 }
  0x1c   : > { %s1067_s11 = smul.u32 (!%p283_p8), 48, %s289_s9  ;;  %p335_p9 = scmp.lt.s32.totalorder (!%p283_p8), %s334_s10, 143 }
  0x1e   : > { %s1266_s16 = scalar_lea.vmem (!%p283_p8), [#allocation3], %s1067_s11 }
  0x22   : > { %s1346_s10 = smov (!%p335_p9, %s334_s10), 143  ;;  %361 = sbr.rel (%p944_p10) target bundleno = 41 (0x29), region = 70 }
  0x23   : > { %s943_s12 = sshll.u32 %s1346_s10, 2  ;;  %v1183_v8 = vmov (!%p944_p10), 0.0  }
  0x24   : > { %s1264_s15 = scalar_lea.vmem %s1334_s1, %s943_s12  ;;  %362 = vst [vmem:[#allocation2] sm:$0xff] (!%p944_p10), %v1183_v8  ;;  %363 = vst [vmem:[#allocation2 + $0x8] sm:$0xff] (!%p944_p10), %v1183_v8 }
  0x25   : > { %364 = vst [vmem:[#allocation2 + $0x10] sm:$0xff] (!%p944_p10), %v1183_v8  ;;  %365 = vst [vmem:[#allocation2 + $0x18] sm:$0xff] (!%p944_p10), %v1183_v8 }
  0x29 PF: > { %v1109_v9 = vld [vmem:[%s1264_s15 + $0x40] sm:$0xff]   ;;  %v1112_v12 = vld [vmem:[%s1264_s15 + $0x48] sm:$0xff]   ;;  %v1115_v15 = vld [vmem:[%s1264_s15 + $0x50] sm:$0xff]   ;;  %p975_p11 = scmp.ne.s32.totalorder %s1173_s20, 2 }
  0x2a   : > { %v1110_v10 = vld [vmem:[%s1264_s15] sm:$0xff]   ;;  %1008 = vmatprep.subr.bf16.mxu0 %v1109_v9  ;;  %v1113_v13 = vld [vmem:[%s1264_s15 + $0x8] sm:$0xff]   ;;  %v1116_v16 = vld [vmem:[%s1264_s15 + $0x10] sm:$0xff]  }
  0x2b   : > { %v1111_v11 = vld [vmem:[%s1264_s15 + $0x80] sm:$0xff]   ;;  %1009 = vmatpush3.bf16.msra.mxu0 %v1110_v10  ;;  %v1114_v14 = vld [vmem:[%s1264_s15 + $0x88] sm:$0xff]   ;;  %v1117_v17 = vld [vmem:[%s1264_s15 + $0x90] sm:$0xff]  }
  0x2c   : > { %1046 = vmatprep.subr.bf16.mxu1 %v1111_v11  ;;  %1010 = vmatprep.subr.bf16.mxu0 %v1112_v12  ;;  %v1118_v18 = vld [vmem:[%s1264_s15 + $0x58] sm:$0xff]   ;;  %v1121_v21 = vld [vmem:[%s1264_s15 + $0x60] sm:$0xff]   ;;  %v1124_v24 = vld [vmem:[%s1264_s15 + $0x68] sm:$0xff]  }
  0x2d   : > { %1047 = vmatpush3.bf16.msra.mxu1 %v1111_v11  ;;  %v1119_v19 = vld [vmem:[%s1264_s15 + $0x18] sm:$0xff]   ;;  %v1123_v22 = vld [vmem:[%s1264_s15 + $0xa0] sm:$0xff]   ;;  %v1126_v25 = vld [vmem:[%s1264_s15 + $0xa8] sm:$0xff]  }
  0x2e   : > { %1048 = vmatprep.subr.bf16.mxu1 %v1114_v14  ;;  %v1120_v20 = vld [vmem:[%s1264_s15 + $0x98] sm:$0xff]   ;;  %v1122_v23 = vld [vmem:[%s1264_s15 + $0x20] sm:$0xff]   ;;  %v1125_v26 = vld [vmem:[%s1264_s15 + $0x28] sm:$0xff]  }
  0x2f   : > { %1011 = vmatpush3.bf16.msra.mxu0 %v1113_v13  ;;  %v1127_v27 = vld [vmem:[%s1264_s15 + $0x70] sm:$0xff]   ;;  %v1130_v30 = vld [vmem:[%s1264_s15 + $0x78] sm:$0xff]   ;;  %v366_v45 = vld [vmem:[#allocation2] sm:$0xff] }
  0x30   : > { %1012 = vmatprep.subr.bf16.mxu0 %v1115_v15  ;;  %v1128_v28 = vld [vmem:[%s1264_s15 + $0x30] sm:$0xff]   ;;  %v1132_v31 = vld [vmem:[%s1264_s15 + $0xb8] sm:$0xff]   ;;  %v367_v50 = vld [vmem:[#allocation2 + $0x8] sm:$0xff] }
  0x31   : > { %1049 = vmatpush3.bf16.msra.mxu1 %v1114_v14  ;;  %v1129_v29 = vld [vmem:[%s1264_s15 + $0xb0] sm:$0xff]   ;;  %v1131_v34 = vld [vmem:[%s1264_s15 + $0x38] sm:$0xff]  }
  0x32   : > { %1050 = vmatprep.subr.bf16.mxu1 %v1117_v17  ;;  %v1135_v32 = vld [vmem:[%s1266_s16 + $0x4] ss:$12 sps:$4 sm:$0xff]   ;;  %v1136_v33 = vld [vmem:[%s1266_s16 + $0x8] ss:$12 sps:$4 sm:$0xff]   ;;  %v1133_v35 = vld [vmem:[%s1266_s16] ss:$12 sps:$4 sm:$0xff]  }
  0x33   : > { %1013 = vmatpush3.bf16.msra.mxu0 %v1116_v16  ;;  %634 = vmatprep.mubr.bf16.mxu0 %v1135_v32  ;;  %v1138_v36 = vld [vmem:[%s1266_s16 + $0x1c] ss:$12 sps:$4 sm:$0xff]   ;;  %v1137_v37 = vld [vmem:[%s1266_s16 + $0x20] ss:$12 sps:$4 sm:$0xff]   ;;  %v1140_v38 = vld [vmem:[%s1266_s16 + $0x18] ss:$12 sps:$4 sm:$0xff]  }
  0x34   : > { %1014 = vmatprep.subr.bf16.mxu0 %v1118_v18  ;;  %1062 = vmatprep.mubr.bf16.mxu1 %v1136_v33  ;;  %v368_v59 = vld [vmem:[#allocation2 + $0x10] sm:$0xff]  ;;  %v369_v63 = vld [vmem:[#allocation2 + $0x18] sm:$0xff] }
  0x35   : > { %1051 = vmatpush3.bf16.msra.mxu1 %v1117_v17 }
  0x36   : > { %1052 = vmatprep.subr.bf16.mxu1 %v1120_v20 }
  0x37   : > { %1015 = vmatpush3.bf16.msra.mxu0 %v1119_v19 }
  0x38   : > { %1016 = vmatprep.subr.bf16.mxu0 %v1121_v21 }
  0x39   : > { %1053 = vmatpush3.bf16.msra.mxu1 %v1120_v20 }
  0x3a   : > { %1054 = vmatprep.subr.bf16.mxu1 %v1123_v22 }
  0x3b   : > { %1017 = vmatpush3.bf16.msra.mxu0 %v1122_v23 }
  0x3c   : > { %1018 = vmatprep.subr.bf16.mxu0 %v1124_v24 }
  0x3d   : > { %1055 = vmatpush3.bf16.msra.mxu1 %v1123_v22 }
  0x3e   : > { %1056 = vmatprep.subr.bf16.mxu1 %v1126_v25 }
  0x3f   : > { %1019 = vmatpush3.bf16.msra.mxu0 %v1125_v26 }
  0x40   : > { %1020 = vmatprep.subr.bf16.mxu0 %v1127_v27 }
  0x41   : > { %1057 = vmatpush3.bf16.msra.mxu1 %v1126_v25 }
  0x42   : > { %1058 = vmatprep.subr.bf16.mxu1 %v1129_v29 }
  0x43   : > { %1021 = vmatpush3.bf16.msra.mxu0 %v1128_v28 }
  0x44   : > { %1022 = vmatprep.subr.bf16.mxu0 %v1130_v30 }
  0x45   : > { %1059 = vmatpush3.bf16.msra.mxu1 %v1129_v29 }
  0x46   : > { %1060 = vmatprep.subr.bf16.mxu1 %v1132_v31 }
  0x47   : > { %1023 = vmatpush3.bf16.msra.mxu0 %v1131_v34 }
  0x49   : > { %1061 = vmatpush3.bf16.msra.mxu1 %v1132_v31 }
  0x4a   : > { %635 = vmatmul.mubr.bf16.vlgmr.msra.gmra.mrb[0].mxu0 %v1133_v35  ;;  %v750_v35 = vlaneseq (!%p975_p11) }
  0x4b   : > { %642 = vmatprep.mubr.bf16.mxu0 %v1138_v36 }
  0x4c   : > { %1063 = vmatmul.mubr.bf16.vlgmr.msra.gmra.mrb[0].mxu1 %v1137_v37  ;;  %v751_v36 = vshrl.u32 (!%p975_p11), %v750_v35, 7  ;;  %v745_v37 = vld [vmem:[%s1335_s2] sm:$0x1] (!%p975_p11) }
  0x52   : > { %643 = vmatmul.mubr.bf16.gmra.mrb[4].mxu0 %v1140_v38  ;;  %v752_v38 = vsub.s32 (!%p975_p11), 0, %v751_v36 }
 0x11d   : > { %v1024_v39 = vpop.f32.mrb[0].mxu0 }
 0x11e   : > { %v1025_v40 = vpop.f32.mrb[1].mxu0 }
 0x11f   : > { %v1026_v41 = vadd.f32 %v1025_v40, %v1024_v39  ;;  %v1027_v42 = vpop.f32.mrb[2].mxu0  ;;  %v1064_v43 = vpop.f32.mrb[0].mxu1 }
 0x120   : > { %v1028_v44 = vpop.f32.mrb[3].mxu0  ;;  %v685_v46 = vpop.f32.mrb[1].mxu1 }
 0x121   : > { %v1029_v47 = vadd.f32 %v1028_v44, %v1027_v42  ;;  %v686_v48 = vadd.f32 %v1026_v41, %v685_v46  ;;  %v1065_v49 = vpop.f32.mrb[2].mxu1  ;;  %v747_v41 = vld [vmem:[%s1336_s3] sm:$0x1] (!%p975_p11) }
 0x122   : > { %v688_v51 = vpop.f32.mrb[3].mxu1  ;;  %v989_v44 = vld [vmem:[%s1337_s4] sm:$0xff] (!%p975_p11)  }
 0x123   : > { %v700_v52 = vadd.f32 %v686_v48, %v366_v45  ;;  %v689_v53 = vadd.f32 %v1029_v47, %v688_v51  ;;  %v1006_v45 = vld [vmem:[%s1337_s4 + $0x8] sm:$0xff] (!%p975_p11)  }
 0x125   : > { %704 = vst [vmem:[#allocation2] sm:$0xff] %v700_v52  ;;  %v701_v54 = vadd.f32 %v689_v53, %v367_v50  ;;  %v1030_v55 = vpop.f32.mrb[4].mxu0  ;;  %v990_v50 = vunpack.c.l.bf16 (!%p975_p11), %v989_v44  ;;  %v991_v53 = vunpack.c.h.bf16 (!%p975_p11), %v989_v44 }
 0x126   : > { %v1031_v56 = vpop.f32.mrb[5].mxu0 }
 0x127   : > { %705 = vst [vmem:[#allocation2 + $0x8] sm:$0xff] %v701_v54  ;;  %v1032_v57 = vadd.f32 %v1031_v56, %v1030_v55  ;;  %v1033_v58 = vpop.f32.mrb[6].mxu0  ;;  %v994_v54 = vunpack.c.l.bf16 (!%p975_p11), %v1006_v45  ;;  %v995_v55 = vunpack.c.h.bf16 (!%p975_p11), %v1006_v45 }
 0x128   : > { %v1034_v60 = vpop.f32.mrb[7].mxu0 }
 0x129   : > { %v694_v61 = vadd.f32 %v1064_v43, %v1032_v57  ;;  %v1035_v62 = vadd.f32 %v1034_v60, %v1033_v58  ;;  %711 = sbr.rel (%p975_p11) target bundleno = 363 (0x16b), region = 74 }
 0x12b   : > { %v702_v0 = vadd.f32 %v694_v61, %v368_v59  ;;  %v697_v1 = vadd.f32 %v1065_v49, %v1035_v62 }
 0x12c   : > { %v712_v3 = vld [vmem:[#allocation2] sm:$0xff] (!%p975_p11) }
 0x12d   : > { %706 = vst [vmem:[#allocation2 + $0x10] sm:$0xff] %v702_v0  ;;  %v703_v2 = vadd.f32 %v697_v1, %v369_v63  ;;  %v726_v8 = vmul.f32 (!%p975_p11), %v712_v3, %v712_v3 }
 0x12e   : > { %v713_v4 = vld [vmem:[#allocation2 + $0x8] sm:$0xff] (!%p975_p11) }
 0x12f   : > { %707 = vst [vmem:[#allocation2 + $0x18] sm:$0xff] %v703_v2  ;;  %v716_v7 = vadd.f32 (!%p975_p11), %v713_v4, %v712_v3  ;;  %v727_v9 = vmul.f32 (!%p975_p11), %v713_v4, %v713_v4 }
 0x131   : > { %v730_v13 = vadd.f32 %v727_v9, %v726_v8 }
 0x134   : > { %v714_v5 = vld [vmem:[#allocation2 + $0x10] sm:$0xff] }
 0x135   : > { %v728_v10 = vmul.f32 %v714_v5, %v714_v5  ;;  %v717_v11 = vadd.f32 %v716_v7, %v714_v5 }
 0x136   : > { %v715_v6 = vld [vmem:[#allocation2 + $0x18] sm:$0xff] }
 0x137   : > { %v729_v12 = vmul.f32 %v715_v6, %v715_v6  ;;  %v718_v14 = vadd.f32 %v717_v11, %v715_v6  ;;  %v731_v15 = vadd.f32 %v730_v13, %v728_v10 }
 0x139   : > { %v719_v16 = vrot.slane %v718_v14, 4  ;;  %v732_v17 = vadd.f32 %v731_v15, %v729_v12 }
 0x13b   : > { %v720_v18 = vadd.f32 %v719_v16, %v718_v14  ;;  %v733_v19 = vrot.slane %v732_v17, 4 }
 0x13d   : > { %v721_v20 = vrot.slane %v720_v18, 2  ;;  %v734_v21 = vadd.f32 %v733_v19, %v732_v17 }
 0x13f   : > { %v722_v22 = vadd.f32 %v721_v20, %v720_v18  ;;  %v735_v23 = vrot.slane %v734_v21, 2 }
 0x141   : > { %v723_v24 = vrot.slane %v722_v22, 1  ;;  %v736_v25 = vadd.f32 %v735_v23, %v734_v21 }
 0x143   : > { %v724_v26 = vadd.f32 %v723_v24, %v722_v22  ;;  %v737_v27 = vrot.slane %v736_v25, 1 }
 0x145   : > { %v725_v28 = vmul.f32 0.03125, %v724_v26  ;;  %v738_v29 = vadd.f32 %v737_v27, %v736_v25 }
 0x147   : > { %v739_v30 = vmul.f32 0.03125, %v738_v29  ;;  %v740_v31 = vmul.f32 %v725_v28, %v725_v28 }
 0x149   : > { %v741_v32 = vsub.f32 %v739_v30, %v740_v31 }
 0x14b   : > { %v742_v33 = vmax.f32 %v741_v32, 0.0 }
 0x14d   : > { %v743_v34 = vadd.f32 1e-05, %v742_v33 }
 0x14f   : > { %1141 = vrsqrt.f32 %v743_v34 }
 0x159   : > { %v1142_v39 = vpop.eup %1141 }
 0x15a   : > { %v746_v40 = vmul.f32 %v1142_v39, %v745_v37 }
 0x15c   : > { %v748_v42 = vmul.f32 %v746_v40, %v725_v28  ;;  %v753_v43 = vrot.slane %v746_v40, %v752_v38 }
 0x15e   : > { %v749_v46 = vsub.f32 %v747_v41, %v748_v42  ;;  %v754_v47 = vmul.f32 %v753_v43, %v712_v3  ;;  %v755_v48 = vmul.f32 %v753_v43, %v713_v4  ;;  %v756_v49 = vmul.f32 %v753_v43, %v714_v5 }
 0x15f   : > { %v757_v51 = vmul.f32 %v753_v43, %v715_v6 }
 0x160   : > { %v762_v52 = vrot.slane %v749_v46, %v752_v38 }
 0x162   : > { %v764_v56 = vadd.f32 %v762_v52, %v754_v47  ;;  %v765_v57 = vadd.f32 %v762_v52, %v755_v48  ;;  %v766_v58 = vadd.f32 %v762_v52, %v756_v49  ;;  %v767_v59 = vadd.f32 %v762_v52, %v757_v51 }
 0x164   : > { %v776_v60 = vadd.f32 %v990_v50, %v764_v56  ;;  %v777_v61 = vadd.f32 %v991_v53, %v765_v57  ;;  %v778_v62 = vadd.f32 %v994_v54, %v766_v58  ;;  %v779_v63 = vadd.f32 %v995_v55, %v767_v59 }
 0x166   : > { %v780_v0 = vmax.f32 %v776_v60, 0.0  ;;  %v781_v1 = vmax.f32 %v777_v61, 0.0  ;;  %v782_v2 = vmax.f32 %v778_v62, 0.0  ;;  %v783_v3 = vmax.f32 %v779_v63, 0.0 }
 0x168   : > { %v999_v4 = vpack.c.bf16 %v781_v1, %v780_v0  ;;  %v1004_v5 = vpack.c.bf16 %v783_v3, %v782_v2 }
 0x16a   : > { %1000 = vst [vmem:[%s1338_s5] sm:$0xff] %v999_v4   ;;  %1007 = vst [vmem:[%s1338_s5 + $0x8] sm:$0xff] %v1004_v5  }
 0x16b PF: > { %s15_s22 = sadd.s32 1, %s1181_s22   ;;  %s1339_s18 = smov %s1169_s19 }
 0x16c   : > { %p12_p12 = scmp.ge.s32.totalorder %s15_s22, 5   ;;  %s1340_s19 = smov %s1249_s26 }
 0x16d   : > { %s1341_s20 = smov %s1177_s21  ;;  %s1342_s21 = smov %s1344_s23 }
 0x16e   :  { %14 = sbr.rel (!%p12_p12) target bundleno = 3 (0x3), region = 127 }

// kernel: multihead_forward.42
= control target key start
LH: loop header
LB: loop body
LE: loop exit
PB: predicated region body
PF: predicated region fallthrough
CT: control target
= control target key end

     0   :  { %v208_v42 = vlaneseq  ;;  %s388_s1 = inlined_call_operand.vmem [shape: bf16[128,128], index: 1, kind: input, shape index: {}]   ;;  %s389_s0 = inlined_call_operand.vmem [shape: bf16[32,128], index: 0, kind: input, shape index: {}]   ;;  %s390_s2 = inlined_call_operand.vmem [shape: f32[1,128], index: 2, kind: input, shape index: {}]   ;;  %s391_s3 = inlined_call_operand.vmem [shape: f32[1,128], index: 3, kind: input, shape index: {}]   ;;  %s392_s4 = inlined_call_operand.vmem [shape: bf16[32,128], index: 4, kind: output, shape index: {}]  }
   0x1   :  { %v309_v0 = vld [vmem:[%s388_s1] sm:$0xff]   ;;  %v310_v1 = vld [vmem:[%s388_s1 + $0x8] sm:$0xff]   ;;  %v311_v2 = vld [vmem:[%s388_s1 + $0x10] sm:$0xff]  }
   0x2   :  { %289 = vmatprep.subr.bf16.mxu0 %v309_v0  ;;  %v312_v3 = vld [vmem:[%s388_s1 + $0x18] sm:$0xff]   ;;  %v317_v4 = vld [vmem:[%s389_s0] sm:$0xff]   ;;  %v314_v6 = vld [vmem:[%s388_s1 + $0x28] sm:$0xff]   ;;  %v209_v43 = vshrl.u32 %v208_v42, 7 }
   0x3   :  { %290 = vmatpush3.bf16.msra.mxu0 %v309_v0  ;;  %305 = vmatprep.mubr.bf16.mxu0 %v317_v4  ;;  %v313_v5 = vld [vmem:[%s388_s1 + $0x20] sm:$0xff]   ;;  %v315_v7 = vld [vmem:[%s388_s1 + $0x30] sm:$0xff]   ;;  %v316_v8 = vld [vmem:[%s388_s1 + $0x38] sm:$0xff]  }
   0x4   :  { %291 = vmatprep.subr.bf16.mxu0 %v310_v1  ;;  %v318_v9 = vld [vmem:[%s389_s0 + $0x8] sm:$0xff]   ;;  %v203_v44 = vld [vmem:[%s390_s2] sm:$0x1]  ;;  %v210_v45 = vsub.s32 0, %v209_v43 }
   0x5   :  { %v205_v48 = vld [vmem:[%s391_s3] sm:$0x1] }
   0x7   :  { %292 = vmatpush3.bf16.msra.mxu0 %v310_v1 }
   0x8   :  { %293 = vmatprep.subr.bf16.mxu0 %v311_v2 }
   0xb   :  { %294 = vmatpush3.bf16.msra.mxu0 %v311_v2 }
   0xc   :  { %295 = vmatprep.subr.bf16.mxu0 %v312_v3 }
   0xf   :  { %296 = vmatpush3.bf16.msra.mxu0 %v312_v3 }
  0x10   :  { %297 = vmatprep.subr.bf16.mxu0 %v313_v5 }
  0x13   :  { %298 = vmatpush3.bf16.msra.mxu0 %v313_v5 }
  0x14   :  { %299 = vmatprep.subr.bf16.mxu0 %v314_v6 }
  0x17   :  { %300 = vmatpush3.bf16.msra.mxu0 %v314_v6 }
  0x18   :  { %301 = vmatprep.subr.bf16.mxu0 %v315_v7 }
  0x1b   :  { %302 = vmatpush3.bf16.msra.mxu0 %v315_v7 }
  0x1c   :  { %303 = vmatprep.subr.bf16.mxu0 %v316_v8 }
  0x1f   :  { %304 = vmatpush3.bf16.msra.mxu0 %v316_v8 }
  0x22   :  { %306 = vmatmul.mubr.bf16.vlgmr.msra.gmra.mrb[0].mxu0 %v318_v9 }
  0xf5   :  { %v307_v10 = vpop.f32.mrb[0].mxu0 }
  0xf6   :  { %v144_v11 = vpop.f32.mrb[1].mxu0  ;;  %v186_v17 = vmul.f32 %v307_v10, %v307_v10 }
  0xf7   :  { %v308_v12 = vpop.f32.mrb[2].mxu0  ;;  %v184_v14 = vmul.f32 %v144_v11, %v144_v11 }
  0xf8   :  { %v147_v13 = vpop.f32.mrb[3].mxu0  ;;  %v187_v20 = vmul.f32 %v308_v12, %v308_v12 }
  0xf9   :  { %v174_v15 = vadd.f32 %v147_v13, %v144_v11  ;;  %v185_v16 = vmul.f32 %v147_v13, %v147_v13 }
  0xfb   :  { %v175_v18 = vadd.f32 %v307_v10, %v174_v15  ;;  %v188_v19 = vadd.f32 %v185_v16, %v184_v14 }
  0xfd   :  { %v176_v21 = vadd.f32 %v308_v12, %v175_v18  ;;  %v189_v22 = vadd.f32 %v188_v19, %v186_v17 }
  0xff   :  { %v177_v23 = vrot.slane %v176_v21, 4  ;;  %v190_v24 = vadd.f32 %v189_v22, %v187_v20 }
 0x101   :  { %v178_v25 = vadd.f32 %v177_v23, %v176_v21  ;;  %v191_v26 = vrot.slane %v190_v24, 4 }
 0x103   :  { %v179_v27 = vrot.slane %v178_v25, 2  ;;  %v192_v28 = vadd.f32 %v191_v26, %v190_v24 }
 0x105   :  { %v180_v29 = vadd.f32 %v179_v27, %v178_v25  ;;  %v193_v30 = vrot.slane %v192_v28, 2 }
 0x107   :  { %v181_v31 = vrot.slane %v180_v29, 1  ;;  %v194_v32 = vadd.f32 %v193_v30, %v192_v28 }
 0x109   :  { %v182_v33 = vadd.f32 %v181_v31, %v180_v29  ;;  %v195_v34 = vrot.slane %v194_v32, 1 }
 0x10b   :  { %v183_v35 = vmul.f32 0.03125, %v182_v33  ;;  %v196_v36 = vadd.f32 %v195_v34, %v194_v32 }
 0x10d   :  { %v197_v37 = vmul.f32 0.03125, %v196_v36  ;;  %v198_v38 = vmul.f32 %v183_v35, %v183_v35 }
 0x10f   :  { %v199_v39 = vsub.f32 %v197_v37, %v198_v38 }
 0x111   :  { %v200_v40 = vmax.f32 %v199_v39, 0.0 }
 0x113   :  { %v201_v41 = vadd.f32 1e-05, %v200_v40 }
 0x115   :  { %319 = vrsqrt.f32 %v201_v41 }
 0x11f   :  { %v320_v46 = vpop.eup %319 }
 0x120   :  { %v204_v47 = vmul.f32 %v320_v46, %v203_v44 }
 0x122   :  { %v206_v49 = vmul.f32 %v204_v47, %v183_v35  ;;  %v211_v50 = vrot.slane %v204_v47, %v210_v45 }
 0x124   :  { %v207_v51 = vsub.f32 %v205_v48, %v206_v49  ;;  %v212_v52 = vmul.f32 %v211_v50, %v144_v11  ;;  %v213_v53 = vmul.f32 %v211_v50, %v147_v13  ;;  %v214_v54 = vmul.f32 %v307_v10, %v211_v50 }
 0x125   :  { %v215_v55 = vmul.f32 %v308_v12, %v211_v50 }
 0x126   :  { %v220_v56 = vrot.slane %v207_v51, %v210_v45 }
 0x128   :  { %v222_v57 = vadd.f32 %v220_v56, %v212_v52  ;;  %v223_v58 = vadd.f32 %v220_v56, %v213_v53  ;;  %v224_v59 = vadd.f32 %v220_v56, %v214_v54  ;;  %v225_v60 = vadd.f32 %v220_v56, %v215_v55 }
 0x12a   :  { %v271_v61 = vpack.c.bf16 %v223_v58, %v222_v57  ;;  %v276_v62 = vpack.c.bf16 %v225_v60, %v224_v59 }
 0x12c   :  { %272 = vst [vmem:[%s392_s4] sm:$0xff] %v271_v61   ;;  %278 = vst [vmem:[%s392_s4 + $0x8] sm:$0xff] %v276_v62  }

// kernel: multihead_forward.46
= control target key start
LH: loop header
LB: loop body
LE: loop exit
PB: predicated region body
PF: predicated region fallthrough
CT: control target
= control target key end

     0   :  { %s1028_s15 = smov 0   ;;  %s1030_s16 = smov 0   ;;  %s1135_s0 = inlined_call_operand.vmem [shape: bf16[16,1152], index: 0, kind: input, shape index: {}]   ;;  %s1136_s1 = inlined_call_operand.vmem [shape: bf16[1152,128], index: 1, kind: input, shape index: {}]   ;;  %s1137_s2 = inlined_call_operand.vmem [shape: f32[1,128], index: 2, kind: input, shape index: {}]   ;;  %s1138_s3 = inlined_call_operand.vmem [shape: f32[1,128], index: 3, kind: input, shape index: {}]   ;;  %s1139_s4 = inlined_call_operand.vmem [shape: bf16[16,128], index: 4, kind: output, shape index: {}]  }
   0x1   :  { %s1032_s17 = smov 0   ;;  %s1034_s18 = smov 0  }
   0x2   :  { %s1036_s19 = smov 0  }
   0x3 LB: > { %s23_s20 = sadd.s32 1, %s994_s18  ;;  %p40_p1 = scmp.ne.s32.totalorder %s986_s16, %s982_s15  ;;  %s998_s19 = sphi %s1036_s19, %s14_s19   ;;  %s994_s18 = sphi %s1034_s18, %s1143_s18   ;;  %s990_s17 = sphi %s1032_s17, %s1142_s17   ;;  %s986_s16 = sphi %s1030_s16, %s1141_s16   ;;  %s982_s15 = sphi %s1028_s15, %s1140_s15  }
   0x4   : > { %p24_p0 = scmp.ge.s32.totalorder %s23_s20, 3  ;;  %p41_p2 = scmp.eq.s32.totalorder %s998_s19, 0 }
   0x5   : > { %s33_s22 = sadd.s32 1, %s986_s16  ;;  %p784_p5 = scmp.ge.s32.totalorder %s998_s19, 3 }
   0x6   : > { %s1145_s20 = smov (%p24_p0, %s23_s20), 0  ;;  %p42_p3 = por %p41_p2, %p40_p1 }
   0x7   : > { %s30_s21 = ssub.s32 %s994_s18, %s1145_s20  ;;  %184 = sbr.rel (%p784_p5) target bundleno = 21 (0x15), region = 24 }
   0x8   : > { %p31_p4 = scmp.eq.s32.totalorder %s30_s21, 0 }
   0xa   : > { %s1063_s23 = scalar_select %p31_p4, %s986_s16, %s33_s22  }
   0xe   : > { %187 = sbr.rel (!%p42_p3) target bundleno = 21 (0x15), region = 28  ;;  %s189_s24 = sand.u32 (%p42_p3), 1, %s986_s16  }
   0xf   : > { %s826_s25 = smul.u32 (%p42_p3), 12, %s994_s18 }
  0x10   : > { %s885_s26 = smul.u32 (%p42_p3), 24, %s189_s24 }
  0x11   : > { %s194_s29 = scalar_lea.vmem (%p42_p3), %s1135_s0, %s826_s25 }
  0x12   : > { %v209_v0 = vld [vmem:[%s194_s29] sm:$0xff] (%p42_p3)  ;;  %v786_v2 = vld [vmem:[%s194_s29 + $0x8] sm:$0xf] (%p42_p3)  ;;  %s191_s30 = scalar_lea.vmem (%p42_p3), [#allocation3], %s885_s26  ;;  %v788_v3 = vld [vmem:[%s194_s29 + $0x2c] sm:$0xf] (%p42_p3) }
  0x13   : > { %v211_v1 = vld [vmem:[%s194_s29 + $0x24] sm:$0xff] (%p42_p3)  ;;  %210 = vst [vmem:[%s191_s30] sm:$0xff] (%p42_p3), %v209_v0  ;;  %787 = vst [vmem:[%s191_s30 + $0x8] sm:$0xf] (%p42_p3), %v786_v2 }
  0x14   : > { %212 = vst [vmem:[%s191_s30 + $0xc] sm:$0xff] (%p42_p3), %v211_v1  ;;  %789 = vst [vmem:[%s191_s30 + $0x14] sm:$0xf] (%p42_p3), %v788_v3 }
  0x15 PF: > { %p790_p6 = scmp.ge.s32.totalorder %s998_s19, 1  ;;  %p240_p7 = scmp.lt.s32.totalorder %s998_s19, 4 }
  0x17   : > { %p241_p8 = pnand %p790_p6, %p240_p7 }
  0x18   : > { %s247_s5 = sand.u32 (!%p241_p8), 1, %s982_s15   ;;  %s286_s6 = smul.u32 (!%p241_p8), 48, %s990_s17 }
  0x19   : > { %244 = sbr.rel (%p241_p8) target bundleno = 351 (0x15f), region = 58  ;;  %p792_p10 = scmp.ne.s32.totalorder (!%p241_p8), %s990_s17, 0 }
  0x1a   : > { %s886_s7 = smul.u32 (!%p241_p8), 24, %s247_s5  ;;  %p287_p9 = scmp.lt.s32.totalorder (!%p241_p8), %s286_s6, 143 }
  0x1c   : > { %s1080_s12 = scalar_lea.vmem (!%p241_p8), [#allocation3], %s886_s7 }
  0x20   : > { %s1147_s6 = smov (!%p287_p9, %s286_s6), 143  ;;  %309 = sbr.rel (%p792_p10) target bundleno = 39 (0x27), region = 66 }
  0x21   : > { %s791_s8 = sshll.u32 %s1147_s6, 2  ;;  %v1000_v4 = vmov (!%p792_p10), 0.0  }
  0x22   : > { %s1078_s11 = scalar_lea.vmem %s1136_s1, %s791_s8  ;;  %310 = vst [vmem:[#allocation2] sm:$0xff] (!%p792_p10), %v1000_v4  ;;  %311 = vst [vmem:[#allocation2 + $0x8] sm:$0xff] (!%p792_p10), %v1000_v4 }
  0x27 PF: > { %v930_v5 = vld [vmem:[%s1078_s11 + $0x40] sm:$0xff]   ;;  %v1001_v6 = vmov 0.0   ;;  %vm1002_vm0 = vmmov 0   ;;  %v933_v9 = vld [vmem:[%s1078_s11 + $0x48] sm:$0xff]   ;;  %v936_v12 = vld [vmem:[%s1078_s11 + $0x50] sm:$0xff]   ;;  %p820_p11 = scmp.ne.s32.totalorder %s990_s17, 2 }
  0x28   : > { %865 = vmatprep.subr.bf16.mxu1 %v1001_v6  ;;  %v931_v7 = vld [vmem:[%s1078_s11] sm:$0xff]   ;;  %834 = vmatprep.subr.bf16.mxu0 %v930_v5  ;;  %v934_v10 = vld [vmem:[%s1078_s11 + $0x8] sm:$0xff]   ;;  %v937_v13 = vld [vmem:[%s1078_s11 + $0x10] sm:$0xff]  }
  0x29   : > { %v932_v8 = vld [vmem:[%s1078_s11 + $0x80] sm:$0xff]   ;;  %881 = vmatprep.mubr.msk.bf16.mxu1 %vm1002_vm0, %v1001_v6  ;;  %835 = vmatpush3.bf16.msra.mxu0 %v931_v7  ;;  %v935_v11 = vld [vmem:[%s1078_s11 + $0x88] sm:$0xff]   ;;  %v938_v14 = vld [vmem:[%s1078_s11 + $0x90] sm:$0xff]  }
  0x2a   : > { %866 = vmatpush3.bf16.msra.mxu1 %v932_v8  ;;  %836 = vmatprep.subr.bf16.mxu0 %v933_v9  ;;  %v939_v15 = vld [vmem:[%s1078_s11 + $0x58] sm:$0xff]   ;;  %v942_v18 = vld [vmem:[%s1078_s11 + $0x60] sm:$0xff]   ;;  %v945_v21 = vld [vmem:[%s1078_s11 + $0x68] sm:$0xff]   ;;  %v646_v9 = vlaneseq (!%p820_p11) }
  0x2b   : > { %867 = vmatprep.subr.bf16.mxu1 %v1001_v6  ;;  %v940_v16 = vld [vmem:[%s1078_s11 + $0x18] sm:$0xff]   ;;  %v943_v19 = vld [vmem:[%s1078_s11 + $0x20] sm:$0xff]   ;;  %v946_v22 = vld [vmem:[%s1078_s11 + $0x28] sm:$0xff]  }
  0x2c   : > { %v941_v17 = vld [vmem:[%s1078_s11 + $0x98] sm:$0xff]   ;;  %v944_v20 = vld [vmem:[%s1078_s11 + $0xa0] sm:$0xff]   ;;  %v947_v23 = vld [vmem:[%s1078_s11 + $0xa8] sm:$0xff]  }
  0x2d   : > { %837 = vmatpush3.bf16.msra.mxu0 %v934_v10  ;;  %v948_v24 = vld [vmem:[%s1078_s11 + $0x70] sm:$0xff]   ;;  %v951_v27 = vld [vmem:[%s1078_s11 + $0x78] sm:$0xff]   ;;  %v312_v39 = vld [vmem:[#allocation2] sm:$0xff]  ;;  %v647_v10 = vshrl.u32 (!%p820_p11), %v646_v9, 7 }
  0x2e   : > { %868 = vmatpush3.bf16.msra.mxu1 %v935_v11  ;;  %838 = vmatprep.subr.bf16.mxu0 %v936_v12  ;;  %v949_v25 = vld [vmem:[%s1078_s11 + $0x30] sm:$0xff]   ;;  %v952_v29 = vld [vmem:[%s1078_s11 + $0x38] sm:$0xff]   ;;  %v313_v45 = vld [vmem:[#allocation2 + $0x8] sm:$0xff] }
  0x2f   : > { %869 = vmatprep.subr.bf16.mxu1 %v1001_v6  ;;  %v950_v26 = vld [vmem:[%s1078_s11 + $0xb0] sm:$0xff]   ;;  %v953_v30 = vld [vmem:[%s1078_s11 + $0xb8] sm:$0xff]   ;;  %v641_v11 = vld [vmem:[%s1137_s2] sm:$0x1] (!%p820_p11)  ;;  %v648_v12 = vsub.s32 (!%p820_p11), 0, %v647_v10 }
  0x30   : > { %v956_v28 = vld [vmem:[%s1080_s12 + $0x4] ss:$12 sps:$4 sm:$0xff]   ;;  %v954_v31 = vld [vmem:[%s1080_s12] ss:$12 sps:$4 sm:$0xff]   ;;  %v957_v32 = vld [vmem:[%s1080_s12 + $0x8] ss:$12 sps:$4 sm:$0xff]  }
  0x31   : > { %839 = vmatpush3.bf16.msra.mxu0 %v937_v13  ;;  %558 = vmatprep.mubr.bf16.mxu0 %v956_v28 }
  0x32   : > { %870 = vmatpush3.bf16.msra.mxu1 %v938_v14  ;;  %840 = vmatprep.subr.bf16.mxu0 %v939_v15  ;;  %v643_v15 = vld [vmem:[%s1138_s3] sm:$0x1] (!%p820_p11) }
  0x33   : > { %871 = vmatprep.subr.bf16.mxu1 %v1001_v6 }
  0x35   : > { %841 = vmatpush3.bf16.msra.mxu0 %v940_v16 }
  0x36   : > { %872 = vmatpush3.bf16.msra.mxu1 %v941_v17  ;;  %842 = vmatprep.subr.bf16.mxu0 %v942_v18 }
  0x37   : > { %873 = vmatprep.subr.bf16.mxu1 %v1001_v6 }
  0x39   : > { %843 = vmatpush3.bf16.msra.mxu0 %v943_v19 }
  0x3a   : > { %874 = vmatpush3.bf16.msra.mxu1 %v944_v20  ;;  %844 = vmatprep.subr.bf16.mxu0 %v945_v21 }
  0x3b   : > { %875 = vmatprep.subr.bf16.mxu1 %v1001_v6 }
  0x3d   : > { %845 = vmatpush3.bf16.msra.mxu0 %v946_v22 }
  0x3e   : > { %876 = vmatpush3.bf16.msra.mxu1 %v947_v23  ;;  %846 = vmatprep.subr.bf16.mxu0 %v948_v24 }
  0x3f   : > { %877 = vmatprep.subr.bf16.mxu1 %v1001_v6 }
  0x41   : > { %847 = vmatpush3.bf16.msra.mxu0 %v949_v25 }
  0x42   : > { %878 = vmatpush3.bf16.msra.mxu1 %v950_v26  ;;  %848 = vmatprep.subr.bf16.mxu0 %v951_v27 }
  0x43   : > { %879 = vmatprep.subr.bf16.mxu1 %v1001_v6 }
  0x45   : > { %849 = vmatpush3.bf16.msra.mxu0 %v952_v29 }
  0x46   : > { %880 = vmatpush3.bf16.msra.mxu1 %v953_v30 }
  0x48   : > { %559 = vmatmul.mubr.bf16.vlgmr.msra.gmra.mrb[0].mxu0 %v954_v31 }
  0x49   : > { %882 = vmatmul.mubr.bf16.vlgmr.msra.gmra.mrb[0].mxu1 %v957_v32 }
 0x11b   : > { %v850_v33 = vpop.f32.mrb[0].mxu0 }
 0x11c   : > { %v601_v34 = vpop.f32.mrb[0].mxu1  ;;  %v851_v35 = vpop.f32.mrb[1].mxu0 }
 0x11d   : > { %v852_v36 = vadd.f32 %v851_v35, %v850_v33  ;;  %v883_v37 = vpop.f32.mrb[1].mxu1  ;;  %v853_v38 = vpop.f32.mrb[2].mxu0 }
 0x11e   : > { %v604_v40 = vpop.f32.mrb[2].mxu1  ;;  %v854_v41 = vpop.f32.mrb[3].mxu0 }
 0x11f   : > { %v602_v42 = vadd.f32 %v852_v36, %v601_v34  ;;  %v855_v43 = vadd.f32 %v854_v41, %v853_v38  ;;  %v884_v44 = vpop.f32.mrb[3].mxu1  ;;  %615 = sbr.rel (%p820_p11) target bundleno = 351 (0x15f), region = 70 }
 0x121   : > { %v608_v46 = vadd.f32 %v602_v42, %v312_v39  ;;  %v605_v47 = vadd.f32 %v855_v43, %v604_v40 }
 0x123   : > { %610 = vst [vmem:[#allocation2] sm:$0xff] %v608_v46  ;;  %v609_v48 = vadd.f32 %v605_v47, %v313_v45 }
 0x125   : > { %611 = vst [vmem:[#allocation2 + $0x8] sm:$0xff] %v609_v48 }
 0x12a   : > { %v616_v49 = vld [vmem:[#allocation2] sm:$0xff] }
 0x12b   : > { %v626_v52 = vmul.f32 %v616_v49, %v616_v49 }
 0x12c   : > { %v617_v50 = vld [vmem:[#allocation2 + $0x8] sm:$0xff] }
 0x12d   : > { %v618_v51 = vadd.f32 %v617_v50, %v616_v49  ;;  %v627_v53 = vmul.f32 %v617_v50, %v617_v50 }
 0x12f   : > { %v619_v54 = vrot.slane %v618_v51, 4  ;;  %v628_v55 = vadd.f32 %v627_v53, %v626_v52 }
 0x131   : > { %v620_v56 = vadd.f32 %v619_v54, %v618_v51  ;;  %v629_v57 = vrot.slane %v628_v55, 4 }
 0x133   : > { %v621_v58 = vrot.slane %v620_v56, 2  ;;  %v630_v59 = vadd.f32 %v629_v57, %v628_v55 }
 0x135   : > { %v622_v60 = vadd.f32 %v621_v58, %v620_v56  ;;  %v631_v61 = vrot.slane %v630_v59, 2 }
 0x137   : > { %v623_v62 = vrot.slane %v622_v60, 1  ;;  %v632_v63 = vadd.f32 %v631_v61, %v630_v59 }
 0x139   : > { %v624_v0 = vadd.f32 %v623_v62, %v622_v60  ;;  %v633_v1 = vrot.slane %v632_v63, 1 }
 0x13b   : > { %v625_v2 = vmul.f32 0.125, %v624_v0  ;;  %v634_v3 = vadd.f32 %v633_v1, %v632_v63 }
 0x13d   : > { %v635_v4 = vmul.f32 0.125, %v634_v3  ;;  %v636_v5 = vmul.f32 %v625_v2, %v625_v2 }
 0x13f   : > { %v637_v6 = vsub.f32 %v635_v4, %v636_v5 }
 0x141   : > { %v638_v7 = vmax.f32 %v637_v6, 0.0 }
 0x143   : > { %v639_v8 = vadd.f32 1e-05, %v638_v7 }
 0x145   : > { %958 = vrsqrt.f32 %v639_v8 }
 0x14f   : > { %v959_v13 = vpop.eup %958 }
 0x150   : > { %v642_v14 = vmul.f32 %v959_v13, %v641_v11 }
 0x152   : > { %v644_v16 = vmul.f32 %v642_v14, %v625_v2  ;;  %v649_v17 = vrot.slane %v642_v14, %v648_v12 }
 0x154   : > { %v645_v18 = vsub.f32 %v643_v15, %v644_v16  ;;  %v650_v19 = vmul.f32 %v649_v17, %v616_v49  ;;  %v651_v20 = vmul.f32 %v649_v17, %v617_v50 }
 0x156   : > { %v656_v21 = vrot.slane %v645_v18, %v648_v12 }
 0x158   : > { %v658_v22 = vadd.f32 %v656_v21, %v650_v19  ;;  %v659_v23 = vadd.f32 %v656_v21, %v651_v20 }
 0x15a   : > { %v660_v24 = vmax.f32 %v658_v22, 0.0  ;;  %v661_v25 = vmax.f32 %v659_v23, 0.0 }
 0x15c   : > { %v832_v26 = vpack.c.bf16 %v661_v25, %v660_v24 }
 0x15e   : > { %833 = vst [vmem:[%s1139_s4] sm:$0xff] %v832_v26  }
 0x15f PF: > { %s14_s19 = sadd.s32 1, %s998_s19   ;;  %s1140_s15 = smov %s986_s16 }
 0x160   : > { %p11_p12 = scmp.ge.s32.totalorder %s14_s19, 5   ;;  %s1141_s16 = smov %s1063_s23 }
 0x161   : > { %s1142_s17 = smov %s994_s18  ;;  %s1143_s18 = smov %s1145_s20 }
 0x162   :  { %13 = sbr.rel (!%p11_p12) target bundleno = 3 (0x3), region = 120 }

// kernel: multihead_forward.47
= control target key start
LH: loop header
LB: loop body
LE: loop exit
PB: predicated region body
PF: predicated region fallthrough
CT: control target
= control target key end

     0   :  { %v264_v0 = vmov 0.0   ;;  %vm265_vm0 = vmmov 0   ;;  %v176_v36 = vlaneseq  ;;  %s327_s1 = inlined_call_operand.vmem [shape: bf16[128,128], index: 1, kind: input, shape index: {}]   ;;  %s328_s0 = inlined_call_operand.vmem [shape: bf16[16,128], index: 0, kind: input, shape index: {}]   ;;  %s329_s2 = inlined_call_operand.vmem [shape: f32[1,128], index: 2, kind: input, shape index: {}]   ;;  %s330_s3 = inlined_call_operand.vmem [shape: f32[1,128], index: 3, kind: input, shape index: {}]   ;;  %s331_s4 = inlined_call_operand.vmem [shape: bf16[16,128], index: 4, kind: output, shape index: {}]  }
   0x1   :  { %231 = vmatprep.subr.bf16.mxu0 %v264_v0  ;;  %v253_v1 = vld [vmem:[%s327_s1] sm:$0xff]   ;;  %247 = vmatprep.mubr.msk.bf16.mxu0 %vm265_vm0, %v264_v0  ;;  %v254_v2 = vld [vmem:[%s327_s1 + $0x8] sm:$0xff]   ;;  %v255_v3 = vld [vmem:[%s327_s1 + $0x10] sm:$0xff]  }
   0x2   :  { %232 = vmatpush3.bf16.msra.mxu0 %v253_v1  ;;  %v256_v4 = vld [vmem:[%s327_s1 + $0x18] sm:$0xff]   ;;  %v257_v5 = vld [vmem:[%s327_s1 + $0x20] sm:$0xff]   ;;  %v258_v6 = vld [vmem:[%s327_s1 + $0x28] sm:$0xff]   ;;  %v177_v37 = vshrl.u32 %v176_v36, 7 }
   0x3   :  { %233 = vmatprep.subr.bf16.mxu0 %v264_v0  ;;  %v259_v7 = vld [vmem:[%s327_s1 + $0x30] sm:$0xff]   ;;  %v260_v8 = vld [vmem:[%s327_s1 + $0x38] sm:$0xff]   ;;  %v261_v9 = vld [vmem:[%s328_s0] sm:$0xff]  }
   0x4   :  { %v171_v38 = vld [vmem:[%s329_s2] sm:$0x1]  ;;  %v178_v39 = vsub.s32 0, %v177_v37 }
   0x5   :  { %v173_v42 = vld [vmem:[%s330_s3] sm:$0x1] }
   0x6   :  { %234 = vmatpush3.bf16.msra.mxu0 %v254_v2 }
   0x7   :  { %235 = vmatprep.subr.bf16.mxu0 %v264_v0 }
   0xa   :  { %236 = vmatpush3.bf16.msra.mxu0 %v255_v3 }
   0xb   :  { %237 = vmatprep.subr.bf16.mxu0 %v264_v0 }
   0xe   :  { %238 = vmatpush3.bf16.msra.mxu0 %v256_v4 }
   0xf   :  { %239 = vmatprep.subr.bf16.mxu0 %v264_v0 }
  0x12   :  { %240 = vmatpush3.bf16.msra.mxu0 %v257_v5 }
  0x13   :  { %241 = vmatprep.subr.bf16.mxu0 %v264_v0 }
  0x16   :  { %242 = vmatpush3.bf16.msra.mxu0 %v258_v6 }
  0x17   :  { %243 = vmatprep.subr.bf16.mxu0 %v264_v0 }
  0x1a   :  { %244 = vmatpush3.bf16.msra.mxu0 %v259_v7 }
  0x1b   :  { %245 = vmatprep.subr.bf16.mxu0 %v264_v0 }
  0x1e   :  { %246 = vmatpush3.bf16.msra.mxu0 %v260_v8 }
  0x21   :  { %248 = vmatmul.mubr.bf16.vlgmr.msra.gmra.mrb[0].mxu0 %v261_v9 }
  0xf4   :  { %v132_v10 = vpop.f32.mrb[0].mxu0 }
  0xf5   :  { %v249_v11 = vpop.f32.mrb[1].mxu0  ;;  %v156_v13 = vmul.f32 %v132_v10, %v132_v10 }
  0xf6   :  { %v135_v12 = vpop.f32.mrb[2].mxu0 }
  0xf7   :  { %v148_v14 = vadd.f32 %v135_v12, %v132_v10  ;;  %v157_v15 = vmul.f32 %v135_v12, %v135_v12  ;;  %v250_v16 = vpop.f32.mrb[3].mxu0 }
  0xf9   :  { %v149_v17 = vrot.slane %v148_v14, 4  ;;  %v158_v18 = vadd.f32 %v157_v15, %v156_v13 }
  0xfb   :  { %v150_v19 = vadd.f32 %v149_v17, %v148_v14  ;;  %v159_v20 = vrot.slane %v158_v18, 4 }
  0xfd   :  { %v151_v21 = vrot.slane %v150_v19, 2  ;;  %v160_v22 = vadd.f32 %v159_v20, %v158_v18 }
  0xff   :  { %v152_v23 = vadd.f32 %v151_v21, %v150_v19  ;;  %v161_v24 = vrot.slane %v160_v22, 2 }
 0x101   :  { %v153_v25 = vrot.slane %v152_v23, 1  ;;  %v162_v26 = vadd.f32 %v161_v24, %v160_v22 }
 0x103   :  { %v154_v27 = vadd.f32 %v153_v25, %v152_v23  ;;  %v163_v28 = vrot.slane %v162_v26, 1 }
 0x105   :  { %v155_v29 = vmul.f32 0.125, %v154_v27  ;;  %v164_v30 = vadd.f32 %v163_v28, %v162_v26 }
 0x107   :  { %v165_v31 = vmul.f32 0.125, %v164_v30  ;;  %v166_v32 = vmul.f32 %v155_v29, %v155_v29 }
 0x109   :  { %v167_v33 = vsub.f32 %v165_v31, %v166_v32 }
 0x10b   :  { %v168_v34 = vmax.f32 %v167_v33, 0.0 }
 0x10d   :  { %v169_v35 = vadd.f32 1e-05, %v168_v34 }
 0x10f   :  { %262 = vrsqrt.f32 %v169_v35 }
 0x119   :  { %v263_v40 = vpop.eup %262 }
 0x11a   :  { %v172_v41 = vmul.f32 %v263_v40, %v171_v38 }
 0x11c   :  { %v174_v43 = vmul.f32 %v172_v41, %v155_v29  ;;  %v179_v44 = vrot.slane %v172_v41, %v178_v39 }
 0x11e   :  { %v175_v45 = vsub.f32 %v173_v42, %v174_v43  ;;  %v180_v46 = vmul.f32 %v179_v44, %v132_v10  ;;  %v181_v47 = vmul.f32 %v179_v44, %v135_v12 }
 0x120   :  { %v186_v48 = vrot.slane %v175_v45, %v178_v39 }
 0x122   :  { %v188_v49 = vadd.f32 %v186_v48, %v180_v46  ;;  %v189_v50 = vadd.f32 %v186_v48, %v181_v47 }
 0x124   :  { %v220_v51 = vpack.c.bf16 %v189_v50, %v188_v49 }
 0x126   :  { %221 = vst [vmem:[%s331_s4] sm:$0xff] %v220_v51  }

// kernel: multihead_forward.51
= control target key start
LH: loop header
LB: loop body
LE: loop exit
PB: predicated region body
PF: predicated region fallthrough
CT: control target
= control target key end

     0   :  { %v301_v0 = vmov 0.0   ;;  %vm302_vm0 = vmmov 0   ;;  %vm31_vm1 = vcmask 1043456   ;;  %vm144_vm2 = vcmask 1041409   ;;  %s397_s1 = inlined_call_operand.vmem [shape: bf16[128,128], index: 1, kind: input, shape index: {}]   ;;  %s398_s0 = inlined_call_operand.vmem [shape: bf16[8,4,128], index: 0, kind: input, shape index: {}]   ;;  %s399_s2 = inlined_call_operand.vmem [shape: f32[1,128], index: 2, kind: input, shape index: {}]   ;;  %s400_s3 = inlined_call_operand.vmem [shape: f32[8,128], index: 3, kind: output, shape index: {}]  }
   0x1   :  { %271 = vmatprep.subr.bf16.mxu0 %v301_v0  ;;  %v293_v1 = vld [vmem:[%s397_s1] sm:$0xff]   ;;  %287 = vmatprep.mubr.msk.bf16.mxu0 %vm302_vm0, %v301_v0  ;;  %v294_v2 = vld [vmem:[%s397_s1 + $0x8] sm:$0xff]   ;;  %v295_v3 = vld [vmem:[%s397_s1 + $0x10] sm:$0xff]   ;;  %vm146_vm3 = vcmask 1042434   ;;  %vm148_vm4 = vcmask 1043459   ;;  %vm150_vm5 = vcmask 1044484  }
   0x2   :  { %272 = vmatpush3.bf16.msra.mxu0 %v293_v1  ;;  %v15_v4 = vld [vmem:[%s398_s0] sm:$0x3]  ;;  %v16_v5 = vld [vmem:[%s398_s0 + $0x2] sm:$0x3]  ;;  %v17_v6 = vld [vmem:[%s398_s0 + $0x4] sm:$0x3] }
   0x3   :  { %273 = vmatprep.subr.bf16.mxu0 %v301_v0  ;;  %v18_v7 = vld [vmem:[%s398_s0 + $0x6] sm:$0x3]  ;;  %v19_v8 = vld [vmem:[%s398_s0 + $0x8] sm:$0x3]  ;;  %v20_v9 = vld [vmem:[%s398_s0 + $0xa] sm:$0x3]  ;;  %v23_v10 = vunpack.c.l.bf16 %v15_v4  ;;  %v24_v11 = vunpack.c.l.bf16 %v16_v5  ;;  %v25_v12 = vunpack.c.l.bf16 %v17_v6 }
   0x4   :  { %v296_v13 = vld [vmem:[%s397_s1 + $0x18] sm:$0xff]   ;;  %v21_v14 = vld [vmem:[%s398_s0 + $0xc] sm:$0x3]  ;;  %v22_v15 = vld [vmem:[%s398_s0 + $0xe] sm:$0x3]  ;;  %v26_v16 = vunpack.c.l.bf16 %v18_v7  ;;  %v27_v17 = vunpack.c.l.bf16 %v19_v8  ;;  %v28_v18 = vunpack.c.l.bf16 %v20_v9  ;;  %vm152_vm6 = vcmask 1045509  }
   0x5   :  { %v29_v19 = vunpack.c.l.bf16 %v21_v14  ;;  %v30_v20 = vunpack.c.l.bf16 %v22_v15  ;;  %v32_v21 = vsel %vm31_vm1, %v23_v10, 0.0  ;;  %v39_v22 = vsel %vm31_vm1, %v24_v11, 0.0  ;;  %v297_v31 = vld [vmem:[%s397_s1 + $0x20] sm:$0xff]   ;;  %v298_v48 = vld [vmem:[%s397_s1 + $0x28] sm:$0xff]  }
   0x6   :  { %274 = vmatpush3.bf16.msra.mxu0 %v294_v2  ;;  %v33_v23 = vrot.slane %v32_v21, 4  ;;  %v40_v24 = vrot.slane %v39_v22, 4  ;;  %v46_v25 = vsel %vm31_vm1, %v25_v12, 0.0  ;;  %v53_v26 = vsel %vm31_vm1, %v26_v16, 0.0  ;;  %v299_v2 = vld [vmem:[%s397_s1 + $0x30] sm:$0xff]  }
   0x7   :  { %275 = vmatprep.subr.bf16.mxu0 %v301_v0  ;;  %v47_v27 = vrot.slane %v46_v25, 4  ;;  %v54_v28 = vrot.slane %v53_v26, 4  ;;  %v60_v29 = vsel %vm31_vm1, %v27_v17, 0.0  ;;  %v67_v30 = vsel %vm31_vm1, %v28_v18, 0.0 }
   0x8   :  { %v34_v32 = vadd.f32 %v33_v23, %v32_v21  ;;  %v41_v33 = vadd.f32 %v40_v24, %v39_v22  ;;  %v61_v34 = vrot.slane %v60_v29, 4  ;;  %v68_v35 = vrot.slane %v67_v30, 4 }
   0x9   :  { %v48_v36 = vadd.f32 %v47_v27, %v46_v25  ;;  %v55_v37 = vadd.f32 %v54_v28, %v53_v26  ;;  %v74_v38 = vsel %vm31_vm1, %v29_v19, 0.0  ;;  %v81_v39 = vsel %vm31_vm1, %v30_v20, 0.0  ;;  %v300_v19 = vld [vmem:[%s397_s1 + $0x38] sm:$0xff]  }
   0xa   :  { %276 = vmatpush3.bf16.msra.mxu0 %v295_v3  ;;  %v35_v40 = vrot.slane %v34_v32, 2  ;;  %v42_v41 = vrot.slane %v41_v33, 2  ;;  %v62_v42 = vadd.f32 %v61_v34, %v60_v29  ;;  %v69_v43 = vadd.f32 %v68_v35, %v67_v30 }
   0xb   :  { %277 = vmatprep.subr.bf16.mxu0 %v301_v0  ;;  %v49_v44 = vrot.slane %v48_v36, 2  ;;  %v56_v45 = vrot.slane %v55_v37, 2  ;;  %v75_v46 = vrot.slane %v74_v38, 4  ;;  %v82_v47 = vrot.slane %v81_v39, 4 }
   0xc   :  { %v36_v49 = vadd.f32 %v35_v40, %v34_v32  ;;  %v43_v50 = vadd.f32 %v42_v41, %v41_v33  ;;  %v63_v51 = vrot.slane %v62_v42, 2  ;;  %v70_v52 = vrot.slane %v69_v43, 2 }
   0xd   :  { %v50_v53 = vadd.f32 %v49_v44, %v48_v36  ;;  %v57_v54 = vadd.f32 %v56_v45, %v55_v37  ;;  %v76_v55 = vadd.f32 %v75_v46, %v74_v38  ;;  %v83_v56 = vadd.f32 %v82_v47, %v81_v39 }
   0xe   :  { %278 = vmatpush3.bf16.msra.mxu0 %v296_v13  ;;  %v37_v57 = vrot.slane %v36_v49, 1  ;;  %v44_v58 = vrot.slane %v43_v50, 1  ;;  %v64_v59 = vadd.f32 %v63_v51, %v62_v42  ;;  %v71_v60 = vadd.f32 %v70_v52, %v69_v43 }
   0xf   :  { %279 = vmatprep.subr.bf16.mxu0 %v301_v0  ;;  %v51_v61 = vrot.slane %v50_v53, 1  ;;  %v58_v62 = vrot.slane %v57_v54, 1  ;;  %v77_v63 = vrot.slane %v76_v55, 2  ;;  %v84_v1 = vrot.slane %v83_v56, 2 }
  0x10   :  { %v38_v3 = vadd.f32 %v37_v57, %v36_v49  ;;  %v45_v4 = vadd.f32 %v44_v58, %v43_v50  ;;  %v65_v5 = vrot.slane %v64_v59, 1  ;;  %v72_v6 = vrot.slane %v71_v60, 1  ;;  %v253_v49 = vld [vmem:[%s399_s2] ss:$0 sm:$0xff] }
  0x11   :  { %v52_v7 = vadd.f32 %v51_v61, %v50_v53  ;;  %v59_v8 = vadd.f32 %v58_v62, %v57_v54  ;;  %v78_v9 = vadd.f32 %v77_v63, %v76_v55  ;;  %v85_v10 = vadd.f32 %v84_v1, %v83_v56 }
  0x12   :  { %280 = vmatpush3.bf16.msra.mxu0 %v297_v31  ;;  %v66_v11 = vadd.f32 %v65_v5, %v64_v59  ;;  %v73_v12 = vadd.f32 %v72_v6, %v71_v60  ;;  %v89_v13 = vmul.f32 0.25, %v38_v3  ;;  %v90_v14 = vmul.f32 0.25, %v45_v4 }
  0x13   :  { %281 = vmatprep.subr.bf16.mxu0 %v301_v0  ;;  %v79_v15 = vrot.slane %v78_v9, 1  ;;  %v86_v16 = vrot.slane %v85_v10, 1  ;;  %v91_v17 = vmul.f32 0.25, %v52_v7  ;;  %v92_v18 = vmul.f32 0.25, %v59_v8 }
  0x14   :  { %v93_v20 = vmul.f32 0.25, %v66_v11  ;;  %v94_v21 = vmul.f32 0.25, %v73_v12  ;;  %v97_v22 = vpack.c.bf16 %v89_v13, %v89_v13  ;;  %v98_v23 = vpack.c.bf16 %v90_v14, %v90_v14 }
  0x15   :  { %v80_v24 = vadd.f32 %v79_v15, %v78_v9  ;;  %v87_v25 = vadd.f32 %v86_v16, %v85_v10  ;;  %v99_v26 = vpack.c.bf16 %v91_v17, %v91_v17  ;;  %v100_v27 = vpack.c.bf16 %v92_v18, %v92_v18 }
  0x16   :  { %282 = vmatpush3.bf16.msra.mxu0 %v298_v48  ;;  %v101_v28 = vpack.c.bf16 %v93_v20, %v93_v20  ;;  %v102_v29 = vpack.c.bf16 %v94_v21, %v94_v21  ;;  %v136_v30 = vunpack.c.l.b16 %v97_v22  ;;  %v137_v31 = vunpack.c.l.b16 %v98_v23 }
  0x17   :  { %283 = vmatprep.subr.bf16.mxu0 %v301_v0  ;;  %v95_v32 = vmul.f32 0.25, %v80_v24  ;;  %v96_v33 = vmul.f32 0.25, %v87_v25  ;;  %v138_v34 = vunpack.c.l.b16 %v99_v26  ;;  %v139_v35 = vunpack.c.l.b16 %v100_v27 }
  0x18   :  { %v140_v36 = vunpack.c.l.b16 %v101_v28  ;;  %v141_v37 = vunpack.c.l.b16 %v102_v29  ;;  %v145_v38 = vsel %vm144_vm2, %v137_v31, %v136_v30  ;;  %vm154_vm7 = vcmask 1046534  }
  0x19   :  { %v103_v39 = vpack.c.bf16 %v95_v32, %v95_v32  ;;  %v147_v40 = vsel %vm146_vm3, %v138_v34, %v145_v38  ;;  %vm156_vm8 = vcmask 1047559  }
  0x1a   :  { %284 = vmatpush3.bf16.msra.mxu0 %v299_v2  ;;  %v149_v41 = vsel %vm148_vm4, %v139_v35, %v147_v40 }
  0x1b   :  { %285 = vmatprep.subr.bf16.mxu0 %v301_v0  ;;  %v104_v0 = vpack.c.bf16 %v96_v33, %v96_v33  ;;  %v142_v42 = vunpack.c.l.b16 %v103_v39  ;;  %v151_v44 = vsel %vm150_vm5, %v140_v36, %v149_v41 }
  0x1c   :  { %v153_v45 = vsel %vm152_vm6, %v141_v37, %v151_v44 }
  0x1d   :  { %v143_v43 = vunpack.c.l.b16 %v104_v0  ;;  %v155_v46 = vsel %vm154_vm7, %v142_v42, %v153_v45 }
  0x1e   :  { %286 = vmatpush3.bf16.msra.mxu0 %v300_v19 }
  0x1f   :  { %v157_v47 = vsel %vm156_vm8, %v143_v43, %v155_v46 }
  0x20   :  { %v158_v48 = vpack.c.b16 %v157_v47, %v157_v47 }
  0x22   :  { %288 = vmatmul.mubr.bf16.vlgmr.msra.gmra.mrb[0].mxu0 %v158_v48 }
  0xf5   :  { %v242_v50 = vpop.f32.mrb[0].mxu0 }
  0xf6   :  { %v243_v51 = vadd.f32 %v253_v49, %v242_v50  ;;  %v289_v52 = vpop.f32.mrb[1].mxu0 }
  0xf7   :  { %v245_v53 = vpop.f32.mrb[2].mxu0 }
  0xf8   :  { %248 = vst [vmem:[%s400_s3] sm:$0xff] %v243_v51  ;;  %v290_v54 = vpop.f32.mrb[3].mxu0 }

// kernel: multihead_forward.48
= control target key start
LH: loop header
LB: loop body
LE: loop exit
PB: predicated region body
PF: predicated region fallthrough
CT: control target
= control target key end

     0   :  { %s1103_s18 = smov 0   ;;  %s1105_s19 = smov 0   ;;  %s1213_s0 = inlined_call_operand.vmem [shape: bf16[16,1152], index: 0, kind: input, shape index: {}]   ;;  %s1214_s1 = inlined_call_operand.vmem [shape: bf16[1152,128], index: 1, kind: input, shape index: {}]   ;;  %s1215_s2 = inlined_call_operand.vmem [shape: f32[1,128], index: 2, kind: input, shape index: {}]   ;;  %s1216_s3 = inlined_call_operand.vmem [shape: f32[1,128], index: 3, kind: input, shape index: {}]   ;;  %s1217_s4 = inlined_call_operand.vmem [shape: bf16[16,128], index: 4, kind: input, shape index: {}]   ;;  %s1218_s5 = inlined_call_operand.vmem [shape: bf16[16,128], index: 5, kind: output, shape index: {}]  }
   0x1   :  { %s1107_s20 = smov 0   ;;  %s1109_s21 = smov 0  }
   0x2   :  { %s1111_s22 = smov 0  }
   0x3 LB: > { %s24_s23 = sadd.s32 1, %s1064_s21  ;;  %p41_p1 = scmp.ne.s32.totalorder %s1056_s19, %s1052_s18  ;;  %s1068_s22 = sphi %s1111_s22, %s15_s22   ;;  %s1064_s21 = sphi %s1109_s21, %s1222_s21   ;;  %s1060_s20 = sphi %s1107_s20, %s1221_s20   ;;  %s1056_s19 = sphi %s1105_s19, %s1220_s19   ;;  %s1052_s18 = sphi %s1103_s18, %s1219_s18  }
   0x4   : > { %p25_p0 = scmp.ge.s32.totalorder %s24_s23, 3  ;;  %p42_p2 = scmp.eq.s32.totalorder %s1068_s22, 0 }
   0x5   : > { %s34_s25 = sadd.s32 1, %s1056_s19  ;;  %p850_p5 = scmp.ge.s32.totalorder %s1068_s22, 3 }
   0x6   : > { %s1224_s23 = smov (%p25_p0, %s24_s23), 0  ;;  %p43_p3 = por %p42_p2, %p41_p1 }
   0x7   : > { %s31_s24 = ssub.s32 %s1064_s21, %s1224_s23  ;;  %218 = sbr.rel (%p850_p5) target bundleno = 21 (0x15), region = 28 }
   0x8   : > { %p32_p4 = scmp.eq.s32.totalorder %s31_s24, 0 }
   0xa   : > { %s1138_s26 = scalar_select %p32_p4, %s1056_s19, %s34_s25  }
   0xe   : > { %221 = sbr.rel (!%p43_p3) target bundleno = 21 (0x15), region = 32  ;;  %s223_s27 = sand.u32 (%p43_p3), 1, %s1056_s19  }
   0xf   : > { %s892_s28 = smul.u32 (%p43_p3), 12, %s1064_s21 }
  0x10   : > { %s955_s29 = smul.u32 (%p43_p3), 24, %s223_s27 }
  0x11   : > { %s228_s7 = scalar_lea.vmem (%p43_p3), %s1213_s0, %s892_s28 }
  0x12   : > { %v243_v0 = vld [vmem:[%s228_s7] sm:$0xff] (%p43_p3)  ;;  %v852_v2 = vld [vmem:[%s228_s7 + $0x8] sm:$0xf] (%p43_p3)  ;;  %s225_s8 = scalar_lea.vmem (%p43_p3), [#allocation3], %s955_s29  ;;  %v854_v3 = vld [vmem:[%s228_s7 + $0x2c] sm:$0xf] (%p43_p3) }
  0x13   : > { %v245_v1 = vld [vmem:[%s228_s7 + $0x24] sm:$0xff] (%p43_p3)  ;;  %244 = vst [vmem:[%s225_s8] sm:$0xff] (%p43_p3), %v243_v0  ;;  %853 = vst [vmem:[%s225_s8 + $0x8] sm:$0xf] (%p43_p3), %v852_v2 }
  0x14   : > { %246 = vst [vmem:[%s225_s8 + $0xc] sm:$0xff] (%p43_p3), %v245_v1  ;;  %855 = vst [vmem:[%s225_s8 + $0x14] sm:$0xf] (%p43_p3), %v854_v3 }
  0x15 PF: > { %p856_p6 = scmp.ge.s32.totalorder %s1068_s22, 1  ;;  %p274_p7 = scmp.lt.s32.totalorder %s1068_s22, 4 }
  0x17   : > { %p275_p8 = pnand %p856_p6, %p274_p7 }
  0x18   : > { %s281_s9 = sand.u32 (!%p275_p8), 1, %s1052_s18   ;;  %s326_s10 = smul.u32 (!%p275_p8), 48, %s1060_s20 }
  0x19   : > { %278 = sbr.rel (%p275_p8) target bundleno = 353 (0x161), region = 62  ;;  %p858_p10 = scmp.ne.s32.totalorder (!%p275_p8), %s1060_s20, 0 }
  0x1a   : > { %s956_s11 = smul.u32 (!%p275_p8), 24, %s281_s9  ;;  %p327_p9 = scmp.lt.s32.totalorder (!%p275_p8), %s326_s10, 143 }
  0x1c   : > { %s1155_s16 = scalar_lea.vmem (!%p275_p8), [#allocation3], %s956_s11 }
  0x20   : > { %s1226_s10 = smov (!%p327_p9, %s326_s10), 143  ;;  %353 = sbr.rel (%p858_p10) target bundleno = 39 (0x27), region = 70 }
  0x21   : > { %s857_s12 = sshll.u32 %s1226_s10, 2  ;;  %v1070_v4 = vmov (!%p858_p10), 0.0  }
  0x22   : > { %s1153_s15 = scalar_lea.vmem %s1214_s1, %s857_s12  ;;  %354 = vst [vmem:[#allocation2] sm:$0xff] (!%p858_p10), %v1070_v4  ;;  %355 = vst [vmem:[#allocation2 + $0x8] sm:$0xff] (!%p858_p10), %v1070_v4 }
  0x27 PF: > { %v1000_v5 = vld [vmem:[%s1153_s15 + $0x40] sm:$0xff]   ;;  %v1071_v6 = vmov 0.0   ;;  %vm1072_vm0 = vmmov 0   ;;  %v1003_v9 = vld [vmem:[%s1153_s15 + $0x48] sm:$0xff]   ;;  %v1006_v12 = vld [vmem:[%s1153_s15 + $0x50] sm:$0xff]   ;;  %p886_p11 = scmp.ne.s32.totalorder %s1060_s20, 2 }
  0x28   : > { %935 = vmatprep.subr.bf16.mxu1 %v1071_v6  ;;  %v1001_v7 = vld [vmem:[%s1153_s15] sm:$0xff]   ;;  %904 = vmatprep.subr.bf16.mxu0 %v1000_v5  ;;  %v1004_v10 = vld [vmem:[%s1153_s15 + $0x8] sm:$0xff]   ;;  %v1007_v13 = vld [vmem:[%s1153_s15 + $0x10] sm:$0xff]  }
  0x29   : > { %v1002_v8 = vld [vmem:[%s1153_s15 + $0x80] sm:$0xff]   ;;  %951 = vmatprep.mubr.msk.bf16.mxu1 %vm1072_vm0, %v1071_v6  ;;  %905 = vmatpush3.bf16.msra.mxu0 %v1001_v7  ;;  %v1005_v11 = vld [vmem:[%s1153_s15 + $0x88] sm:$0xff]   ;;  %v1008_v14 = vld [vmem:[%s1153_s15 + $0x90] sm:$0xff]  }
  0x2a   : > { %936 = vmatpush3.bf16.msra.mxu1 %v1002_v8  ;;  %906 = vmatprep.subr.bf16.mxu0 %v1003_v9  ;;  %v1009_v15 = vld [vmem:[%s1153_s15 + $0x58] sm:$0xff]   ;;  %v1012_v18 = vld [vmem:[%s1153_s15 + $0x60] sm:$0xff]   ;;  %v1015_v21 = vld [vmem:[%s1153_s15 + $0x68] sm:$0xff]   ;;  %v690_v9 = vlaneseq (!%p886_p11) }
  0x2b   : > { %937 = vmatprep.subr.bf16.mxu1 %v1071_v6  ;;  %v1010_v16 = vld [vmem:[%s1153_s15 + $0x18] sm:$0xff]   ;;  %v1013_v19 = vld [vmem:[%s1153_s15 + $0x20] sm:$0xff]   ;;  %v1016_v22 = vld [vmem:[%s1153_s15 + $0x28] sm:$0xff]  }
  0x2c   : > { %v1011_v17 = vld [vmem:[%s1153_s15 + $0x98] sm:$0xff]   ;;  %v1014_v20 = vld [vmem:[%s1153_s15 + $0xa0] sm:$0xff]   ;;  %v1017_v23 = vld [vmem:[%s1153_s15 + $0xa8] sm:$0xff]  }
  0x2d   : > { %907 = vmatpush3.bf16.msra.mxu0 %v1004_v10  ;;  %v1018_v24 = vld [vmem:[%s1153_s15 + $0x70] sm:$0xff]   ;;  %v1021_v27 = vld [vmem:[%s1153_s15 + $0x78] sm:$0xff]   ;;  %v356_v39 = vld [vmem:[#allocation2] sm:$0xff]  ;;  %v691_v10 = vshrl.u32 (!%p886_p11), %v690_v9, 7 }
  0x2e   : > { %938 = vmatpush3.bf16.msra.mxu1 %v1005_v11  ;;  %908 = vmatprep.subr.bf16.mxu0 %v1006_v12  ;;  %v1019_v25 = vld [vmem:[%s1153_s15 + $0x30] sm:$0xff]   ;;  %v1022_v29 = vld [vmem:[%s1153_s15 + $0x38] sm:$0xff]   ;;  %v357_v45 = vld [vmem:[#allocation2 + $0x8] sm:$0xff] }
  0x2f   : > { %939 = vmatprep.subr.bf16.mxu1 %v1071_v6  ;;  %v1020_v26 = vld [vmem:[%s1153_s15 + $0xb0] sm:$0xff]   ;;  %v1023_v30 = vld [vmem:[%s1153_s15 + $0xb8] sm:$0xff]   ;;  %v685_v11 = vld [vmem:[%s1215_s2] sm:$0x1] (!%p886_p11)  ;;  %v692_v12 = vsub.s32 (!%p886_p11), 0, %v691_v10 }
  0x30   : > { %v1026_v28 = vld [vmem:[%s1155_s16 + $0x4] ss:$12 sps:$4 sm:$0xff]   ;;  %v1024_v31 = vld [vmem:[%s1155_s16] ss:$12 sps:$4 sm:$0xff]   ;;  %v1027_v32 = vld [vmem:[%s1155_s16 + $0x8] ss:$12 sps:$4 sm:$0xff]  }
  0x31   : > { %909 = vmatpush3.bf16.msra.mxu0 %v1007_v13  ;;  %602 = vmatprep.mubr.bf16.mxu0 %v1026_v28 }
  0x32   : > { %940 = vmatpush3.bf16.msra.mxu1 %v1008_v14  ;;  %910 = vmatprep.subr.bf16.mxu0 %v1009_v15  ;;  %v687_v15 = vld [vmem:[%s1216_s3] sm:$0x1] (!%p886_p11) }
  0x33   : > { %941 = vmatprep.subr.bf16.mxu1 %v1071_v6 }
  0x35   : > { %911 = vmatpush3.bf16.msra.mxu0 %v1010_v16 }
  0x36   : > { %942 = vmatpush3.bf16.msra.mxu1 %v1011_v17  ;;  %912 = vmatprep.subr.bf16.mxu0 %v1012_v18  ;;  %v896_v18 = vld [vmem:[%s1217_s4] sm:$0xff] (!%p886_p11)  }
  0x37   : > { %943 = vmatprep.subr.bf16.mxu1 %v1071_v6 }
  0x39   : > { %913 = vmatpush3.bf16.msra.mxu0 %v1013_v19 }
  0x3a   : > { %944 = vmatpush3.bf16.msra.mxu1 %v1014_v20  ;;  %914 = vmatprep.subr.bf16.mxu0 %v1015_v21 }
  0x3b   : > { %945 = vmatprep.subr.bf16.mxu1 %v1071_v6 }
  0x3d   : > { %915 = vmatpush3.bf16.msra.mxu0 %v1016_v22 }
  0x3e   : > { %946 = vmatpush3.bf16.msra.mxu1 %v1017_v23  ;;  %916 = vmatprep.subr.bf16.mxu0 %v1018_v24  ;;  %v897_v23 = vunpack.c.l.bf16 (!%p886_p11), %v896_v18  ;;  %v898_v24 = vunpack.c.h.bf16 (!%p886_p11), %v896_v18 }
  0x3f   : > { %947 = vmatprep.subr.bf16.mxu1 %v1071_v6 }
  0x41   : > { %917 = vmatpush3.bf16.msra.mxu0 %v1019_v25 }
  0x42   : > { %948 = vmatpush3.bf16.msra.mxu1 %v1020_v26  ;;  %918 = vmatprep.subr.bf16.mxu0 %v1021_v27 }
  0x43   : > { %949 = vmatprep.subr.bf16.mxu1 %v1071_v6 }
  0x45   : > { %919 = vmatpush3.bf16.msra.mxu0 %v1022_v29 }
  0x46   : > { %950 = vmatpush3.bf16.msra.mxu1 %v1023_v30 }
  0x48   : > { %603 = vmatmul.mubr.bf16.vlgmr.msra.gmra.mrb[0].mxu0 %v1024_v31 }
  0x49   : > { %952 = vmatmul.mubr.bf16.vlgmr.msra.gmra.mrb[0].mxu1 %v1027_v32 }
 0x11b   : > { %v920_v33 = vpop.f32.mrb[0].mxu0 }
 0x11c   : > { %v645_v34 = vpop.f32.mrb[0].mxu1  ;;  %v921_v35 = vpop.f32.mrb[1].mxu0 }
 0x11d   : > { %v922_v36 = vadd.f32 %v921_v35, %v920_v33  ;;  %v953_v37 = vpop.f32.mrb[1].mxu1  ;;  %v923_v38 = vpop.f32.mrb[2].mxu0 }
 0x11e   : > { %v648_v40 = vpop.f32.mrb[2].mxu1  ;;  %v924_v41 = vpop.f32.mrb[3].mxu0 }
 0x11f   : > { %v646_v42 = vadd.f32 %v922_v36, %v645_v34  ;;  %v925_v43 = vadd.f32 %v924_v41, %v923_v38  ;;  %v954_v44 = vpop.f32.mrb[3].mxu1  ;;  %659 = sbr.rel (%p886_p11) target bundleno = 353 (0x161), region = 74 }
 0x121   : > { %v652_v46 = vadd.f32 %v646_v42, %v356_v39  ;;  %v649_v47 = vadd.f32 %v925_v43, %v648_v40 }
 0x123   : > { %654 = vst [vmem:[#allocation2] sm:$0xff] %v652_v46  ;;  %v653_v48 = vadd.f32 %v649_v47, %v357_v45 }
 0x125   : > { %655 = vst [vmem:[#allocation2 + $0x8] sm:$0xff] %v653_v48 }
 0x12a   : > { %v660_v49 = vld [vmem:[#allocation2] sm:$0xff] }
 0x12b   : > { %v670_v52 = vmul.f32 %v660_v49, %v660_v49 }
 0x12c   : > { %v661_v50 = vld [vmem:[#allocation2 + $0x8] sm:$0xff] }
 0x12d   : > { %v662_v51 = vadd.f32 %v661_v50, %v660_v49  ;;  %v671_v53 = vmul.f32 %v661_v50, %v661_v50 }
 0x12f   : > { %v663_v54 = vrot.slane %v662_v51, 4  ;;  %v672_v55 = vadd.f32 %v671_v53, %v670_v52 }
 0x131   : > { %v664_v56 = vadd.f32 %v663_v54, %v662_v51  ;;  %v673_v57 = vrot.slane %v672_v55, 4 }
 0x133   : > { %v665_v58 = vrot.slane %v664_v56, 2  ;;  %v674_v59 = vadd.f32 %v673_v57, %v672_v55 }
 0x135   : > { %v666_v60 = vadd.f32 %v665_v58, %v664_v56  ;;  %v675_v61 = vrot.slane %v674_v59, 2 }
 0x137   : > { %v667_v62 = vrot.slane %v666_v60, 1  ;;  %v676_v63 = vadd.f32 %v675_v61, %v674_v59 }
 0x139   : > { %v668_v0 = vadd.f32 %v667_v62, %v666_v60  ;;  %v677_v1 = vrot.slane %v676_v63, 1 }
 0x13b   : > { %v669_v2 = vmul.f32 0.125, %v668_v0  ;;  %v678_v3 = vadd.f32 %v677_v1, %v676_v63 }
 0x13d   : > { %v679_v4 = vmul.f32 0.125, %v678_v3  ;;  %v680_v5 = vmul.f32 %v669_v2, %v669_v2 }
 0x13f   : > { %v681_v6 = vsub.f32 %v679_v4, %v680_v5 }
 0x141   : > { %v682_v7 = vmax.f32 %v681_v6, 0.0 }
 0x143   : > { %v683_v8 = vadd.f32 1e-05, %v682_v7 }
 0x145   : > { %1028 = vrsqrt.f32 %v683_v8 }
 0x14f   : > { %v1029_v13 = vpop.eup %1028 }
 0x150   : > { %v686_v14 = vmul.f32 %v1029_v13, %v685_v11 }
 0x152   : > { %v688_v16 = vmul.f32 %v686_v14, %v669_v2  ;;  %v693_v17 = vrot.slane %v686_v14, %v692_v12 }
 0x154   : > { %v689_v19 = vsub.f32 %v687_v15, %v688_v16  ;;  %v694_v20 = vmul.f32 %v693_v17, %v660_v49  ;;  %v695_v21 = vmul.f32 %v693_v17, %v661_v50 }
 0x156   : > { %v700_v22 = vrot.slane %v689_v19, %v692_v12 }
 0x158   : > { %v702_v25 = vadd.f32 %v700_v22, %v694_v20  ;;  %v703_v26 = vadd.f32 %v700_v22, %v695_v21 }
 0x15a   : > { %v708_v27 = vadd.f32 %v897_v23, %v702_v25  ;;  %v709_v28 = vadd.f32 %v898_v24, %v703_v26 }
 0x15c   : > { %v710_v29 = vmax.f32 %v708_v27, 0.0  ;;  %v711_v30 = vmax.f32 %v709_v28, 0.0 }
 0x15e   : > { %v902_v31 = vpack.c.bf16 %v711_v30, %v710_v29 }
 0x160   : > { %903 = vst [vmem:[%s1218_s5] sm:$0xff] %v902_v31  }
 0x161 PF: > { %s15_s22 = sadd.s32 1, %s1068_s22   ;;  %s1219_s18 = smov %s1056_s19 }
 0x162   : > { %p12_p12 = scmp.ge.s32.totalorder %s15_s22, 5   ;;  %s1220_s19 = smov %s1138_s26 }
 0x163   : > { %s1221_s20 = smov %s1064_s21  ;;  %s1222_s21 = smov %s1224_s23 }
 0x164   :  { %14 = sbr.rel (!%p12_p12) target bundleno = 3 (0x3), region = 127 }

</bundles_post_ra>
